<compile_context>
chip_gen: v5e
topology: v5e:2x2
jax: 0.10.0
libtpu: 0.0.40
codegen_flags: <defaults>
</compile_context>

<pallas_src>
import numpy as np
import jax
import jax.numpy as jnp
from jax.experimental import pallas as pl
from jax.experimental.pallas import tpu as pltpu


# ---------------------------------------------------------------------------
# host-side glue (pure data construction / layout plumbing, no device compute)
# ---------------------------------------------------------------------------
def _round_up(x, m):
    return (x + m - 1) // m * m


def _bilinear_matrix(out_size, in_size):
    """Row matrix of F.interpolate(mode='bilinear', align_corners=True)."""
    A = np.zeros((out_size, in_size), np.float32)
    if out_size == 1:
        A[0, 0] = 1.0
        return A
    for i in range(out_size):
        src = i * (in_size - 1) / (out_size - 1)
        lo = int(np.floor(src))
        hi = min(lo + 1, in_size - 1)
        f = src - lo
        A[i, lo] += 1.0 - f
        A[i, hi] += f
    return A


def _bilinear_pixel_matrix(h_out, w_out, h_in, w_in, p_out_pad):
    """(P_in, P_out_pad) matrix so that y_out = y_in @ B with y laid out
    (channels, flattened_pixels); columns beyond h_out*w_out are zero pad."""
    K = np.kron(_bilinear_matrix(h_out, h_in), _bilinear_matrix(w_out, w_in)).T
    Kp = np.zeros((h_in * w_in, p_out_pad), np.float32)
    Kp[:, : h_out * w_out] = K
    return Kp


def _nearest_resize_mask(frame_masks, h_out, w_out):
    """F.interpolate(frame_masks[:, None], (h_out, w_out), mode='nearest')."""
    n, h_in, w_in = frame_masks.shape
    h_idx = np.minimum(
        np.floor(np.arange(h_out) * (h_in / h_out)).astype(np.int32), h_in - 1)
    w_idx = np.minimum(
        np.floor(np.arange(w_out) * (w_in / w_out)).astype(np.int32), w_in - 1)
    m = frame_masks[:, h_idx][:, :, w_idx]      # tiny gather, host-side glue
    return m.reshape(n, 1, h_out * w_out)


def _pick_frames_per_step(n_frames, per_frame_bytes, const_bytes,
                          budget_bytes=12 * 1024 * 1024):
    """Frames per grid step: amortize the ~0.35us/step overhead while keeping
    the double-buffered working set inside a VMEM budget; prefer an even
    number of grid steps (v7x megacore split) when it costs <= 1 extra step."""
    avail = max(budget_bytes - const_bytes, per_frame_bytes)
    f = int(max(1, min(n_frames, avail // (2 * per_frame_bytes))))
    steps = -(-n_frames // f)
    if steps > 1 and steps % 2 == 1:
        for cand in range(f, 0, -1):
            s = -(-n_frames // cand)
            if s % 2 == 0 and s <= steps + 1:
                return cand
    return f


# ---------------------------------------------------------------------------
# fused kernel: for each frame of this grid step
#   convert(cat([l4, up(l3), up(l2)])) * mask
# with the 1x1 conv hoisted before the (linear) bilinear resample.
# Layout: channels on sublanes, pixels on lanes; P4 padded to a 128 multiple.
# ---------------------------------------------------------------------------
def _fused_convert_kernel(l4_ref, l3_ref, l2_ref,
                          w4_ref, w3_ref, w2_ref, b32_ref, bias_ref,
                          mask_ref, out_ref):
    # constants: resident in VMEM across the whole grid, single-buffered
    w4 = w4_ref[...]
    w3 = w3_ref[...]
    w2 = w2_ref[...]
    b32 = b32_ref[...]
    bias = bias_ref[...]
    n_frames = out_ref.shape[0]
    for f in range(n_frames):           # static unroll over frames in the step
        # 1x1 conv branches (channel contraction), bf16 MXU, f32 accumulate
        y = jnp.dot(w4, l4_ref[f], preferred_element_type=jnp.float32)
        y3 = jnp.dot(w3, l3_ref[f], preferred_element_type=jnp.float32)
        y2 = jnp.dot(w2, l2_ref[f], preferred_element_type=jnp.float32)
        # fused bilinear resample of layer3+layer2: one matmul over the
        # lane-concatenated native-resolution pixel axes (all 128-aligned)
        y32 = jnp.concatenate([y3, y2], axis=1).astype(jnp.bfloat16)
        y = y + jnp.dot(y32, b32, preferred_element_type=jnp.float32)
        y = y + bias                                   # (hidden, 1) lane bcast
        out_ref[f] = (y * mask_ref[f]).astype(out_ref.dtype)   # (1, P4p) bcast


def video_encoder_forward(l4, l3, l2, convert_w, convert_b, frame_masks,
                          frames_per_step=None):
    """Post-backbone VideoEncoder.forward (multi-scale branch).

    l4: (N, C4, H4, W4)   layer4 features (stride 32)
    l3: (N, C3, H3, W3)   layer3 features (stride 16)
    l2: (N, C2, H2, W2)   layer2 features (stride 8)
    convert_w: (hidden, C4+C3+C2, 1, 1)  -- torch.cat order [layer4, layer3, layer2]
    convert_b: (hidden,)
    frame_masks: (N, Hm, Wm)
    returns video_feature * mask in NCHW: (N, hidden, H4, W4)
    """
    N, C4, H4, W4 = l4.shape
    _, C3, H3, W3 = l3.shape
    _, C2, H2, W2 = l2.shape
    hidden = convert_w.shape[0]
    P4, P3, P2 = H4 * W4, H3 * W3, H2 * W2
    P4p = _round_up(P4, 128)            # lane-dense output / matmul N dim

    # split the 1x1 conv weight along the concat axis ([l4, l3, l2]); bf16
    w = convert_w.reshape(hidden, C4 + C3 + C2)
    w4 = w[:, :C4].astype(jnp.bfloat16)
    w3 = w[:, C4:C4 + C3].astype(jnp.bfloat16)
    w2 = w[:, C4 + C3:].astype(jnp.bfloat16)
    bias = convert_b.reshape(hidden, 1).astype(jnp.float32)

    # fused bilinear-resample matrix for [layer3, layer2], zero-padded to P4p
    B3 = _bilinear_pixel_matrix(H4, W4, H3, W3, P4p)
    B2 = _bilinear_pixel_matrix(H4, W4, H2, W2, P4p)
    B32 = jnp.asarray(np.concatenate([B3, B2], axis=0), jnp.bfloat16)  # (P3+P2, P4p)

    # channel-on-sublane / pixel-on-lane layout, bf16; layer4 pixels padded
    l4f = jnp.pad(l4.reshape(N, C4, P4),
                  ((0, 0), (0, 0), (0, P4p - P4))).astype(jnp.bfloat16)
    l3f = l3.reshape(N, C3, P3).astype(jnp.bfloat16)
    l2f = l2.reshape(N, C2, P2).astype(jnp.bfloat16)

    mask_r = jnp.pad(
        _nearest_resize_mask(frame_masks, H4, W4).astype(jnp.float32),
        ((0, 0), (0, 0), (0, P4p - P4)))                        # (N, 1, P4p)

    per_frame_bytes = (2 * (C4 * P4p + C3 * P3 + C2 * P2)   # bf16 features
                       + 4 * P4p                             # f32 mask
                       + 4 * hidden * P4p)                   # f32 output
    const_bytes = 2 * ((C4 + C3 + C2) * hidden + (P3 + P2) * P4p) + 4 * hidden
    F = frames_per_step or _pick_frames_per_step(N, per_frame_bytes, const_bytes)
    steps = -(-N // F)
    Np = steps * F
    if Np != N:   # pad frames so the grid divides evenly (zero mask -> zero out)
        l4f = jnp.pad(l4f, ((0, Np - N), (0, 0), (0, 0)))
        l3f = jnp.pad(l3f, ((0, Np - N), (0, 0), (0, 0)))
        l2f = jnp.pad(l2f, ((0, Np - N), (0, 0), (0, 0)))
        mask_r = jnp.pad(mask_r, ((0, Np - N), (0, 0), (0, 0)))

    const = lambda g: (0, 0)
    frame_blk = lambda g: (g, 0, 0)
    single = pl.Buffered(1)           # constants: fetch once, no double buffer

    flops = 2 * Np * hidden * (C4 * P4p + C3 * P3 + C2 * P2 + (P3 + P2) * P4p)
    bytes_accessed = Np * per_frame_bytes + const_bytes
    vmem_est = 2 * F * per_frame_bytes + const_bytes
    vmem_limit = int(min(48 * 2**20, max(32 * 2**20, 2 * vmem_est)))

    out = pl.pallas_call(
        _fused_convert_kernel,
        out_shape=jax.ShapeDtypeStruct((Np, hidden, P4p), jnp.float32),
        grid=(steps,),
        in_specs=[
            pl.BlockSpec((F, C4, P4p), frame_blk),
            pl.BlockSpec((F, C3, P3), frame_blk),
            pl.BlockSpec((F, C2, P2), frame_blk),
            pl.BlockSpec((hidden, C4), const, pipeline_mode=single),
            pl.BlockSpec((hidden, C3), const, pipeline_mode=single),
            pl.BlockSpec((hidden, C2), const, pipeline_mode=single),
            pl.BlockSpec((P3 + P2, P4p), const, pipeline_mode=single),
            pl.BlockSpec((hidden, 1), const, pipeline_mode=single),
            pl.BlockSpec((F, 1, P4p), frame_blk),
        ],
        out_specs=pl.BlockSpec((F, hidden, P4p), frame_blk),
        compiler_params=pltpu.CompilerParams(
            dimension_semantics=("parallel",),
            vmem_limit_bytes=vmem_limit,
        ),
        cost_estimate=pl.CostEstimate(
            flops=int(flops), transcendentals=0,
            bytes_accessed=int(bytes_accessed)),
    )(l4f, l3f, l2f, w4, w3, w2, B32, bias, mask_r)

    return out[:N, :, :P4].reshape(N, hidden, H4, W4)


# ---------------------------------------------------------------------------
# pure-JAX reference (follows the original op order: interp -> cat -> conv)
# ---------------------------------------------------------------------------
def _reference_forward(l4, l3, l2, convert_w, convert_b, frame_masks):
    N, C4, H4, W4 = l4.shape
    A_h3 = jnp.asarray(_bilinear_matrix(H4, l3.shape[2]))
    A_w3 = jnp.asarray(_bilinear_matrix(W4, l3.shape[3]))
    A_h2 = jnp.asarray(_bilinear_matrix(H4, l2.shape[2]))
    A_w2 = jnp.asarray(_bilinear_matrix(W4, l2.shape[3]))
    up3 = jnp.einsum('Hh,nchw,Ww->ncHW', A_h3, l3, A_w3)
    up2 = jnp.einsum('Hh,nchw,Ww->ncHW', A_h2, l2, A_w2)
    cat = jnp.concatenate([l4, up3, up2], axis=1)
    w = convert_w.reshape(convert_w.shape[0], -1)
    feat = jnp.einsum('oc,nchw->nohw', w, cat) + convert_b[None, :, None, None]
    mask = _nearest_resize_mask(frame_masks, H4, W4).reshape(N, 1, H4, W4)
    return feat * mask


if __name__ == "__main__":
    key = jax.random.PRNGKey(0)
    k = jax.random.split(key, 6)

    # SMALL shapes consistent with the module (scaled-down ResNet feature dims)
    N = 5                        # frames (reference chunks into 5 groups only
                                 # for the external backbone; no effect here)
    hidden = 32                  # cfg.hidden_dim
    C2, C3, C4 = 128, 256, 512   # scaled-down feature_dims[1:4]
    H4 = W4 = 8                  # layer4 spatial
    H3 = W3 = 16                 # layer3 spatial
    H2 = W2 = 32                 # layer2 spatial
    Hm = Wm = 64                 # frame_mask resolution

    l2 = jax.random.normal(k[0], (N, C2, H2, W2), jnp.float32)
    l3 = jax.random.normal(k[1], (N, C3, H3, W3), jnp.float32)
    l4 = jax.random.normal(k[2], (N, C4, H4, W4), jnp.float32)
    convert_w = 0.02 * jax.random.normal(k[3], (hidden, C4 + C3 + C2, 1, 1),
                                         jnp.float32)
    convert_b = 0.01 * jax.random.normal(k[4], (hidden,), jnp.float32)
    frame_masks = (jax.random.uniform(k[5], (N, Hm, Wm)) > 0.1).astype(jnp.float32)

    out = video_encoder_forward(l4, l3, l2, convert_w, convert_b, frame_masks)
    jax.block_until_ready(out)
    assert out.shape == (N, hidden, H4, W4)

    ref = _reference_forward(l4, l3, l2, convert_w, convert_b, frame_masks)
    jax.block_until_ready(ref)
    np.testing.assert_allclose(np.asarray(out), np.asarray(ref),
                               rtol=5e-2, atol=5e-2)

    print("KERNEL_OK")
</pallas_src>

<mosaic_0001>
module attributes {stable_mosaic.version = 11 : i64} {
  func.func @_fused_convert_kernel(%arg0: i32, %arg1: memref<5x512x128xbf16, #tpu.memory_space<vmem>>, %arg2: memref<5x256x256xbf16, #tpu.memory_space<vmem>>, %arg3: memref<5x128x1024xbf16, #tpu.memory_space<vmem>>, %arg4: memref<32x512xbf16, #tpu.memory_space<vmem>>, %arg5: memref<32x256xbf16, #tpu.memory_space<vmem>>, %arg6: memref<32x128xbf16, #tpu.memory_space<vmem>>, %arg7: memref<1280x128xbf16, #tpu.memory_space<vmem>>, %arg8: memref<32x1xf32, #tpu.memory_space<vmem>>, %arg9: memref<5x1x128xf32, #tpu.memory_space<vmem>>, %arg10: memref<5x32x128xf32, #tpu.memory_space<vmem>>) attributes {dimension_semantics = [#tpu.dimension_semantics<parallel>], iteration_bounds = array<i64: 1>, scalar_prefetch = 0 : i64, scratch_operands = 0 : i64, tpu.core_type = #tpu.core_type<tc>, window_params = [{transform_indices = @transform_0, window_bounds = array<i64: 5, 512, 128>}, {transform_indices = @transform_1, window_bounds = array<i64: 5, 256, 256>}, {transform_indices = @transform_2, window_bounds = array<i64: 5, 128, 1024>}, {pipeline_mode = #tpu.pipeline_mode<synchronous>, transform_indices = @transform_3, window_bounds = array<i64: 32, 512>}, {pipeline_mode = #tpu.pipeline_mode<synchronous>, transform_indices = @transform_4, window_bounds = array<i64: 32, 256>}, {pipeline_mode = #tpu.pipeline_mode<synchronous>, transform_indices = @transform_5, window_bounds = array<i64: 32, 128>}, {pipeline_mode = #tpu.pipeline_mode<synchronous>, transform_indices = @transform_6, window_bounds = array<i64: 1280, 128>}, {pipeline_mode = #tpu.pipeline_mode<synchronous>, transform_indices = @transform_7, window_bounds = array<i64: 32, 1>}, {transform_indices = @transform_8, window_bounds = array<i64: 5, 1, 128>}, {transform_indices = @transform_9, window_bounds = array<i64: 5, 32, 128>}]} {
    %c0 = arith.constant 0 : index
    %c0_0 = arith.constant 0 : index
    %0 = vector.load %arg4[%c0, %c0_0] : memref<32x512xbf16, #tpu.memory_space<vmem>>, vector<32x512xbf16>
    %c0_1 = arith.constant 0 : index
    %c0_2 = arith.constant 0 : index
    %1 = vector.load %arg5[%c0_1, %c0_2] : memref<32x256xbf16, #tpu.memory_space<vmem>>, vector<32x256xbf16>
    %c0_3 = arith.constant 0 : index
    %c0_4 = arith.constant 0 : index
    %2 = vector.load %arg6[%c0_3, %c0_4] : memref<32x128xbf16, #tpu.memory_space<vmem>>, vector<32x128xbf16>
    %c0_5 = arith.constant 0 : index
    %c0_6 = arith.constant 0 : index
    %3 = vector.load %arg7[%c0_5, %c0_6] : memref<1280x128xbf16, #tpu.memory_space<vmem>>, vector<1280x128xbf16>
    %c0_7 = arith.constant 0 : index
    %c0_8 = arith.constant 0 : index
    %4 = vector.load %arg8[%c0_7, %c0_8] : memref<32x1xf32, #tpu.memory_space<vmem>>, vector<32x1xf32>
    %c0_9 = arith.constant 0 : index
    %c0_10 = arith.constant 0 : index
    %c0_11 = arith.constant 0 : index
    %5 = vector.load %arg1[%c0_9, %c0_10, %c0_11] : memref<5x512x128xbf16, #tpu.memory_space<vmem>>, vector<1x512x128xbf16>
    %6 = vector.shape_cast %5 : vector<1x512x128xbf16> to vector<512x128xbf16>
    %cst = arith.constant dense<0.000000e+00> : vector<32x128xf32>
    %7 = tpu.matmul %0, %6, %cst {dimension_numbers = #tpu.dot_dimension_numbers<[1], [0], [0], [1], [0, 0, 1, 1], [], []>} : vector<32x512xbf16>, vector<512x128xbf16>, vector<32x128xf32> -> vector<32x128xf32>
    %c0_12 = arith.constant 0 : index
    %c0_13 = arith.constant 0 : index
    %c0_14 = arith.constant 0 : index
    %8 = vector.load %arg2[%c0_12, %c0_13, %c0_14] : memref<5x256x256xbf16, #tpu.memory_space<vmem>>, vector<1x256x256xbf16>
    %9 = vector.shape_cast %8 : vector<1x256x256xbf16> to vector<256x256xbf16>
    %cst_15 = arith.constant dense<0.000000e+00> : vector<32x256xf32>
    %10 = tpu.matmul %1, %9, %cst_15 {dimension_numbers = #tpu.dot_dimension_numbers<[1], [0], [0], [1], [0, 0, 1, 1], [], []>} : vector<32x256xbf16>, vector<256x256xbf16>, vector<32x256xf32> -> vector<32x256xf32>
    %c0_16 = arith.constant 0 : index
    %c0_17 = arith.constant 0 : index
    %c0_18 = arith.constant 0 : index
    %11 = vector.load %arg3[%c0_16, %c0_17, %c0_18] : memref<5x128x1024xbf16, #tpu.memory_space<vmem>>, vector<1x128x1024xbf16>
    %12 = vector.shape_cast %11 : vector<1x128x1024xbf16> to vector<128x1024xbf16>
    %cst_19 = arith.constant dense<0.000000e+00> : vector<32x1024xf32>
    %13 = tpu.matmul %2, %12, %cst_19 {dimension_numbers = #tpu.dot_dimension_numbers<[1], [0], [0], [1], [0, 0, 1, 1], [], []>} : vector<32x128xbf16>, vector<128x1024xbf16>, vector<32x1024xf32> -> vector<32x1024xf32>
    %14 = tpu.concatenate %10, %13 in 1 : vector<32x256xf32>, vector<32x1024xf32> -> vector<32x1280xf32>
    %15 = arith.truncf %14 : vector<32x1280xf32> to vector<32x1280xbf16>
    %cst_20 = arith.constant dense<0.000000e+00> : vector<32x128xf32>
    %16 = tpu.matmul %15, %3, %cst_20 {dimension_numbers = #tpu.dot_dimension_numbers<[1], [0], [0], [1], [0, 0, 1, 1], [], []>} : vector<32x1280xbf16>, vector<1280x128xbf16>, vector<32x128xf32> -> vector<32x128xf32>
    %17 = arith.addf %7, %16 : vector<32x128xf32>
    %18 = vector.broadcast %4 : vector<32x1xf32> to vector<32x128xf32>
    %19 = arith.addf %17, %18 : vector<32x128xf32>
    %c0_21 = arith.constant 0 : index
    %c0_22 = arith.constant 0 : index
    %c0_23 = arith.constant 0 : index
    %20 = vector.load %arg9[%c0_21, %c0_22, %c0_23] : memref<5x1x128xf32, #tpu.memory_space<vmem>>, vector<1x1x128xf32>
    %21 = vector.shape_cast %20 : vector<1x1x128xf32> to vector<1x128xf32>
    %22 = vector.broadcast %21 : vector<1x128xf32> to vector<32x128xf32>
    %23 = arith.mulf %19, %22 : vector<32x128xf32>
    %c0_24 = arith.constant 0 : index
    %c0_25 = arith.constant 0 : index
    %c0_26 = arith.constant 0 : index
    %24 = vector.load %arg10[%c0_24, %c0_25, %c0_26] : memref<5x32x128xf32, #tpu.memory_space<vmem>>, vector<1x32x128xf32>
    %25 = vector.shape_cast %24 : vector<1x32x128xf32> to vector<32x128xf32>
    %26 = vector.shape_cast %23 : vector<32x128xf32> to vector<1x32x128xf32>
    tpu.vector_store %arg10[%c0_24, %c0_25, %c0_26], %26 {strides = array<i32>} : memref<5x32x128xf32, #tpu.memory_space<vmem>>, vector<1x32x128xf32>,
    %c1 = arith.constant 1 : index
    %c0_27 = arith.constant 0 : index
    %c0_28 = arith.constant 0 : index
    %27 = vector.load %arg1[%c1, %c0_27, %c0_28] : memref<5x512x128xbf16, #tpu.memory_space<vmem>>, vector<1x512x128xbf16>
    %28 = vector.shape_cast %27 : vector<1x512x128xbf16> to vector<512x128xbf16>
    %cst_29 = arith.constant dense<0.000000e+00> : vector<32x128xf32>
    %29 = tpu.matmul %0, %28, %cst_29 {dimension_numbers = #tpu.dot_dimension_numbers<[1], [0], [0], [1], [0, 0, 1, 1], [], []>} : vector<32x512xbf16>, vector<512x128xbf16>, vector<32x128xf32> -> vector<32x128xf32>
    %c1_30 = arith.constant 1 : index
    %c0_31 = arith.constant 0 : index
    %c0_32 = arith.constant 0 : index
    %30 = vector.load %arg2[%c1_30, %c0_31, %c0_32] : memref<5x256x256xbf16, #tpu.memory_space<vmem>>, vector<1x256x256xbf16>
    %31 = vector.shape_cast %30 : vector<1x256x256xbf16> to vector<256x256xbf16>
    %cst_33 = arith.constant dense<0.000000e+00> : vector<32x256xf32>
    %32 = tpu.matmul %1, %31, %cst_33 {dimension_numbers = #tpu.dot_dimension_numbers<[1], [0], [0], [1], [0, 0, 1, 1], [], []>} : vector<32x256xbf16>, vector<256x256xbf16>, vector<32x256xf32> -> vector<32x256xf32>
    %c1_34 = arith.constant 1 : index
    %c0_35 = arith.constant 0 : index
    %c0_36 = arith.constant 0 : index
    %33 = vector.load %arg3[%c1_34, %c0_35, %c0_36] : memref<5x128x1024xbf16, #tpu.memory_space<vmem>>, vector<1x128x1024xbf16>
    %34 = vector.shape_cast %33 : vector<1x128x1024xbf16> to vector<128x1024xbf16>
    %cst_37 = arith.constant dense<0.000000e+00> : vector<32x1024xf32>
    %35 = tpu.matmul %2, %34, %cst_37 {dimension_numbers = #tpu.dot_dimension_numbers<[1], [0], [0], [1], [0, 0, 1, 1], [], []>} : vector<32x128xbf16>, vector<128x1024xbf16>, vector<32x1024xf32> -> vector<32x1024xf32>
    %36 = tpu.concatenate %32, %35 in 1 : vector<32x256xf32>, vector<32x1024xf32> -> vector<32x1280xf32>
    %37 = arith.truncf %36 : vector<32x1280xf32> to vector<32x1280xbf16>
    %cst_38 = arith.constant dense<0.000000e+00> : vector<32x128xf32>
    %38 = tpu.matmul %37, %3, %cst_38 {dimension_numbers = #tpu.dot_dimension_numbers<[1], [0], [0], [1], [0, 0, 1, 1], [], []>} : vector<32x1280xbf16>, vector<1280x128xbf16>, vector<32x128xf32> -> vector<32x128xf32>
    %39 = arith.addf %29, %38 : vector<32x128xf32>
    %40 = vector.broadcast %4 : vector<32x1xf32> to vector<32x128xf32>
    %41 = arith.addf %39, %40 : vector<32x128xf32>
    %c1_39 = arith.constant 1 : index
    %c0_40 = arith.constant 0 : index
    %c0_41 = arith.constant 0 : index
    %42 = vector.load %arg9[%c1_39, %c0_40, %c0_41] : memref<5x1x128xf32, #tpu.memory_space<vmem>>, vector<1x1x128xf32>
    %43 = vector.shape_cast %42 : vector<1x1x128xf32> to vector<1x128xf32>
    %44 = vector.broadcast %43 : vector<1x128xf32> to vector<32x128xf32>
    %45 = arith.mulf %41, %44 : vector<32x128xf32>
    %c1_42 = arith.constant 1 : index
    %c0_43 = arith.constant 0 : index
    %c0_44 = arith.constant 0 : index
    %46 = vector.load %arg10[%c1_42, %c0_43, %c0_44] : memref<5x32x128xf32, #tpu.memory_space<vmem>>, vector<1x32x128xf32>
    %47 = vector.shape_cast %46 : vector<1x32x128xf32> to vector<32x128xf32>
    %48 = vector.shape_cast %45 : vector<32x128xf32> to vector<1x32x128xf32>
    tpu.vector_store %arg10[%c1_42, %c0_43, %c0_44], %48 {strides = array<i32>} : memref<5x32x128xf32, #tpu.memory_space<vmem>>, vector<1x32x128xf32>,
    %c2 = arith.constant 2 : index
    %c0_45 = arith.constant 0 : index
    %c0_46 = arith.constant 0 : index
    %49 = vector.load %arg1[%c2, %c0_45, %c0_46] : memref<5x512x128xbf16, #tpu.memory_space<vmem>>, vector<1x512x128xbf16>
    %50 = vector.shape_cast %49 : vector<1x512x128xbf16> to vector<512x128xbf16>
    %cst_47 = arith.constant dense<0.000000e+00> : vector<32x128xf32>
    %51 = tpu.matmul %0, %50, %cst_47 {dimension_numbers = #tpu.dot_dimension_numbers<[1], [0], [0], [1], [0, 0, 1, 1], [], []>} : vector<32x512xbf16>, vector<512x128xbf16>, vector<32x128xf32> -> vector<32x128xf32>
    %c2_48 = arith.constant 2 : index
    %c0_49 = arith.constant 0 : index
    %c0_50 = arith.constant 0 : index
    %52 = vector.load %arg2[%c2_48, %c0_49, %c0_50] : memref<5x256x256xbf16, #tpu.memory_space<vmem>>, vector<1x256x256xbf16>
    %53 = vector.shape_cast %52 : vector<1x256x256xbf16> to vector<256x256xbf16>
    %cst_51 = arith.constant dense<0.000000e+00> : vector<32x256xf32>
    %54 = tpu.matmul %1, %53, %cst_51 {dimension_numbers = #tpu.dot_dimension_numbers<[1], [0], [0], [1], [0, 0, 1, 1], [], []>} : vector<32x256xbf16>, vector<256x256xbf16>, vector<32x256xf32> -> vector<32x256xf32>
    %c2_52 = arith.constant 2 : index
    %c0_53 = arith.constant 0 : index
    %c0_54 = arith.constant 0 : index
    %55 = vector.load %arg3[%c2_52, %c0_53, %c0_54] : memref<5x128x1024xbf16, #tpu.memory_space<vmem>>, vector<1x128x1024xbf16>
    %56 = vector.shape_cast %55 : vector<1x128x1024xbf16> to vector<128x1024xbf16>
    %cst_55 = arith.constant dense<0.000000e+00> : vector<32x1024xf32>
    %57 = tpu.matmul %2, %56, %cst_55 {dimension_numbers = #tpu.dot_dimension_numbers<[1], [0], [0], [1], [0, 0, 1, 1], [], []>} : vector<32x128xbf16>, vector<128x1024xbf16>, vector<32x1024xf32> -> vector<32x1024xf32>
    %58 = tpu.concatenate %54, %57 in 1 : vector<32x256xf32>, vector<32x1024xf32> -> vector<32x1280xf32>
    %59 = arith.truncf %58 : vector<32x1280xf32> to vector<32x1280xbf16>
    %cst_56 = arith.constant dense<0.000000e+00> : vector<32x128xf32>
    %60 = tpu.matmul %59, %3, %cst_56 {dimension_numbers = #tpu.dot_dimension_numbers<[1], [0], [0], [1], [0, 0, 1, 1], [], []>} : vector<32x1280xbf16>, vector<1280x128xbf16>, vector<32x128xf32> -> vector<32x128xf32>
    %61 = arith.addf %51, %60 : vector<32x128xf32>
    %62 = vector.broadcast %4 : vector<32x1xf32> to vector<32x128xf32>
    %63 = arith.addf %61, %62 : vector<32x128xf32>
    %c2_57 = arith.constant 2 : index
    %c0_58 = arith.constant 0 : index
    %c0_59 = arith.constant 0 : index
    %64 = vector.load %arg9[%c2_57, %c0_58, %c0_59] : memref<5x1x128xf32, #tpu.memory_space<vmem>>, vector<1x1x128xf32>
    %65 = vector.shape_cast %64 : vector<1x1x128xf32> to vector<1x128xf32>
    %66 = vector.broadcast %65 : vector<1x128xf32> to vector<32x128xf32>
    %67 = arith.mulf %63, %66 : vector<32x128xf32>
    %c2_60 = arith.constant 2 : index
    %c0_61 = arith.constant 0 : index
    %c0_62 = arith.constant 0 : index
    %68 = vector.load %arg10[%c2_60, %c0_61, %c0_62] : memref<5x32x128xf32, #tpu.memory_space<vmem>>, vector<1x32x128xf32>
    %69 = vector.shape_cast %68 : vector<1x32x128xf32> to vector<32x128xf32>
    %70 = vector.shape_cast %67 : vector<32x128xf32> to vector<1x32x128xf32>
    tpu.vector_store %arg10[%c2_60, %c0_61, %c0_62], %70 {strides = array<i32>} : memref<5x32x128xf32, #tpu.memory_space<vmem>>, vector<1x32x128xf32>,
    %c3 = arith.constant 3 : index
    %c0_63 = arith.constant 0 : index
    %c0_64 = arith.constant 0 : index
    %71 = vector.load %arg1[%c3, %c0_63, %c0_64] : memref<5x512x128xbf16, #tpu.memory_space<vmem>>, vector<1x512x128xbf16>
    %72 = vector.shape_cast %71 : vector<1x512x128xbf16> to vector<512x128xbf16>
    %cst_65 = arith.constant dense<0.000000e+00> : vector<32x128xf32>
    %73 = tpu.matmul %0, %72, %cst_65 {dimension_numbers = #tpu.dot_dimension_numbers<[1], [0], [0], [1], [0, 0, 1, 1], [], []>} : vector<32x512xbf16>, vector<512x128xbf16>, vector<32x128xf32> -> vector<32x128xf32>
    %c3_66 = arith.constant 3 : index
    %c0_67 = arith.constant 0 : index
    %c0_68 = arith.constant 0 : index
    %74 = vector.load %arg2[%c3_66, %c0_67, %c0_68] : memref<5x256x256xbf16, #tpu.memory_space<vmem>>, vector<1x256x256xbf16>
    %75 = vector.shape_cast %74 : vector<1x256x256xbf16> to vector<256x256xbf16>
    %cst_69 = arith.constant dense<0.000000e+00> : vector<32x256xf32>
    %76 = tpu.matmul %1, %75, %cst_69 {dimension_numbers = #tpu.dot_dimension_numbers<[1], [0], [0], [1], [0, 0, 1, 1], [], []>} : vector<32x256xbf16>, vector<256x256xbf16>, vector<32x256xf32> -> vector<32x256xf32>
    %c3_70 = arith.constant 3 : index
    %c0_71 = arith.constant 0 : index
    %c0_72 = arith.constant 0 : index
    %77 = vector.load %arg3[%c3_70, %c0_71, %c0_72] : memref<5x128x1024xbf16, #tpu.memory_space<vmem>>, vector<1x128x1024xbf16>
    %78 = vector.shape_cast %77 : vector<1x128x1024xbf16> to vector<128x1024xbf16>
    %cst_73 = arith.constant dense<0.000000e+00> : vector<32x1024xf32>
    %79 = tpu.matmul %2, %78, %cst_73 {dimension_numbers = #tpu.dot_dimension_numbers<[1], [0], [0], [1], [0, 0, 1, 1], [], []>} : vector<32x128xbf16>, vector<128x1024xbf16>, vector<32x1024xf32> -> vector<32x1024xf32>
    %80 = tpu.concatenate %76, %79 in 1 : vector<32x256xf32>, vector<32x1024xf32> -> vector<32x1280xf32>
    %81 = arith.truncf %80 : vector<32x1280xf32> to vector<32x1280xbf16>
    %cst_74 = arith.constant dense<0.000000e+00> : vector<32x128xf32>
    %82 = tpu.matmul %81, %3, %cst_74 {dimension_numbers = #tpu.dot_dimension_numbers<[1], [0], [0], [1], [0, 0, 1, 1], [], []>} : vector<32x1280xbf16>, vector<1280x128xbf16>, vector<32x128xf32> -> vector<32x128xf32>
    %83 = arith.addf %73, %82 : vector<32x128xf32>
    %84 = vector.broadcast %4 : vector<32x1xf32> to vector<32x128xf32>
    %85 = arith.addf %83, %84 : vector<32x128xf32>
    %c3_75 = arith.constant 3 : index
    %c0_76 = arith.constant 0 : index
    %c0_77 = arith.constant 0 : index
    %86 = vector.load %arg9[%c3_75, %c0_76, %c0_77] : memref<5x1x128xf32, #tpu.memory_space<vmem>>, vector<1x1x128xf32>
    %87 = vector.shape_cast %86 : vector<1x1x128xf32> to vector<1x128xf32>
    %88 = vector.broadcast %87 : vector<1x128xf32> to vector<32x128xf32>
    %89 = arith.mulf %85, %88 : vector<32x128xf32>
    %c3_78 = arith.constant 3 : index
    %c0_79 = arith.constant 0 : index
    %c0_80 = arith.constant 0 : index
    %90 = vector.load %arg10[%c3_78, %c0_79, %c0_80] : memref<5x32x128xf32, #tpu.memory_space<vmem>>, vector<1x32x128xf32>
    %91 = vector.shape_cast %90 : vector<1x32x128xf32> to vector<32x128xf32>
    %92 = vector.shape_cast %89 : vector<32x128xf32> to vector<1x32x128xf32>
    tpu.vector_store %arg10[%c3_78, %c0_79, %c0_80], %92 {strides = array<i32>} : memref<5x32x128xf32, #tpu.memory_space<vmem>>, vector<1x32x128xf32>,
    %c4 = arith.constant 4 : index
    %c0_81 = arith.constant 0 : index
    %c0_82 = arith.constant 0 : index
    %93 = vector.load %arg1[%c4, %c0_81, %c0_82] : memref<5x512x128xbf16, #tpu.memory_space<vmem>>, vector<1x512x128xbf16>
    %94 = vector.shape_cast %93 : vector<1x512x128xbf16> to vector<512x128xbf16>
    %cst_83 = arith.constant dense<0.000000e+00> : vector<32x128xf32>
    %95 = tpu.matmul %0, %94, %cst_83 {dimension_numbers = #tpu.dot_dimension_numbers<[1], [0], [0], [1], [0, 0, 1, 1], [], []>} : vector<32x512xbf16>, vector<512x128xbf16>, vector<32x128xf32> -> vector<32x128xf32>
    %c4_84 = arith.constant 4 : index
    %c0_85 = arith.constant 0 : index
    %c0_86 = arith.constant 0 : index
    %96 = vector.load %arg2[%c4_84, %c0_85, %c0_86] : memref<5x256x256xbf16, #tpu.memory_space<vmem>>, vector<1x256x256xbf16>
    %97 = vector.shape_cast %96 : vector<1x256x256xbf16> to vector<256x256xbf16>
    %cst_87 = arith.constant dense<0.000000e+00> : vector<32x256xf32>
    %98 = tpu.matmul %1, %97, %cst_87 {dimension_numbers = #tpu.dot_dimension_numbers<[1], [0], [0], [1], [0, 0, 1, 1], [], []>} : vector<32x256xbf16>, vector<256x256xbf16>, vector<32x256xf32> -> vector<32x256xf32>
    %c4_88 = arith.constant 4 : index
    %c0_89 = arith.constant 0 : index
    %c0_90 = arith.constant 0 : index
    %99 = vector.load %arg3[%c4_88, %c0_89, %c0_90] : memref<5x128x1024xbf16, #tpu.memory_space<vmem>>, vector<1x128x1024xbf16>
    %100 = vector.shape_cast %99 : vector<1x128x1024xbf16> to vector<128x1024xbf16>
    %cst_91 = arith.constant dense<0.000000e+00> : vector<32x1024xf32>
    %101 = tpu.matmul %2, %100, %cst_91 {dimension_numbers = #tpu.dot_dimension_numbers<[1], [0], [0], [1], [0, 0, 1, 1], [], []>} : vector<32x128xbf16>, vector<128x1024xbf16>, vector<32x1024xf32> -> vector<32x1024xf32>
    %102 = tpu.concatenate %98, %101 in 1 : vector<32x256xf32>, vector<32x1024xf32> -> vector<32x1280xf32>
    %103 = arith.truncf %102 : vector<32x1280xf32> to vector<32x1280xbf16>
    %cst_92 = arith.constant dense<0.000000e+00> : vector<32x128xf32>
    %104 = tpu.matmul %103, %3, %cst_92 {dimension_numbers = #tpu.dot_dimension_numbers<[1], [0], [0], [1], [0, 0, 1, 1], [], []>} : vector<32x1280xbf16>, vector<1280x128xbf16>, vector<32x128xf32> -> vector<32x128xf32>
    %105 = arith.addf %95, %104 : vector<32x128xf32>
    %106 = vector.broadcast %4 : vector<32x1xf32> to vector<32x128xf32>
    %107 = arith.addf %105, %106 : vector<32x128xf32>
    %c4_93 = arith.constant 4 : index
    %c0_94 = arith.constant 0 : index
    %c0_95 = arith.constant 0 : index
    %108 = vector.load %arg9[%c4_93, %c0_94, %c0_95] : memref<5x1x128xf32, #tpu.memory_space<vmem>>, vector<1x1x128xf32>
    %109 = vector.shape_cast %108 : vector<1x1x128xf32> to vector<1x128xf32>
    %110 = vector.broadcast %109 : vector<1x128xf32> to vector<32x128xf32>
    %111 = arith.mulf %107, %110 : vector<32x128xf32>
    %c4_96 = arith.constant 4 : index
    %c0_97 = arith.constant 0 : index
    %c0_98 = arith.constant 0 : index
    %112 = vector.load %arg10[%c4_96, %c0_97, %c0_98] : memref<5x32x128xf32, #tpu.memory_space<vmem>>, vector<1x32x128xf32>
    %113 = vector.shape_cast %112 : vector<1x32x128xf32> to vector<32x128xf32>
    %114 = vector.shape_cast %111 : vector<32x128xf32> to vector<1x32x128xf32>
    tpu.vector_store %arg10[%c4_96, %c0_97, %c0_98], %114 {strides = array<i32>} : memref<5x32x128xf32, #tpu.memory_space<vmem>>, vector<1x32x128xf32>,
    return
  }
  func.func @transform_0(%arg0: i32) -> (i32, i32, i32) {
    %c0_i32 = arith.constant 0 : i32
    %c0_i32_0 = arith.constant 0 : i32
    %c0_i32_1 = arith.constant 0 : i32
    return %arg0, %c0_i32, %c0_i32_0 : i32, i32, i32
  }
  func.func @transform_1(%arg0: i32) -> (i32, i32, i32) {
    %c0_i32 = arith.constant 0 : i32
    %c0_i32_0 = arith.constant 0 : i32
    %c0_i32_1 = arith.constant 0 : i32
    return %arg0, %c0_i32, %c0_i32_0 : i32, i32, i32
  }
  func.func @transform_2(%arg0: i32) -> (i32, i32, i32) {
    %c0_i32 = arith.constant 0 : i32
    %c0_i32_0 = arith.constant 0 : i32
    %c0_i32_1 = arith.constant 0 : i32
    return %arg0, %c0_i32, %c0_i32_0 : i32, i32, i32
  }
  func.func @transform_3(%arg0: i32) -> (i32, i32) {
    %c0_i32 = arith.constant 0 : i32
    %c0_i32_0 = arith.constant 0 : i32
    %c0_i32_1 = arith.constant 0 : i32
    return %c0_i32, %c0_i32_0 : i32, i32
  }
  func.func @transform_4(%arg0: i32) -> (i32, i32) {
    %c0_i32 = arith.constant 0 : i32
    %c0_i32_0 = arith.constant 0 : i32
    %c0_i32_1 = arith.constant 0 : i32
    return %c0_i32, %c0_i32_0 : i32, i32
  }
  func.func @transform_5(%arg0: i32) -> (i32, i32) {
    %c0_i32 = arith.constant 0 : i32
    %c0_i32_0 = arith.constant 0 : i32
    %c0_i32_1 = arith.constant 0 : i32
    return %c0_i32, %c0_i32_0 : i32, i32
  }
  func.func @transform_6(%arg0: i32) -> (i32, i32) {
    %c0_i32 = arith.constant 0 : i32
    %c0_i32_0 = arith.constant 0 : i32
    %c0_i32_1 = arith.constant 0 : i32
    return %c0_i32, %c0_i32_0 : i32, i32
  }
  func.func @transform_7(%arg0: i32) -> (i32, i32) {
    %c0_i32 = arith.constant 0 : i32
    %c0_i32_0 = arith.constant 0 : i32
    %c0_i32_1 = arith.constant 0 : i32
    return %c0_i32, %c0_i32_0 : i32, i32
  }
  func.func @transform_8(%arg0: i32) -> (i32, i32, i32) {
    %c0_i32 = arith.constant 0 : i32
    %c0_i32_0 = arith.constant 0 : i32
    %c0_i32_1 = arith.constant 0 : i32
    return %arg0, %c0_i32, %c0_i32_0 : i32, i32, i32
  }
  func.func @transform_9(%arg0: i32) -> (i32, i32, i32) {
    %c0_i32 = arith.constant 0 : i32
    %c0_i32_0 = arith.constant 0 : i32
    %c0_i32_1 = arith.constant 0 : i32
    return %arg0, %c0_i32, %c0_i32_0 : i32, i32, i32
  }
}

</mosaic_0001>

<bundles_post_ra>
// kernel: tpu_custom_call.1
= control target key start
LH: loop header
LB: loop body
LE: loop exit
PB: predicated region body
PF: predicated region fallthrough
CT: control target
= control target key end

     0   :  { %14 = vsyncpa [#allocation3], 0  ;;  %s12786_s0 = inlined_call_operand.hbm [shape: bf16[5,512,128], index: 0, kind: input, shape index: {}]   ;;  %s12787_s1 = inlined_call_operand.hbm [shape: bf16[5,256,256], index: 1, kind: input, shape index: {}]   ;;  %s12788_s2 = inlined_call_operand.hbm [shape: bf16[5,128,1024], index: 2, kind: input, shape index: {}]   ;;  %s12789_s3 = inlined_call_operand.hbm [shape: bf16[32,512], index: 3, kind: input, shape index: {}]   ;;  %s12790_s4 = inlined_call_operand.hbm [shape: bf16[32,256], index: 4, kind: input, shape index: {}]   ;;  %s12791_s5 = inlined_call_operand.hbm [shape: bf16[32,128], index: 5, kind: input, shape index: {}]   ;;  %s12792_s6 = inlined_call_operand.hbm [shape: bf16[1280,128], index: 6, kind: input, shape index: {}]   ;;  %s12793_s7 = inlined_call_operand.vmem [shape: f32[32,1], index: 7, kind: input, shape index: {}]   ;;  %s12794_s8 = inlined_call_operand.hbm [shape: f32[5,1,128], index: 8, kind: input, shape index: {}]   ;;  %s12795_s9 = inlined_call_operand.hbm [shape: f32[5,32,128], index: 9, kind: output, shape index: {}]  }
   0x1   :  { %15 = vsyncpa [#allocation6], 0 }
   0x2   :  { %16 = vsyncpa [#allocation9], 0 }
   0x3   :  { %17 = vsyncpa [#allocation12], 0 }
   0x4   :  { %18 = vsyncpa [#allocation15], 0  ;;  %s37_s11 = sshll.u32 %s12787_s1, 4  ;;  %s38_s11 = int_to_ptr.hbm [resolvable:$true] %s37_s11 }
   0x5   :  { %19 = vsyncpa [#allocation4], 0  ;;  %s12031_s12 = smov [#allocation5]   ;;  %s63_s16 = sshll.u32 %s12789_s3, 4  ;;  %s64_s16 = int_to_ptr.hbm [resolvable:$true] %s63_s16 }
   0x6   :  { %s39_s13 = sshll.u32 %s12031_s12, 4  ;;  %s12032_s17 = smov 128   ;;  %s40_s13 = int_to_ptr.vmem [resolvable:$true] %s39_s13 }
   0x7   :  { %s12033_s18 = smov 8   ;;  %s12034_s19 = smov [#allocation8]  }
   0x8   :  { %45 = dma.hbm_to_vmem [thread:$0]  %s38_s11, 20480, %s40_s13, [#allocation6], %s12032_s17, %s12032_s17, %s12033_s18  }
   0x9   :  { %s65_s20 = sshll.u32 %s12034_s19, 4  ;;  %s12035_s1 = smov 256   ;;  %s66_s20 = int_to_ptr.vmem [resolvable:$true] %s65_s20 }
   0xa   :  { %s12036_s21 = smov 16   ;;  %s89_s24 = sshll.u32 %s12791_s5, 4  ;;  %s90_s24 = int_to_ptr.hbm [resolvable:$true] %s89_s24 }
   0xb   :  { %71 = dma.hbm_to_vmem [thread:$0]  %s64_s16, 1024, %s66_s20, [#allocation9], %s12035_s1, %s12035_s1, %s12036_s21  }
   0xc   :  { %s12037_s3 = smov [#allocation11]   ;;  %s24_s28 = sshll.u32 %s12786_s0, 4  ;;  %s25_s28 = int_to_ptr.hbm [resolvable:$true] %s24_s28 }
   0xd   :  { %s91_s25 = sshll.u32 %s12037_s3, 4  ;;  %s12038_s29 = smov 64   ;;  %s92_s25 = int_to_ptr.vmem [resolvable:$true] %s91_s25 }
   0xe   :  { %s12039_s30 = smov 4   ;;  %s12040_s10 = smov [#allocation2]  }
   0xf   :  { %97 = dma.hbm_to_vmem [thread:$0]  %s90_s24, 256, %s92_s25, [#allocation12], %s12038_s29, %s12038_s29, %s12039_s30  }
  0x10   :  { %s26_s11 = sshll.u32 %s12040_s10, 4  ;;  %s50_s5 = sshll.u32 %s12788_s2, 4  ;;  %s27_s11 = int_to_ptr.vmem [resolvable:$true] %s26_s11  ;;  %s51_s5 = int_to_ptr.hbm [resolvable:$true] %s50_s5 }
  0x11   :  { %32 = dma.hbm_to_vmem [thread:$0]  %s25_s28, 20480, %s27_s11, [#allocation3], %s12038_s29, %s12038_s29, %s12039_s30  }
  0x12   :  { %s12041_s0 = smov [#allocation7]   ;;  %s76_s19 = sshll.u32 %s12790_s4, 4  ;;  %s77_s19 = int_to_ptr.hbm [resolvable:$true] %s76_s19 }
  0x13   :  { %s52_s14 = sshll.u32 %s12041_s0, 4  ;;  %s12042_s20 = smov 512   ;;  %s53_s14 = int_to_ptr.vmem [resolvable:$true] %s52_s14 }
  0x14   :  { %s12043_s1 = smov 32   ;;  %s12044_s22 = smov [#allocation10]  }
  0x15   :  { %58 = dma.hbm_to_vmem [thread:$0]  %s51_s5, 40960, %s53_s14, [#allocation6], %s12042_s20, %s12042_s20, %s12043_s1  }
  0x16   :  { %s78_s23 = sshll.u32 %s12044_s22, 4  ;;  %s102_s3 = sshll.u32 %s12792_s6, 4  ;;  %s79_s23 = int_to_ptr.vmem [resolvable:$true] %s78_s23  ;;  %s103_s3 = int_to_ptr.hbm [resolvable:$true] %s102_s3 }
  0x17   :  { %84 = dma.hbm_to_vmem [thread:$0]  %s77_s19, 512, %s79_s23, [#allocation9], %s12032_s17, %s12032_s17, %s12033_s18  }
  0x18   :  { %s117_s4 = sshll.u32 %s12794_s8, 4  ;;  %s12045_s27 = smov [#allocation13]   ;;  %s118_s4 = int_to_ptr.hbm [resolvable:$true] %s117_s4 }
  0x19   :  { %s104_s28 = sshll.u32 %s12045_s27, 4  ;;  %s12046_s10 = smov [#allocation14]   ;;  %s105_s28 = int_to_ptr.vmem [resolvable:$true] %s104_s28 }
  0x1a   :  { %110 = dma.hbm_to_vmem [thread:$0]  %s103_s3, 10240, %s105_s28, [#allocation12], %s12038_s29, %s12038_s29, %s12039_s30  }
  0x1b   :  { %s119_s6 = sshll.u32 %s12046_s10, 4  ;;  %s12047_s11 = smov 1   ;;  %s120_s6 = int_to_ptr.vmem [resolvable:$true] %s119_s6 }
  0x1c   :  { %125 = dma.hbm_to_vmem [thread:$0]  %s118_s4, 80, %s120_s6, [#allocation15], %s12036_s21, %s12036_s21, %s12047_s11  }
  0x1d   :  { %12019 = dma.done.wait [#allocation3], 20480  }
  0x1e   :  { %12020 = vsyncadd [#allocation3], 4294946816 }
  0x1f   :  { %12021 = dma.done.wait [#allocation6], 61440  }
  0x20   :  { %12022 = vsyncadd [#allocation6], 4294905856 }
  0x21   :  { %12023 = dma.done.wait [#allocation9], 1536  }
  0x22   :  { %12024 = vsyncadd [#allocation9], 4294965760 }
  0x23   :  { %12025 = dma.done.wait [#allocation12], 10496  }
  0x24   :  { %12026 = vsyncadd [#allocation12], 4294956800 }
  0x25   :  { %12027 = dma.done.wait [#allocation15], 80  }
  0x26   :  { %12028 = vsyncadd [#allocation15], 4294967216  ;;  %v7837_v0 = vld [vmem:[#allocation5 + $0x70] sm:$0xf]  ;;  %v10840_v1 = vld [vmem:[#allocation5 + $0x74] sm:$0xf0] }
  0x27   :  { %v7901_v2 = vld [vmem:[#allocation5 + $0xf0] sm:$0xf]  ;;  %v7838_v3 = vor.u32 %v10840_v1, %v7837_v0  ;;  %v10856_v4 = vld [vmem:[#allocation5 + $0xf4] sm:$0xf0]  ;;  %v10839_v5 = vld [vmem:[#allocation5 + $0x74] sm:$0xf] }
  0x28   :  { %v7839_v6 = vld [vmem:[#allocation5 + $0x78] sm:$0xf0]  ;;  %v7902_v7 = vor.u32 %v10856_v4, %v7901_v2  ;;  %v10855_v9 = vld [vmem:[#allocation5 + $0xf4] sm:$0xf]  ;;  %v7829_v11 = vld [vmem:[#allocation5 + $0x60] sm:$0xf] }
  0x29   :  { %v7842_v8 = vor.u32 %v10839_v5, %v7839_v6  ;;  %v7903_v10 = vld [vmem:[#allocation5 + $0xf8] sm:$0xf0]  ;;  %614 = vmatpush.bf16.msra.mxu0 %v7838_v3  ;;  %v10838_v13 = vld [vmem:[#allocation5 + $0x64] sm:$0xf0]  ;;  %v7893_v14 = vld [vmem:[#allocation5 + $0xe0] sm:$0xf] }
  0x2a   :  { %v7906_v12 = vor.u32 %v10855_v9, %v7903_v10  ;;  %v10854_v15 = vld [vmem:[#allocation5 + $0xe4] sm:$0xf0]  ;;  %633 = vmatpush.bf16.msra.mxu1 %v7902_v7  ;;  %v7830_v16 = vor.u32 %v10838_v13, %v7829_v11  ;;  %v10837_v18 = vld [vmem:[#allocation5 + $0x64] sm:$0xf]  ;;  %v7831_v19 = vld [vmem:[#allocation5 + $0x68] sm:$0xf0] }
  0x2b   :  { %652 = vmatpush.bf16.msra.mxu2 %v7842_v8  ;;  %v7894_v17 = vor.u32 %v10854_v15, %v7893_v14  ;;  %v10853_v20 = vld [vmem:[#allocation5 + $0xe4] sm:$0xf]  ;;  %v7834_v21 = vor.u32 %v10837_v18, %v7831_v19  ;;  %v7895_v22 = vld [vmem:[#allocation5 + $0xe8] sm:$0xf0]  ;;  %v7821_v23 = vld [vmem:[#allocation5 + $0x50] sm:$0xf] }
  0x2c   :  { %671 = vmatpush.bf16.msra.mxu3 %v7906_v12  ;;  %v10836_v24 = vld [vmem:[#allocation5 + $0x54] sm:$0xf0]  ;;  %v7898_v25 = vor.u32 %v10853_v20, %v7895_v22  ;;  %v7885_v26 = vld [vmem:[#allocation5 + $0xd0] sm:$0xf]  ;;  %v10835_v28 = vld [vmem:[#allocation5 + $0x54] sm:$0xf] }
  0x2d   :  { %v10852_v27 = vld [vmem:[#allocation5 + $0xd4] sm:$0xf0]  ;;  %615 = vmatpush.bf16.msra.mxu0 %v7830_v16  ;;  %v7822_v29 = vor.u32 %v10836_v24, %v7821_v23  ;;  %v7823_v30 = vld [vmem:[#allocation5 + $0x58] sm:$0xf0]  ;;  %v10851_v31 = vld [vmem:[#allocation5 + $0xd4] sm:$0xf] }
  0x2e   :  { %v7887_v32 = vld [vmem:[#allocation5 + $0xd8] sm:$0xf0]  ;;  %634 = vmatpush.bf16.msra.mxu1 %v7894_v17  ;;  %v7886_v33 = vor.u32 %v10852_v27, %v7885_v26  ;;  %v7826_v34 = vor.u32 %v10835_v28, %v7823_v30  ;;  %v7813_v35 = vld [vmem:[#allocation5 + $0x40] sm:$0xf]  ;;  %v10834_v36 = vld [vmem:[#allocation5 + $0x44] sm:$0xf0] }
  0x2f   :  { %653 = vmatpush.bf16.msra.mxu2 %v7834_v21  ;;  %v7877_v37 = vld [vmem:[#allocation5 + $0xc0] sm:$0xf]  ;;  %v7890_v38 = vor.u32 %v10851_v31, %v7887_v32  ;;  %v10850_v39 = vld [vmem:[#allocation5 + $0xc4] sm:$0xf0]  ;;  %v10833_v40 = vld [vmem:[#allocation5 + $0x44] sm:$0xf]  ;;  %v7814_v44 = vor.u32 %v10834_v36, %v7813_v35 }
  0x30   :  { %672 = vmatpush.bf16.msra.mxu3 %v7898_v25  ;;  %v7815_v41 = vld [vmem:[#allocation5 + $0x48] sm:$0xf0]  ;;  %v10849_v42 = vld [vmem:[#allocation5 + $0xc4] sm:$0xf]  ;;  %v7878_v45 = vor.u32 %v10850_v39, %v7877_v37  ;;  %v7805_v47 = vld [vmem:[#allocation5 + $0x30] sm:$0xf] }
  0x31   :  { %v7879_v43 = vld [vmem:[#allocation5 + $0xc8] sm:$0xf0]  ;;  %616 = vmatpush.bf16.msra.mxu0 %v7822_v29  ;;  %v7818_v46 = vor.u32 %v10833_v40, %v7815_v41  ;;  %v10832_v48 = vld [vmem:[#allocation5 + $0x34] sm:$0xf0]  ;;  %v7869_v49 = vld [vmem:[#allocation5 + $0xb0] sm:$0xf] }
  0x32   :  { %635 = vmatpush.bf16.msra.mxu1 %v7886_v33  ;;  %v7882_v50 = vor.u32 %v10849_v42, %v7879_v43  ;;  %v10848_v51 = vld [vmem:[#allocation5 + $0xb4] sm:$0xf0]  ;;  %v10831_v52 = vld [vmem:[#allocation5 + $0x34] sm:$0xf]  ;;  %v7807_v53 = vld [vmem:[#allocation5 + $0x38] sm:$0xf0]  ;;  %v7806_v56 = vor.u32 %v10832_v48, %v7805_v47 }
  0x33   :  { %654 = vmatpush.bf16.msra.mxu2 %v7826_v34  ;;  %v10847_v54 = vld [vmem:[#allocation5 + $0xb4] sm:$0xf]  ;;  %v7871_v55 = vld [vmem:[#allocation5 + $0xb8] sm:$0xf0]  ;;  %v7870_v57 = vor.u32 %v10848_v51, %v7869_v49  ;;  %v7810_v58 = vor.u32 %v10831_v52, %v7807_v53  ;;  %v7797_v59 = vld [vmem:[#allocation5 + $0x20] sm:$0xf] }
  0x34   :  { %673 = vmatpush.bf16.msra.mxu3 %v7890_v38  ;;  %v10830_v60 = vld [vmem:[#allocation5 + $0x24] sm:$0xf0]  ;;  %v7861_v61 = vld [vmem:[#allocation5 + $0xa0] sm:$0xf]  ;;  %v7874_v62 = vor.u32 %v10847_v54, %v7871_v55  ;;  %v10829_v0 = vld [vmem:[#allocation5 + $0x24] sm:$0xf] }
  0x35   :  { %617 = vmatpush.bf16.msra.mxu0 %v7814_v44  ;;  %v10846_v63 = vld [vmem:[#allocation5 + $0xa4] sm:$0xf0]  ;;  %v7799_v1 = vld [vmem:[#allocation5 + $0x28] sm:$0xf0]  ;;  %v10845_v2 = vld [vmem:[#allocation5 + $0xa4] sm:$0xf]  ;;  %v7798_v4 = vor.u32 %v10830_v60, %v7797_v59 }
  0x36   :  { %636 = vmatpush.bf16.msra.mxu1 %v7878_v45  ;;  %v7863_v3 = vld [vmem:[#allocation5 + $0xa8] sm:$0xf0]  ;;  %v7862_v5 = vor.u32 %v10846_v63, %v7861_v61  ;;  %v7802_v6 = vor.u32 %v10829_v0, %v7799_v1  ;;  %v7789_v7 = vld [vmem:[#allocation5 + $0x10] sm:$0xf]  ;;  %v10828_v8 = vld [vmem:[#allocation5 + $0x14] sm:$0xf0] }
  0x37   :  { %655 = vmatpush.bf16.msra.mxu2 %v7818_v46  ;;  %v7853_v9 = vld [vmem:[#allocation5 + $0x90] sm:$0xf]  ;;  %v7866_v10 = vor.u32 %v10845_v2, %v7863_v3  ;;  %v10844_v11 = vld [vmem:[#allocation5 + $0x94] sm:$0xf0]  ;;  %v10827_v12 = vld [vmem:[#allocation5 + $0x14] sm:$0xf]  ;;  %v7790_v16 = vor.u32 %v10828_v8, %v7789_v7 }
  0x38   :  { %674 = vmatpush.bf16.msra.mxu3 %v7882_v50  ;;  %v7791_v13 = vld [vmem:[#allocation5 + $0x18] sm:$0xf0]  ;;  %v10843_v14 = vld [vmem:[#allocation5 + $0x94] sm:$0xf]  ;;  %v7781_v17 = vld [vmem:[#allocation5] sm:$0xf]  ;;  %v7854_v19 = vor.u32 %v10844_v11, %v7853_v9 }
  0x39   :  { %618 = vmatpush.bf16.msra.mxu0 %v7806_v56  ;;  %v7855_v15 = vld [vmem:[#allocation5 + $0x98] sm:$0xf0]  ;;  %v10826_v18 = vld [vmem:[#allocation5 + $0x4] sm:$0xf0]  ;;  %v7794_v20 = vor.u32 %v10827_v12, %v7791_v13  ;;  %v7845_v21 = vld [vmem:[#allocation5 + $0x80] sm:$0xf] }
  0x3a   :  { %637 = vmatpush.bf16.msra.mxu1 %v7870_v57  ;;  %v10842_v22 = vld [vmem:[#allocation5 + $0x84] sm:$0xf0]  ;;  %v10825_v23 = vld [vmem:[#allocation5 + $0x4] sm:$0xf]  ;;  %v7858_v24 = vor.u32 %v10843_v14, %v7855_v15  ;;  %v7783_v25 = vld [vmem:[#allocation5 + $0x8] sm:$0xf0]  ;;  %v7782_v31 = vor.u32 %v10826_v18, %v7781_v17 }
  0x3b   :  { %656 = vmatpush.bf16.msra.mxu2 %v7810_v58  ;;  %v10841_v26 = vld [vmem:[#allocation5 + $0x84] sm:$0xf]  ;;  %v7847_v27 = vld [vmem:[#allocation5 + $0x88] sm:$0xf0]  ;;  %v7765_v28 = vld [vmem:[#allocation10] sm:$0xf]  ;;  %v7846_v35 = vor.u32 %v10842_v22, %v7845_v21  ;;  %v7786_v36 = vor.u32 %v10825_v23, %v7783_v25 }
  0x3c   :  { %675 = vmatpush.bf16.msra.mxu3 %v7874_v62  ;;  %v8141_v29 = vld [vmem:[#allocation7 + $0x1c0] sm:$0xf]  ;;  %v10708_v32 = vld [vmem:[#allocation10 + $0x4] sm:$0xf0]  ;;  %v10913_v33 = vld [vmem:[#allocation7 + $0x1c4] sm:$0xf]  ;;  %v7850_v39 = vor.u32 %v10841_v26, %v7847_v27 }
  0x3d   :  { %619 = vmatpush.bf16.msra.mxu0 %v7798_v4  ;;  %v10917_v30 = vld [vmem:[#allocation7 + $0x1dc] sm:$0xf0]  ;;  %v8143_v34 = vld [vmem:[#allocation7 + $0x1e0] sm:$0xf0]  ;;  %v7767_v38 = vld [vmem:[#allocation10 + $0x8] sm:$0xf0]  ;;  %v12142_v44 = vor.u32 %v10708_v32, %v7765_v28 }
  0x3e   :  { %638 = vmatpush.bf16.msra.mxu1 %v7862_v5  ;;  %v10707_v37 = vld [vmem:[#allocation10 + $0x4] sm:$0xf]  ;;  %v8142_v40 = vor.u32 %v10917_v30, %v8141_v29  ;;  %v8149_v41 = vld [vmem:[#allocation7 + $0x1c8] sm:$0xf]  ;;  %v10914_v43 = vld [vmem:[#allocation7 + $0x1cc] sm:$0xf]  ;;  %v8146_v45 = vor.u32 %v10913_v33, %v8143_v34 }
  0x3f   :  { %657 = vmatpush.bf16.msra.mxu2 %v7802_v6  ;;  %v10918_v42 = vld [vmem:[#allocation7 + $0x1e4] sm:$0xf0]  ;;  %v8151_v46 = vld [vmem:[#allocation7 + $0x1e8] sm:$0xf0]  ;;  %v8109_v47 = vld [vmem:[#allocation7 + $0x180] sm:$0xf]  ;;  %v12144_v49 = vor.u32 %v10707_v37, %v7767_v38 }
  0x40   :  { %676 = vmatpush.bf16.msra.mxu3 %v7866_v10  ;;  %v10909_v48 = vld [vmem:[#allocation7 + $0x19c] sm:$0xf0]  ;;  %v10905_v50 = vld [vmem:[#allocation7 + $0x184] sm:$0xf]  ;;  %v8150_v52 = vor.u32 %v10918_v42, %v8149_v41  ;;  %v8154_v53 = vor.u32 %v10914_v43, %v8151_v46  ;;  %v8117_v55 = vld [vmem:[#allocation7 + $0x188] sm:$0xf] }
  0x41   :  { %620 = vmatpush.bf16.msra.mxu0 %v7790_v16  ;;  %v8111_v51 = vld [vmem:[#allocation7 + $0x1a0] sm:$0xf0]  ;;  %v8110_v54 = vor.u32 %v10909_v48, %v8109_v47  ;;  %v10910_v56 = vld [vmem:[#allocation7 + $0x1a4] sm:$0xf0]  ;;  %v10906_v57 = vld [vmem:[#allocation7 + $0x18c] sm:$0xf] }
  0x42   :  { %639 = vmatpush.bf16.msra.mxu1 %v7854_v19  ;;  %v8114_v58 = vor.u32 %v10905_v50, %v8111_v51  ;;  %v8119_v59 = vld [vmem:[#allocation7 + $0x1a8] sm:$0xf0]  ;;  %v8077_v60 = vld [vmem:[#allocation7 + $0x140] sm:$0xf]  ;;  %v10897_v62 = vld [vmem:[#allocation7 + $0x144] sm:$0xf]  ;;  %v8118_v0 = vor.u32 %v10910_v56, %v8117_v55 }
  0x43   :  { %658 = vmatpush.bf16.msra.mxu2 %v7794_v20  ;;  %v10901_v61 = vld [vmem:[#allocation7 + $0x15c] sm:$0xf0]  ;;  %v8079_v63 = vld [vmem:[#allocation7 + $0x160] sm:$0xf0]  ;;  %v8122_v1 = vor.u32 %v10906_v57, %v8119_v59  ;;  %v8085_v3 = vld [vmem:[#allocation7 + $0x148] sm:$0xf] }
  0x44   :  { %677 = vmatpush.bf16.msra.mxu3 %v7858_v24  ;;  %v8078_v2 = vor.u32 %v10901_v61, %v8077_v60  ;;  %v10902_v4 = vld [vmem:[#allocation7 + $0x164] sm:$0xf0]  ;;  %v10898_v5 = vld [vmem:[#allocation7 + $0x14c] sm:$0xf]  ;;  %v8082_v6 = vor.u32 %v10897_v62, %v8079_v63  ;;  %v8045_v8 = vld [vmem:[#allocation7 + $0x100] sm:$0xf] }
  0x45   :  { %621 = vmatpush.bf16.msra.mxu0 %v7782_v31  ;;  %v8087_v7 = vld [vmem:[#allocation7 + $0x168] sm:$0xf0]  ;;  %v10893_v9 = vld [vmem:[#allocation7 + $0x11c] sm:$0xf0]  ;;  %v10889_v10 = vld [vmem:[#allocation7 + $0x104] sm:$0xf]  ;;  %v8086_v12 = vor.u32 %v10902_v4, %v8085_v3 }
  0x46   :  { %640 = vmatpush.bf16.msra.mxu1 %v7846_v35  ;;  %v8047_v11 = vld [vmem:[#allocation7 + $0x120] sm:$0xf0]  ;;  %v8053_v13 = vld [vmem:[#allocation7 + $0x108] sm:$0xf]  ;;  %v8090_v14 = vor.u32 %v10898_v5, %v8087_v7  ;;  %v8046_v15 = vor.u32 %v10893_v9, %v8045_v8  ;;  %v10890_v17 = vld [vmem:[#allocation7 + $0x10c] sm:$0xf] }
  0x47   :  { %659 = vmatpush.bf16.msra.mxu2 %v7786_v36  ;;  %v10894_v16 = vld [vmem:[#allocation7 + $0x124] sm:$0xf0]  ;;  %v8055_v18 = vld [vmem:[#allocation7 + $0x128] sm:$0xf0]  ;;  %v8050_v19 = vor.u32 %v10889_v10, %v8047_v11  ;;  %v7773_v20 = vld [vmem:[#allocation10 + $0x10] sm:$0xf] }
  0x48   :  { %678 = vmatpush.bf16.msra.mxu3 %v7850_v39  ;;  %622 = vmatmul.bf16.vlgmr.msra.gmra.mxu0 %v12142_v44  ;;  %v8013_v21 = vld [vmem:[#allocation7 + $0xc0] sm:$0xf]  ;;  %v10710_v23 = vld [vmem:[#allocation10 + $0x14] sm:$0xf0]  ;;  %v10881_v24 = vld [vmem:[#allocation7 + $0xc4] sm:$0xf]  ;;  %v8054_v26 = vor.u32 %v10894_v16, %v8053_v13  ;;  %v8058_v29 = vor.u32 %v10890_v17, %v8055_v18 }
  0x49   :  { %1086 = vmatpush.bf16.msrb.mxu0 %v8142_v40  ;;  %641 = vmatmul.bf16.vlgmr.msra.gmra.mxu1 %v12144_v49  ;;  %v10885_v22 = vld [vmem:[#allocation7 + $0xdc] sm:$0xf0]  ;;  %v8015_v25 = vld [vmem:[#allocation7 + $0xe0] sm:$0xf0]  ;;  %v10709_v27 = vld [vmem:[#allocation10 + $0x14] sm:$0xf]  ;;  %v12150_v34 = vor.u32 %v10710_v23, %v7773_v20 }
  0x4a   :  { %1105 = vmatpush.bf16.msrb.mxu1 %v8146_v45  ;;  %660 = vmatmul.bf16.vlgmr.msra.gmra.mxu2 %v12142_v44  ;;  %v7775_v28 = vld [vmem:[#allocation10 + $0x18] sm:$0xf0]  ;;  %v8014_v30 = vor.u32 %v10885_v22, %v8013_v21  ;;  %v8021_v31 = vld [vmem:[#allocation7 + $0xc8] sm:$0xf]  ;;  %v10882_v33 = vld [vmem:[#allocation7 + $0xcc] sm:$0xf]  ;;  %v8018_v35 = vor.u32 %v10881_v24, %v8015_v25 }
  0x4b   :  { %679 = vmatmul.bf16.vlgmr.msra.gmra.mxu3 %v12144_v49  ;;  %1124 = vmatpush.bf16.msrb.mxu2 %v8150_v52  ;;  %v10886_v32 = vld [vmem:[#allocation7 + $0xe4] sm:$0xf0]  ;;  %v8023_v36 = vld [vmem:[#allocation7 + $0xe8] sm:$0xf0]  ;;  %v7981_v37 = vld [vmem:[#allocation7 + $0x80] sm:$0xf]  ;;  %v12152_v39 = vor.u32 %v10709_v27, %v7775_v28 }
  0x4c   :  { %1143 = vmatpush.bf16.msrb.mxu3 %v8154_v53  ;;  %v10877_v38 = vld [vmem:[#allocation7 + $0x9c] sm:$0xf0]  ;;  %v10873_v40 = vld [vmem:[#allocation7 + $0x84] sm:$0xf]  ;;  %v8022_v42 = vor.u32 %v10886_v32, %v8021_v31  ;;  %v8026_v43 = vor.u32 %v10882_v33, %v8023_v36  ;;  %v7989_v46 = vld [vmem:[#allocation7 + $0x88] sm:$0xf] }
  0x4d   :  { %1087 = vmatpush.bf16.msrb.mxu0 %v8110_v54  ;;  %v7983_v41 = vld [vmem:[#allocation7 + $0xa0] sm:$0xf0]  ;;  %v7982_v45 = vor.u32 %v10877_v38, %v7981_v37  ;;  %v10878_v47 = vld [vmem:[#allocation7 + $0xa4] sm:$0xf0]  ;;  %v10874_v48 = vld [vmem:[#allocation7 + $0x8c] sm:$0xf] }
  0x4e   :  { %1106 = vmatpush.bf16.msrb.mxu1 %v8114_v58  ;;  %v7986_v50 = vor.u32 %v10873_v40, %v7983_v41  ;;  %v7991_v51 = vld [vmem:[#allocation7 + $0xa8] sm:$0xf0]  ;;  %v7949_v52 = vld [vmem:[#allocation7 + $0x40] sm:$0xf]  ;;  %v10865_v54 = vld [vmem:[#allocation7 + $0x44] sm:$0xf]  ;;  %v7990_v56 = vor.u32 %v10878_v47, %v7989_v46 }
  0x4f   :  { %1125 = vmatpush.bf16.msrb.mxu2 %v8118_v0  ;;  %v10869_v53 = vld [vmem:[#allocation7 + $0x5c] sm:$0xf0]  ;;  %v7951_v55 = vld [vmem:[#allocation7 + $0x60] sm:$0xf0]  ;;  %v7957_v57 = vld [vmem:[#allocation7 + $0x48] sm:$0xf]  ;;  %v7994_v58 = vor.u32 %v10874_v48, %v7991_v51 }
  0x50   :  { %1144 = vmatpush.bf16.msrb.mxu3 %v8122_v1  ;;  %v7950_v59 = vor.u32 %v10869_v53, %v7949_v52  ;;  %v10870_v60 = vld [vmem:[#allocation7 + $0x64] sm:$0xf0]  ;;  %v10866_v61 = vld [vmem:[#allocation7 + $0x4c] sm:$0xf]  ;;  %v7954_v63 = vor.u32 %v10865_v54, %v7951_v55  ;;  %v7917_v0 = vld [vmem:[#allocation7] sm:$0xf] }
  0x51   :  { %1088 = vmatpush.bf16.msrb.mxu0 %v8078_v2  ;;  %v7959_v62 = vld [vmem:[#allocation7 + $0x68] sm:$0xf0]  ;;  %v10861_v1 = vld [vmem:[#allocation7 + $0x1c] sm:$0xf0]  ;;  %v10857_v2 = vld [vmem:[#allocation7 + $0x4] sm:$0xf] }
  0x52   :  { %1107 = vmatpush.bf16.msrb.mxu1 %v8082_v6  ;;  %v7919_v3 = vld [vmem:[#allocation7 + $0x20] sm:$0xf0]  ;;  %v8157_v4 = vld [vmem:[#allocation7 + $0x1d0] sm:$0xf]  ;;  %v7958_v6 = vor.u32 %v10870_v60, %v7957_v57  ;;  %v10915_v7 = vld [vmem:[#allocation7 + $0x1d4] sm:$0xf]  ;;  %v7962_v9 = vor.u32 %v10866_v61, %v7959_v62  ;;  %v7918_v10 = vor.u32 %v10861_v1, %v7917_v0 }
  0x53   :  { %1126 = vmatpush.bf16.msrb.mxu2 %v8086_v12  ;;  %v10919_v5 = vld [vmem:[#allocation7 + $0x1ec] sm:$0xf0]  ;;  %v8159_v8 = vld [vmem:[#allocation7 + $0x1f0] sm:$0xf0]  ;;  %v7925_v11 = vld [vmem:[#allocation7 + $0x8] sm:$0xf] }
  0x54   :  { %1145 = vmatpush.bf16.msrb.mxu3 %v8090_v14  ;;  %v10862_v12 = vld [vmem:[#allocation7 + $0x24] sm:$0xf0]  ;;  %v10858_v13 = vld [vmem:[#allocation7 + $0xc] sm:$0xf]  ;;  %v7922_v14 = vor.u32 %v10857_v2, %v7919_v3  ;;  %v8158_v16 = vor.u32 %v10919_v5, %v8157_v4  ;;  %v8165_v17 = vld [vmem:[#allocation7 + $0x1d8] sm:$0xf] }
  0x55   :  { %1089 = vmatpush.bf16.msrb.mxu0 %v8046_v15  ;;  %v7927_v15 = vld [vmem:[#allocation7 + $0x28] sm:$0xf0]  ;;  %v10920_v18 = vld [vmem:[#allocation7 + $0x1f4] sm:$0xf0]  ;;  %v10916_v20 = vld [vmem:[#allocation7 + $0x1dc] sm:$0xf]  ;;  %v7926_v22 = vor.u32 %v10862_v12, %v7925_v11 }
  0x56   :  { %1108 = vmatpush.bf16.msrb.mxu1 %v8050_v19  ;;  %v8162_v19 = vor.u32 %v10915_v7, %v8159_v8  ;;  %v8167_v21 = vld [vmem:[#allocation7 + $0x1f8] sm:$0xf0]  ;;  %v12158_v23 = vld [vmem:[#allocation11] sm:$0xff]  ;;  %v7930_v24 = vor.u32 %v10858_v13, %v7927_v15  ;;  %v8166_v25 = vor.u32 %v10920_v18, %v8165_v17  ;;  %v10911_v27 = vld [vmem:[#allocation7 + $0x1ac] sm:$0xf0]  ;;  %s7746_s19 = sshll.u32 %s12795_s9, 4  ;;  %s7747_s19 = int_to_ptr.hbm [resolvable:$true] %s7746_s19 }
  0x57   :  { %1127 = vmatpush.bf16.msrb.mxu2 %v8054_v26  ;;  %v8125_v26 = vld [vmem:[#allocation7 + $0x190] sm:$0xf]  ;;  %v10907_v28 = vld [vmem:[#allocation7 + $0x194] sm:$0xf]  ;;  %v8133_v31 = vld [vmem:[#allocation7 + $0x198] sm:$0xf] }
  0x58   :  { %1146 = vmatpush.bf16.msrb.mxu3 %v8058_v29  ;;  %627 = vmatmul.bf16.gmra.mxu0 %v12150_v34  ;;  %v8170_v29 = vor.u32 %v10916_v20, %v8167_v21  ;;  %v10912_v32 = vld [vmem:[#allocation7 + $0x1b4] sm:$0xf0]  ;;  %v10908_v33 = vld [vmem:[#allocation7 + $0x19c] sm:$0xf]  ;;  %v8126_v36 = vor.u32 %v10911_v27, %v8125_v26  ;;  %v8093_v37 = vld [vmem:[#allocation7 + $0x150] sm:$0xf] }
  0x59   :  { %1090 = vmatpush.bf16.msrb.mxu0 %v8014_v30  ;;  %646 = vmatmul.bf16.gmra.mxu1 %v12152_v39  ;;  %v8127_v30 = vld [vmem:[#allocation7 + $0x1b0] sm:$0xf0]  ;;  %v8134_v40 = vor.u32 %v10912_v32, %v8133_v31  ;;  %v10903_v41 = vld [vmem:[#allocation7 + $0x16c] sm:$0xf0]  ;;  %v8101_v46 = vld [vmem:[#allocation7 + $0x158] sm:$0xf] }
  0x5a   :  { %1109 = vmatpush.bf16.msrb.mxu1 %v8018_v35  ;;  %665 = vmatmul.bf16.gmra.mxu2 %v12150_v34  ;;  %v8135_v35 = vld [vmem:[#allocation7 + $0x1b8] sm:$0xf0]  ;;  %v8130_v38 = vor.u32 %v10907_v28, %v8127_v30  ;;  %v10904_v47 = vld [vmem:[#allocation7 + $0x174] sm:$0xf0]  ;;  %v8094_v51 = vor.u32 %v10903_v41, %v8093_v37  ;;  %v8061_v54 = vld [vmem:[#allocation7 + $0x110] sm:$0xf] }
  0x5b   :  { %684 = vmatmul.bf16.gmra.mxu3 %v12152_v39  ;;  %1128 = vmatpush.bf16.msrb.mxu2 %v8022_v42  ;;  %v10899_v42 = vld [vmem:[#allocation7 + $0x154] sm:$0xf]  ;;  %v10900_v48 = vld [vmem:[#allocation7 + $0x15c] sm:$0xf]  ;;  %v8102_v53 = vor.u32 %v10904_v47, %v8101_v46  ;;  %v10895_v55 = vld [vmem:[#allocation7 + $0x12c] sm:$0xf0] }
  0x5c   :  { %1147 = vmatpush.bf16.msrb.mxu3 %v8026_v43  ;;  %v8095_v43 = vld [vmem:[#allocation7 + $0x170] sm:$0xf0]  ;;  %v10896_v60 = vld [vmem:[#allocation7 + $0x134] sm:$0xf0]  ;;  %v10892_v61 = vld [vmem:[#allocation7 + $0x11c] sm:$0xf] }
  0x5d   :  { %1091 = vmatpush.bf16.msrb.mxu0 %v7982_v45  ;;  %v8138_v45 = vor.u32 %v10908_v33, %v8135_v35  ;;  %v8098_v52 = vor.u32 %v10899_v42, %v8095_v43  ;;  %v8071_v62 = vld [vmem:[#allocation7 + $0x138] sm:$0xf0]  ;;  %v8029_v2 = vld [vmem:[#allocation7 + $0xd0] sm:$0xf]  ;;  %v10883_v4 = vld [vmem:[#allocation7 + $0xd4] sm:$0xf] }
  0x5e   :  { %1110 = vmatpush.bf16.msrb.mxu1 %v7986_v50  ;;  %v8103_v50 = vld [vmem:[#allocation7 + $0x178] sm:$0xf0]  ;;  %v10887_v3 = vld [vmem:[#allocation7 + $0xec] sm:$0xf0]  ;;  %v8074_v5 = vor.u32 %v10892_v61, %v8071_v62  ;;  %v8037_v7 = vld [vmem:[#allocation7 + $0xd8] sm:$0xf] }
  0x5f   :  { %1129 = vmatpush.bf16.msrb.mxu2 %v7990_v56  ;;  %v10891_v56 = vld [vmem:[#allocation7 + $0x114] sm:$0xf]  ;;  %v8106_v57 = vor.u32 %v10900_v48, %v8103_v50  ;;  %v10888_v8 = vld [vmem:[#allocation7 + $0xf4] sm:$0xf0]  ;;  %v12164_v11 = vld [vmem:[#allocation11 + $0x8] sm:$0xff]  ;;  %v8030_v12 = vor.u32 %v10887_v3, %v8029_v2 }
  0x60   :  { %1148 = vmatpush.bf16.msrb.mxu3 %v7994_v58  ;;  %v8063_v58 = vld [vmem:[#allocation7 + $0x130] sm:$0xf0]  ;;  %v7997_v15 = vld [vmem:[#allocation7 + $0x90] sm:$0xf]  ;;  %v8005_v20 = vld [vmem:[#allocation7 + $0x98] sm:$0xf] }
  0x61   :  { %1092 = vmatpush.bf16.msrb.mxu0 %v7950_v59  ;;  %v8069_v59 = vld [vmem:[#allocation7 + $0x118] sm:$0xf]  ;;  %v8066_v0 = vor.u32 %v10891_v56, %v8063_v58  ;;  %v10875_v17 = vld [vmem:[#allocation7 + $0x94] sm:$0xf]  ;;  %v7965_v28 = vld [vmem:[#allocation7 + $0x50] sm:$0xf] }
  0x62   :  { %1111 = vmatpush.bf16.msrb.mxu1 %v7954_v63  ;;  %v8062_v63 = vor.u32 %v10895_v55, %v8061_v54  ;;  %v8070_v1 = vor.u32 %v10896_v60, %v8069_v59  ;;  %v10880_v21 = vld [vmem:[#allocation7 + $0xb4] sm:$0xf0]  ;;  %v10867_v30 = vld [vmem:[#allocation7 + $0x54] sm:$0xf]  ;;  %v7975_v37 = vld [vmem:[#allocation7 + $0x78] sm:$0xf0] }
  0x63   :  { %1130 = vmatpush.bf16.msrb.mxu2 %v7958_v6  ;;  %v8031_v6 = vld [vmem:[#allocation7 + $0xf0] sm:$0xf0]  ;;  %v8006_v27 = vor.u32 %v10880_v21, %v8005_v20  ;;  %v7973_v33 = vld [vmem:[#allocation7 + $0x58] sm:$0xf]  ;;  %v7933_v42 = vld [vmem:[#allocation7 + $0x10] sm:$0xf] }
  0x64   :  { %1149 = vmatpush.bf16.msrb.mxu3 %v7962_v9  ;;  %v10884_v9 = vld [vmem:[#allocation7 + $0xdc] sm:$0xf]  ;;  %v8034_v13 = vor.u32 %v10883_v4, %v8031_v6  ;;  %v7967_v32 = vld [vmem:[#allocation7 + $0x70] sm:$0xf0]  ;;  %v10872_v35 = vld [vmem:[#allocation7 + $0x74] sm:$0xf0] }
  0x65   :  { %1093 = vmatpush.bf16.msrb.mxu0 %v7918_v10  ;;  %v8039_v10 = vld [vmem:[#allocation7 + $0xf8] sm:$0xf0]  ;;  %v7974_v41 = vor.u32 %v10872_v35, %v7973_v33  ;;  %v10863_v43 = vld [vmem:[#allocation7 + $0x2c] sm:$0xf0]  ;;  %v7935_v47 = vld [vmem:[#allocation7 + $0x30] sm:$0xf0] }
  0x66   :  { %1112 = vmatpush.bf16.msrb.mxu1 %v7922_v14  ;;  %v8038_v14 = vor.u32 %v10888_v8, %v8037_v7  ;;  %v8042_v18 = vor.u32 %v10884_v9, %v8039_v10  ;;  %v7941_v48 = vld [vmem:[#allocation7 + $0x18] sm:$0xf]  ;;  %v10728_v58 = vld [vmem:[#allocation13 + $0x78] sm:$0xff]  ;;  %v10719_v59 = vld [vmem:[#allocation13 + $0x30] sm:$0xff] }
  0x67   :  { %1131 = vmatpush.bf16.msrb.mxu2 %v7926_v22  ;;  %v10876_v22 = vld [vmem:[#allocation7 + $0x9c] sm:$0xf]  ;;  %v10864_v50 = vld [vmem:[#allocation7 + $0x34] sm:$0xf0]  ;;  %v10727_v60 = vld [vmem:[#allocation13 + $0x70] sm:$0xff] }
  0x68   :  { %1150 = vmatpush.bf16.msrb.mxu3 %v7930_v24  ;;  %1094 = vmatmul.bf16.vlgmr.msrb.gmra.mxu0 %v12158_v23  ;;  %v8007_v24 = vld [vmem:[#allocation7 + $0xb8] sm:$0xf0]  ;;  %v7942_v55 = vor.u32 %v10864_v50, %v7941_v48  ;;  %v10724_v2 = vld [vmem:[#allocation13 + $0x58] sm:$0xff]  ;;  %v10723_v4 = vld [vmem:[#allocation13 + $0x50] sm:$0xff] }
  0x69   :  { %1162 = vmatpush.bf16.msra.mxu0 %v8158_v16  ;;  %1113 = vmatmul.bf16.vlgmr.msrb.gmra.mxu1 %v12158_v23  ;;  %v10879_v16 = vld [vmem:[#allocation7 + $0xac] sm:$0xf0]  ;;  %v8010_v31 = vor.u32 %v10876_v22, %v8007_v24  ;;  %v10718_v61 = vld [vmem:[#allocation13 + $0x28] sm:$0xff]  ;;  %v10736_v6 = vld [vmem:[#allocation13 + $0xb8] sm:$0xff] }
  0x6a   :  { %1181 = vmatpush.bf16.msra.mxu1 %v8162_v19  ;;  %1132 = vmatmul.bf16.vlgmr.msrb.gmra.mxu2 %v12158_v23  ;;  %v7999_v19 = vld [vmem:[#allocation7 + $0xb0] sm:$0xf0]  ;;  %v10726_v62 = vld [vmem:[#allocation13 + $0x68] sm:$0xff]  ;;  %v10744_v8 = vld [vmem:[#allocation13 + $0xf8] sm:$0xff] }
  0x6b   :  { %1200 = vmatpush.bf16.msra.mxu2 %v8166_v25  ;;  %1151 = vmatmul.bf16.vlgmr.msrb.gmra.mxu3 %v12158_v23  ;;  %v7998_v25 = vor.u32 %v10879_v16, %v7997_v15  ;;  %v8002_v26 = vor.u32 %v10875_v17, %v7999_v19  ;;  %v10714_v3 = vld [vmem:[#allocation13 + $0x8] sm:$0xff]  ;;  %v10735_v9 = vld [vmem:[#allocation13 + $0xb0] sm:$0xff]  ;;  %v10721_v10 = vld [vmem:[#allocation13 + $0x40] sm:$0xff] }
  0x6c   :  { %1219 = vmatpush.bf16.msra.mxu3 %v8170_v29  ;;  %v10871_v29 = vld [vmem:[#allocation7 + $0x6c] sm:$0xf0]  ;;  %v10722_v7 = vld [vmem:[#allocation13 + $0x48] sm:$0xff]  ;;  %v10760_v15 = vld [vmem:[#allocation13 + $0x178] sm:$0xff] }
  0x6d   :  { %1163 = vmatpush.bf16.msra.mxu0 %v8126_v36  ;;  %v10868_v36 = vld [vmem:[#allocation7 + $0x5c] sm:$0xf]  ;;  %v10733_v16 = vld [vmem:[#allocation13 + $0xa0] sm:$0xff]  ;;  %v10759_v19 = vld [vmem:[#allocation13 + $0x170] sm:$0xff] }
  0x6e   :  { %1182 = vmatpush.bf16.msra.mxu1 %v8130_v38  ;;  %v7966_v38 = vor.u32 %v10871_v29, %v7965_v28  ;;  %v7978_v46 = vor.u32 %v10868_v36, %v7975_v37  ;;  %v10741_v17 = vld [vmem:[#allocation13 + $0xe0] sm:$0xff]  ;;  %v10732_v20 = vld [vmem:[#allocation13 + $0x98] sm:$0xff]  ;;  %v10750_v21 = vld [vmem:[#allocation13 + $0x128] sm:$0xff] }
  0x6f   :  { %1201 = vmatpush.bf16.msra.mxu2 %v8134_v40  ;;  %v7970_v40 = vor.u32 %v10867_v30, %v7967_v32  ;;  %v10740_v22 = vld [vmem:[#allocation13 + $0xd8] sm:$0xff]  ;;  %v10758_v24 = vld [vmem:[#allocation13 + $0x168] sm:$0xff]  ;;  %v10749_v28 = vld [vmem:[#allocation13 + $0x120] sm:$0xff] }
  0x70   :  { %1220 = vmatpush.bf16.msra.mxu3 %v8138_v45  ;;  %v10859_v45 = vld [vmem:[#allocation7 + $0x14] sm:$0xf]  ;;  %v10738_v32 = vld [vmem:[#allocation13 + $0xc8] sm:$0xff]  ;;  %v10748_v33 = vld [vmem:[#allocation13 + $0x118] sm:$0xff] }
  0x71   :  { %1164 = vmatpush.bf16.msra.mxu0 %v8094_v51  ;;  %v10860_v51 = vld [vmem:[#allocation7 + $0x1c] sm:$0xf]  ;;  %v7938_v54 = vor.u32 %v10859_v45, %v7935_v47  ;;  %v10757_v30 = vld [vmem:[#allocation13 + $0x160] sm:$0xff]  ;;  %v10756_v35 = vld [vmem:[#allocation13 + $0x158] sm:$0xff] }
  0x72   :  { %1183 = vmatpush.bf16.msra.mxu1 %v8098_v52  ;;  %v7943_v52 = vld [vmem:[#allocation7 + $0x38] sm:$0xf0]  ;;  %v10729_v36 = vld [vmem:[#allocation13 + $0x80] sm:$0xff]  ;;  %v10768_v50 = vld [vmem:[#allocation13 + $0x1b8] sm:$0xff] }
  0x73   :  { %1202 = vmatpush.bf16.msra.mxu2 %v8102_v53  ;;  %v7934_v53 = vor.u32 %v10863_v43, %v7933_v42  ;;  %v7946_v56 = vor.u32 %v10860_v51, %v7943_v52  ;;  %v10747_v42 = vld [vmem:[#allocation13 + $0x110] sm:$0xff]  ;;  %v10746_v51 = vld [vmem:[#allocation13 + $0x108] sm:$0xff] }
  0x74   :  { %1221 = vmatpush.bf16.msra.mxu3 %v8106_v57  ;;  %v10720_v57 = vld [vmem:[#allocation13 + $0x38] sm:$0xff]  ;;  %v10755_v43 = vld [vmem:[#allocation13 + $0x150] sm:$0xff]  ;;  %v10754_v52 = vld [vmem:[#allocation13 + $0x148] sm:$0xff] }
  0x75   :  { %1165 = vmatpush.bf16.msra.mxu0 %v8062_v63  ;;  %v10717_v63 = vld [vmem:[#allocation13 + $0x20] sm:$0xff] }
  0x76   :  { %1184 = vmatpush.bf16.msra.mxu1 %v8066_v0  ;;  %v10716_v0 = vld [vmem:[#allocation13 + $0x18] sm:$0xff] }
  0x77   :  { %1203 = vmatpush.bf16.msra.mxu2 %v8070_v1  ;;  %v10725_v1 = vld [vmem:[#allocation13 + $0x60] sm:$0xff] }
  0x78   :  { %1222 = vmatpush.bf16.msra.mxu3 %v8074_v5  ;;  %1099 = vmatmul.bf16.gmra.mxu0 %v12164_v11  ;;  %v10713_v5 = vld [vmem:[#allocation13] sm:$0xff] }
  0x79   :  { %1166 = vmatpush.bf16.msra.mxu0 %v8030_v12  ;;  %1118 = vmatmul.bf16.gmra.mxu1 %v12164_v11  ;;  %v10734_v12 = vld [vmem:[#allocation13 + $0xa8] sm:$0xff] }
  0x7a   :  { %1185 = vmatpush.bf16.msra.mxu1 %v8034_v13  ;;  %1137 = vmatmul.bf16.gmra.mxu2 %v12164_v11  ;;  %v10742_v13 = vld [vmem:[#allocation13 + $0xe8] sm:$0xff] }
  0x7b   :  { %1204 = vmatpush.bf16.msra.mxu2 %v8038_v14  ;;  %1156 = vmatmul.bf16.gmra.mxu3 %v12164_v11  ;;  %v10752_v14 = vld [vmem:[#allocation13 + $0x138] sm:$0xff] }
  0x7c   :  { %1223 = vmatpush.bf16.msra.mxu3 %v8042_v18  ;;  %v10751_v18 = vld [vmem:[#allocation13 + $0x130] sm:$0xff] }
  0x7d   :  { %1167 = vmatpush.bf16.msra.mxu0 %v7998_v25 }
  0x7e   :  { %1186 = vmatpush.bf16.msra.mxu1 %v8002_v26  ;;  %v10731_v26 = vld [vmem:[#allocation13 + $0x90] sm:$0xff] }
  0x7f   :  { %1205 = vmatpush.bf16.msra.mxu2 %v8006_v27  ;;  %v10739_v27 = vld [vmem:[#allocation13 + $0xd0] sm:$0xff] }
  0x80   :  { %1224 = vmatpush.bf16.msra.mxu3 %v8010_v31  ;;  %v10730_v31 = vld [vmem:[#allocation13 + $0x88] sm:$0xff] }
  0x81   :  { %1168 = vmatpush.bf16.msra.mxu0 %v7966_v38 }
  0x82   :  { %1187 = vmatpush.bf16.msra.mxu1 %v7970_v40 }
  0x83   :  { %1206 = vmatpush.bf16.msra.mxu2 %v7974_v41  ;;  %v10737_v41 = vld [vmem:[#allocation13 + $0xc0] sm:$0xff] }
  0x84   :  { %1225 = vmatpush.bf16.msra.mxu3 %v7978_v46 }
  0x85   :  { %1169 = vmatpush.bf16.msra.mxu0 %v7934_v53  ;;  %v10776_v53 = vld [vmem:[#allocation13 + $0x1f8] sm:$0xff] }
  0x86   :  { %1188 = vmatpush.bf16.msra.mxu1 %v7938_v54  ;;  %v10767_v54 = vld [vmem:[#allocation13 + $0x1b0] sm:$0xff] }
  0x87   :  { %1207 = vmatpush.bf16.msra.mxu2 %v7942_v55 }
  0x88   :  { %1226 = vmatpush.bf16.msra.mxu3 %v7946_v56  ;;  %1170 = vmatmul.bf16.vlgmr.msra.gmra.mxu0 %v12158_v23 }
  0x89   :  { %1738 = vmatpush.bf16.msrb.mxu0 %v10720_v57  ;;  %1189 = vmatmul.bf16.vlgmr.msra.gmra.mxu1 %v12158_v23 }
  0x8a   :  { %1757 = vmatpush.bf16.msrb.mxu1 %v10728_v58  ;;  %1208 = vmatmul.bf16.vlgmr.msra.gmra.mxu2 %v12158_v23 }
  0x8b   :  { %1227 = vmatmul.bf16.vlgmr.msra.gmra.mxu3 %v12158_v23  ;;  %v10715_v23 = vld [vmem:[#allocation13 + $0x10] sm:$0xff]  ;;  %1776 = vmatpush.bf16.msrb.mxu2 %v10736_v6 }
  0x8c   :  { %1795 = vmatpush.bf16.msrb.mxu3 %v10744_v8  ;;  %v10773_v8 = vld [vmem:[#allocation13 + $0x1e0] sm:$0xff] }
  0x8d   :  { %1739 = vmatpush.bf16.msrb.mxu0 %v10719_v59  ;;  %v10745_v59 = vld [vmem:[#allocation13 + $0x100] sm:$0xff] }
  0x8e   :  { %1758 = vmatpush.bf16.msrb.mxu1 %v10727_v60  ;;  %v10753_v60 = vld [vmem:[#allocation13 + $0x140] sm:$0xff] }
  0x8f   :  { %1777 = vmatpush.bf16.msrb.mxu2 %v10735_v9  ;;  %v10783_v9 = vld [vmem:[#allocation13 + $0x230] sm:$0xff] }
  0x91   :  { %1740 = vmatpush.bf16.msrb.mxu0 %v10718_v61  ;;  %v10775_v61 = vld [vmem:[#allocation13 + $0x1f0] sm:$0xff] }
  0x92   :  { %1759 = vmatpush.bf16.msrb.mxu1 %v10726_v62 }
  0x93   :  { %1778 = vmatpush.bf16.msrb.mxu2 %v10734_v12 }
  0x95   :  { %1741 = vmatpush.bf16.msrb.mxu0 %v10717_v63 }
  0x96   :  { %1760 = vmatpush.bf16.msrb.mxu1 %v10725_v1  ;;  %v10766_v1 = vld [vmem:[#allocation13 + $0x1a8] sm:$0xff] }
  0x97   :  { %1779 = vmatpush.bf16.msrb.mxu2 %v10733_v16  ;;  %v10772_v16 = vld [vmem:[#allocation13 + $0x1d8] sm:$0xff] }
  0x98   :  { %1175 = vmatmul.bf16.gmra.mxu0 %v12164_v11 }
  0x99   :  { %1742 = vmatpush.bf16.msrb.mxu0 %v10716_v0  ;;  %1194 = vmatmul.bf16.gmra.mxu1 %v12164_v11 }
  0x9a   :  { %1213 = vmatmul.bf16.gmra.mxu2 %v12164_v11  ;;  %1761 = vmatpush.bf16.msrb.mxu1 %v10724_v2  ;;  %v10784_v2 = vld [vmem:[#allocation13 + $0x238] sm:$0xff] }
  0x9b   :  { %1232 = vmatmul.bf16.gmra.mxu3 %v12164_v11  ;;  %v10743_v11 = vld [vmem:[#allocation13 + $0xf0] sm:$0xff]  ;;  %1780 = vmatpush.bf16.msrb.mxu2 %v10732_v20 }
  0x9c   :  { %1796 = vmatpush.bf16.msrb.mxu3 %v10743_v11 }
  0x9d   :  { %1743 = vmatpush.bf16.msrb.mxu0 %v10715_v23  ;;  %v10774_v23 = vld [vmem:[#allocation13 + $0x1e8] sm:$0xff] }
  0x9e   :  { %1762 = vmatpush.bf16.msrb.mxu1 %v10723_v4  ;;  %v10765_v4 = vld [vmem:[#allocation13 + $0x1a0] sm:$0xff] }
  0x9f   :  { %1781 = vmatpush.bf16.msrb.mxu2 %v10731_v26  ;;  %v10781_v26 = vld [vmem:[#allocation13 + $0x220] sm:$0xff] }
  0xa0   :  { %1797 = vmatpush.bf16.msrb.mxu3 %v10742_v13 }
  0xa1   :  { %1744 = vmatpush.bf16.msrb.mxu0 %v10714_v3  ;;  %v10792_v3 = vld [vmem:[#allocation13 + $0x278] sm:$0xff] }
  0xa2   :  { %1763 = vmatpush.bf16.msrb.mxu1 %v10722_v7 }
  0xa3   :  { %1782 = vmatpush.bf16.msrb.mxu2 %v10730_v31  ;;  %v10762_v31 = vld [vmem:[#allocation13 + $0x188] sm:$0xff] }
  0xa4   :  { %1798 = vmatpush.bf16.msrb.mxu3 %v10741_v17  ;;  %v10782_v17 = vld [vmem:[#allocation13 + $0x228] sm:$0xff] }
  0xa5   :  { %1745 = vmatpush.bf16.msrb.mxu0 %v10713_v5 }
  0xa6   :  { %1764 = vmatpush.bf16.msrb.mxu1 %v10721_v10  ;;  %v10791_v10 = vld [vmem:[#allocation13 + $0x270] sm:$0xff] }
  0xa7   :  { %1783 = vmatpush.bf16.msrb.mxu2 %v10729_v36  ;;  %v10761_v36 = vld [vmem:[#allocation13 + $0x180] sm:$0xff] }
  0xa8   :  { %1799 = vmatpush.bf16.msrb.mxu3 %v10740_v22 }
  0xa9   :  { %1814 = vmatpush.bf16.msra.mxu0 %v10752_v14 }
  0xaa   :  { %1833 = vmatpush.bf16.msra.mxu1 %v10760_v15  ;;  %v10764_v15 = vld [vmem:[#allocation13 + $0x198] sm:$0xff] }
  0xab   :  { %1852 = vmatpush.bf16.msra.mxu2 %v10768_v50  ;;  %v10778_v50 = vld [vmem:[#allocation13 + $0x208] sm:$0xff] }
  0xac   :  { %1800 = vmatpush.bf16.msrb.mxu3 %v10739_v27  ;;  %v10789_v27 = vld [vmem:[#allocation13 + $0x260] sm:$0xff] }
  0xad   :  { %1815 = vmatpush.bf16.msra.mxu0 %v10751_v18  ;;  %v10790_v18 = vld [vmem:[#allocation13 + $0x268] sm:$0xff] }
  0xae   :  { %1834 = vmatpush.bf16.msra.mxu1 %v10759_v19  ;;  %v10763_v19 = vld [vmem:[#allocation13 + $0x190] sm:$0xff] }
  0xaf   :  { %1853 = vmatpush.bf16.msra.mxu2 %v10767_v54 }
  0xb0   :  { %1801 = vmatpush.bf16.msrb.mxu3 %v10738_v32  ;;  %v10770_v32 = vld [vmem:[#allocation13 + $0x1c8] sm:$0xff] }
  0xb1   :  { %1816 = vmatpush.bf16.msra.mxu0 %v10750_v21 }
  0xb2   :  { %1835 = vmatpush.bf16.msra.mxu1 %v10758_v24 }
  0xb3   :  { %1854 = vmatpush.bf16.msra.mxu2 %v10766_v1  ;;  %v10816_v1 = vld [vmem:[#allocation2 + $0xb8] sm:$0xff] }
  0xb4   :  { %1802 = vmatpush.bf16.msrb.mxu3 %v10737_v41  ;;  %v10779_v41 = vld [vmem:[#allocation13 + $0x210] sm:$0xff] }
  0xb5   :  { %1817 = vmatpush.bf16.msra.mxu0 %v10749_v28 }
  0xb6   :  { %1836 = vmatpush.bf16.msra.mxu1 %v10757_v30 }
  0xb7   :  { %1855 = vmatpush.bf16.msra.mxu2 %v10765_v4 }
  0xb8   :  { %1871 = vmatpush.bf16.msra.mxu3 %v10776_v53  ;;  %v10799_v53 = vld [vmem:[#allocation2 + $0x30] sm:$0xff] }
  0xb9   :  { %1818 = vmatpush.bf16.msra.mxu0 %v10748_v33  ;;  %v10780_v33 = vld [vmem:[#allocation13 + $0x218] sm:$0xff] }
  0xba   :  { %1837 = vmatpush.bf16.msra.mxu1 %v10756_v35  ;;  %v10788_v35 = vld [vmem:[#allocation13 + $0x258] sm:$0xff] }
  0xbb   :  { %1856 = vmatpush.bf16.msra.mxu2 %v10764_v15  ;;  %v10822_v15 = vld [vmem:[#allocation2 + $0xe8] sm:$0xff] }
  0xbc   :  { %1872 = vmatpush.bf16.msra.mxu3 %v10775_v61 }
  0xbd   :  { %1819 = vmatpush.bf16.msra.mxu0 %v10747_v42  ;;  %v10787_v42 = vld [vmem:[#allocation13 + $0x250] sm:$0xff] }
  0xbe   :  { %1838 = vmatpush.bf16.msra.mxu1 %v10755_v43 }
  0xbf   :  { %1857 = vmatpush.bf16.msra.mxu2 %v10763_v19 }
  0xc0   :  { %1873 = vmatpush.bf16.msra.mxu3 %v10774_v23  ;;  %v10824_v23 = vld [vmem:[#allocation2 + $0xf8] sm:$0xff] }
  0xc1   :  { %1820 = vmatpush.bf16.msra.mxu0 %v10746_v51  ;;  %v10786_v51 = vld [vmem:[#allocation13 + $0x248] sm:$0xff] }
  0xc2   :  { %1839 = vmatpush.bf16.msra.mxu1 %v10754_v52  ;;  %v10808_v52 = vld [vmem:[#allocation2 + $0x78] sm:$0xff] }
  0xc3   :  { %1858 = vmatpush.bf16.msra.mxu2 %v10762_v31  ;;  %v10793_v31 = vld [vmem:[#allocation2] sm:$0xff] }
  0xc4   :  { %1874 = vmatpush.bf16.msra.mxu3 %v10773_v8  ;;  %v10823_v8 = vld [vmem:[#allocation2 + $0xf0] sm:$0xff] }
  0xc5   :  { %v623_v25 = vpop.f32.mrf.mxu0  ;;  %1821 = vmatpush.bf16.msra.mxu0 %v10745_v59  ;;  %v10785_v59 = vld [vmem:[#allocation13 + $0x240] sm:$0xff] }
  0xc6   :  { %v642_v29 = vpop.f32.mrf.mxu1  ;;  %1840 = vmatpush.bf16.msra.mxu1 %v10753_v60  ;;  %v10807_v60 = vld [vmem:[#allocation2 + $0x70] sm:$0xff] }
  0xc7   :  { %v643_v46 = vadd.f32 %v642_v29, %v623_v25  ;;  %v10771_v25 = vld [vmem:[#allocation13 + $0x1d0] sm:$0xff]  ;;  %1859 = vmatpush.bf16.msra.mxu2 %v10761_v36 }
  0xc8   :  { %1875 = vmatpush.bf16.msra.mxu3 %v10772_v16  ;;  %v10795_v16 = vld [vmem:[#allocation2 + $0x10] sm:$0xff] }
  0xcc   :  { %1876 = vmatpush.bf16.msra.mxu3 %v10771_v25 }
  0xcd   :  { %v661_v37 = vpop.f32.mrf.mxu2  ;;  %v625_v40 = vpop.f32.mrf.mxu0 }
  0xce   :  { %v680_v38 = vpop.f32.mrf.mxu3  ;;  %v644_v45 = vpop.f32.mrf.mxu1 }
  0xcf   :  { %v645_v47 = vadd.f32 %v644_v45, %v625_v40  ;;  %v681_v55 = vadd.f32 %v680_v38, %v661_v37 }
  0xd0   :  { %1877 = vmatpush.bf16.msra.mxu3 %v10770_v32 }
  0xd1   :  { %v1238_v48 = vpack.c.bf16 %v645_v47, %v643_v46  ;;  %v10769_v46 = vld [vmem:[#allocation13 + $0x1c0] sm:$0xff] }
  0xd3   :  { %1746 = vmatmul.bf16.vlgmr.msrb.gmra.mxu0 %v1238_v48  ;;  %v10800_v48 = vld [vmem:[#allocation2 + $0x38] sm:$0xff] }
  0xd4   :  { %1890 = vmatpush.bf16.msrb.mxu0 %v10784_v2  ;;  %1878 = vmatpush.bf16.msra.mxu3 %v10769_v46  ;;  %v10797_v2 = vld [vmem:[#allocation2 + $0x20] sm:$0xff]  ;;  %v8773_v46 = vld [vmem:[#allocation5 + $0x1f0] sm:$0xf] }
  0xd5   :  { %v663_v56 = vpop.f32.mrf.mxu2  ;;  %v628_v58 = vpop.f32.mrf.mxu0 }
  0xd6   :  { %v682_v57 = vpop.f32.mrf.mxu3  ;;  %v647_v63 = vpop.f32.mrf.mxu1 }
  0xd7   :  { %v683_v62 = vadd.f32 %v682_v57, %v663_v56  ;;  %v648_v12 = vadd.f32 %v647_v63, %v628_v58  ;;  %v10777_v58 = vld [vmem:[#allocation13 + $0x200] sm:$0xff]  ;;  %v10798_v63 = vld [vmem:[#allocation2 + $0x28] sm:$0xff] }
  0xd8   :  { %1891 = vmatpush.bf16.msrb.mxu0 %v10783_v9 }
  0xd9   :  { %v1239_v0 = vpack.c.bf16 %v683_v62, %v681_v55 }
  0xdb   :  { %1765 = vmatmul.bf16.vlgmr.msrb.gmra.mxu1 %v1239_v0  ;;  %v10806_v0 = vld [vmem:[#allocation2 + $0x68] sm:$0xff] }
  0xdc   :  { %1909 = vmatpush.bf16.msrb.mxu1 %v10792_v3  ;;  %1892 = vmatpush.bf16.msrb.mxu0 %v10782_v17 }
  0xdd   :  { %v666_v5 = vpop.f32.mrf.mxu2  ;;  %v630_v7 = vpop.f32.mrf.mxu0 }
  0xde   :  { %v685_v6 = vpop.f32.mrf.mxu3  ;;  %v649_v11 = vpop.f32.mrf.mxu1 }
  0xdf   :  { %v650_v13 = vadd.f32 %v649_v11, %v630_v7  ;;  %v686_v20 = vadd.f32 %v685_v6, %v666_v5  ;;  %v10805_v6 = vld [vmem:[#allocation2 + $0x60] sm:$0xff]  ;;  %v10815_v7 = vld [vmem:[#allocation2 + $0xb0] sm:$0xff] }
  0xe0   :  { %1910 = vmatpush.bf16.msrb.mxu1 %v10791_v10  ;;  %1893 = vmatpush.bf16.msrb.mxu0 %v10781_v26 }
  0xe1   :  { %v1248_v14 = vpack.c.bf16 %v650_v13, %v648_v12  ;;  %v10796_v12 = vld [vmem:[#allocation2 + $0x18] sm:$0xff] }
  0xe2   :  { %v10804_v13 = vld [vmem:[#allocation2 + $0x58] sm:$0xff] }
  0xe3   :  { %1751 = vmatmul.bf16.gmra.mxu0 %v1248_v14  ;;  %v10814_v14 = vld [vmem:[#allocation2 + $0xa8] sm:$0xff] }
  0xe4   :  { %1911 = vmatpush.bf16.msrb.mxu1 %v10790_v18  ;;  %1894 = vmatpush.bf16.msrb.mxu0 %v10780_v33  ;;  %v10801_v33 = vld [vmem:[#allocation2 + $0x40] sm:$0xff] }
  0xe5   :  { %v668_v21 = vpop.f32.mrf.mxu2  ;;  %v1095_v24 = vpop.f32.mrf.mxu0 }
  0xe6   :  { %v687_v22 = vpop.f32.mrf.mxu3  ;;  %v1114_v29 = vpop.f32.mrf.mxu1 }
  0xe7   :  { %v688_v28 = vadd.f32 %v687_v22, %v668_v21  ;;  %v10803_v21 = vld [vmem:[#allocation2 + $0x50] sm:$0xff]  ;;  %v10813_v22 = vld [vmem:[#allocation2 + $0xa0] sm:$0xff] }
  0xe8   :  { %1912 = vmatpush.bf16.msrb.mxu1 %v10789_v27  ;;  %1895 = vmatpush.bf16.msrb.mxu0 %v10779_v41  ;;  %v10794_v27 = vld [vmem:[#allocation2 + $0x8] sm:$0xff]  ;;  %v10819_v41 = vld [vmem:[#allocation2 + $0xd0] sm:$0xff] }
  0xe9   :  { %v1249_v30 = vpack.c.bf16 %v688_v28, %v686_v20  ;;  %v10802_v28 = vld [vmem:[#allocation2 + $0x48] sm:$0xff] }
  0xeb   :  { %1770 = vmatmul.bf16.gmra.mxu1 %v1249_v30  ;;  %v10820_v30 = vld [vmem:[#allocation2 + $0xd8] sm:$0xff] }
  0xec   :  { %1913 = vmatpush.bf16.msrb.mxu1 %v10788_v35  ;;  %1896 = vmatpush.bf16.msrb.mxu0 %v10778_v50  ;;  %v10984_v50 = vld [vmem:[#allocation5 + $0x1f4] sm:$0xf0] }
  0xed   :  { %v1133_v37 = vpop.f32.mrf.mxu2  ;;  %v1097_v38 = vpop.f32.mrf.mxu0 }
  0xee   :  { %v1152_v40 = vpop.f32.mrf.mxu3  ;;  %v1240_v43 = vpack.c.bf16 %v1097_v38, %v1095_v24  ;;  %v1116_v45 = vpop.f32.mrf.mxu1  ;;  %v10821_v24 = vld [vmem:[#allocation2 + $0xe0] sm:$0xff] }
  0xef   :  { %v1241_v47 = vpack.c.bf16 %v1116_v45, %v1114_v29  ;;  %v10812_v29 = vld [vmem:[#allocation2 + $0x98] sm:$0xff] }
  0xf0   :  { %1784 = vmatmul.bf16.vlgmr.msrb.gmra.mxu2 %v1240_v43  ;;  %1914 = vmatpush.bf16.msrb.mxu1 %v10787_v42  ;;  %v8709_v43 = vld [vmem:[#allocation5 + $0x170] sm:$0xf]  ;;  %v10968_v45 = vld [vmem:[#allocation5 + $0x174] sm:$0xf0] }
  0xf1   :  { %1803 = vmatmul.bf16.vlgmr.msrb.gmra.mxu3 %v1241_v47  ;;  %2160 = vmatpush.bf16.msrb.mxu2 %v10800_v48  ;;  %v8710_v47 = vor.u32 %v10968_v45, %v8709_v43  ;;  %v10810_v48 = vld [vmem:[#allocation2 + $0x88] sm:$0xff]  ;;  %v10979_v45 = vld [vmem:[#allocation5 + $0x1d4] sm:$0xf] }
  0xf2   :  { %2179 = vmatpush.bf16.msrb.mxu3 %v10808_v52  ;;  %1897 = vmatpush.bf16.msrb.mxu0 %v10777_v58  ;;  %v8774_v52 = vor.u32 %v10984_v50, %v8773_v46  ;;  %v8759_v46 = vld [vmem:[#allocation5 + $0x1d8] sm:$0xf0]  ;;  %v10958_v50 = vld [vmem:[#allocation5 + $0x124] sm:$0xf0] }
  0xf4   :  { %1915 = vmatpush.bf16.msrb.mxu1 %v10786_v51  ;;  %v10818_v51 = vld [vmem:[#allocation2 + $0xc8] sm:$0xff] }
  0xf5   :  { %v1135_v54 = vpop.f32.mrf.mxu2  ;;  %v1100_v55 = vpop.f32.mrf.mxu0  ;;  %2161 = vmatpush.bf16.msrb.mxu2 %v10799_v53  ;;  %v8701_v53 = vld [vmem:[#allocation5 + $0x160] sm:$0xf] }
  0xf6   :  { %v1242_v56 = vpack.c.bf16 %v1135_v54, %v1133_v37  ;;  %v1154_v57 = vpop.f32.mrf.mxu3  ;;  %v1119_v61 = vpop.f32.mrf.mxu1  ;;  %2180 = vmatpush.bf16.msrb.mxu3 %v10807_v60  ;;  %v10811_v37 = vld [vmem:[#allocation2 + $0x90] sm:$0xff]  ;;  %v10966_v54 = vld [vmem:[#allocation5 + $0x164] sm:$0xf0] }
  0xf7   :  { %v1243_v62 = vpack.c.bf16 %v1154_v57, %v1152_v40  ;;  %v10982_v57 = vld [vmem:[#allocation5 + $0x1e4] sm:$0xf0] }
  0xf8   :  { %1822 = vmatmul.bf16.vlgmr.msra.gmra.mxu0 %v1242_v56  ;;  %1916 = vmatpush.bf16.msrb.mxu1 %v10785_v59  ;;  %v8765_v56 = vld [vmem:[#allocation5 + $0x1e0] sm:$0xf] }
  0xf9   :  { %2162 = vmatpush.bf16.msrb.mxu2 %v10798_v63  ;;  %2198 = vmatpush.bf16.msra.mxu0 %v10816_v1  ;;  %v8766_v59 = vor.u32 %v10982_v57, %v8765_v56  ;;  %v10809_v63 = vld [vmem:[#allocation2 + $0x80] sm:$0xff]  ;;  %v8687_v57 = vld [vmem:[#allocation5 + $0x148] sm:$0xf0] }
  0xfa   :  { %2181 = vmatpush.bf16.msrb.mxu3 %v10806_v0  ;;  %v10961_v56 = vld [vmem:[#allocation5 + $0x144] sm:$0xf] }
  0xfb   :  { %1841 = vmatmul.bf16.vlgmr.msra.gmra.mxu1 %v1243_v62 }
  0xfc   :  { %2217 = vmatpush.bf16.msra.mxu1 %v10824_v23  ;;  %v10817_v23 = vld [vmem:[#allocation2 + $0xc0] sm:$0xff] }
  0xfd   :  { %v1138_v3 = vpop.f32.mrf.mxu2  ;;  %v1102_v4 = vpop.f32.mrf.mxu0  ;;  %2163 = vmatpush.bf16.msrb.mxu2 %v10797_v2  ;;  %2199 = vmatpush.bf16.msra.mxu0 %v10815_v7  ;;  %v8693_v2 = vld [vmem:[#allocation5 + $0x150] sm:$0xf]  ;;  %v10967_v7 = vld [vmem:[#allocation5 + $0x174] sm:$0xf] }
  0xfe   :  { %v1157_v5 = vpop.f32.mrf.mxu3  ;;  %v1121_v9 = vpop.f32.mrf.mxu1  ;;  %v1250_v10 = vpack.c.bf16 %v1102_v4, %v1100_v55  ;;  %2182 = vmatpush.bf16.msrb.mxu3 %v10805_v6  ;;  %v8702_v55 = vor.u32 %v10966_v54, %v8701_v53  ;;  %v8757_v4 = vld [vmem:[#allocation5 + $0x1d0] sm:$0xf]  ;;  %v10980_v6 = vld [vmem:[#allocation5 + $0x1d4] sm:$0xf0] }
  0xff   :  { %v1251_v11 = vpack.c.bf16 %v1121_v9, %v1119_v61  ;;  %v8758_v9 = vor.u32 %v10980_v6, %v8757_v4  ;;  %v8495_v4 = vld [vmem:[#allocation8 + $0x10] sm:$0xf0]  ;;  %v10956_v6 = vld [vmem:[#allocation5 + $0x114] sm:$0xf0] }
 0x100   :  { %1789 = vmatmul.bf16.gmra.mxu2 %v1250_v10  ;;  %2218 = vmatpush.bf16.msra.mxu1 %v10823_v8  ;;  %v8711_v8 = vld [vmem:[#allocation5 + $0x178] sm:$0xf0] }
 0x101   :  { %1808 = vmatmul.bf16.gmra.mxu3 %v1251_v11  ;;  %2164 = vmatpush.bf16.msrb.mxu2 %v10796_v12  ;;  %v8714_v10 = vor.u32 %v10967_v7, %v8711_v8  ;;  %v10983_v11 = vld [vmem:[#allocation5 + $0x1f4] sm:$0xf]  ;;  %v8775_v12 = vld [vmem:[#allocation5 + $0x1f8] sm:$0xf0]  ;;  %v8725_v7 = vld [vmem:[#allocation5 + $0x190] sm:$0xf] }
 0x102   :  { %2200 = vmatpush.bf16.msra.mxu0 %v10814_v14  ;;  %2183 = vmatpush.bf16.msrb.mxu3 %v10804_v13  ;;  %v8685_v13 = vld [vmem:[#allocation5 + $0x140] sm:$0xf]  ;;  %v8778_v14 = vor.u32 %v10983_v11, %v8775_v12  ;;  %v8679_v11 = vld [vmem:[#allocation5 + $0x138] sm:$0xf0] }
 0x103   :  { %v334_v12 = vld [vmem:[%s12793_s7] sm:$0xff] }
 0x104   :  { %2219 = vmatpush.bf16.msra.mxu1 %v10822_v15  ;;  %v10962_v15 = vld [vmem:[#allocation5 + $0x144] sm:$0xf0] }
 0x105   :  { %v1140_v17 = vpop.f32.mrf.mxu2  ;;  %v1171_v19 = vpop.f32.mrf.mxu0  ;;  %2165 = vmatpush.bf16.msrb.mxu2 %v10795_v16  ;;  %v8749_v16 = vld [vmem:[#allocation5 + $0x1c0] sm:$0xf] }
 0x106   :  { %v1159_v18 = vpop.f32.mrf.mxu3  ;;  %v1252_v20 = vpack.c.bf16 %v1140_v17, %v1138_v3  ;;  %v1190_v25 = vpop.f32.mrf.mxu1  ;;  %2184 = vmatpush.bf16.msrb.mxu3 %v10803_v21  ;;  %2201 = vmatpush.bf16.msra.mxu0 %v10813_v22  ;;  %v10964_v3 = vld [vmem:[#allocation5 + $0x154] sm:$0xf0]  ;;  %v10978_v17 = vld [vmem:[#allocation5 + $0x1c4] sm:$0xf0]  ;;  %v10965_v21 = vld [vmem:[#allocation5 + $0x164] sm:$0xf] }
 0x107   :  { %v1253_v26 = vpack.c.bf16 %v1159_v18, %v1157_v5  ;;  %v8694_v5 = vor.u32 %v10964_v3, %v8693_v2  ;;  %v8703_v22 = vld [vmem:[#allocation5 + $0x168] sm:$0xf0]  ;;  %v10699_v3 = vld [vmem:[#allocation8 + $0x4] sm:$0xf] }
 0x108   :  { %1827 = vmatmul.bf16.gmra.mxu0 %v1252_v20  ;;  %2220 = vmatpush.bf16.msra.mxu1 %v10821_v24  ;;  %v8750_v20 = vor.u32 %v10978_v17, %v8749_v16  ;;  %v10981_v24 = vld [vmem:[#allocation5 + $0x1e4] sm:$0xf]  ;;  %v8743_v16 = vld [vmem:[#allocation5 + $0x1b8] sm:$0xf0] }
 0x109   :  { %2166 = vmatpush.bf16.msrb.mxu2 %v10794_v27  ;;  %v8706_v27 = vor.u32 %v10965_v21, %v8703_v22 }
 0x10a   :  { %2185 = vmatpush.bf16.msrb.mxu3 %v10802_v28  ;;  %2202 = vmatpush.bf16.msra.mxu0 %v10812_v29  ;;  %v8767_v28 = vld [vmem:[#allocation5 + $0x1e8] sm:$0xf0] }
 0x10b   :  { %1846 = vmatmul.bf16.gmra.mxu1 %v1253_v26 }
 0x10c   :  { %2221 = vmatpush.bf16.msra.mxu1 %v10820_v30 }
 0x10d   :  { %v1209_v32 = vpop.f32.mrf.mxu2  ;;  %v1173_v35 = vpop.f32.mrf.mxu0  ;;  %2167 = vmatpush.bf16.msrb.mxu2 %v10793_v31  ;;  %v8770_v31 = vor.u32 %v10981_v24, %v8767_v28  ;;  %v10970_v24 = vld [vmem:[#allocation5 + $0x184] sm:$0xf0] }
 0x10e   :  { %v1228_v36 = vpop.f32.mrf.mxu3  ;;  %v1244_v38 = vpack.c.bf16 %v1173_v35, %v1171_v19  ;;  %v1192_v40 = vpop.f32.mrf.mxu1  ;;  %2186 = vmatpush.bf16.msrb.mxu3 %v10801_v33  ;;  %2203 = vmatpush.bf16.msra.mxu0 %v10811_v37  ;;  %v8686_v19 = vor.u32 %v10962_v15, %v8685_v13  ;;  %v8677_v33 = vld [vmem:[#allocation5 + $0x130] sm:$0xf]  ;;  %v10960_v35 = vld [vmem:[#allocation5 + $0x134] sm:$0xf0]  ;;  %v10975_v15 = vld [vmem:[#allocation5 + $0x1b4] sm:$0xf] }
 0x10f   :  { %v1245_v42 = vpack.c.bf16 %v1192_v40, %v1190_v25  ;;  %v8678_v37 = vor.u32 %v10960_v35, %v8677_v33  ;;  %v10963_v40 = vld [vmem:[#allocation5 + $0x154] sm:$0xf]  ;;  %v8746_v17 = vor.u32 %v10975_v15, %v8743_v16  ;;  %v10702_v33 = vld [vmem:[#allocation8 + $0x14] sm:$0xf0] }
 0x110   :  { %1860 = vmatmul.bf16.vlgmr.msra.gmra.mxu2 %v1244_v38  ;;  %2222 = vmatpush.bf16.msra.mxu1 %v10819_v41  ;;  %v10976_v38 = vld [vmem:[#allocation5 + $0x1b4] sm:$0xf0]  ;;  %v8695_v41 = vld [vmem:[#allocation5 + $0x158] sm:$0xf0] }
 0x111   :  { %1879 = vmatmul.bf16.vlgmr.msra.gmra.mxu3 %v1245_v42  ;;  %2530 = vmatpush.bf16.msra.mxu2 %v8710_v47  ;;  %v8698_v43 = vor.u32 %v10963_v40, %v8695_v41  ;;  %v8669_v47 = vld [vmem:[#allocation5 + $0x120] sm:$0xf]  ;;  %v10700_v40 = vld [vmem:[#allocation8 + $0xc] sm:$0xf] }
 0x112   :  { %2549 = vmatpush.bf16.msra.mxu3 %v8774_v52  ;;  %2204 = vmatpush.bf16.msra.mxu0 %v10810_v48  ;;  %v8762_v48 = vor.u32 %v10979_v45, %v8759_v46  ;;  %v10974_v52 = vld [vmem:[#allocation5 + $0x1a4] sm:$0xf0]  ;;  %v8670_v54 = vor.u32 %v10958_v50, %v8669_v47  ;;  %v10971_v45 = vld [vmem:[#allocation5 + $0x194] sm:$0xf]  ;;  %v8727_v47 = vld [vmem:[#allocation5 + $0x198] sm:$0xf0] }
 0x113   :  { %v9007_v50 = vld [vmem:[#allocation7 + $0x3e0] sm:$0xf0] }
 0x114   :  { %2223 = vmatpush.bf16.msra.mxu1 %v10818_v51  ;;  %v8733_v51 = vld [vmem:[#allocation5 + $0x1a0] sm:$0xf] }
 0x115   :  { %v1211_v58 = vpop.f32.mrf.mxu2  ;;  %v1176_v60 = vpop.f32.mrf.mxu0  ;;  %2531 = vmatpush.bf16.msra.mxu2 %v8702_v55  ;;  %v8734_v55 = vor.u32 %v10974_v52, %v8733_v51  ;;  %v8503_v52 = vld [vmem:[#allocation8 + $0x18] sm:$0xf0] }
 0x116   :  { %v1246_v61 = vpack.c.bf16 %v1211_v58, %v1209_v32  ;;  %v1230_v62 = vpop.f32.mrf.mxu3  ;;  %v1195_v0 = vpop.f32.mrf.mxu1  ;;  %2550 = vmatpush.bf16.msra.mxu3 %v8766_v59  ;;  %2205 = vmatpush.bf16.msra.mxu0 %v10809_v63  ;;  %v10977_v58 = vld [vmem:[#allocation5 + $0x1c4] sm:$0xf] }
 0x117   :  { %v1247_v1 = vpack.c.bf16 %v1230_v62, %v1228_v36  ;;  %v8741_v36 = vld [vmem:[#allocation5 + $0x1b0] sm:$0xf]  ;;  %v8751_v62 = vld [vmem:[#allocation5 + $0x1c8] sm:$0xf0] }
 0x118   :  { %1898 = vmatmul.bf16.vlgmr.msrb.gmra.mxu0 %v1246_v61  ;;  %2224 = vmatpush.bf16.msra.mxu1 %v10817_v23  ;;  %v8742_v42 = vor.u32 %v10976_v38, %v8741_v36  ;;  %v8690_v61 = vor.u32 %v10961_v56, %v8687_v57  ;;  %v10701_v23 = vld [vmem:[#allocation8 + $0xc] sm:$0xf0]  ;;  %v8754_v2 = vor.u32 %v10977_v58, %v8751_v62  ;;  %v9005_v36 = vld [vmem:[#allocation7 + $0x3c0] sm:$0xf]  ;;  %v10955_v38 = vld [vmem:[#allocation5 + $0x114] sm:$0xf] }
 0x119   :  { %2532 = vmatpush.bf16.msra.mxu2 %v8694_v5  ;;  %v8661_v5 = vld [vmem:[#allocation5 + $0x110] sm:$0xf]  ;;  %v11037_v56 = vld [vmem:[#allocation7 + $0x39c] sm:$0xf0]  ;;  %v10953_v58 = vld [vmem:[#allocation5 + $0x104] sm:$0xf] }
 0x11a   :  { %2551 = vmatpush.bf16.msra.mxu3 %v8758_v9  ;;  %2568 = vmatpush.bf16.msrb.mxu0 %v8714_v10  ;;  %v8662_v8 = vor.u32 %v10956_v6, %v8661_v5  ;;  %v10972_v9 = vld [vmem:[#allocation5 + $0x194] sm:$0xf0]  ;;  %v10959_v10 = vld [vmem:[#allocation5 + $0x134] sm:$0xf]  ;;  %v8719_v62 = vld [vmem:[#allocation5 + $0x188] sm:$0xf0] }
 0x11b   :  { %1917 = vmatmul.bf16.vlgmr.msrb.gmra.mxu1 %v1247_v1  ;;  %v8493_v1 = vld [vmem:[#allocation8] sm:$0xf]  ;;  %v8726_v13 = vor.u32 %v10972_v9, %v8725_v7  ;;  %v10703_v5 = vld [vmem:[#allocation8 + $0x24] sm:$0xf]  ;;  %v8511_v6 = vld [vmem:[#allocation8 + $0x30] sm:$0xf0] }
 0x11c   :  { %2587 = vmatpush.bf16.msrb.mxu1 %v8778_v14  ;;  %v8682_v14 = vor.u32 %v10959_v10, %v8679_v11  ;;  %v12184_v21 = vor.u32 %v10701_v23, %v8493_v1  ;;  %v12195_v1 = vor.u32 %v10700_v40, %v8503_v52  ;;  %v8941_v7 = vld [vmem:[#allocation7 + $0x340] sm:$0xf]  ;;  %v11025_v9 = vld [vmem:[#allocation7 + $0x344] sm:$0xf] }
 0x11d   :  { %v1214_v18 = vpop.f32.mrf.mxu2  ;;  %v1178_v25 = vpop.f32.mrf.mxu0  ;;  %2533 = vmatpush.bf16.msra.mxu2 %v8686_v19  ;;  %v10954_v19 = vld [vmem:[#allocation5 + $0x104] sm:$0xf0]  ;;  %v8943_v11 = vld [vmem:[#allocation7 + $0x360] sm:$0xf0] }
 0x11e   :  { %v12178_v26 = vpop.f32.mrf.mxu3  ;;  %v1197_v29 = vpop.f32.mrf.mxu1  ;;  %v1254_v30 = vpack.c.bf16 %v1178_v25, %v1176_v60  ;;  %2552 = vmatpush.bf16.msra.mxu3 %v8750_v20  ;;  %2569 = vmatpush.bf16.msrb.mxu0 %v8706_v27  ;;  %v8717_v20 = vld [vmem:[#allocation5 + $0x180] sm:$0xf]  ;;  %v10957_v25 = vld [vmem:[#allocation5 + $0x124] sm:$0xf]  ;;  %v12186_v27 = vor.u32 %v10699_v3, %v8495_v4  ;;  %v10705_v3 = vld [vmem:[#allocation8 + $0x2c] sm:$0xf0]  ;;  %v8946_v15 = vor.u32 %v11025_v9, %v8943_v11 }
 0x11f   :  { %v1255_v32 = vpack.c.bf16 %v1197_v29, %v1195_v0  ;;  %v12048_v0 = vmov 0   ;;  %v8718_v28 = vor.u32 %v10970_v24, %v8717_v20  ;;  %v8909_v20 = vld [vmem:[#allocation7 + $0x300] sm:$0xf]  ;;  %v10993_v11 = vld [vmem:[#allocation7 + $0x244] sm:$0xf] }
 0x120   :  { %1865 = vmatmul.bf16.gmra.mxu2 %v1254_v30  ;;  %2588 = vmatpush.bf16.msrb.mxu1 %v8770_v31  ;;  %v10973_v30 = vld [vmem:[#allocation5 + $0x1a4] sm:$0xf]  ;;  %v8735_v31 = vld [vmem:[#allocation5 + $0x1a8] sm:$0xf0]  ;;  %v8813_v9 = vld [vmem:[#allocation7 + $0x240] sm:$0xf] }
 0x121   :  { %1884 = vmatmul.bf16.gmra.mxu3 %v1255_v32  ;;  %2534 = vmatpush.bf16.msra.mxu2 %v8678_v37  ;;  %v8501_v32 = vld [vmem:[#allocation8 + $0x8] sm:$0xf]  ;;  %v8738_v35 = vor.u32 %v10973_v30, %v8735_v31  ;;  %v11045_v37 = vld [vmem:[#allocation7 + $0x3dc] sm:$0xf0] }
 0x122   :  { %2553 = vmatpush.bf16.msra.mxu3 %v8742_v42  ;;  %2570 = vmatpush.bf16.msrb.mxu0 %v8698_v43  ;;  %v9006_v41 = vor.u32 %v11045_v37, %v9005_v36  ;;  %v335_v42 = vld [vmem:[%s12793_s7 + $0x8] sm:$0xff]  ;;  %v8663_v43 = vld [vmem:[#allocation5 + $0x118] sm:$0xf0]  ;;  %v12193_v51 = vor.u32 %v10702_v33, %v8501_v32 }
 0x123   :  { %11468 = vset.pattern.permute.xlu0 %v12048_v0  ;;  %11469 = vset.pattern.permute.xlu1 %v12048_v0  ;;  %v8666_v46 = vor.u32 %v10955_v38, %v8663_v43  ;;  %v8975_v0 = vld [vmem:[#allocation7 + $0x3a0] sm:$0xf0]  ;;  %v11038_v31 = vld [vmem:[#allocation7 + $0x3a4] sm:$0xf0]  ;;  %v8983_v36 = vld [vmem:[#allocation7 + $0x3a8] sm:$0xf0] }
 0x124   :  { %2589 = vmatpush.bf16.msrb.mxu1 %v8762_v48  ;;  %2238 = vperm.xlu0 %11468, %v334_v12   ;;  %v11041_v48 = vld [vmem:[#allocation7 + $0x3c4] sm:$0xf]  ;;  %v9013_v12 = vld [vmem:[#allocation7 + $0x3c8] sm:$0xf]  ;;  %v10706_v38 = vld [vmem:[#allocation8 + $0x34] sm:$0xf0] }
 0x125   :  { %v1216_v53 = vpop.f32.mrf.mxu2  ;;  %2535 = vmatpush.bf16.msra.mxu2 %v8670_v54  ;;  %v9010_v54 = vor.u32 %v11041_v48, %v9007_v50  ;;  %v8517_v37 = vld [vmem:[#allocation8 + $0x28] sm:$0xf]  ;;  %v11009_v43 = vld [vmem:[#allocation7 + $0x2c4] sm:$0xf] }
 0x126   :  { %v1235_v59 = vpop.f32.mrf.mxu3  ;;  %v1256_v60 = vpack.c.bf16 %v1216_v53, %v1214_v18  ;;  %2554 = vmatpush.bf16.msra.mxu3 %v8734_v55  ;;  %2571 = vmatpush.bf16.msrb.mxu0 %v8690_v61  ;;  %v8653_v18 = vld [vmem:[#allocation5 + $0x100] sm:$0xf]  ;;  %v8730_v53 = vor.u32 %v10971_v45, %v8727_v47  ;;  %v10704_v45 = vld [vmem:[#allocation8 + $0x2c] sm:$0xf]  ;;  %v337_v47 = vld [vmem:[%s12793_s7 + $0x18] sm:$0xff] }
 0x127   :  { %v1257_v63 = vpack.c.bf16 %v1235_v59, %v12178_v26  ;;  %v8654_v22 = vor.u32 %v10954_v19, %v8653_v18  ;;  %v8671_v26 = vld [vmem:[#allocation5 + $0x128] sm:$0xf0]  ;;  %v8973_v55 = vld [vmem:[#allocation7 + $0x380] sm:$0xf]  ;;  %v8879_v48 = vld [vmem:[#allocation7 + $0x2e0] sm:$0xf0] }
 0x128   :  { %1903 = vmatmul.bf16.gmra.mxu0 %v1256_v60  ;;  %2590 = vmatpush.bf16.msrb.mxu1 %v8754_v2  ;;  %v8674_v29 = vor.u32 %v10957_v25, %v8671_v26  ;;  %v8974_v57 = vor.u32 %v11037_v56, %v8973_v55  ;;  %v8655_v59 = vld [vmem:[#allocation5 + $0x108] sm:$0xf0]  ;;  %v10969_v60 = vld [vmem:[#allocation5 + $0x184] sm:$0xf]  ;;  %v8509_v2 = vld [vmem:[#allocation8 + $0x20] sm:$0xf]  ;;  %v8882_v52 = vor.u32 %v11009_v43, %v8879_v48 }
 0x129   :  { %2536 = vmatpush.bf16.msra.mxu2 %v8662_v8  ;;  %v8658_v61 = vor.u32 %v10953_v58, %v8655_v59  ;;  %v8722_v4 = vor.u32 %v10969_v60, %v8719_v62  ;;  %v11029_v8 = vld [vmem:[#allocation7 + $0x35c] sm:$0xf0]  ;;  %v9015_v18 = vld [vmem:[#allocation7 + $0x3e8] sm:$0xf0]  ;;  %v12202_v24 = vor.u32 %v10705_v3, %v8509_v2  ;;  %v11017_v25 = vld [vmem:[#allocation7 + $0x304] sm:$0xf]  ;;  %v12211_v56 = vor.u32 %v10706_v38, %v8517_v37 }
 0x12a   :  { %2555 = vmatpush.bf16.msra.mxu3 %v8726_v13  ;;  %2572 = vmatpush.bf16.msrb.mxu0 %v8682_v14  ;;  %v8942_v10 = vor.u32 %v11029_v8, %v8941_v7  ;;  %v11046_v13 = vld [vmem:[#allocation7 + $0x3e4] sm:$0xf0]  ;;  %v336_v14 = vld [vmem:[%s12793_s7 + $0x10] sm:$0xff]  ;;  %v8911_v26 = vld [vmem:[#allocation7 + $0x320] sm:$0xf0]  ;;  %s12049_s7 = smov [#allocation16]  }
 0x12b   :  { %1922 = vmatmul.bf16.gmra.mxu1 %v1257_v63  ;;  %v11033_v63 = vld [vmem:[#allocation7 + $0x384] sm:$0xf]  ;;  %v9014_v16 = vor.u32 %v11046_v13, %v9013_v12  ;;  %2248 = vperm.xlu1 %11469, %v336_v14   ;;  %v8914_v32 = vor.u32 %v11017_v25, %v8911_v26  ;;  %v8949_v50 = vld [vmem:[#allocation7 + $0x348] sm:$0xf]  ;;  %v8951_v55 = vld [vmem:[#allocation7 + $0x368] sm:$0xf0] }
 0x12c   :  { %2591 = vmatpush.bf16.msrb.mxu1 %v8746_v17  ;;  %2243 = vperm.xlu0 %11468, %v335_v42   ;;  %v8978_v23 = vor.u32 %v11033_v63, %v8975_v0  ;;  %v11042_v17 = vld [vmem:[#allocation7 + $0x3cc] sm:$0xf]  ;;  %v11013_v42 = vld [vmem:[#allocation7 + $0x2dc] sm:$0xf0]  ;;  %v11001_v62 = vld [vmem:[#allocation7 + $0x284] sm:$0xf] }
 0x12d   :  { %2537 = vmatpush.bf16.msra.mxu2 %v8654_v22  ;;  %v9018_v19 = vor.u32 %v11042_v17, %v9015_v18  ;;  %v11021_v22 = vld [vmem:[#allocation7 + $0x31c] sm:$0xf0]  ;;  %v8847_v63 = vld [vmem:[#allocation7 + $0x2a0] sm:$0xf0]  ;;  %v8917_v0 = vld [vmem:[#allocation7 + $0x308] sm:$0xf] }
 0x12e   :  { %2556 = vmatpush.bf16.msra.mxu3 %v8718_v28  ;;  %2573 = vmatpush.bf16.msrb.mxu0 %v8674_v29  ;;  %v8981_v28 = vld [vmem:[#allocation7 + $0x388] sm:$0xf]  ;;  %v12204_v29 = vor.u32 %v10703_v5, %v8511_v6  ;;  %v8910_v30 = vor.u32 %v11021_v22, %v8909_v20  ;;  %v8845_v60 = vld [vmem:[#allocation7 + $0x280] sm:$0xf]  ;;  %v11018_v6 = vld [vmem:[#allocation7 + $0x30c] sm:$0xf] }
 0x12f   :  { %v8982_v33 = vor.u32 %v11038_v31, %v8981_v28  ;;  %v11022_v2 = vld [vmem:[#allocation7 + $0x324] sm:$0xf0]  ;;  %v8919_v7 = vld [vmem:[#allocation7 + $0x328] sm:$0xf0]  ;;  %v8815_v13 = vld [vmem:[#allocation7 + $0x260] sm:$0xf0] }
 0x130   :  { %2168 = vmatmul.bf16.vlgmr.msrb.gmra.mxu2 %v12184_v21  ;;  %2592 = vmatpush.bf16.msrb.mxu1 %v8738_v35  ;;  %v11034_v35 = vld [vmem:[#allocation7 + $0x38c] sm:$0xf]  ;;  %v8918_v5 = vor.u32 %v11022_v2, %v8917_v0  ;;  %v8922_v8 = vor.u32 %v11018_v6, %v8919_v7  ;;  %v8885_v14 = vld [vmem:[#allocation7 + $0x2c8] sm:$0xf]  ;;  %v8781_v20 = vld [vmem:[#allocation7 + $0x200] sm:$0xf] }
 0x131   :  { %2187 = vmatmul.bf16.vlgmr.msrb.gmra.mxu3 %v12186_v27  ;;  %2991 = vmatpush.bf16.msrb.mxu2 %v9006_v41  ;;  %v8986_v40 = vor.u32 %v11034_v35, %v8983_v36  ;;  %v8877_v41 = vld [vmem:[#allocation7 + $0x2c0] sm:$0xf]  ;;  %v11010_v18 = vld [vmem:[#allocation7 + $0x2cc] sm:$0xf]  ;;  %v10985_v26 = vld [vmem:[#allocation7 + $0x204] sm:$0xf] }
 0x132   :  { %2574 = vmatpush.bf16.msrb.mxu0 %v8666_v46  ;;  %3010 = vmatpush.bf16.msrb.mxu3 %v9010_v54  ;;  %v8878_v46 = vor.u32 %v11013_v42, %v8877_v41  ;;  %v11026_v54 = vld [vmem:[#allocation7 + $0x34c] sm:$0xf]  ;;  %v10989_v25 = vld [vmem:[#allocation7 + $0x21c] sm:$0xf0]  ;;  %v8783_v28 = vld [vmem:[#allocation7 + $0x220] sm:$0xf0] }
 0x133   :  { %2253 = vperm.xlu1 %11469, %v337_v47   ;;  %v8954_v59 = vor.u32 %v11026_v54, %v8951_v55  ;;  %v8782_v31 = vor.u32 %v10989_v25, %v8781_v20  ;;  %v11002_v36 = vld [vmem:[#allocation7 + $0x28c] sm:$0xf]  ;;  %v9021_v41 = vld [vmem:[#allocation7 + $0x3d0] sm:$0xf]  ;;  %v8821_v43 = vld [vmem:[#allocation7 + $0x248] sm:$0xf] }
 0x134   :  { %2593 = vmatpush.bf16.msrb.mxu1 %v8730_v53  ;;  %v11030_v53 = vld [vmem:[#allocation7 + $0x364] sm:$0xf0]  ;;  %v8855_v37 = vld [vmem:[#allocation7 + $0x2a8] sm:$0xf0]  ;;  %v11047_v42 = vld [vmem:[#allocation7 + $0x3ec] sm:$0xf0] }
 0x135   :  { %2992 = vmatpush.bf16.msrb.mxu2 %v8974_v57  ;;  %v8519_v57 = vld [vmem:[#allocation8 + $0x38] sm:$0xf0]  ;;  %v8950_v58 = vor.u32 %v11030_v53, %v8949_v50  ;;  %v8858_v38 = vor.u32 %v11002_v36, %v8855_v37  ;;  %v11043_v47 = vld [vmem:[#allocation7 + $0x3d4] sm:$0xf]  ;;  %v10994_v53 = vld [vmem:[#allocation7 + $0x24c] sm:$0xf] }
 0x136   :  { %2575 = vmatpush.bf16.msrb.mxu0 %v8658_v61  ;;  %3011 = vmatpush.bf16.msrb.mxu3 %v8978_v23  ;;  %v11005_v61 = vld [vmem:[#allocation7 + $0x29c] sm:$0xf0]  ;;  %v12213_v3 = vor.u32 %v10704_v45, %v8519_v57  ;;  %v9022_v45 = vor.u32 %v11047_v42, %v9021_v41  ;;  %v9023_v48 = vld [vmem:[#allocation7 + $0x3f0] sm:$0xf0]  ;;  %v8823_v54 = vld [vmem:[#allocation7 + $0x268] sm:$0xf0] }
 0x137   :  { %v8846_v23 = vor.u32 %v11005_v61, %v8845_v60  ;;  %v8826_v55 = vor.u32 %v10994_v53, %v8823_v54  ;;  %v8989_v57 = vld [vmem:[#allocation7 + $0x390] sm:$0xf]  ;;  %v10990_v61 = vld [vmem:[#allocation7 + $0x224] sm:$0xf0]  ;;  %v10986_v2 = vld [vmem:[#allocation7 + $0x20c] sm:$0xf] }
 0x138   :  { %2206 = vmatmul.bf16.vlgmr.msra.gmra.mxu0 %v12193_v51  ;;  %2594 = vmatpush.bf16.msrb.mxu1 %v8722_v4  ;;  %v8850_v4 = vor.u32 %v11001_v62, %v8847_v63  ;;  %v11035_v62 = vld [vmem:[#allocation7 + $0x394] sm:$0xf]  ;;  %v11023_v25 = vld [vmem:[#allocation7 + $0x32c] sm:$0xf0]  ;;  %v11036_v36 = vld [vmem:[#allocation7 + $0x39c] sm:$0xf] }
 0x139   :  { %2993 = vmatpush.bf16.msrb.mxu2 %v8942_v10  ;;  %v10997_v10 = vld [vmem:[#allocation7 + $0x25c] sm:$0xf0]  ;;  %v8991_v63 = vld [vmem:[#allocation7 + $0x3b0] sm:$0xf0]  ;;  %v8999_v37 = vld [vmem:[#allocation7 + $0x3b8] sm:$0xf0] }
 0x13a   :  { %3029 = vmatpush.bf16.msra.mxu0 %v9014_v16  ;;  %3012 = vmatpush.bf16.msrb.mxu3 %v8946_v15  ;;  %v8814_v12 = vor.u32 %v10997_v10, %v8813_v9  ;;  %v11014_v15 = vld [vmem:[#allocation7 + $0x2e4] sm:$0xf0]  ;;  %v8818_v16 = vor.u32 %v10993_v11, %v8815_v13  ;;  %v8957_v9 = vld [vmem:[#allocation7 + $0x350] sm:$0xf]  ;;  %v11027_v11 = vld [vmem:[#allocation7 + $0x354] sm:$0xf] }
 0x13b   :  { %2225 = vmatmul.bf16.vlgmr.msra.gmra.mxu1 %v12195_v1  ;;  %v8886_v17 = vor.u32 %v11014_v15, %v8885_v14  ;;  %v11031_v10 = vld [vmem:[#allocation7 + $0x36c] sm:$0xf0]  ;;  %v8959_v13 = vld [vmem:[#allocation7 + $0x370] sm:$0xf0]  ;;  %v9029_v14 = vld [vmem:[#allocation7 + $0x3d8] sm:$0xf] }
 0x13c   :  { %3048 = vmatpush.bf16.msra.mxu1 %v9018_v19  ;;  %v8887_v19 = vld [vmem:[#allocation7 + $0x2e8] sm:$0xf0]  ;;  %v11048_v15 = vld [vmem:[#allocation7 + $0x3f4] sm:$0xf0]  ;;  %v8893_v42 = vld [vmem:[#allocation7 + $0x2d0] sm:$0xf] }
 0x13d   :  { %2994 = vmatpush.bf16.msrb.mxu2 %v8910_v30  ;;  %v8890_v22 = vor.u32 %v11010_v18, %v8887_v19  ;;  %v8853_v30 = vld [vmem:[#allocation7 + $0x288] sm:$0xf]  ;;  %v11044_v18 = vld [vmem:[#allocation7 + $0x3dc] sm:$0xf]  ;;  %s7744_s14 = sshll.u32 %s12049_s7, 4  ;;  %s7745_s14 = int_to_ptr.vmem [resolvable:$true] %s7744_s14 }
 0x13e   :  { %3030 = vmatpush.bf16.msra.mxu0 %v8982_v33  ;;  %3013 = vmatpush.bf16.msrb.mxu3 %v8914_v32  ;;  %v11006_v32 = vld [vmem:[#allocation7 + $0x2a4] sm:$0xf0]  ;;  %v8786_v33 = vor.u32 %v10985_v26, %v8783_v28  ;;  %v9031_v19 = vld [vmem:[#allocation7 + $0x3f8] sm:$0xf0]  ;;  %v11019_v26 = vld [vmem:[#allocation7 + $0x314] sm:$0xf] }
 0x13f   :  { %v8854_v35 = vor.u32 %v11006_v32, %v8853_v30  ;;  %v9034_v20 = vor.u32 %v11044_v18, %v9031_v19  ;;  %v8927_v30 = vld [vmem:[#allocation7 + $0x330] sm:$0xf0]  ;;  %v11040_v32 = vld [vmem:[#allocation7 + $0x3b4] sm:$0xf0] }
 0x140   :  { %2173 = vmatmul.bf16.gmra.mxu2 %v12202_v24  ;;  %3049 = vmatpush.bf16.msra.mxu1 %v8986_v40 }
 0x141   :  { %2192 = vmatmul.bf16.gmra.mxu3 %v12204_v29  ;;  %2995 = vmatpush.bf16.msrb.mxu2 %v8878_v46  ;;  %v10998_v46 = vld [vmem:[#allocation7 + $0x264] sm:$0xf0] }
 0x142   :  { %3031 = vmatpush.bf16.msra.mxu0 %v8950_v58  ;;  %3014 = vmatpush.bf16.msrb.mxu3 %v8882_v52  ;;  %v8822_v50 = vor.u32 %v10998_v46, %v8821_v43  ;;  %v9026_v52 = vor.u32 %v11043_v47, %v9023_v48  ;;  %v11039_v58 = vld [vmem:[#allocation7 + $0x3ac] sm:$0xf0]  ;;  %v8895_v47 = vld [vmem:[#allocation7 + $0x2f0] sm:$0xf0]  ;;  %v8965_v48 = vld [vmem:[#allocation7 + $0x358] sm:$0xf] }
 0x143   :  { %v8990_v60 = vor.u32 %v11039_v58, %v8989_v57  ;;  %v11015_v43 = vld [vmem:[#allocation7 + $0x2ec] sm:$0xf0]  ;;  %v8967_v57 = vld [vmem:[#allocation7 + $0x378] sm:$0xf0] }
 0x144   :  { %3050 = vmatpush.bf16.msra.mxu1 %v8954_v59  ;;  %v8789_v59 = vld [vmem:[#allocation7 + $0x208] sm:$0xf]  ;;  %v8894_v46 = vor.u32 %v11015_v43, %v8893_v42  ;;  %v8871_v42 = vld [vmem:[#allocation7 + $0x2b8] sm:$0xf0] }
 0x145   :  { %2996 = vmatpush.bf16.msrb.mxu2 %v8846_v23  ;;  %v8790_v0 = vor.u32 %v10990_v61, %v8789_v59  ;;  %v8994_v23 = vor.u32 %v11035_v62, %v8991_v63  ;;  %v8861_v59 = vld [vmem:[#allocation7 + $0x290] sm:$0xf]  ;;  %v11003_v61 = vld [vmem:[#allocation7 + $0x294] sm:$0xf] }
 0x146   :  { %3032 = vmatpush.bf16.msra.mxu0 %v8918_v5  ;;  %3015 = vmatpush.bf16.msrb.mxu3 %v8850_v4  ;;  %v8791_v4 = vld [vmem:[#allocation7 + $0x228] sm:$0xf0]  ;;  %v8863_v63 = vld [vmem:[#allocation7 + $0x2b0] sm:$0xf0] }
 0x147   :  { %v8794_v6 = vor.u32 %v10986_v2, %v8791_v4  ;;  %v8866_v2 = vor.u32 %v11003_v61, %v8863_v63  ;;  %v10992_v63 = vld [vmem:[#allocation7 + $0x234] sm:$0xf0] }
 0x148   :  { %2211 = vmatmul.bf16.gmra.mxu0 %v12211_v56  ;;  %3051 = vmatpush.bf16.msra.mxu1 %v8922_v8 }
 0x149   :  { %2997 = vmatpush.bf16.msrb.mxu2 %v8814_v12  ;;  %v8958_v12 = vor.u32 %v11031_v10, %v8957_v9 }
 0x14a   :  { %3033 = vmatpush.bf16.msra.mxu0 %v8886_v17  ;;  %3016 = vmatpush.bf16.msrb.mxu3 %v8818_v16  ;;  %v8962_v16 = vor.u32 %v11027_v11, %v8959_v13  ;;  %v9030_v17 = vor.u32 %v11048_v15, %v9029_v14  ;;  %v8829_v11 = vld [vmem:[#allocation7 + $0x250] sm:$0xf]  ;;  %v10995_v13 = vld [vmem:[#allocation7 + $0x254] sm:$0xf] }
 0x14b   :  { %2230 = vmatmul.bf16.gmra.mxu1 %v12213_v3  ;;  %v8831_v15 = vld [vmem:[#allocation7 + $0x270] sm:$0xf0] }
 0x14c   :  { %3052 = vmatpush.bf16.msra.mxu1 %v8890_v22  ;;  %v8925_v22 = vld [vmem:[#allocation7 + $0x310] sm:$0xf]  ;;  %v8834_v18 = vor.u32 %v10995_v13, %v8831_v15  ;;  %v11482_v15 = vld [vmem:[#allocation13 + $0xb8] sm:$0xff] }
 0x14d   :  { %2998 = vmatpush.bf16.msrb.mxu2 %v8782_v31  ;;  %v8926_v28 = vor.u32 %v11023_v25, %v8925_v22  ;;  %v8997_v31 = vld [vmem:[#allocation7 + $0x398] sm:$0xf]  ;;  %v8903_v22 = vld [vmem:[#allocation7 + $0x2f8] sm:$0xf0] }
 0x14e   :  { %3017 = vmatpush.bf16.msrb.mxu3 %v8786_v33  ;;  %3034 = vmatpush.bf16.msra.mxu0 %v8854_v35  ;;  %v8930_v33 = vor.u32 %v11019_v26, %v8927_v30  ;;  %v8998_v35 = vor.u32 %v11040_v32, %v8997_v31  ;;  %v10991_v30 = vld [vmem:[#allocation7 + $0x22c] sm:$0xf0]  ;;  %v10987_v31 = vld [vmem:[#allocation7 + $0x214] sm:$0xf] }
 0x150   :  { %v1747_v40 = vpop.f32.mrf.mxu0  ;;  %2538 = vmatmul.bf16.vlgmr.msra.gmra.mxu2 %v12142_v44  ;;  %3053 = vmatpush.bf16.msra.mxu1 %v8858_v38 }
 0x151   :  { %2557 = vmatmul.bf16.vlgmr.msra.gmra.mxu3 %v12144_v49  ;;  %3067 = vmatpush.bf16.msra.mxu2 %v9022_v45  ;;  %v11011_v45 = vld [vmem:[#allocation7 + $0x2d4] sm:$0xf] }
 0x152   :  { %3086 = vmatpush.bf16.msra.mxu3 %v9026_v52  ;;  %3035 = vmatpush.bf16.msra.mxu0 %v8822_v50  ;;  %v11032_v50 = vld [vmem:[#allocation7 + $0x374] sm:$0xf0]  ;;  %v8898_v53 = vor.u32 %v11011_v45, %v8895_v47  ;;  %v12233_v47 = vld [vmem:[#allocation11] sm:$0xff] }
 0x153   :  { %v8966_v54 = vor.u32 %v11032_v50, %v8965_v48  ;;  %v8837_v48 = vld [vmem:[#allocation7 + $0x258] sm:$0xf] }
 0x154   :  { %3054 = vmatpush.bf16.msra.mxu1 %v8826_v55  ;;  %v11028_v55 = vld [vmem:[#allocation7 + $0x35c] sm:$0xf]  ;;  %v11000_v50 = vld [vmem:[#allocation7 + $0x274] sm:$0xf0] }
 0x155   :  { %3068 = vmatpush.bf16.msra.mxu2 %v8990_v60  ;;  %v8970_v58 = vor.u32 %v11028_v55, %v8967_v57  ;;  %v11007_v60 = vld [vmem:[#allocation7 + $0x2ac] sm:$0xf0]  ;;  %v11476_v55 = vld [vmem:[#allocation13 + $0x38] sm:$0xff] }
 0x156   :  { %3087 = vmatpush.bf16.msra.mxu3 %v8994_v23  ;;  %3036 = vmatpush.bf16.msra.mxu0 %v8790_v0  ;;  %v8862_v62 = vor.u32 %v11007_v60, %v8861_v59  ;;  %v8933_v0 = vld [vmem:[#allocation7 + $0x318] sm:$0xf]  ;;  %v11477_v59 = vld [vmem:[#allocation13 + $0x78] sm:$0xff] }
 0x157   :  { %v11024_v23 = vld [vmem:[#allocation7 + $0x334] sm:$0xf0] }
 0x158   :  { %v1766_v5 = vpop.f32.mrf.mxu1  ;;  %2576 = vmatmul.bf16.vlgmr.msrb.gmra.mxu0 %v12142_v44  ;;  %v1749_v8 = vpop.f32.mrf.mxu0  ;;  %3055 = vmatpush.bf16.msra.mxu1 %v8794_v6  ;;  %v8934_v4 = vor.u32 %v11024_v23, %v8933_v0  ;;  %v8935_v6 = vld [vmem:[#allocation7 + $0x338] sm:$0xf0] }
 0x159   :  { %v12220_v7 = vadd.f32 %v1766_v5, %v1747_v40  ;;  %3069 = vmatpush.bf16.msra.mxu2 %v8958_v12  ;;  %v9002_v40 = vor.u32 %v11036_v36, %v8999_v37  ;;  %v11020_v5 = vld [vmem:[#allocation7 + $0x31c] sm:$0xf]  ;;  %v10999_v12 = vld [vmem:[#allocation7 + $0x26c] sm:$0xf0]  ;;  %v11008_v36 = vld [vmem:[#allocation7 + $0x2b4] sm:$0xf0] }
 0x15a   :  { %3088 = vmatpush.bf16.msra.mxu3 %v8962_v16  ;;  %3105 = vmatpush.bf16.msrb.mxu0 %v9030_v17  ;;  %v8938_v9 = vor.u32 %v11020_v5, %v8935_v6  ;;  %v8830_v14 = vor.u32 %v10999_v12, %v8829_v11  ;;  %v8901_v16 = vld [vmem:[#allocation7 + $0x2d8] sm:$0xf]  ;;  %v10988_v23 = vld [vmem:[#allocation7 + $0x21c] sm:$0xf] }
 0x15b   :  { %2595 = vmatmul.bf16.vlgmr.msrb.gmra.mxu1 %v12144_v49  ;;  %v11016_v17 = vld [vmem:[#allocation7 + $0x2f4] sm:$0xf0] }
 0x15c   :  { %3124 = vmatpush.bf16.msrb.mxu1 %v9034_v20  ;;  %v8902_v19 = vor.u32 %v11016_v17, %v8901_v16  ;;  %v11012_v20 = vld [vmem:[#allocation7 + $0x2dc] sm:$0xf]  ;;  %v11483_v16 = vld [vmem:[#allocation13 + $0xf8] sm:$0xff] }
 0x15d   :  { %3070 = vmatpush.bf16.msra.mxu2 %v8926_v28  ;;  %v8906_v25 = vor.u32 %v11012_v20, %v8903_v22  ;;  %v8797_v28 = vld [vmem:[#allocation7 + $0x210] sm:$0xf]  ;;  %v11480_v11 = vld [vmem:[#allocation13 + $0x28] sm:$0xff]  ;;  %v11487_v22 = vld [vmem:[#allocation13 + $0xb0] sm:$0xff] }
 0x15e   :  { %3089 = vmatpush.bf16.msra.mxu3 %v8930_v33  ;;  %3106 = vmatpush.bf16.msrb.mxu0 %v8998_v35  ;;  %v8798_v32 = vor.u32 %v10991_v30, %v8797_v28  ;;  %v8799_v33 = vld [vmem:[#allocation7 + $0x230] sm:$0xf0]  ;;  %v8869_v35 = vld [vmem:[#allocation7 + $0x298] sm:$0xf]  ;;  %v11489_v28 = vld [vmem:[#allocation13 + $0x18] sm:$0xff] }
 0x15f   :  { %v8802_v37 = vor.u32 %v10987_v31, %v8799_v33  ;;  %v11486_v20 = vld [vmem:[#allocation13 + $0x60] sm:$0xff]  ;;  %v11491_v33 = vld [vmem:[#allocation13 + $0xa8] sm:$0xff] }
 0x160   :  { %v1768_v38 = vpop.f32.mrf.mxu1  ;;  %2543 = vmatmul.bf16.gmra.mxu2 %v12150_v34  ;;  %v1752_v52 = vpop.f32.mrf.mxu0  ;;  %3125 = vmatpush.bf16.msrb.mxu1 %v9002_v40  ;;  %v11004_v40 = vld [vmem:[#allocation7 + $0x29c] sm:$0xf] }
 0x161   :  { %v12223_v41 = vadd.f32 %v1768_v38, %v1749_v8  ;;  %2562 = vmatmul.bf16.gmra.mxu3 %v12152_v39  ;;  %3071 = vmatpush.bf16.msra.mxu2 %v8894_v46  ;;  %v8870_v38 = vor.u32 %v11008_v36, %v8869_v35  ;;  %v8874_v45 = vor.u32 %v11004_v40, %v8871_v42  ;;  %v11492_v35 = vld [vmem:[#allocation13 + $0xe8] sm:$0xff]  ;;  %v11495_v40 = vld [vmem:[#allocation13 + $0xa0] sm:$0xff] }
 0x162   :  { %3090 = vmatpush.bf16.msra.mxu3 %v8898_v53  ;;  %3107 = vmatpush.bf16.msrb.mxu0 %v8966_v54  ;;  %v10996_v53 = vld [vmem:[#allocation7 + $0x25c] sm:$0xf] }
 0x163   :  { %v8839_v54 = vld [vmem:[#allocation7 + $0x278] sm:$0xf0] }
 0x164   :  { %3126 = vmatpush.bf16.msrb.mxu1 %v8970_v58  ;;  %v8842_v58 = vor.u32 %v10996_v53, %v8839_v54  ;;  %v11499_v53 = vld [vmem:[#allocation13 + $0x98] sm:$0xff] }
 0x165   :  { %3072 = vmatpush.bf16.msra.mxu2 %v8862_v62  ;;  %v8805_v62 = vld [vmem:[#allocation7 + $0x218] sm:$0xf] }
 0x166   :  { %3091 = vmatpush.bf16.msra.mxu3 %v8866_v2  ;;  %3108 = vmatpush.bf16.msrb.mxu0 %v8934_v4  ;;  %v8806_v0 = vor.u32 %v10992_v63, %v8805_v62  ;;  %v8807_v2 = vld [vmem:[#allocation7 + $0x238] sm:$0xf0]  ;;  %v11478_v4 = vld [vmem:[#allocation13 + $0x30] sm:$0xff]  ;;  %v11503_v62 = vld [vmem:[#allocation13 + $0x138] sm:$0xff] }
 0x167   :  { %v8810_v6 = vor.u32 %v10988_v23, %v8807_v2  ;;  %v11504_v63 = vld [vmem:[#allocation13 + $0x178] sm:$0xff]  ;;  %v11506_v2 = vld [vmem:[#allocation13 + $0xd0] sm:$0xff] }
 0x168   :  { %v1771_v8 = vpop.f32.mrf.mxu1  ;;  %2581 = vmatmul.bf16.gmra.mxu0 %v12150_v34  ;;  %3127 = vmatpush.bf16.msrb.mxu1 %v8938_v9  ;;  %v1754_v26 = vpop.f32.mrf.mxu0 }
 0x169   :  { %v12228_v10 = vadd.f32 %v1771_v8, %v1752_v52  ;;  %3073 = vmatpush.bf16.msra.mxu2 %v8830_v14  ;;  %v8838_v52 = vor.u32 %v11000_v50, %v8837_v48  ;;  %v11479_v8 = vld [vmem:[#allocation13 + $0x70] sm:$0xff]  ;;  %v11481_v14 = vld [vmem:[#allocation13 + $0x68] sm:$0xff] }
 0x16a   :  { %3092 = vmatpush.bf16.msra.mxu3 %v8834_v18  ;;  %3109 = vmatpush.bf16.msrb.mxu0 %v8902_v19  ;;  %v11484_v18 = vld [vmem:[#allocation13 + $0x20] sm:$0xff]  ;;  %v12255_v19 = vld [vmem:[#allocation11 + $0x8] sm:$0xff] }
 0x16b   :  { %2600 = vmatmul.bf16.gmra.mxu1 %v12152_v39 }
 0x16c   :  { %3128 = vmatpush.bf16.msrb.mxu1 %v8906_v25  ;;  %v11488_v25 = vld [vmem:[#allocation13 + $0xf0] sm:$0xff] }
 0x16d   :  { %3074 = vmatpush.bf16.msra.mxu2 %v8798_v32  ;;  %v11490_v32 = vld [vmem:[#allocation13 + $0x58] sm:$0xff] }
 0x16e   :  { %3093 = vmatpush.bf16.msra.mxu3 %v8802_v37  ;;  %3110 = vmatpush.bf16.msrb.mxu0 %v8870_v38  ;;  %v11493_v37 = vld [vmem:[#allocation13 + $0x10] sm:$0xff] }
 0x16f   :  { %v11494_v38 = vld [vmem:[#allocation13 + $0x50] sm:$0xff] }
 0x170   :  { %v1773_v43 = vpop.f32.mrf.mxu1  ;;  %2999 = vmatmul.bf16.vlgmr.msrb.gmra.mxu2 %v12233_v47  ;;  %3129 = vmatpush.bf16.msrb.mxu1 %v8874_v45  ;;  %v11497_v45 = vld [vmem:[#allocation13 + $0xe0] sm:$0xff] }
 0x171   :  { %v12231_v46 = vadd.f32 %v1773_v43, %v1754_v26  ;;  %3018 = vmatmul.bf16.vlgmr.msrb.gmra.mxu3 %v12233_v47  ;;  %3163 = vmatpush.bf16.msrb.mxu2 %v11476_v55  ;;  %v11496_v43 = vld [vmem:[#allocation13 + $0x8] sm:$0xff]  ;;  %v11500_v55 = vld [vmem:[#allocation13] sm:$0xff] }
 0x172   :  { %3182 = vmatpush.bf16.msrb.mxu3 %v11477_v59  ;;  %3111 = vmatpush.bf16.msrb.mxu0 %v8838_v52  ;;  %v11498_v52 = vld [vmem:[#allocation13 + $0x48] sm:$0xff]  ;;  %v11502_v59 = vld [vmem:[#allocation13 + $0x40] sm:$0xff] }
 0x173   :  { %v12237_v57 = vpop.f32.mrf.mxu2 }
 0x174   :  { %v12239_v60 = vpop.f32.mrf.mxu3  ;;  %3130 = vmatpush.bf16.msrb.mxu1 %v8842_v58  ;;  %v11501_v58 = vld [vmem:[#allocation13 + $0xd8] sm:$0xff] }
 0x175   :  { %v12241_v61 = vpop.f32.mrf.mxu0  ;;  %3164 = vmatpush.bf16.msrb.mxu2 %v11478_v4 }
 0x176   :  { %3183 = vmatpush.bf16.msrb.mxu3 %v11479_v8  ;;  %3112 = vmatpush.bf16.msrb.mxu0 %v8806_v0  ;;  %v11505_v0 = vld [vmem:[#allocation13 + $0x90] sm:$0xff] }
 0x177   :  { %v11507_v8 = vld [vmem:[#allocation13 + $0x130] sm:$0xff] }
 0x178   :  { %v12243_v5 = vpop.f32.mrf.mxu1  ;;  %3037 = vmatmul.bf16.vlgmr.msra.gmra.mxu0 %v12233_v47  ;;  %3131 = vmatpush.bf16.msrb.mxu1 %v8810_v6 }
 0x179   :  { %3165 = vmatpush.bf16.msrb.mxu2 %v11480_v11  ;;  %v11508_v11 = vld [vmem:[#allocation13 + $0x170] sm:$0xff] }
 0x17a   :  { %3184 = vmatpush.bf16.msrb.mxu3 %v11481_v14  ;;  %3201 = vmatpush.bf16.msra.mxu0 %v11482_v15  ;;  %v11509_v14 = vld [vmem:[#allocation13 + $0x88] sm:$0xff] }
 0x17b   :  { %3056 = vmatmul.bf16.vlgmr.msra.gmra.mxu1 %v12233_v47  ;;  %v12247_v9 = vpop.f32.mrf.mxu2 }
 0x17c   :  { %v12249_v12 = vpop.f32.mrf.mxu3  ;;  %3220 = vmatpush.bf16.msra.mxu1 %v11483_v16  ;;  %v11510_v16 = vld [vmem:[#allocation13 + $0xc8] sm:$0xff] }
 0x17d   :  { %v12251_v13 = vpop.f32.mrf.mxu0  ;;  %3166 = vmatpush.bf16.msrb.mxu2 %v11484_v18  ;;  %v1786_v18 = vadd.f32 %v12237_v57, %v12220_v7  ;;  %v11516_v7 = vld [vmem:[#allocation13 + $0x1f8] sm:$0xff]  ;;  %v11517_v57 = vld [vmem:[#allocation13 + $0x120] sm:$0xff] }
 0x17e   :  { %3185 = vmatpush.bf16.msrb.mxu3 %v11486_v20  ;;  %3202 = vmatpush.bf16.msra.mxu0 %v11487_v22  ;;  %v11511_v20 = vld [vmem:[#allocation13 + $0x128] sm:$0xff] }
 0x17f   :  { %v11512_v22 = vld [vmem:[#allocation13 + $0x168] sm:$0xff] }
 0x180   :  { %v12253_v17 = vpop.f32.mrf.mxu1  ;;  %3004 = vmatmul.bf16.gmra.mxu2 %v12255_v19  ;;  %3221 = vmatpush.bf16.msra.mxu1 %v11488_v25 }
 0x181   :  { %3023 = vmatmul.bf16.gmra.mxu3 %v12255_v19  ;;  %3167 = vmatpush.bf16.msrb.mxu2 %v11489_v28  ;;  %v11513_v28 = vld [vmem:[#allocation13 + $0x80] sm:$0xff] }
 0x182   :  { %3186 = vmatpush.bf16.msrb.mxu3 %v11490_v32  ;;  %3203 = vmatpush.bf16.msra.mxu0 %v11491_v33  ;;  %v11514_v32 = vld [vmem:[#allocation13 + $0xc0] sm:$0xff]  ;;  %v1805_v33 = vadd.f32 %v12239_v60, %v1786_v18  ;;  %v11519_v60 = vld [vmem:[#allocation13 + $0x1b0] sm:$0xff] }
 0x183   :  { %v12259_v26 = vpop.f32.mrf.mxu2 }
 0x184   :  { %v12261_v30 = vpop.f32.mrf.mxu3  ;;  %3222 = vmatpush.bf16.msra.mxu1 %v11492_v35 }
 0x185   :  { %v12263_v31 = vpop.f32.mrf.mxu0  ;;  %3168 = vmatpush.bf16.msrb.mxu2 %v11493_v37 }
 0x186   :  { %3187 = vmatpush.bf16.msrb.mxu3 %v11494_v38  ;;  %3204 = vmatpush.bf16.msra.mxu0 %v11495_v40  ;;  %v11515_v38 = vld [vmem:[#allocation13 + $0x1b8] sm:$0xff] }
 0x188   :  { %v12265_v36 = vpop.f32.mrf.mxu1  ;;  %3042 = vmatmul.bf16.gmra.mxu0 %v12255_v19  ;;  %3223 = vmatpush.bf16.msra.mxu1 %v11497_v45  ;;  %v1788_v45 = vadd.f32 %v12247_v9, %v12223_v41  ;;  %v11523_v9 = vld [vmem:[#allocation13 + $0x1a8] sm:$0xff] }
 0x189   :  { %3169 = vmatpush.bf16.msrb.mxu2 %v11496_v43  ;;  %v1824_v43 = vadd.f32 %v12241_v61, %v1805_v33 }
 0x18a   :  { %3188 = vmatpush.bf16.msrb.mxu3 %v11498_v52  ;;  %3205 = vmatpush.bf16.msra.mxu0 %v11499_v53  ;;  %v11520_v52 = vld [vmem:[#allocation13 + $0x118] sm:$0xff]  ;;  %v1807_v61 = vadd.f32 %v12249_v12, %v1788_v45  ;;  %v1791_v12 = vadd.f32 %v12259_v26, %v12228_v10  ;;  %v11532_v26 = vld [vmem:[#allocation13 + $0x100] sm:$0xff] }
 0x18b   :  { %3061 = vmatmul.bf16.gmra.mxu1 %v12255_v19  ;;  %v12269_v42 = vpop.f32.mrf.mxu2  ;;  %v11521_v53 = vld [vmem:[#allocation13 + $0x158] sm:$0xff] }
 0x18c   :  { %v12271_v48 = vpop.f32.mrf.mxu3  ;;  %3224 = vmatpush.bf16.msra.mxu1 %v11501_v58  ;;  %v11531_v10 = vld [vmem:[#allocation13 + $0x198] sm:$0xff] }
 0x18d   :  { %v12273_v50 = vpop.f32.mrf.mxu0  ;;  %3170 = vmatpush.bf16.msrb.mxu2 %v11500_v55  ;;  %v11522_v55 = vld [vmem:[#allocation13 + $0x1f0] sm:$0xff] }
 0x18e   :  { %3189 = vmatpush.bf16.msrb.mxu3 %v11502_v59  ;;  %3206 = vmatpush.bf16.msra.mxu0 %v11505_v0  ;;  %v1843_v59 = vadd.f32 %v12243_v5, %v1824_v43  ;;  %v1826_v5 = vadd.f32 %v12251_v13, %v1807_v61  ;;  %v1810_v13 = vadd.f32 %v12261_v30, %v1791_v12 }
 0x18f   :  { %v1793_v30 = vadd.f32 %v12269_v42, %v12231_v46 }
 0x190   :  { %v12275_v54 = vpop.f32.mrf.mxu1  ;;  %3075 = vmatmul.bf16.vlgmr.msra.gmra.mxu2 %v12233_v47  ;;  %3225 = vmatpush.bf16.msra.mxu1 %v11506_v2  ;;  %v11525_v2 = vld [vmem:[#allocation13 + $0x150] sm:$0xff] }
 0x191   :  { %3094 = vmatmul.bf16.vlgmr.msra.gmra.mxu3 %v12233_v47  ;;  %3239 = vmatpush.bf16.msra.mxu2 %v11503_v62 }
 0x192   :  { %3258 = vmatpush.bf16.msra.mxu3 %v11504_v63  ;;  %3207 = vmatpush.bf16.msra.mxu0 %v11509_v14  ;;  %v11524_v63 = vld [vmem:[#allocation13 + $0x110] sm:$0xff]  ;;  %v11527_v14 = vld [vmem:[#allocation13 + $0x1a0] sm:$0xff] }
 0x193   :  { %v1861_v23 = vpop.f32.mrf.mxu2 }
 0x194   :  { %v12279_v4 = vpop.f32.mrf.mxu3  ;;  %3226 = vmatpush.bf16.msra.mxu1 %v11510_v16  ;;  %v1862_v0 = vadd.f32 %v1861_v23, %v1843_v59  ;;  %v11528_v16 = vld [vmem:[#allocation13 + $0x108] sm:$0xff] }
 0x195   :  { %v12281_v6 = vpop.f32.mrf.mxu0  ;;  %3240 = vmatpush.bf16.msra.mxu2 %v11507_v8  ;;  %v11526_v8 = vld [vmem:[#allocation13 + $0x1e8] sm:$0xff] }
 0x196   :  { %3259 = vmatpush.bf16.msra.mxu3 %v11508_v11  ;;  %3208 = vmatpush.bf16.msra.mxu0 %v11513_v28  ;;  %v1881_v18 = vadd.f32 %v12279_v4, %v1862_v0  ;;  %v11529_v23 = vld [vmem:[#allocation13 + $0x148] sm:$0xff]  ;;  %v1845_v28 = vadd.f32 %v12253_v17, %v1826_v5  ;;  %v1829_v17 = vadd.f32 %v12263_v31, %v1810_v13  ;;  %v11470_v5 = vld [vmem:[#allocation14] ss:$0 sm:$0xff] }
 0x197   :  { %v11537_v31 = vld [vmem:[#allocation13 + $0x188] sm:$0xff] }
 0x198   :  { %v12283_v15 = vpop.f32.mrf.mxu1  ;;  %3113 = vmatmul.bf16.vlgmr.msrb.gmra.mxu0 %v12233_v47  ;;  %3227 = vmatpush.bf16.msra.mxu1 %v11514_v32  ;;  %v1900_v4 = vadd.f32 %v12281_v6, %v1881_v18 }
 0x199   :  { %3241 = vmatpush.bf16.msra.mxu2 %v11511_v20 }
 0x19a   :  { %3260 = vmatpush.bf16.msra.mxu3 %v11512_v22  ;;  %3277 = vmatpush.bf16.msrb.mxu0 %v11515_v38  ;;  %v11530_v22 = vld [vmem:[#allocation13 + $0x1e0] sm:$0xff]  ;;  %v1919_v43 = vadd.f32 %v12283_v15, %v1900_v4  ;;  %v12333_v15 = vpop.permute.xlu0 %2238 }
 0x19b   :  { %3132 = vmatmul.bf16.vlgmr.msrb.gmra.mxu1 %v12233_v47  ;;  %v12289_v25 = vpop.f32.mrf.mxu2  ;;  %v11518_v47 = vld [vmem:[#allocation13 + $0x160] sm:$0xff] }
 0x19c   :  { %v12292_v35 = vpop.f32.mrf.mxu3  ;;  %3296 = vmatpush.bf16.msrb.mxu1 %v11516_v7  ;;  %v11533_v38 = vld [vmem:[#allocation13 + $0x140] sm:$0xff] }
 0x19d   :  { %v12294_v37 = vpop.f32.mrf.mxu0  ;;  %3242 = vmatpush.bf16.msra.mxu2 %v11517_v57  ;;  %v11534_v57 = vld [vmem:[#allocation13 + $0x1d8] sm:$0xff] }
 0x19e   :  { %3261 = vmatpush.bf16.msra.mxu3 %v11518_v47  ;;  %3278 = vmatpush.bf16.msrb.mxu0 %v11519_v60  ;;  %v11535_v47 = vld [vmem:[#allocation13 + $0x190] sm:$0xff] }
 0x19f   :  { %v11536_v60 = vld [vmem:[#allocation13 + $0x1d0] sm:$0xff] }
 0x1a0   :  { %v12296_v40 = vpop.f32.mrf.mxu1  ;;  %3080 = vmatmul.bf16.gmra.mxu2 %v12255_v19  ;;  %3297 = vmatpush.bf16.msrb.mxu1 %v11522_v55 }
 0x1a1   :  { %3099 = vmatmul.bf16.gmra.mxu3 %v12255_v19  ;;  %3243 = vmatpush.bf16.msra.mxu2 %v11520_v52  ;;  %v1812_v52 = vadd.f32 %v12271_v48, %v1793_v30 }
 0x1a2   :  { %3262 = vmatpush.bf16.msra.mxu3 %v11521_v53  ;;  %3279 = vmatpush.bf16.msrb.mxu0 %v11523_v9 }
 0x1a3   :  { %v1866_v58 = vpop.f32.mrf.mxu2 }
 0x1a4   :  { %v12305_v62 = vpop.f32.mrf.mxu3  ;;  %3298 = vmatpush.bf16.msrb.mxu1 %v11526_v8 }
 0x1a5   :  { %v12307_v41 = vpop.f32.mrf.mxu0  ;;  %3244 = vmatpush.bf16.msra.mxu2 %v11524_v63  ;;  %v1831_v63 = vadd.f32 %v12273_v50, %v1812_v52 }
 0x1a6   :  { %3263 = vmatpush.bf16.msra.mxu3 %v11525_v2  ;;  %3280 = vmatpush.bf16.msrb.mxu0 %v11527_v14 }
 0x1a8   :  { %v12309_v11 = vpop.f32.mrf.mxu1  ;;  %3118 = vmatmul.bf16.gmra.mxu0 %v12255_v19  ;;  %3299 = vmatpush.bf16.msrb.mxu1 %v11530_v22 }
 0x1a9   :  { %3245 = vmatpush.bf16.msra.mxu2 %v11528_v16 }
 0x1aa   :  { %3264 = vmatpush.bf16.msra.mxu3 %v11529_v23  ;;  %3281 = vmatpush.bf16.msrb.mxu0 %v11531_v10  ;;  %v12341_v10 = vpop.permute.xlu0 %2243 }
 0x1ab   :  { %3137 = vmatmul.bf16.gmra.mxu1 %v12255_v19  ;;  %v1868_v20 = vpop.f32.mrf.mxu2  ;;  %v1864_v19 = vadd.f32 %v12289_v25, %v1845_v28  ;;  %v1848_v25 = vadd.f32 %v12265_v36, %v1829_v17  ;;  %v11539_v36 = vld [vmem:[#allocation13 + $0x180] sm:$0xff] }
 0x1ac   :  { %v1887_v32 = vpop.f32.mrf.mxu3  ;;  %3300 = vmatpush.bf16.msrb.mxu1 %v11534_v57 }
 0x1ad   :  { %v12319_v33 = vpop.f32.mrf.mxu0  ;;  %3246 = vmatpush.bf16.msra.mxu2 %v11532_v26  ;;  %v1883_v45 = vadd.f32 %v12292_v35, %v1864_v19  ;;  %v1867_v42 = vadd.f32 %v1866_v58, %v1848_v25  ;;  %v11538_v35 = vld [vmem:[#allocation13 + $0x1c8] sm:$0xff]  ;;  %v1850_v58 = vadd.f32 %v12275_v54, %v1831_v63 }
 0x1ae   :  { %3265 = vmatpush.bf16.msra.mxu3 %v11533_v38  ;;  %3282 = vmatpush.bf16.msrb.mxu0 %v11535_v47 }
 0x1af   :  { %v1902_v46 = vadd.f32 %v12294_v37, %v1883_v45  ;;  %v1886_v2 = vadd.f32 %v12305_v62, %v1867_v42  ;;  %v11540_v37 = vld [vmem:[#allocation13 + $0x1c0] sm:$0xff]  ;;  %v1869_v22 = vadd.f32 %v1868_v20, %v1850_v58  ;;  %v12346_v45 = vpop.permute.xlu1 %2248 }
 0x1b0   :  { %v12323_v7 = vpop.f32.mrf.mxu1  ;;  %3301 = vmatpush.bf16.msrb.mxu1 %v11536_v60 }
 0x1b1   :  { %v1921_v48 = vadd.f32 %v12296_v40, %v1902_v46  ;;  %v1905_v50 = vadd.f32 %v12307_v41, %v1886_v2  ;;  %v1888_v4 = vadd.f32 %v1887_v32, %v1869_v22 }
 0x1b2   :  { %3283 = vmatpush.bf16.msrb.mxu0 %v11537_v31 }
 0x1b3   :  { %v2169_v6 = vpop.f32.mrf.mxu2  ;;  %v1924_v26 = vadd.f32 %v12309_v11, %v1905_v50  ;;  %v1907_v41 = vadd.f32 %v12319_v33, %v1888_v4  ;;  %v11541_v50 = vld [vmem:[#allocation13 + $0x238] sm:$0xff]  ;;  %v11545_v4 = vld [vmem:[#allocation13 + $0x228] sm:$0xff] }
 0x1b4   :  { %v2170_v53 = vadd.f32 %v2169_v6, %v1919_v43  ;;  %v2188_v55 = vpop.f32.mrf.mxu3  ;;  %3302 = vmatpush.bf16.msrb.mxu1 %v11538_v35 }
 0x1b5   :  { %v2207_v59 = vpop.f32.mrf.mxu0  ;;  %v1926_v60 = vadd.f32 %v12323_v7, %v1907_v41 }
 0x1b6   :  { %v2189_v61 = vadd.f32 %v2188_v55, %v2170_v53  ;;  %3284 = vmatpush.bf16.msrb.mxu0 %v11539_v36 }
 0x1b7   :  { %v12350_v42 = vpop.permute.xlu1 %2253 }
 0x1b8   :  { %v2226_v9 = vpop.f32.mrf.mxu1  ;;  %v2208_v0 = vadd.f32 %v2207_v59, %v2189_v61  ;;  %3303 = vmatpush.bf16.msrb.mxu1 %v11540_v37 }
 0x1ba   :  { %v2227_v8 = vadd.f32 %v2226_v9, %v2208_v0 }
 0x1bb   :  { %v2171_v12 = vpop.f32.mrf.mxu2 }
 0x1bc   :  { %v2256_v14 = vadd.f32 %v12333_v15, %v2227_v8  ;;  %v2172_v16 = vadd.f32 %v2171_v12, %v1921_v48  ;;  %v2190_v18 = vpop.f32.mrf.mxu3 }
 0x1bd   :  { %v2209_v23 = vpop.f32.mrf.mxu0 }
 0x1be   :  { %v2264_v28 = vmul.f32 %v11470_v5, %v2256_v14  ;;  %v2191_v13 = vadd.f32 %v2190_v18, %v2172_v16 }
 0x1c0   :  { %v2228_v40 = vpop.f32.mrf.mxu1  ;;  %2268 = vst [vmem:[#allocation16] sm:$0xff] %v2264_v28  ;;  %v2210_v62 = vadd.f32 %v2209_v23, %v2191_v13 }
 0x1c2   :  { %v2229_v19 = vadd.f32 %v2228_v40, %v2210_v62  ;;  %v11543_v40 = vld [vmem:[#allocation13 + $0x230] sm:$0xff] }
 0x1c3   :  { %v2174_v54 = vpop.f32.mrf.mxu2 }
 0x1c4   :  { %v2257_v38 = vadd.f32 %v12341_v10, %v2229_v19  ;;  %v2175_v57 = vadd.f32 %v2174_v54, %v1924_v26  ;;  %v2193_v17 = vpop.f32.mrf.mxu3  ;;  %v11544_v26 = vld [vmem:[#allocation13 + $0x270] sm:$0xff] }
 0x1c5   :  { %v2212_v30 = vpop.f32.mrf.mxu0 }
 0x1c6   :  { %v2265_v20 = vmul.f32 %v11470_v5, %v2257_v38  ;;  %v2194_v47 = vadd.f32 %v2193_v17, %v2175_v57 }
 0x1c8   :  { %v2231_v43 = vpop.f32.mrf.mxu1  ;;  %2269 = vst [vmem:[#allocation16 + $0x8] sm:$0xff] %v2265_v20  ;;  %v2213_v6 = vadd.f32 %v2212_v30, %v2194_v47  ;;  %v11546_v30 = vld [vmem:[#allocation13 + $0x268] sm:$0xff]  ;;  %v11547_v20 = vld [vmem:[#allocation13 + $0x220] sm:$0xff] }
 0x1ca   :  { %v2232_v11 = vadd.f32 %v2231_v43, %v2213_v6 }
 0x1cb   :  { %v2176_v32 = vpop.f32.mrf.mxu2 }
 0x1cc   :  { %v2258_v25 = vadd.f32 %v12346_v45, %v2232_v11  ;;  %v2177_v52 = vadd.f32 %v2176_v32, %v1926_v60  ;;  %v2195_v53 = vpop.f32.mrf.mxu3  ;;  %v11548_v60 = vld [vmem:[#allocation13 + $0x260] sm:$0xff]  ;;  %v11549_v32 = vld [vmem:[#allocation13 + $0x218] sm:$0xff] }
 0x1cd   :  { %v2214_v55 = vpop.f32.mrf.mxu0 }
 0x1ce   :  { %v2266_v59 = vmul.f32 %v11470_v5, %v2258_v25  ;;  %v2196_v31 = vadd.f32 %v2195_v53, %v2177_v52 }
 0x1d0   :  { %v2233_v46 = vpop.f32.mrf.mxu1  ;;  %2270 = vst [vmem:[#allocation16 + $0x10] sm:$0xff] %v2266_v59  ;;  %v2215_v33 = vadd.f32 %v2214_v55, %v2196_v31  ;;  %v11550_v55 = vld [vmem:[#allocation13 + $0x258] sm:$0xff]  ;;  %v11551_v59 = vld [vmem:[#allocation13 + $0x210] sm:$0xff] }
 0x1d2   :  { %v2234_v61 = vadd.f32 %v2233_v46, %v2215_v33  ;;  %v11552_v46 = vld [vmem:[#allocation13 + $0x250] sm:$0xff]  ;;  %v11553_v33 = vld [vmem:[#allocation13 + $0x208] sm:$0xff] }
 0x1d3   :  { %v2539_v9 = vpop.f32.mrf.mxu2 }
 0x1d4   :  { %v2259_v35 = vadd.f32 %v12350_v42, %v2234_v61  ;;  %v2558_v63 = vpop.f32.mrf.mxu3 }
 0x1d5   :  { %v2577_v7 = vpop.f32.mrf.mxu0  ;;  %v2559_v12 = vadd.f32 %v2558_v63, %v2539_v9 }
 0x1d6   :  { %v2267_v0 = vmul.f32 %v11470_v5, %v2259_v35  ;;  %v11542_v5 = vld [vmem:[#allocation13 + $0x278] sm:$0xff] }
 0x1d8   :  { %v2596_v36 = vpop.f32.mrf.mxu1  ;;  %2271 = vst [vmem:[#allocation16 + $0x18] sm:$0xff] %v2267_v0 }
 0x1d9   :  { %v2597_v58 = vadd.f32 %v2596_v36, %v2577_v7  ;;  %v11554_v36 = vld [vmem:[#allocation13 + $0x248] sm:$0xff] }
 0x1db   :  { %v2541_v48 = vpop.f32.mrf.mxu2 }
 0x1dc   :  { %v2560_v2 = vpop.f32.mrf.mxu3 }
 0x1dd   :  { %v2579_v8 = vpop.f32.mrf.mxu0  ;;  %v2561_v37 = vadd.f32 %v2560_v2, %v2541_v48  ;;  %v11555_v48 = vld [vmem:[#allocation13 + $0x200] sm:$0xff] }
 0x1df   :  { %v3143_v14 = vpack.c.bf16 %v2561_v37, %v2559_v12  ;;  %v10936_v12 = vld [vmem:[#allocation2 + $0x178] sm:$0xff] }
 0x1e0   :  { %v2598_v16 = vpop.f32.mrf.mxu1 }
 0x1e1   :  { %v2599_v18 = vadd.f32 %v2598_v16, %v2579_v8  ;;  %3171 = vmatmul.bf16.vlgmr.msrb.gmra.mxu2 %v3143_v14  ;;  %v10928_v8 = vld [vmem:[#allocation2 + $0x138] sm:$0xff]  ;;  %v11556_v14 = vld [vmem:[#allocation13 + $0x240] sm:$0xff] }
 0x1e2   :  { %3315 = vmatpush.bf16.msrb.mxu2 %v11541_v50  ;;  %v10952_v50 = vld [vmem:[#allocation2 + $0x1f8] sm:$0xff] }
 0x1e3   :  { %v3144_v23 = vpack.c.bf16 %v2599_v18, %v2597_v58  ;;  %v2544_v22 = vpop.f32.mrf.mxu2  ;;  %v10944_v58 = vld [vmem:[#allocation2 + $0x1b8] sm:$0xff]  ;;  %v10927_v18 = vld [vmem:[#allocation2 + $0x130] sm:$0xff] }
 0x1e4   :  { %v2563_v28 = vpop.f32.mrf.mxu3 }
 0x1e5   :  { %3190 = vmatmul.bf16.vlgmr.msrb.gmra.mxu3 %v3144_v23  ;;  %v2582_v13 = vpop.f32.mrf.mxu0  ;;  %v2564_v57 = vadd.f32 %v2563_v28, %v2544_v22  ;;  %v10935_v23 = vld [vmem:[#allocation2 + $0x170] sm:$0xff] }
 0x1e6   :  { %3334 = vmatpush.bf16.msrb.mxu3 %v11542_v5  ;;  %3316 = vmatpush.bf16.msrb.mxu2 %v11543_v40  ;;  %v10926_v5 = vld [vmem:[#allocation2 + $0x128] sm:$0xff] }
 0x1e8   :  { %v2601_v62 = vpop.f32.mrf.mxu1 }
 0x1e9   :  { %v2602_v41 = vadd.f32 %v2601_v62, %v2582_v13  ;;  %v10943_v13 = vld [vmem:[#allocation2 + $0x1b0] sm:$0xff]  ;;  %v10934_v62 = vld [vmem:[#allocation2 + $0x168] sm:$0xff] }
 0x1ea   :  { %3335 = vmatpush.bf16.msrb.mxu3 %v11544_v26  ;;  %3317 = vmatpush.bf16.msrb.mxu2 %v11545_v4  ;;  %v10951_v26 = vld [vmem:[#allocation2 + $0x1f0] sm:$0xff]  ;;  %v10942_v4 = vld [vmem:[#allocation2 + $0x1a8] sm:$0xff] }
 0x1eb   :  { %v2546_v19 = vpop.f32.mrf.mxu2 }
 0x1ec   :  { %v2565_v54 = vpop.f32.mrf.mxu3 }
 0x1ed   :  { %v2584_v38 = vpop.f32.mrf.mxu0  ;;  %v2566_v17 = vadd.f32 %v2565_v54, %v2546_v19  ;;  %v10925_v19 = vld [vmem:[#allocation2 + $0x120] sm:$0xff] }
 0x1ee   :  { %3336 = vmatpush.bf16.msrb.mxu3 %v11546_v30  ;;  %3318 = vmatpush.bf16.msrb.mxu2 %v11547_v20 }
 0x1ef   :  { %v3153_v47 = vpack.c.bf16 %v2566_v17, %v2564_v57  ;;  %v10950_v57 = vld [vmem:[#allocation2 + $0x1e8] sm:$0xff] }
 0x1f0   :  { %v2603_v43 = vpop.f32.mrf.mxu1 }
 0x1f1   :  { %v2604_v6 = vadd.f32 %v2603_v43, %v2584_v38  ;;  %3176 = vmatmul.bf16.gmra.mxu2 %v3153_v47  ;;  %v10933_v38 = vld [vmem:[#allocation2 + $0x160] sm:$0xff] }
 0x1f2   :  { %3337 = vmatpush.bf16.msrb.mxu3 %v11548_v60  ;;  %3319 = vmatpush.bf16.msrb.mxu2 %v11549_v32  ;;  %v10941_v43 = vld [vmem:[#allocation2 + $0x1a0] sm:$0xff]  ;;  %v10924_v60 = vld [vmem:[#allocation2 + $0x118] sm:$0xff] }
 0x1f3   :  { %v3154_v11 = vpack.c.bf16 %v2604_v6, %v2602_v41  ;;  %v3000_v25 = vpop.f32.mrf.mxu2  ;;  %v10949_v32 = vld [vmem:[#allocation2 + $0x1e0] sm:$0xff] }
 0x1f4   :  { %v3019_v52 = vpop.f32.mrf.mxu3 }
 0x1f5   :  { %3195 = vmatmul.bf16.gmra.mxu3 %v3154_v11  ;;  %v3038_v53 = vpop.f32.mrf.mxu0  ;;  %v10932_v11 = vld [vmem:[#allocation2 + $0x158] sm:$0xff] }
 0x1f6   :  { %3338 = vmatpush.bf16.msrb.mxu3 %v11550_v55  ;;  %3320 = vmatpush.bf16.msrb.mxu2 %v11551_v59  ;;  %v10923_v55 = vld [vmem:[#allocation2 + $0x110] sm:$0xff] }
 0x1f7   :  { %v10931_v59 = vld [vmem:[#allocation2 + $0x150] sm:$0xff] }
 0x1f8   :  { %v3057_v31 = vpop.f32.mrf.mxu1 }
 0x1fa   :  { %3339 = vmatpush.bf16.msrb.mxu3 %v11552_v46  ;;  %3321 = vmatpush.bf16.msrb.mxu2 %v11553_v33 }
 0x1fb   :  { %v3002_v61 = vpop.f32.mrf.mxu2 }
 0x1fc   :  { %v3145_v9 = vpack.c.bf16 %v3002_v61, %v3000_v25  ;;  %v3021_v35 = vpop.f32.mrf.mxu3  ;;  %v10939_v61 = vld [vmem:[#allocation2 + $0x190] sm:$0xff] }
 0x1fd   :  { %v3040_v63 = vpop.f32.mrf.mxu0  ;;  %v3146_v7 = vpack.c.bf16 %v3021_v35, %v3019_v52  ;;  %v10940_v52 = vld [vmem:[#allocation2 + $0x198] sm:$0xff]  ;;  %v10930_v35 = vld [vmem:[#allocation2 + $0x148] sm:$0xff] }
 0x1fe   :  { %v3147_v0 = vpack.c.bf16 %v3040_v63, %v3038_v53  ;;  %3340 = vmatpush.bf16.msrb.mxu3 %v11554_v36  ;;  %3209 = vmatmul.bf16.vlgmr.msra.gmra.mxu0 %v3145_v9  ;;  %v10922_v9 = vld [vmem:[#allocation2 + $0x108] sm:$0xff]  ;;  %v10947_v63 = vld [vmem:[#allocation2 + $0x1d0] sm:$0xff]  ;;  %v10921_v36 = vld [vmem:[#allocation2 + $0x100] sm:$0xff] }
 0x1ff   :  { %3322 = vmatpush.bf16.msrb.mxu2 %v11555_v48  ;;  %3228 = vmatmul.bf16.vlgmr.msra.gmra.mxu1 %v3146_v7  ;;  %v10929_v48 = vld [vmem:[#allocation2 + $0x140] sm:$0xff] }
 0x200   :  { %v3059_v2 = vpop.f32.mrf.mxu1  ;;  %3545 = vmatpush.bf16.msra.mxu0 %v10928_v8  ;;  %3564 = vmatpush.bf16.msra.mxu1 %v10936_v12  ;;  %v10946_v8 = vld [vmem:[#allocation2 + $0x1c8] sm:$0xff] }
 0x201   :  { %v3148_v37 = vpack.c.bf16 %v3059_v2, %v3057_v31  ;;  %3247 = vmatmul.bf16.vlgmr.msra.gmra.mxu2 %v3147_v0  ;;  %v10948_v31 = vld [vmem:[#allocation2 + $0x1d8] sm:$0xff]  ;;  %v10938_v0 = vld [vmem:[#allocation2 + $0x188] sm:$0xff] }
 0x202   :  { %3341 = vmatpush.bf16.msrb.mxu3 %v11556_v14  ;;  %v10937_v14 = vld [vmem:[#allocation2 + $0x180] sm:$0xff] }
 0x203   :  { %v3005_v16 = vpop.f32.mrf.mxu2  ;;  %3583 = vmatpush.bf16.msra.mxu2 %v10944_v58 }
 0x204   :  { %v3024_v22 = vpop.f32.mrf.mxu3  ;;  %3546 = vmatpush.bf16.msra.mxu0 %v10927_v18  ;;  %3565 = vmatpush.bf16.msra.mxu1 %v10935_v23  ;;  %v9221_v23 = vld [vmem:[#allocation5 + $0x270] sm:$0xf] }
 0x205   :  { %3266 = vmatmul.bf16.vlgmr.msra.gmra.mxu3 %v3148_v37  ;;  %v3043_v28 = vpop.f32.mrf.mxu0 }
 0x206   :  { %3602 = vmatpush.bf16.msra.mxu3 %v10952_v50  ;;  %v11096_v50 = vld [vmem:[#allocation5 + $0x274] sm:$0xf0] }
 0x207   :  { %3584 = vmatpush.bf16.msra.mxu2 %v10943_v13  ;;  %v9222_v13 = vor.u32 %v11096_v50, %v9221_v23  ;;  %v9199_v23 = vld [vmem:[#allocation5 + $0x248] sm:$0xf0] }
 0x208   :  { %v3062_v40 = vpop.f32.mrf.mxu1  ;;  %3547 = vmatpush.bf16.msra.mxu0 %v10926_v5  ;;  %3566 = vmatpush.bf16.msra.mxu1 %v10934_v62  ;;  %v10945_v5 = vld [vmem:[#allocation2 + $0x1c0] sm:$0xff] }
 0x20a   :  { %3603 = vmatpush.bf16.msra.mxu3 %v10951_v26 }
 0x20b   :  { %v3007_v54 = vpop.f32.mrf.mxu2  ;;  %3585 = vmatpush.bf16.msra.mxu2 %v10942_v4  ;;  %v11095_v4 = vld [vmem:[#allocation5 + $0x274] sm:$0xf] }
 0x20c   :  { %v3155_v17 = vpack.c.bf16 %v3007_v54, %v3005_v16  ;;  %v3026_v30 = vpop.f32.mrf.mxu3  ;;  %3548 = vmatpush.bf16.msra.mxu0 %v10925_v19  ;;  %3567 = vmatpush.bf16.msra.mxu1 %v10933_v38  ;;  %v9223_v19 = vld [vmem:[#allocation5 + $0x278] sm:$0xf0]  ;;  %v9213_v38 = vld [vmem:[#allocation5 + $0x260] sm:$0xf] }
 0x20d   :  { %v3045_v41 = vpop.f32.mrf.mxu0  ;;  %v3156_v20 = vpack.c.bf16 %v3026_v30, %v3024_v22  ;;  %v9285_v22 = vld [vmem:[#allocation5 + $0x2f0] sm:$0xf]  ;;  %v9226_v54 = vor.u32 %v11095_v4, %v9223_v19 }
 0x20e   :  { %v3157_v47 = vpack.c.bf16 %v3045_v41, %v3043_v28  ;;  %3604 = vmatpush.bf16.msra.mxu3 %v10950_v57  ;;  %3214 = vmatmul.bf16.gmra.mxu0 %v3155_v17  ;;  %v11094_v57 = vld [vmem:[#allocation5 + $0x264] sm:$0xf0]  ;;  %v9277_v17 = vld [vmem:[#allocation5 + $0x2e0] sm:$0xf]  ;;  %v9189_v19 = vld [vmem:[#allocation5 + $0x230] sm:$0xf] }
 0x20f   :  { %3233 = vmatmul.bf16.gmra.mxu1 %v3156_v20  ;;  %3586 = vmatpush.bf16.msra.mxu2 %v10941_v43  ;;  %v9214_v41 = vor.u32 %v11094_v57, %v9213_v38  ;;  %v11110_v20 = vld [vmem:[#allocation5 + $0x2e4] sm:$0xf0]  ;;  %v9287_v43 = vld [vmem:[#allocation5 + $0x2f8] sm:$0xf0]  ;;  %v9253_v38 = vld [vmem:[#allocation5 + $0x2b0] sm:$0xf] }
 0x210   :  { %v3064_v6 = vpop.f32.mrf.mxu1  ;;  %3549 = vmatpush.bf16.msra.mxu0 %v10924_v60  ;;  %3568 = vmatpush.bf16.msra.mxu1 %v10932_v11  ;;  %v9278_v11 = vor.u32 %v11110_v20, %v9277_v17  ;;  %v11105_v20 = vld [vmem:[#allocation5 + $0x2c4] sm:$0xf] }
 0x211   :  { %v3158_v25 = vpack.c.bf16 %v3064_v6, %v3062_v40  ;;  %3252 = vmatmul.bf16.gmra.mxu2 %v3157_v47  ;;  %v11112_v40 = vld [vmem:[#allocation5 + $0x2f4] sm:$0xf0]  ;;  %v11111_v47 = vld [vmem:[#allocation5 + $0x2f4] sm:$0xf] }
 0x212   :  { %3605 = vmatpush.bf16.msra.mxu3 %v10949_v32  ;;  %v9286_v26 = vor.u32 %v11112_v40, %v9285_v22  ;;  %v9290_v32 = vor.u32 %v11111_v47, %v9287_v43  ;;  %v9263_v47 = vld [vmem:[#allocation5 + $0x2c8] sm:$0xf0] }
 0x213   :  { %v3076_v53 = vpop.f32.mrf.mxu2  ;;  %3587 = vmatpush.bf16.msra.mxu2 %v10940_v52  ;;  %v9215_v52 = vld [vmem:[#allocation5 + $0x268] sm:$0xf0] }
 0x214   :  { %v3095_v46 = vpop.f32.mrf.mxu3  ;;  %3550 = vmatpush.bf16.msra.mxu0 %v10923_v55  ;;  %3569 = vmatpush.bf16.msra.mxu1 %v10931_v59  ;;  %v11092_v59 = vld [vmem:[#allocation5 + $0x254] sm:$0xf0] }
 0x215   :  { %3271 = vmatmul.bf16.gmra.mxu3 %v3158_v25  ;;  %v3114_v33 = vpop.f32.mrf.mxu0  ;;  %v11093_v25 = vld [vmem:[#allocation5 + $0x264] sm:$0xf] }
 0x216   :  { %3606 = vmatpush.bf16.msra.mxu3 %v10948_v31  ;;  %v9218_v55 = vor.u32 %v11093_v25, %v9215_v52  ;;  %v9269_v31 = vld [vmem:[#allocation5 + $0x2d0] sm:$0xf]  ;;  %v9181_v25 = vld [vmem:[#allocation5 + $0x220] sm:$0xf]  ;;  %v11086_v52 = vld [vmem:[#allocation5 + $0x224] sm:$0xf0] }
 0x217   :  { %3588 = vmatpush.bf16.msra.mxu2 %v10939_v61 }
 0x218   :  { %v3133_v7 = vpop.f32.mrf.mxu1  ;;  %3551 = vmatpush.bf16.msra.mxu0 %v10922_v9  ;;  %3570 = vmatpush.bf16.msra.mxu1 %v10930_v35  ;;  %v11109_v9 = vld [vmem:[#allocation5 + $0x2e4] sm:$0xf]  ;;  %v9279_v35 = vld [vmem:[#allocation5 + $0x2e8] sm:$0xf0] }
 0x21a   :  { %3607 = vmatpush.bf16.msra.mxu3 %v10947_v63  ;;  %v11091_v63 = vld [vmem:[#allocation5 + $0x254] sm:$0xf] }
 0x21b   :  { %v3078_v2 = vpop.f32.mrf.mxu2  ;;  %3589 = vmatpush.bf16.msra.mxu2 %v10938_v0  ;;  %v9282_v0 = vor.u32 %v11109_v9, %v9279_v35  ;;  %v11085_v9 = vld [vmem:[#allocation5 + $0x224] sm:$0xf]  ;;  %v9183_v35 = vld [vmem:[#allocation5 + $0x228] sm:$0xf0] }
 0x21c   :  { %v3149_v12 = vpack.c.bf16 %v3078_v2, %v3076_v53  ;;  %v3097_v37 = vpop.f32.mrf.mxu3  ;;  %3552 = vmatpush.bf16.msra.mxu0 %v10921_v36  ;;  %3571 = vmatpush.bf16.msra.mxu1 %v10929_v48  ;;  %v9205_v53 = vld [vmem:[#allocation5 + $0x250] sm:$0xf]  ;;  %v9207_v36 = vld [vmem:[#allocation5 + $0x258] sm:$0xf0]  ;;  %v9197_v48 = vld [vmem:[#allocation5 + $0x240] sm:$0xf] }
 0x21d   :  { %v3116_v58 = vpop.f32.mrf.mxu0  ;;  %v3150_v16 = vpack.c.bf16 %v3097_v37, %v3095_v46  ;;  %v11108_v46 = vld [vmem:[#allocation5 + $0x2d4] sm:$0xf0]  ;;  %v11090_v2 = vld [vmem:[#allocation5 + $0x244] sm:$0xf0] }
 0x21e   :  { %v3151_v18 = vpack.c.bf16 %v3116_v58, %v3114_v33  ;;  %3285 = vmatmul.bf16.vlgmr.msrb.gmra.mxu0 %v3149_v12  ;;  %3608 = vmatpush.bf16.msra.mxu3 %v10946_v8  ;;  %v9206_v33 = vor.u32 %v11092_v59, %v9205_v53  ;;  %v9270_v61 = vor.u32 %v11108_v46, %v9269_v31  ;;  %v9261_v12 = vld [vmem:[#allocation5 + $0x2c0] sm:$0xf]  ;;  %v11106_v37 = vld [vmem:[#allocation5 + $0x2c4] sm:$0xf0]  ;;  %v11107_v58 = vld [vmem:[#allocation5 + $0x2d4] sm:$0xf] }
 0x21f   :  { %3304 = vmatmul.bf16.vlgmr.msrb.gmra.mxu1 %v3150_v16  ;;  %3590 = vmatpush.bf16.msra.mxu2 %v10937_v14  ;;  %v9210_v8 = vor.u32 %v11091_v63, %v9207_v36  ;;  %v9198_v14 = vor.u32 %v11090_v2, %v9197_v48  ;;  %v9271_v16 = vld [vmem:[#allocation5 + $0x2d8] sm:$0xf0]  ;;  %v9262_v50 = vor.u32 %v11106_v37, %v9261_v12  ;;  %v9245_v53 = vld [vmem:[#allocation5 + $0x2a0] sm:$0xf]  ;;  %v11102_v59 = vld [vmem:[#allocation5 + $0x2a4] sm:$0xf0] }
 0x220   :  { %v3135_v28 = vpop.f32.mrf.mxu1  ;;  %3897 = vmatpush.bf16.msrb.mxu0 %v9222_v13  ;;  %3916 = vmatpush.bf16.msrb.mxu1 %v9286_v26  ;;  %v11103_v31 = vld [vmem:[#allocation5 + $0x2b4] sm:$0xf]  ;;  %v9255_v46 = vld [vmem:[#allocation5 + $0x2b8] sm:$0xf0]  ;;  %v9173_v63 = vld [vmem:[#allocation5 + $0x210] sm:$0xf] }
 0x221   :  { %v3152_v62 = vpack.c.bf16 %v3135_v28, %v3133_v7  ;;  %3323 = vmatmul.bf16.vlgmr.msrb.gmra.mxu2 %v3151_v18  ;;  %v11089_v18 = vld [vmem:[#allocation5 + $0x244] sm:$0xf]  ;;  %v9274_v28 = vor.u32 %v11107_v58, %v9271_v16  ;;  %v9237_v36 = vld [vmem:[#allocation5 + $0x290] sm:$0xf]  ;;  %v11100_v48 = vld [vmem:[#allocation5 + $0x294] sm:$0xf0] }
 0x222   :  { %3609 = vmatpush.bf16.msra.mxu3 %v10945_v5  ;;  %v11101_v12 = vld [vmem:[#allocation5 + $0x2a4] sm:$0xf]  ;;  %v9247_v37 = vld [vmem:[#allocation5 + $0x2a8] sm:$0xf0]  ;;  %v11083_v58 = vld [vmem:[#allocation5 + $0x214] sm:$0xf] }
 0x223   :  { %v3081_v30 = vpop.f32.mrf.mxu2  ;;  %3935 = vmatpush.bf16.msrb.mxu2 %v9226_v54  ;;  %v11088_v54 = vld [vmem:[#allocation5 + $0x234] sm:$0xf0]  ;;  %v9175_v16 = vld [vmem:[#allocation5 + $0x218] sm:$0xf0] }
 0x224   :  { %v3100_v6 = vpop.f32.mrf.mxu3  ;;  %3898 = vmatpush.bf16.msrb.mxu0 %v9214_v41  ;;  %3917 = vmatpush.bf16.msrb.mxu1 %v9278_v11  ;;  %v9190_v17 = vor.u32 %v11088_v54, %v9189_v19  ;;  %v11104_v41 = vld [vmem:[#allocation5 + $0x2b4] sm:$0xf0]  ;;  %v9266_v11 = vor.u32 %v11105_v20, %v9263_v47  ;;  %v9231_v20 = vld [vmem:[#allocation5 + $0x288] sm:$0xf0]  ;;  %v11169_v47 = vld [vmem:[#allocation7 + $0x5c4] sm:$0xf] }
 0x225   :  { %3342 = vmatmul.bf16.vlgmr.msrb.gmra.mxu3 %v3152_v62  ;;  %v12353_v60 = vpop.f32.mrf.mxu0  ;;  %v9202_v62 = vor.u32 %v11089_v18, %v9199_v23  ;;  %v9254_v43 = vor.u32 %v11104_v41, %v9253_v38  ;;  %v9165_v18 = vld [vmem:[#allocation5 + $0x200] sm:$0xf]  ;;  %v11082_v23 = vld [vmem:[#allocation5 + $0x204] sm:$0xf0] }
 0x226   :  { %3954 = vmatpush.bf16.msrb.mxu3 %v9290_v32  ;;  %v9191_v32 = vld [vmem:[#allocation5 + $0x238] sm:$0xf0]  ;;  %v9517_v38 = vld [vmem:[#allocation7 + $0x5c0] sm:$0xf] }
 0x227   :  { %3936 = vmatpush.bf16.msrb.mxu2 %v9218_v55  ;;  %v9182_v55 = vor.u32 %v11086_v52, %v9181_v25  ;;  %v9485_v25 = vld [vmem:[#allocation7 + $0x580] sm:$0xf] }
 0x228   :  { %v3138_v7 = vpop.f32.mrf.mxu1  ;;  %3899 = vmatpush.bf16.msrb.mxu0 %v9206_v33  ;;  %3918 = vmatpush.bf16.msrb.mxu1 %v9270_v61  ;;  %v9246_v33 = vor.u32 %v11102_v59, %v9245_v53  ;;  %v9258_v61 = vor.u32 %v11103_v31, %v9255_v46  ;;  %v11165_v52 = vld [vmem:[#allocation7 + $0x59c] sm:$0xf0]  ;;  %v11161_v53 = vld [vmem:[#allocation7 + $0x584] sm:$0xf]  ;;  %v9493_v46 = vld [vmem:[#allocation7 + $0x588] sm:$0xf] }
 0x229   :  { %v9487_v59 = vld [vmem:[#allocation7 + $0x5a0] sm:$0xf0] }
 0x22a   :  { %3955 = vmatpush.bf16.msrb.mxu3 %v9282_v0  ;;  %v11084_v0 = vld [vmem:[#allocation5 + $0x214] sm:$0xf0]  ;;  %v9490_v31 = vor.u32 %v11161_v53, %v9487_v59  ;;  %v11129_v53 = vld [vmem:[#allocation7 + $0x484] sm:$0xf] }
 0x22b   :  { %v3083_v22 = vpop.f32.mrf.mxu2  ;;  %3937 = vmatpush.bf16.msrb.mxu2 %v9210_v8  ;;  %v9174_v2 = vor.u32 %v11084_v0, %v9173_v63  ;;  %v9238_v8 = vor.u32 %v11100_v48, %v9237_v36  ;;  %v11157_v0 = vld [vmem:[#allocation7 + $0x55c] sm:$0xf0]  ;;  %v11153_v36 = vld [vmem:[#allocation7 + $0x544] sm:$0xf] }
 0x22c   :  { %v3159_v13 = vpack.c.bf16 %v3083_v22, %v3081_v30  ;;  %v3102_v5 = vpop.f32.mrf.mxu3  ;;  %3900 = vmatpush.bf16.msrb.mxu0 %v9198_v14  ;;  %3919 = vmatpush.bf16.msrb.mxu1 %v9262_v50  ;;  %v9250_v14 = vor.u32 %v11101_v12, %v9247_v37  ;;  %v9178_v50 = vor.u32 %v11083_v58, %v9175_v16  ;;  %v9229_v22 = vld [vmem:[#allocation5 + $0x280] sm:$0xf]  ;;  %v9461_v12 = vld [vmem:[#allocation7 + $0x548] sm:$0xf]  ;;  %v11162_v58 = vld [vmem:[#allocation7 + $0x58c] sm:$0xf] }
 0x22d   :  { %v3121_v40 = vpop.f32.mrf.mxu0  ;;  %v3160_v26 = vpack.c.bf16 %v3102_v5, %v3100_v6  ;;  %v11087_v6 = vld [vmem:[#allocation5 + $0x234] sm:$0xf]  ;;  %v9166_v5 = vor.u32 %v11082_v23, %v9165_v18  ;;  %v11158_v37 = vld [vmem:[#allocation7 + $0x564] sm:$0xf0]  ;;  %v9495_v16 = vld [vmem:[#allocation7 + $0x5a8] sm:$0xf0] }
 0x22e   :  { %v3161_v4 = vpack.c.bf16 %v3121_v40, %v12353_v60  ;;  %3290 = vmatmul.bf16.gmra.mxu0 %v3159_v13  ;;  %3956 = vmatpush.bf16.msrb.mxu3 %v9274_v28  ;;  %v9194_v60 = vor.u32 %v11087_v6, %v9191_v32  ;;  %v11098_v28 = vld [vmem:[#allocation5 + $0x284] sm:$0xf0]  ;;  %v11099_v13 = vld [vmem:[#allocation5 + $0x294] sm:$0xf]  ;;  %v9239_v40 = vld [vmem:[#allocation5 + $0x298] sm:$0xf0] }
 0x22f   :  { %3309 = vmatmul.bf16.gmra.mxu1 %v3160_v26  ;;  %3938 = vmatpush.bf16.msrb.mxu2 %v9202_v62  ;;  %v11081_v62 = vld [vmem:[#allocation5 + $0x204] sm:$0xf]  ;;  %v9167_v26 = vld [vmem:[#allocation5 + $0x208] sm:$0xf0]  ;;  %v9242_v19 = vor.u32 %v11099_v13, %v9239_v40  ;;  %v9525_v6 = vld [vmem:[#allocation7 + $0x5c8] sm:$0xf] }
 0x230   :  { %v3140_v57 = vpop.f32.mrf.mxu1  ;;  %3901 = vmatpush.bf16.msrb.mxu0 %v9190_v17  ;;  %3920 = vmatpush.bf16.msrb.mxu1 %v9254_v43  ;;  %v9170_v54 = vor.u32 %v11081_v62, %v9167_v26  ;;  %v11097_v17 = vld [vmem:[#allocation5 + $0x284] sm:$0xf]  ;;  %v11174_v32 = vld [vmem:[#allocation7 + $0x5e4] sm:$0xf0]  ;;  %v9421_v18 = vld [vmem:[#allocation7 + $0x500] sm:$0xf] }
 0x231   :  { %v3162_v30 = vpack.c.bf16 %v3140_v57, %v3138_v7  ;;  %3328 = vmatmul.bf16.gmra.mxu2 %v3161_v4  ;;  %v9186_v7 = vor.u32 %v11085_v9, %v9183_v35  ;;  %v9230_v4 = vor.u32 %v11098_v28, %v9229_v22  ;;  %v11173_v57 = vld [vmem:[#allocation7 + $0x5dc] sm:$0xf0]  ;;  %v9234_v43 = vor.u32 %v11097_v17, %v9231_v20  ;;  %v9527_v35 = vld [vmem:[#allocation7 + $0x5e8] sm:$0xf0]  ;;  %v11145_v28 = vld [vmem:[#allocation7 + $0x504] sm:$0xf] }
 0x232   :  { %3957 = vmatpush.bf16.msrb.mxu3 %v9266_v11  ;;  %v9518_v41 = vor.u32 %v11173_v57, %v9517_v38  ;;  %v11149_v23 = vld [vmem:[#allocation7 + $0x51c] sm:$0xf0]  ;;  %v9423_v13 = vld [vmem:[#allocation7 + $0x520] sm:$0xf0]  ;;  %v9429_v40 = vld [vmem:[#allocation7 + $0x508] sm:$0xf] }
 0x233   :  { %3939 = vmatpush.bf16.msrb.mxu2 %v9194_v60  ;;  %v9526_v60 = vor.u32 %v11174_v32, %v9525_v6  ;;  %v9422_v22 = vor.u32 %v11149_v23, %v9421_v18  ;;  %v11150_v62 = vld [vmem:[#allocation7 + $0x524] sm:$0xf0]  ;;  %v11154_v26 = vld [vmem:[#allocation7 + $0x54c] sm:$0xf]  ;;  %v9389_v38 = vld [vmem:[#allocation7 + $0x4c0] sm:$0xf] }
 0x234   :  { %3902 = vmatpush.bf16.msrb.mxu0 %v9182_v55  ;;  %3921 = vmatpush.bf16.msrb.mxu1 %v9246_v33  ;;  %v9486_v55 = vor.u32 %v11165_v52, %v9485_v25  ;;  %v11166_v33 = vld [vmem:[#allocation7 + $0x5a4] sm:$0xf0]  ;;  %v11141_v57 = vld [vmem:[#allocation7 + $0x4dc] sm:$0xf0]  ;;  %v11137_v17 = vld [vmem:[#allocation7 + $0x4c4] sm:$0xf] }
 0x235   :  { %3347 = vmatmul.bf16.gmra.mxu3 %v3162_v30  ;;  %v9519_v30 = vld [vmem:[#allocation7 + $0x5e0] sm:$0xf0]  ;;  %v9494_v9 = vor.u32 %v11166_v33, %v9493_v46  ;;  %v9431_v32 = vld [vmem:[#allocation7 + $0x528] sm:$0xf0]  ;;  %v9357_v25 = vld [vmem:[#allocation7 + $0x480] sm:$0xf] }
 0x236   :  { %3958 = vmatpush.bf16.msrb.mxu3 %v9258_v61  ;;  %v9522_v11 = vor.u32 %v11169_v47, %v9519_v30  ;;  %v11170_v61 = vld [vmem:[#allocation7 + $0x5cc] sm:$0xf]  ;;  %v9391_v20 = vld [vmem:[#allocation7 + $0x4e0] sm:$0xf0]  ;;  %v9397_v30 = vld [vmem:[#allocation7 + $0x4c8] sm:$0xf] }
 0x237   :  { %3940 = vmatpush.bf16.msrb.mxu2 %v9186_v7  ;;  %v9530_v63 = vor.u32 %v11170_v61, %v9527_v35  ;;  %v9453_v7 = vld [vmem:[#allocation7 + $0x540] sm:$0xf]  ;;  %v9394_v47 = vor.u32 %v11137_v17, %v9391_v20  ;;  %v9359_v59 = vld [vmem:[#allocation7 + $0x4a0] sm:$0xf0]  ;;  %v9365_v46 = vld [vmem:[#allocation7 + $0x488] sm:$0xf] }
 0x238   :  { %3903 = vmatpush.bf16.msrb.mxu0 %v9174_v2  ;;  %3922 = vmatpush.bf16.msrb.mxu1 %v9238_v8  ;;  %v9454_v48 = vor.u32 %v11157_v0, %v9453_v7  ;;  %v9455_v2 = vld [vmem:[#allocation7 + $0x560] sm:$0xf0]  ;;  %v11133_v52 = vld [vmem:[#allocation7 + $0x49c] sm:$0xf0]  ;;  %v11134_v33 = vld [vmem:[#allocation7 + $0x4a4] sm:$0xf0] }
 0x239   :  { %v9458_v8 = vor.u32 %v11153_v36, %v9455_v2  ;;  %v11138_v61 = vld [vmem:[#allocation7 + $0x4cc] sm:$0xf]  ;;  %v9325_v7 = vld [vmem:[#allocation7 + $0x440] sm:$0xf]  ;;  %v11121_v36 = vld [vmem:[#allocation7 + $0x444] sm:$0xf] }
 0x23a   :  { %3959 = vmatpush.bf16.msrb.mxu3 %v9250_v14  ;;  %v9462_v14 = vor.u32 %v11158_v37, %v9461_v12  ;;  %v9399_v35 = vld [vmem:[#allocation7 + $0x4e8] sm:$0xf0]  ;;  %v11125_v0 = vld [vmem:[#allocation7 + $0x45c] sm:$0xf0]  ;;  %v9327_v2 = vld [vmem:[#allocation7 + $0x460] sm:$0xf0] }
 0x23b   :  { %3941 = vmatpush.bf16.msrb.mxu2 %v9178_v50  ;;  %v9498_v50 = vor.u32 %v11162_v58, %v9495_v16  ;;  %v9333_v12 = vld [vmem:[#allocation7 + $0x448] sm:$0xf]  ;;  %v11130_v58 = vld [vmem:[#allocation7 + $0x48c] sm:$0xf]  ;;  %v9293_v18 = vld [vmem:[#allocation7 + $0x400] sm:$0xf] }
 0x23c   :  { %3904 = vmatpush.bf16.msrb.mxu0 %v9166_v5  ;;  %3923 = vmatpush.bf16.msrb.mxu1 %v9230_v4  ;;  %v9426_v5 = vor.u32 %v11145_v28, %v9423_v13  ;;  %v9430_v4 = vor.u32 %v11150_v62, %v9429_v40  ;;  %v11126_v37 = vld [vmem:[#allocation7 + $0x464] sm:$0xf0]  ;;  %v9367_v16 = vld [vmem:[#allocation7 + $0x4a8] sm:$0xf0]  ;;  %v11117_v23 = vld [vmem:[#allocation7 + $0x41c] sm:$0xf0] }
 0x23d   :  { %v11113_v28 = vld [vmem:[#allocation7 + $0x404] sm:$0xf]  ;;  %v9301_v40 = vld [vmem:[#allocation7 + $0x408] sm:$0xf]  ;;  %v11171_v17 = vld [vmem:[#allocation7 + $0x5d4] sm:$0xf] }
 0x23e   :  { %3553 = vmatmul.bf16.vlgmr.msra.gmra.mxu0 %v12184_v21  ;;  %3960 = vmatpush.bf16.msrb.mxu3 %v9242_v19  ;;  %v9463_v19 = vld [vmem:[#allocation7 + $0x568] sm:$0xf0]  ;;  %v9295_v13 = vld [vmem:[#allocation7 + $0x420] sm:$0xf0]  ;;  %v11118_v62 = vld [vmem:[#allocation7 + $0x424] sm:$0xf0] }
 0x23f   :  { %3572 = vmatmul.bf16.vlgmr.msra.gmra.mxu1 %v12186_v27  ;;  %3942 = vmatpush.bf16.msrb.mxu2 %v9170_v54  ;;  %v9466_v54 = vor.u32 %v11154_v26, %v9463_v19  ;;  %v11122_v26 = vld [vmem:[#allocation7 + $0x44c] sm:$0xf]  ;;  %v9535_v20 = vld [vmem:[#allocation7 + $0x5f0] sm:$0xf0] }
 0x240   :  { %4358 = vmatpush.bf16.msra.mxu0 %v9518_v41  ;;  %4377 = vmatpush.bf16.msra.mxu1 %v9522_v11  ;;  %v9390_v41 = vor.u32 %v11141_v57, %v9389_v38  ;;  %v11146_v11 = vld [vmem:[#allocation7 + $0x50c] sm:$0xf]  ;;  %v9533_v38 = vld [vmem:[#allocation7 + $0x5d0] sm:$0xf] }
 0x241   :  { %3591 = vmatmul.bf16.vlgmr.msra.gmra.mxu2 %v12193_v51  ;;  %v9335_v19 = vld [vmem:[#allocation7 + $0x468] sm:$0xf0]  ;;  %v11175_v57 = vld [vmem:[#allocation7 + $0x5ec] sm:$0xf0] }
 0x242   :  { %3961 = vmatpush.bf16.msrb.mxu3 %v9234_v43  ;;  %v11142_v43 = vld [vmem:[#allocation7 + $0x4e4] sm:$0xf0] }
 0x243   :  { %4396 = vmatpush.bf16.msra.mxu2 %v9526_v60  ;;  %v9398_v6 = vor.u32 %v11142_v43, %v9397_v30  ;;  %v9434_v60 = vor.u32 %v11146_v11, %v9431_v32  ;;  %v11114_v30 = vld [vmem:[#allocation7 + $0x40c] sm:$0xf]  ;;  %v9541_v11 = vld [vmem:[#allocation7 + $0x5d8] sm:$0xf] }
 0x244   :  { %4359 = vmatpush.bf16.msra.mxu0 %v9486_v55  ;;  %4378 = vmatpush.bf16.msra.mxu1 %v9490_v31  ;;  %v9358_v55 = vor.u32 %v11133_v52, %v9357_v25  ;;  %v9362_v31 = vor.u32 %v11129_v53, %v9359_v59  ;;  %v9303_v43 = vld [vmem:[#allocation7 + $0x428] sm:$0xf0]  ;;  %v11176_v32 = vld [vmem:[#allocation7 + $0x5f4] sm:$0xf0]  ;;  %v11167_v25 = vld [vmem:[#allocation7 + $0x5ac] sm:$0xf0] }
 0x245   :  { %3610 = vmatmul.bf16.vlgmr.msra.gmra.mxu3 %v12195_v1  ;;  %v9542_v52 = vor.u32 %v11176_v32, %v9541_v11  ;;  %v9503_v59 = vld [vmem:[#allocation7 + $0x5b0] sm:$0xf0] }
 0x246   :  { %4415 = vmatpush.bf16.msra.mxu3 %v9530_v63  ;;  %v9402_v63 = vor.u32 %v11138_v61, %v9399_v35  ;;  %v11168_v61 = vld [vmem:[#allocation7 + $0x5b4] sm:$0xf0] }
 0x247   :  { %4397 = vmatpush.bf16.msra.mxu2 %v9494_v9  ;;  %v9366_v9 = vor.u32 %v11134_v33, %v9365_v46  ;;  %v9509_v33 = vld [vmem:[#allocation7 + $0x598] sm:$0xf] }
 0x248   :  { %4360 = vmatpush.bf16.msra.mxu0 %v9454_v48  ;;  %4379 = vmatpush.bf16.msra.mxu1 %v9458_v8  ;;  %v9326_v48 = vor.u32 %v11125_v0, %v9325_v7  ;;  %v9330_v8 = vor.u32 %v11121_v36, %v9327_v2  ;;  %v9510_v35 = vor.u32 %v11168_v61, %v9509_v33  ;;  %v9469_v0 = vld [vmem:[#allocation7 + $0x550] sm:$0xf]  ;;  %v11131_v61 = vld [vmem:[#allocation7 + $0x494] sm:$0xf] }
 0x249   :  { %v11159_v36 = vld [vmem:[#allocation7 + $0x56c] sm:$0xf0] }
 0x24a   :  { %4416 = vmatpush.bf16.msra.mxu3 %v9498_v50  ;;  %v9370_v50 = vor.u32 %v11130_v58, %v9367_v16  ;;  %v11160_v16 = vld [vmem:[#allocation7 + $0x574] sm:$0xf0] }
 0x24b   :  { %4398 = vmatpush.bf16.msra.mxu2 %v9462_v14  ;;  %v9334_v14 = vor.u32 %v11126_v37, %v9333_v12  ;;  %v9471_v12 = vld [vmem:[#allocation7 + $0x570] sm:$0xf0] }
 0x24c   :  { %4361 = vmatpush.bf16.msra.mxu0 %v9422_v22  ;;  %4380 = vmatpush.bf16.msra.mxu1 %v9426_v5  ;;  %v9294_v22 = vor.u32 %v11117_v23, %v9293_v18  ;;  %v9298_v5 = vor.u32 %v11113_v28, %v9295_v13  ;;  %v11164_v18 = vld [vmem:[#allocation7 + $0x59c] sm:$0xf]  ;;  %v11151_v28 = vld [vmem:[#allocation7 + $0x52c] sm:$0xf0] }
 0x24e   :  { %3558 = vmatmul.bf16.gmra.mxu0 %v12202_v24  ;;  %4417 = vmatpush.bf16.msra.mxu3 %v9466_v54  ;;  %v9338_v54 = vor.u32 %v11122_v26, %v9335_v19  ;;  %v9445_v19 = vld [vmem:[#allocation7 + $0x518] sm:$0xf] }
 0x24f   :  { %3577 = vmatmul.bf16.gmra.mxu1 %v12204_v29  ;;  %4399 = vmatpush.bf16.msra.mxu2 %v9430_v4  ;;  %v9302_v4 = vor.u32 %v11118_v62, %v9301_v40  ;;  %v9439_v40 = vld [vmem:[#allocation7 + $0x530] sm:$0xf0] }
 0x250   :  { %4362 = vmatpush.bf16.msra.mxu0 %v9390_v41  ;;  %4381 = vmatpush.bf16.msra.mxu1 %v9394_v47  ;;  %v9534_v41 = vor.u32 %v11175_v57, %v9533_v38  ;;  %v9538_v47 = vor.u32 %v11171_v17, %v9535_v20  ;;  %v11156_v38 = vld [vmem:[#allocation7 + $0x55c] sm:$0xf]  ;;  %v9405_v20 = vld [vmem:[#allocation7 + $0x4d0] sm:$0xf] }
 0x251   :  { %3596 = vmatmul.bf16.gmra.mxu2 %v12211_v56  ;;  %v9479_v17 = vld [vmem:[#allocation7 + $0x578] sm:$0xf0] }
 0x252   :  { %4418 = vmatpush.bf16.msra.mxu3 %v9434_v60  ;;  %v9501_v60 = vld [vmem:[#allocation7 + $0x590] sm:$0xf] }
 0x253   :  { %4400 = vmatpush.bf16.msra.mxu2 %v9398_v6  ;;  %v9306_v6 = vor.u32 %v11114_v30, %v9303_v43  ;;  %v9502_v53 = vor.u32 %v11167_v25, %v9501_v60  ;;  %v11139_v30 = vld [vmem:[#allocation7 + $0x4d4] sm:$0xf]  ;;  %v9413_v25 = vld [vmem:[#allocation7 + $0x4d8] sm:$0xf] }
 0x254   :  { %4363 = vmatpush.bf16.msra.mxu0 %v9358_v55  ;;  %4382 = vmatpush.bf16.msra.mxu1 %v9362_v31  ;;  %v11163_v55 = vld [vmem:[#allocation7 + $0x594] sm:$0xf] }
 0x255   :  { %3615 = vmatmul.bf16.gmra.mxu3 %v12213_v3  ;;  %v9506_v31 = vor.u32 %v11163_v55, %v9503_v59  ;;  %v9447_v59 = vld [vmem:[#allocation7 + $0x538] sm:$0xf0] }
 0x256   :  { %4419 = vmatpush.bf16.msra.mxu3 %v9402_v63  ;;  %v9543_v63 = vld [vmem:[#allocation7 + $0x5f8] sm:$0xf0] }
 0x257   :  { %4401 = vmatpush.bf16.msra.mxu2 %v9366_v9  ;;  %v11172_v9 = vld [vmem:[#allocation7 + $0x5dc] sm:$0xf] }
 0x258   :  { %4364 = vmatpush.bf16.msra.mxu0 %v9326_v48  ;;  %4383 = vmatpush.bf16.msra.mxu1 %v9330_v8  ;;  %v9546_v7 = vor.u32 %v11172_v9, %v9543_v63  ;;  %v11155_v48 = vld [vmem:[#allocation7 + $0x554] sm:$0xf]  ;;  %v9470_v8 = vor.u32 %v11159_v36, %v9469_v0  ;;  %v9381_v0 = vld [vmem:[#allocation7 + $0x498] sm:$0xf] }
 0x259   :  { %v9474_v58 = vor.u32 %v11155_v48, %v9471_v12  ;;  %v9375_v9 = vld [vmem:[#allocation7 + $0x4b0] sm:$0xf0]  ;;  %v11136_v36 = vld [vmem:[#allocation7 + $0x4b4] sm:$0xf0]  ;;  %v11140_v48 = vld [vmem:[#allocation7 + $0x4dc] sm:$0xf] }
 0x25a   :  { %4420 = vmatpush.bf16.msra.mxu3 %v9370_v50  ;;  %v9511_v50 = vld [vmem:[#allocation7 + $0x5b8] sm:$0xf0]  ;;  %v9378_v63 = vor.u32 %v11131_v61, %v9375_v9  ;;  %v11559_v9 = vld [vmem:[#allocation13 + $0x78] sm:$0xff] }
 0x25b   :  { %4402 = vmatpush.bf16.msra.mxu2 %v9334_v14  ;;  %v9477_v14 = vld [vmem:[#allocation7 + $0x558] sm:$0xf]  ;;  %v9514_v13 = vor.u32 %v11164_v18, %v9511_v50  ;;  %v9343_v50 = vld [vmem:[#allocation7 + $0x470] sm:$0xf0] }
 0x25c   :  { %4365 = vmatpush.bf16.msra.mxu0 %v9294_v22  ;;  %4384 = vmatpush.bf16.msra.mxu1 %v9298_v5  ;;  %v9478_v23 = vor.u32 %v11160_v16, %v9477_v14  ;;  %v9437_v22 = vld [vmem:[#allocation7 + $0x510] sm:$0xf]  ;;  %v11147_v5 = vld [vmem:[#allocation7 + $0x514] sm:$0xf] }
 0x25d   :  { %v9438_v62 = vor.u32 %v11151_v28, %v9437_v22  ;;  %v9442_v26 = vor.u32 %v11147_v5, %v9439_v40  ;;  %v11127_v14 = vld [vmem:[#allocation7 + $0x46c] sm:$0xf0]  ;;  %v11123_v16 = vld [vmem:[#allocation7 + $0x454] sm:$0xf]  ;;  %v11128_v5 = vld [vmem:[#allocation7 + $0x474] sm:$0xf0] }
 0x25e   :  { %3905 = vmatmul.bf16.vlgmr.msrb.gmra.mxu0 %v12142_v44  ;;  %4421 = vmatpush.bf16.msra.mxu3 %v9338_v54  ;;  %v11152_v54 = vld [vmem:[#allocation7 + $0x534] sm:$0xf0]  ;;  %v9346_v28 = vor.u32 %v11123_v16, %v9343_v50  ;;  %v11132_v40 = vld [vmem:[#allocation7 + $0x49c] sm:$0xf]  ;;  %v11567_v16 = vld [vmem:[#allocation13 + $0xf0] sm:$0xff] }
 0x25f   :  { %3924 = vmatmul.bf16.vlgmr.msrb.gmra.mxu1 %v12144_v49  ;;  %4403 = vmatpush.bf16.msra.mxu2 %v9302_v4  ;;  %v9446_v57 = vor.u32 %v11152_v54, %v9445_v19  ;;  %v11119_v19 = vld [vmem:[#allocation7 + $0x42c] sm:$0xf0] }
 0x260   :  { %4434 = vmatpush.bf16.msrb.mxu0 %v9534_v41  ;;  %4453 = vmatpush.bf16.msrb.mxu1 %v9538_v47  ;;  %v9482_v41 = vor.u32 %v11156_v38, %v9479_v17  ;;  %v11143_v47 = vld [vmem:[#allocation7 + $0x4ec] sm:$0xf0]  ;;  %v11115_v38 = vld [vmem:[#allocation7 + $0x414] sm:$0xf] }
 0x261   :  { %3943 = vmatmul.bf16.vlgmr.msrb.gmra.mxu2 %v12142_v44  ;;  %v9406_v11 = vor.u32 %v11143_v47, %v9405_v20 }
 0x262   :  { %4422 = vmatpush.bf16.msra.mxu3 %v9306_v6  ;;  %v9407_v6 = vld [vmem:[#allocation7 + $0x4f0] sm:$0xf0] }
 0x263   :  { %4472 = vmatpush.bf16.msrb.mxu2 %v9542_v52  ;;  %v9410_v60 = vor.u32 %v11139_v30, %v9407_v6  ;;  %v11144_v52 = vld [vmem:[#allocation7 + $0x4f4] sm:$0xf0]  ;;  %v11124_v6 = vld [vmem:[#allocation7 + $0x45c] sm:$0xf] }
 0x264   :  { %v3172_v46 = vpop.f32.mrf.mxu2  ;;  %4435 = vmatpush.bf16.msrb.mxu0 %v9502_v53  ;;  %4454 = vmatpush.bf16.msrb.mxu1 %v9506_v31  ;;  %v11148_v53 = vld [vmem:[#allocation7 + $0x51c] sm:$0xf]  ;;  %v9414_v55 = vor.u32 %v11144_v52, %v9413_v25  ;;  %v9373_v31 = vld [vmem:[#allocation7 + $0x490] sm:$0xf]  ;;  %v12382_v52 = vld [vmem:[#allocation11] sm:$0xff] }
 0x265   :  { %3962 = vmatmul.bf16.vlgmr.msrb.gmra.mxu3 %v12144_v49  ;;  %v9450_v33 = vor.u32 %v11148_v53, %v9447_v59  ;;  %v9351_v25 = vld [vmem:[#allocation7 + $0x478] sm:$0xf0] }
 0x266   :  { %4491 = vmatpush.bf16.msrb.mxu3 %v9546_v7  ;;  %v9354_v53 = vor.u32 %v11124_v6, %v9351_v25  ;;  %v11581_v25 = vld [vmem:[#allocation13 + $0x8] sm:$0xff] }
 0x267   :  { %4473 = vmatpush.bf16.msrb.mxu2 %v9510_v35 }
 0x268   :  { %v3191_v2 = vpop.f32.mrf.mxu3  ;;  %4436 = vmatpush.bf16.msrb.mxu0 %v9470_v8  ;;  %4455 = vmatpush.bf16.msrb.mxu1 %v9474_v58  ;;  %v9415_v8 = vld [vmem:[#allocation7 + $0x4f8] sm:$0xf0]  ;;  %v9341_v58 = vld [vmem:[#allocation7 + $0x450] sm:$0xf] }
 0x269   :  { %v12368_v37 = vadd.f32 %v3191_v2, %v3172_v46  ;;  %v11135_v46 = vld [vmem:[#allocation7 + $0x4ac] sm:$0xf0]  ;;  %v9382_v2 = vor.u32 %v11136_v36, %v9381_v0  ;;  %v9418_v12 = vor.u32 %v11140_v48, %v9415_v8  ;;  %v11561_v36 = vld [vmem:[#allocation13 + $0x30] sm:$0xff] }
 0x26a   :  { %4492 = vmatpush.bf16.msrb.mxu3 %v9514_v13  ;;  %v9374_v35 = vor.u32 %v11135_v46, %v9373_v31  ;;  %v9349_v13 = vld [vmem:[#allocation7 + $0x458] sm:$0xf]  ;;  %v11116_v31 = vld [vmem:[#allocation7 + $0x41c] sm:$0xf]  ;;  %v11562_v48 = vld [vmem:[#allocation13 + $0x70] sm:$0xff] }
 0x26b   :  { %4474 = vmatpush.bf16.msrb.mxu2 %v9478_v23  ;;  %v9342_v23 = vor.u32 %v11127_v14, %v9341_v58  ;;  %v9319_v46 = vld [vmem:[#allocation7 + $0x438] sm:$0xf0] }
 0x26c   :  { %v3174_v4 = vpop.f32.mrf.mxu2  ;;  %4456 = vmatpush.bf16.msrb.mxu1 %v9442_v26  ;;  %4437 = vmatpush.bf16.msrb.mxu0 %v9438_v62  ;;  %v9350_v62 = vor.u32 %v11128_v5, %v9349_v13  ;;  %v9383_v26 = vld [vmem:[#allocation7 + $0x4b8] sm:$0xf0]  ;;  %v9322_v61 = vor.u32 %v11116_v31, %v9319_v46  ;;  %v11569_v13 = vld [vmem:[#allocation13 + $0x20] sm:$0xff]  ;;  %v12404_v5 = vld [vmem:[#allocation11 + $0x8] sm:$0xff] }
 0x26d   :  { %v9386_v54 = vor.u32 %v11132_v40, %v9383_v26  ;;  %v11565_v58 = vld [vmem:[#allocation13 + $0x28] sm:$0xff]  ;;  %v11571_v40 = vld [vmem:[#allocation13 + $0x60] sm:$0xff]  ;;  %v11584_v46 = vld [vmem:[#allocation13 + $0xd0] sm:$0xff] }
 0x26e   :  { %3910 = vmatmul.bf16.gmra.mxu0 %v12150_v34  ;;  %4493 = vmatpush.bf16.msrb.mxu3 %v9482_v41  ;;  %v11566_v14 = vld [vmem:[#allocation13 + $0x68] sm:$0xff] }
 0x26f   :  { %3929 = vmatmul.bf16.gmra.mxu1 %v12152_v39  ;;  %4475 = vmatpush.bf16.msrb.mxu2 %v9446_v57  ;;  %v9311_v57 = vld [vmem:[#allocation7 + $0x430] sm:$0xf0]  ;;  %v11572_v26 = vld [vmem:[#allocation13 + $0xe8] sm:$0xff] }
 0x270   :  { %v3193_v43 = vpop.f32.mrf.mxu3  ;;  %4457 = vmatpush.bf16.msrb.mxu1 %v9410_v60  ;;  %4438 = vmatpush.bf16.msrb.mxu0 %v9406_v11  ;;  %v9314_v20 = vor.u32 %v11115_v38, %v9311_v57  ;;  %v11120_v11 = vld [vmem:[#allocation7 + $0x434] sm:$0xf0]  ;;  %v11576_v57 = vld [vmem:[#allocation13 + $0xe0] sm:$0xff] }
 0x271   :  { %v12372_v32 = vadd.f32 %v3193_v43, %v3174_v4  ;;  %3948 = vmatmul.bf16.gmra.mxu2 %v12150_v34  ;;  %v9309_v4 = vld [vmem:[#allocation7 + $0x410] sm:$0xf]  ;;  %v9317_v43 = vld [vmem:[#allocation7 + $0x418] sm:$0xf] }
 0x272   :  { %4494 = vmatpush.bf16.msrb.mxu3 %v9450_v33  ;;  %v9310_v41 = vor.u32 %v11119_v19, %v9309_v4  ;;  %v9318_v60 = vor.u32 %v11120_v11, %v9317_v43  ;;  %v11558_v33 = vld [vmem:[#allocation13 + $0x38] sm:$0xff]  ;;  %v11574_v19 = vld [vmem:[#allocation13 + $0xa0] sm:$0xff]  ;;  %v11579_v11 = vld [vmem:[#allocation13 + $0x50] sm:$0xff] }
 0x273   :  { %4476 = vmatpush.bf16.msrb.mxu2 %v9414_v55  ;;  %v11573_v4 = vld [vmem:[#allocation13 + $0x18] sm:$0xff] }
 0x274   :  { %v3177_v7 = vpop.f32.mrf.mxu2  ;;  %4458 = vmatpush.bf16.msrb.mxu1 %v9378_v63  ;;  %4439 = vmatpush.bf16.msrb.mxu0 %v9374_v35  ;;  %v11560_v35 = vld [vmem:[#allocation13 + $0xb8] sm:$0xff] }
 0x275   :  { %3967 = vmatmul.bf16.gmra.mxu3 %v12152_v39  ;;  %v11578_v43 = vld [vmem:[#allocation13 + $0x98] sm:$0xff] }
 0x276   :  { %4495 = vmatpush.bf16.msrb.mxu3 %v9418_v12  ;;  %v11564_v12 = vld [vmem:[#allocation13 + $0xb0] sm:$0xff] }
 0x277   :  { %4477 = vmatpush.bf16.msrb.mxu2 %v9382_v2  ;;  %v11563_v2 = vld [vmem:[#allocation13 + $0xf8] sm:$0xff] }
 0x278   :  { %v3196_v18 = vpop.f32.mrf.mxu3  ;;  %4459 = vmatpush.bf16.msrb.mxu1 %v9346_v28  ;;  %4440 = vmatpush.bf16.msrb.mxu0 %v9342_v23  ;;  %v11568_v23 = vld [vmem:[#allocation13 + $0xa8] sm:$0xff] }
 0x279   :  { %v12376_v22 = vadd.f32 %v3196_v18, %v3177_v7 }
 0x27a   :  { %4496 = vmatpush.bf16.msrb.mxu3 %v9386_v54  ;;  %v11575_v54 = vld [vmem:[#allocation13 + $0x58] sm:$0xff] }
 0x27b   :  { %v12378_v17 = vpop.f32.mrf.mxu0  ;;  %4478 = vmatpush.bf16.msrb.mxu2 %v9350_v62 }
 0x27c   :  { %v3179_v47 = vpop.f32.mrf.mxu2  ;;  %v12380_v30 = vpop.f32.mrf.mxu1  ;;  %4460 = vmatpush.bf16.msrb.mxu1 %v9314_v20  ;;  %4441 = vmatpush.bf16.msrb.mxu0 %v9310_v41 }
 0x27e   :  { %4366 = vmatmul.bf16.vlgmr.msra.gmra.mxu0 %v12382_v52  ;;  %4497 = vmatpush.bf16.msrb.mxu3 %v9354_v53  ;;  %v11582_v53 = vld [vmem:[#allocation13 + $0x90] sm:$0xff] }
 0x27f   :  { %4385 = vmatmul.bf16.vlgmr.msra.gmra.mxu1 %v12382_v52  ;;  %4479 = vmatpush.bf16.msrb.mxu2 %v9318_v60  ;;  %v11580_v60 = vld [vmem:[#allocation13 + $0xd8] sm:$0xff] }
 0x280   :  { %v3198_v55 = vpop.f32.mrf.mxu3  ;;  %4530 = vmatpush.bf16.msra.mxu0 %v11558_v33  ;;  %4549 = vmatpush.bf16.msra.mxu1 %v11559_v9  ;;  %v11585_v9 = vld [vmem:[#allocation13] sm:$0xff] }
 0x281   :  { %v12386_v59 = vadd.f32 %v3198_v55, %v3179_v47  ;;  %4404 = vmatmul.bf16.vlgmr.msra.gmra.mxu2 %v12382_v52  ;;  %v11577_v47 = vld [vmem:[#allocation13 + $0x10] sm:$0xff]  ;;  %v11583_v55 = vld [vmem:[#allocation13 + $0x48] sm:$0xff] }
 0x282   :  { %4498 = vmatpush.bf16.msrb.mxu3 %v9322_v61 }
 0x283   :  { %4568 = vmatpush.bf16.msra.mxu2 %v11560_v35  ;;  %v12389_v63 = vpop.f32.mrf.mxu0  ;;  %v11586_v35 = vld [vmem:[#allocation13 + $0x88] sm:$0xff] }
 0x284   :  { %v12391_v7 = vpop.f32.mrf.mxu1  ;;  %v12393_v0 = vpop.f32.mrf.mxu2  ;;  %4531 = vmatpush.bf16.msra.mxu0 %v11561_v36  ;;  %4550 = vmatpush.bf16.msra.mxu1 %v11562_v48  ;;  %v11587_v36 = vld [vmem:[#allocation13 + $0x40] sm:$0xff] }
 0x285   :  { %4423 = vmatmul.bf16.vlgmr.msra.gmra.mxu3 %v12382_v52 }
 0x286   :  { %4587 = vmatpush.bf16.msra.mxu3 %v11563_v2  ;;  %v11588_v2 = vld [vmem:[#allocation13 + $0x138] sm:$0xff] }
 0x287   :  { %4569 = vmatpush.bf16.msra.mxu2 %v11564_v12  ;;  %v11589_v12 = vld [vmem:[#allocation13 + $0x178] sm:$0xff] }
 0x288   :  { %v12396_v8 = vpop.f32.mrf.mxu3  ;;  %4532 = vmatpush.bf16.msra.mxu0 %v11565_v58  ;;  %4551 = vmatpush.bf16.msra.mxu1 %v11566_v14  ;;  %v11590_v58 = vld [vmem:[#allocation13 + $0xc8] sm:$0xff]  ;;  %v11591_v14 = vld [vmem:[#allocation13 + $0x80] sm:$0xff] }
 0x28a   :  { %4588 = vmatpush.bf16.msra.mxu3 %v11567_v16 }
 0x28b   :  { %v12398_v18 = vpop.f32.mrf.mxu0  ;;  %4570 = vmatpush.bf16.msra.mxu2 %v11568_v23  ;;  %v11592_v23 = vld [vmem:[#allocation13 + $0x130] sm:$0xff] }
 0x28c   :  { %v12400_v50 = vpop.f32.mrf.mxu1  ;;  %v12402_v28 = vpop.f32.mrf.mxu2  ;;  %4533 = vmatpush.bf16.msra.mxu0 %v11569_v13  ;;  %4552 = vmatpush.bf16.msra.mxu1 %v11571_v40  ;;  %v11593_v13 = vld [vmem:[#allocation13 + $0x1b8] sm:$0xff] }
 0x28e   :  { %4371 = vmatmul.bf16.gmra.mxu0 %v12404_v5  ;;  %4589 = vmatpush.bf16.msra.mxu3 %v11572_v26 }
 0x28f   :  { %4390 = vmatmul.bf16.gmra.mxu1 %v12404_v5  ;;  %4571 = vmatpush.bf16.msra.mxu2 %v11574_v19  ;;  %v11595_v19 = vld [vmem:[#allocation13 + $0xc0] sm:$0xff] }
 0x290   :  { %v12407_v62 = vpop.f32.mrf.mxu3  ;;  %4534 = vmatpush.bf16.msra.mxu0 %v11573_v4  ;;  %4553 = vmatpush.bf16.msra.mxu1 %v11575_v54  ;;  %v11594_v4 = vld [vmem:[#allocation13 + $0x170] sm:$0xff]  ;;  %v11596_v54 = vld [vmem:[#allocation13 + $0x1f8] sm:$0xff] }
 0x291   :  { %4409 = vmatmul.bf16.gmra.mxu2 %v12404_v5 }
 0x292   :  { %4590 = vmatpush.bf16.msra.mxu3 %v11576_v57  ;;  %v3211_v57 = vadd.f32 %v12378_v17, %v12368_v37  ;;  %v11603_v17 = vld [vmem:[#allocation13 + $0x160] sm:$0xff] }
 0x293   :  { %v12411_v38 = vpop.f32.mrf.mxu0  ;;  %4572 = vmatpush.bf16.msra.mxu2 %v11578_v43  ;;  %v11597_v43 = vld [vmem:[#allocation13 + $0x128] sm:$0xff] }
 0x294   :  { %v12413_v41 = vpop.f32.mrf.mxu1  ;;  %v12415_v20 = vpop.f32.mrf.mxu2  ;;  %4535 = vmatpush.bf16.msra.mxu0 %v11577_v47  ;;  %4554 = vmatpush.bf16.msra.mxu1 %v11579_v11  ;;  %v11598_v11 = vld [vmem:[#allocation13 + $0x1b0] sm:$0xff] }
 0x295   :  { %4428 = vmatmul.bf16.gmra.mxu3 %v12404_v5 }
 0x296   :  { %4591 = vmatpush.bf16.msra.mxu3 %v11580_v60  ;;  %v11599_v60 = vld [vmem:[#allocation13 + $0x168] sm:$0xff] }
 0x297   :  { %4573 = vmatpush.bf16.msra.mxu2 %v11582_v53 }
 0x298   :  { %v12418_v6 = vpop.f32.mrf.mxu3  ;;  %4536 = vmatpush.bf16.msra.mxu0 %v11581_v25  ;;  %4555 = vmatpush.bf16.msra.mxu1 %v11583_v55  ;;  %v11600_v25 = vld [vmem:[#allocation13 + $0x1f0] sm:$0xff]  ;;  %v11601_v55 = vld [vmem:[#allocation13 + $0x120] sm:$0xff] }
 0x29a   :  { %4592 = vmatpush.bf16.msra.mxu3 %v11584_v46  ;;  %v11602_v46 = vld [vmem:[#allocation13 + $0x1a8] sm:$0xff] }
 0x29b   :  { %v12420_v31 = vpop.f32.mrf.mxu0  ;;  %4574 = vmatpush.bf16.msra.mxu2 %v11586_v35 }
 0x29c   :  { %v12422_v33 = vpop.f32.mrf.mxu2  ;;  %v12424_v61 = vpop.f32.mrf.mxu1  ;;  %4537 = vmatpush.bf16.msra.mxu0 %v11585_v9  ;;  %4556 = vmatpush.bf16.msra.mxu1 %v11587_v36  ;;  %v11604_v36 = vld [vmem:[#allocation13 + $0x1e8] sm:$0xff] }
 0x29e   :  { %4442 = vmatmul.bf16.vlgmr.msrb.gmra.mxu0 %v12382_v52  ;;  %4593 = vmatpush.bf16.msra.mxu3 %v11590_v58  ;;  %v11606_v58 = vld [vmem:[#allocation13 + $0x158] sm:$0xff] }
 0x29f   :  { %4461 = vmatmul.bf16.vlgmr.msrb.gmra.mxu1 %v12382_v52  ;;  %4575 = vmatpush.bf16.msra.mxu2 %v11591_v14  ;;  %v11607_v14 = vld [vmem:[#allocation13 + $0x1a0] sm:$0xff] }
 0x2a0   :  { %v12427_v48 = vpop.f32.mrf.mxu3  ;;  %4606 = vmatpush.bf16.msrb.mxu0 %v11588_v2  ;;  %4625 = vmatpush.bf16.msrb.mxu1 %v11589_v12  ;;  %v11605_v12 = vld [vmem:[#allocation13 + $0x118] sm:$0xff] }
 0x2a1   :  { %4480 = vmatmul.bf16.vlgmr.msrb.gmra.mxu2 %v12382_v52 }
 0x2a2   :  { %4594 = vmatpush.bf16.msra.mxu3 %v11595_v19 }
 0x2a3   :  { %v12431_v16 = vpop.f32.mrf.mxu0  ;;  %4644 = vmatpush.bf16.msrb.mxu2 %v11593_v13 }
 0x2a4   :  { %4607 = vmatpush.bf16.msrb.mxu0 %v11592_v23  ;;  %v12433_v40 = vpop.f32.mrf.mxu1  ;;  %v12435_v26 = vpop.f32.mrf.mxu2  ;;  %4626 = vmatpush.bf16.msrb.mxu1 %v11594_v4  ;;  %v11609_v4 = vld [vmem:[#allocation13 + $0x110] sm:$0xff] }
 0x2a5   :  { %4499 = vmatmul.bf16.vlgmr.msrb.gmra.mxu3 %v12382_v52  ;;  %v3230_v52 = vadd.f32 %v12380_v30, %v3211_v57  ;;  %v3213_v30 = vadd.f32 %v12389_v63, %v12372_v32  ;;  %v11610_v57 = vld [vmem:[#allocation13 + $0x150] sm:$0xff] }
 0x2a6   :  { %4663 = vmatpush.bf16.msrb.mxu3 %v11596_v54 }
 0x2a7   :  { %4645 = vmatpush.bf16.msrb.mxu2 %v11598_v11  ;;  %v3249_v35 = vadd.f32 %v12393_v0, %v3230_v52  ;;  %v11608_v0 = vld [vmem:[#allocation13 + $0x1e0] sm:$0xff]  ;;  %v3232_v13 = vadd.f32 %v12391_v7, %v3213_v30  ;;  %v11612_v11 = vld [vmem:[#allocation13 + $0x1d8] sm:$0xff]  ;;  %v3216_v7 = vadd.f32 %v12398_v18, %v12376_v22  ;;  %v11614_v52 = vld [vmem:[#allocation13 + $0x148] sm:$0xff] }
 0x2a8   :  { %v12440_v47 = vpop.f32.mrf.mxu3  ;;  %4608 = vmatpush.bf16.msrb.mxu0 %v11597_v43  ;;  %4627 = vmatpush.bf16.msrb.mxu1 %v11599_v60  ;;  %v11611_v43 = vld [vmem:[#allocation13 + $0x198] sm:$0xff]  ;;  %v11617_v18 = vld [vmem:[#allocation13 + $0x100] sm:$0xff] }
 0x2a9   :  { %v3268_v23 = vadd.f32 %v12396_v8, %v3249_v35  ;;  %v3251_v8 = vadd.f32 %v12402_v28, %v3232_v13  ;;  %v11616_v28 = vld [vmem:[#allocation13 + $0x1d0] sm:$0xff]  ;;  %v11618_v30 = vld [vmem:[#allocation13 + $0x140] sm:$0xff] }
 0x2aa   :  { %4664 = vmatpush.bf16.msrb.mxu3 %v11600_v25  ;;  %v11613_v25 = vld [vmem:[#allocation13 + $0x108] sm:$0xff] }
 0x2ab   :  { %v12443_v53 = vpop.f32.mrf.mxu0  ;;  %4646 = vmatpush.bf16.msrb.mxu2 %v11602_v46  ;;  %v3287_v32 = vadd.f32 %v12420_v31, %v3268_v23  ;;  %v11615_v46 = vld [vmem:[#allocation13 + $0x190] sm:$0xff] }
 0x2ac   :  { %4609 = vmatpush.bf16.msrb.mxu0 %v11601_v55  ;;  %v12445_v9 = vpop.f32.mrf.mxu1  ;;  %v12447_v37 = vpop.f32.mrf.mxu2  ;;  %4628 = vmatpush.bf16.msrb.mxu1 %v11603_v17  ;;  %v3235_v17 = vadd.f32 %v12400_v50, %v3216_v7  ;;  %v3218_v50 = vadd.f32 %v12411_v38, %v12386_v59 }
 0x2ad   :  { %v3306_v31 = vadd.f32 %v12424_v61, %v3287_v32  ;;  %v11621_v32 = vld [vmem:[#allocation13 + $0x180] sm:$0xff] }
 0x2ae   :  { %4447 = vmatmul.bf16.gmra.mxu0 %v12404_v5  ;;  %4665 = vmatpush.bf16.msrb.mxu3 %v11604_v36 }
 0x2af   :  { %4466 = vmatmul.bf16.gmra.mxu1 %v12404_v5  ;;  %4647 = vmatpush.bf16.msrb.mxu2 %v11607_v14  ;;  %v3325_v55 = vadd.f32 %v12435_v26, %v3306_v31  ;;  %v11619_v26 = vld [vmem:[#allocation13 + $0x188] sm:$0xff] }
 0x2b0   :  { %v12453_v2 = vpop.f32.mrf.mxu3  ;;  %4610 = vmatpush.bf16.msrb.mxu0 %v11605_v12  ;;  %4629 = vmatpush.bf16.msrb.mxu1 %v11606_v58  ;;  %v3254_v12 = vadd.f32 %v12415_v20, %v3235_v17  ;;  %v11620_v58 = vld [vmem:[#allocation13 + $0x1c8] sm:$0xff]  ;;  %v11622_v20 = vld [vmem:[#allocation13 + $0x1c0] sm:$0xff] }
 0x2b1   :  { %4485 = vmatmul.bf16.gmra.mxu2 %v12404_v5 }
 0x2b2   :  { %4666 = vmatpush.bf16.msrb.mxu3 %v11608_v0  ;;  %v3273_v0 = vadd.f32 %v12418_v6, %v3254_v12 }
 0x2b3   :  { %v12460_v63 = vpop.f32.mrf.mxu0  ;;  %4648 = vmatpush.bf16.msrb.mxu2 %v11611_v43 }
 0x2b4   :  { %4611 = vmatpush.bf16.msrb.mxu0 %v11609_v4  ;;  %v12462_v19 = vpop.f32.mrf.mxu1  ;;  %v3329_v54 = vpop.f32.mrf.mxu2  ;;  %4630 = vmatpush.bf16.msrb.mxu1 %v11610_v57  ;;  %v3292_v4 = vadd.f32 %v12443_v53, %v3273_v0 }
 0x2b5   :  { %4504 = vmatmul.bf16.gmra.mxu3 %v12404_v5  ;;  %v3270_v5 = vadd.f32 %v12407_v62, %v3251_v8  ;;  %v3344_v62 = vadd.f32 %v12440_v47, %v3325_v55  ;;  %v3237_v47 = vadd.f32 %v12413_v41, %v3218_v50 }
 0x2b6   :  { %4667 = vmatpush.bf16.msrb.mxu3 %v11612_v11  ;;  %v3311_v6 = vadd.f32 %v12445_v9, %v3292_v4 }
 0x2b7   :  { %4649 = vmatpush.bf16.msrb.mxu2 %v11615_v46  ;;  %v3289_v35 = vadd.f32 %v12431_v16, %v3270_v5  ;;  %v3256_v38 = vadd.f32 %v12422_v33, %v3237_v47 }
 0x2b8   :  { %v3348_v60 = vpop.f32.mrf.mxu3  ;;  %4612 = vmatpush.bf16.msrb.mxu0 %v11613_v25  ;;  %4631 = vmatpush.bf16.msrb.mxu1 %v11614_v52  ;;  %v11471_v25 = vld [vmem:[#allocation14 + $0x1] ss:$0 sm:$0xff]  ;;  %v3330_v41 = vadd.f32 %v3329_v54, %v3311_v6 }
 0x2b9   :  { %v3308_v16 = vadd.f32 %v12433_v40, %v3289_v35  ;;  %v3275_v52 = vadd.f32 %v12427_v48, %v3256_v38 }
 0x2ba   :  { %4668 = vmatpush.bf16.msrb.mxu3 %v11616_v28 }
 0x2bb   :  { %v3554_v22 = vpop.f32.mrf.mxu0  ;;  %4650 = vmatpush.bf16.msrb.mxu2 %v11619_v26  ;;  %v3327_v13 = vadd.f32 %v12447_v37, %v3308_v16  ;;  %v3294_v5 = vadd.f32 %v12460_v63, %v3275_v52 }
 0x2bc   :  { %4613 = vmatpush.bf16.msrb.mxu0 %v11617_v18  ;;  %v3331_v61 = vpop.f32.mrf.mxu2  ;;  %v3573_v36 = vpop.f32.mrf.mxu1  ;;  %4632 = vmatpush.bf16.msrb.mxu1 %v11618_v30  ;;  %v3555_v14 = vadd.f32 %v3554_v22, %v3344_v62 }
 0x2bd   :  { %v3346_v40 = vadd.f32 %v12453_v2, %v3327_v13  ;;  %v3349_v2 = vadd.f32 %v3348_v60, %v3330_v41  ;;  %v3313_v9 = vadd.f32 %v12462_v19, %v3294_v5  ;;  %v11624_v5 = vld [vmem:[#allocation13 + $0x230] sm:$0xff] }
 0x2be   :  { %4669 = vmatpush.bf16.msrb.mxu3 %v11620_v58  ;;  %v3574_v57 = vadd.f32 %v3573_v36, %v3555_v14 }
 0x2bf   :  { %4651 = vmatpush.bf16.msrb.mxu2 %v11621_v32  ;;  %v3332_v30 = vadd.f32 %v3331_v61, %v3313_v9 }
 0x2c0   :  { %v3350_v23 = vpop.f32.mrf.mxu3 }
 0x2c1   :  { %v3351_v58 = vadd.f32 %v3350_v23, %v3332_v30 }
 0x2c2   :  { %4670 = vmatpush.bf16.msrb.mxu3 %v11622_v20 }
 0x2c3   :  { %v3556_v8 = vpop.f32.mrf.mxu0 }
 0x2c4   :  { %v3575_v43 = vpop.f32.mrf.mxu1  ;;  %v3592_v59 = vpop.f32.mrf.mxu2  ;;  %v3557_v37 = vadd.f32 %v3556_v8, %v3346_v40 }
 0x2c5   :  { %v3593_v11 = vadd.f32 %v3592_v59, %v3574_v57 }
 0x2c6   :  { %v3576_v55 = vadd.f32 %v3575_v43, %v3557_v37 }
 0x2c8   :  { %v3611_v7 = vpop.f32.mrf.mxu3 }
 0x2c9   :  { %v3612_v31 = vadd.f32 %v3611_v7, %v3593_v11  ;;  %v11623_v7 = vld [vmem:[#allocation13 + $0x238] sm:$0xff] }
 0x2cb   :  { %v3621_v53 = vadd.f32 %v3612_v31, %v12333_v15  ;;  %v3559_v46 = vpop.f32.mrf.mxu0 }
 0x2cc   :  { %v3578_v33 = vpop.f32.mrf.mxu1  ;;  %v3594_v17 = vpop.f32.mrf.mxu2  ;;  %v3560_v22 = vadd.f32 %v3559_v46, %v3349_v2 }
 0x2cd   :  { %v3630_v28 = vmul.f32 %v11471_v25, %v3621_v53  ;;  %v3595_v35 = vadd.f32 %v3594_v17, %v3576_v55 }
 0x2ce   :  { %v3579_v54 = vadd.f32 %v3578_v33, %v3560_v22  ;;  %v11626_v22 = vld [vmem:[#allocation13 + $0x278] sm:$0xff] }
 0x2cf   :  { %3635 = vst [vmem:[#allocation16 + $0x20] sm:$0xff] %v3630_v28 }
 0x2d0   :  { %v3613_v18 = vpop.f32.mrf.mxu3 }
 0x2d1   :  { %v3614_v36 = vadd.f32 %v3613_v18, %v3595_v35  ;;  %v11627_v18 = vld [vmem:[#allocation13 + $0x220] sm:$0xff] }
 0x2d3   :  { %v3622_v48 = vadd.f32 %v3614_v36, %v12341_v10  ;;  %v3561_v12 = vpop.f32.mrf.mxu0 }
 0x2d4   :  { %v3580_v63 = vpop.f32.mrf.mxu1  ;;  %v3597_v26 = vpop.f32.mrf.mxu2  ;;  %v3562_v16 = vadd.f32 %v3561_v12, %v3351_v58 }
 0x2d5   :  { %v3631_v62 = vmul.f32 %v11471_v25, %v3622_v48  ;;  %v3598_v50 = vadd.f32 %v3597_v26, %v3579_v54  ;;  %v11628_v48 = vld [vmem:[#allocation13 + $0x270] sm:$0xff]  ;;  %v11629_v54 = vld [vmem:[#allocation13 + $0x218] sm:$0xff]  ;;  %v11630_v26 = vld [vmem:[#allocation13 + $0x268] sm:$0xff] }
 0x2d6   :  { %v3581_v19 = vadd.f32 %v3580_v63, %v3562_v16 }
 0x2d7   :  { %3636 = vst [vmem:[#allocation16 + $0x28] sm:$0xff] %v3631_v62 }
 0x2d8   :  { %v3616_v60 = vpop.f32.mrf.mxu3 }
 0x2d9   :  { %v3617_v14 = vadd.f32 %v3616_v60, %v3598_v50  ;;  %v11631_v50 = vld [vmem:[#allocation13 + $0x210] sm:$0xff] }
 0x2db   :  { %v3623_v0 = vadd.f32 %v3617_v14, %v12346_v45  ;;  %v3906_v13 = vpop.f32.mrf.mxu0  ;;  %v11632_v14 = vld [vmem:[#allocation13 + $0x260] sm:$0xff] }
 0x2dc   :  { %v3599_v20 = vpop.f32.mrf.mxu2  ;;  %v3925_v61 = vpop.f32.mrf.mxu1 }
 0x2dd   :  { %v3632_v32 = vmul.f32 %v11471_v25, %v3623_v0  ;;  %v3600_v47 = vadd.f32 %v3599_v20, %v3581_v19  ;;  %v3926_v40 = vadd.f32 %v3925_v61, %v3906_v13  ;;  %v11633_v19 = vld [vmem:[#allocation13 + $0x208] sm:$0xff] }
 0x2df   :  { %3637 = vst [vmem:[#allocation16 + $0x30] sm:$0xff] %v3632_v32 }
 0x2e0   :  { %v3618_v4 = vpop.f32.mrf.mxu3 }
 0x2e1   :  { %v3619_v57 = vadd.f32 %v3618_v4, %v3600_v47  ;;  %v11634_v4 = vld [vmem:[#allocation13 + $0x258] sm:$0xff] }
 0x2e3   :  { %v3624_v8 = vadd.f32 %v3619_v57, %v12350_v42  ;;  %v3908_v43 = vpop.f32.mrf.mxu0  ;;  %v11635_v57 = vld [vmem:[#allocation13 + $0x200] sm:$0xff] }
 0x2e4   :  { %v3927_v59 = vpop.f32.mrf.mxu1  ;;  %v3944_v38 = vpop.f32.mrf.mxu2 }
 0x2e5   :  { %v3633_v23 = vmul.f32 %v11471_v25, %v3624_v8  ;;  %v3928_v11 = vadd.f32 %v3927_v59, %v3908_v43  ;;  %v11625_v25 = vld [vmem:[#allocation13 + $0x228] sm:$0xff]  ;;  %v11636_v59 = vld [vmem:[#allocation13 + $0x250] sm:$0xff] }
 0x2e6   :  { %v11056_v43 = vld [vmem:[#allocation2 + $0x238] sm:$0xff] }
 0x2e7   :  { %3638 = vst [vmem:[#allocation16 + $0x38] sm:$0xff] %v3633_v23  ;;  %v4510_v6 = vpack.c.bf16 %v3928_v11, %v3926_v40  ;;  %v11064_v23 = vld [vmem:[#allocation2 + $0x278] sm:$0xff]  ;;  %v11063_v11 = vld [vmem:[#allocation2 + $0x270] sm:$0xff] }
 0x2e8   :  { %v3963_v37 = vpop.f32.mrf.mxu3 }
 0x2e9   :  { %4538 = vmatmul.bf16.vlgmr.msra.gmra.mxu0 %v4510_v6  ;;  %v3964_v53 = vadd.f32 %v3963_v37, %v3944_v38  ;;  %v11055_v38 = vld [vmem:[#allocation2 + $0x230] sm:$0xff] }
 0x2ea   :  { %4682 = vmatpush.bf16.msra.mxu0 %v11623_v7 }
 0x2eb   :  { %v3911_v31 = vpop.f32.mrf.mxu0 }
 0x2ec   :  { %v3930_v52 = vpop.f32.mrf.mxu1  ;;  %v3946_v41 = vpop.f32.mrf.mxu2 }
 0x2ed   :  { %v3931_v35 = vadd.f32 %v3930_v52, %v3911_v31  ;;  %v11637_v31 = vld [vmem:[#allocation13 + $0x248] sm:$0xff] }
 0x2ee   :  { %4683 = vmatpush.bf16.msra.mxu0 %v11624_v5  ;;  %v11072_v5 = vld [vmem:[#allocation2 + $0x2b8] sm:$0xff] }
 0x2f0   :  { %v3965_v55 = vpop.f32.mrf.mxu3 }
 0x2f1   :  { %v3966_v46 = vadd.f32 %v3965_v55, %v3946_v41  ;;  %v11054_v41 = vld [vmem:[#allocation2 + $0x228] sm:$0xff] }
 0x2f2   :  { %4684 = vmatpush.bf16.msra.mxu0 %v11625_v25  ;;  %v11053_v25 = vld [vmem:[#allocation2 + $0x220] sm:$0xff] }
 0x2f3   :  { %v4511_v28 = vpack.c.bf16 %v3966_v46, %v3964_v53  ;;  %v3913_v33 = vpop.f32.mrf.mxu0  ;;  %v11062_v53 = vld [vmem:[#allocation2 + $0x268] sm:$0xff]  ;;  %v11638_v46 = vld [vmem:[#allocation13 + $0x240] sm:$0xff] }
 0x2f4   :  { %v3932_v17 = vpop.f32.mrf.mxu1  ;;  %v3949_v2 = vpop.f32.mrf.mxu2 }
 0x2f5   :  { %4557 = vmatmul.bf16.vlgmr.msra.gmra.mxu1 %v4511_v28  ;;  %v3933_v9 = vadd.f32 %v3932_v17, %v3913_v33  ;;  %v11061_v33 = vld [vmem:[#allocation2 + $0x260] sm:$0xff]  ;;  %v11071_v17 = vld [vmem:[#allocation2 + $0x2b0] sm:$0xff] }
 0x2f6   :  { %4701 = vmatpush.bf16.msra.mxu1 %v11626_v22  ;;  %4685 = vmatpush.bf16.msra.mxu0 %v11627_v18  ;;  %v11080_v22 = vld [vmem:[#allocation2 + $0x2f8] sm:$0xff] }
 0x2f7   :  { %v4520_v36 = vpack.c.bf16 %v3933_v9, %v3931_v35 }
 0x2f8   :  { %v3968_v30 = vpop.f32.mrf.mxu3 }
 0x2f9   :  { %4543 = vmatmul.bf16.gmra.mxu0 %v4520_v36  ;;  %v3969_v58 = vadd.f32 %v3968_v30, %v3949_v2  ;;  %v11052_v30 = vld [vmem:[#allocation2 + $0x218] sm:$0xff] }
 0x2fa   :  { %4702 = vmatpush.bf16.msra.mxu1 %v11628_v48  ;;  %4686 = vmatpush.bf16.msra.mxu0 %v11629_v54  ;;  %v11060_v48 = vld [vmem:[#allocation2 + $0x258] sm:$0xff]  ;;  %v11070_v54 = vld [vmem:[#allocation2 + $0x2a8] sm:$0xff] }
 0x2fb   :  { %v4367_v12 = vpop.f32.mrf.mxu0 }
 0x2fc   :  { %v3951_v62 = vpop.f32.mrf.mxu2  ;;  %v4386_v63 = vpop.f32.mrf.mxu1 }
 0x2fe   :  { %4703 = vmatpush.bf16.msra.mxu1 %v11630_v26  ;;  %4687 = vmatpush.bf16.msra.mxu0 %v11631_v50  ;;  %v11059_v26 = vld [vmem:[#allocation2 + $0x250] sm:$0xff] }
 0x300   :  { %v3970_v16 = vpop.f32.mrf.mxu3 }
 0x301   :  { %v3971_v60 = vadd.f32 %v3970_v16, %v3951_v62  ;;  %v11051_v62 = vld [vmem:[#allocation2 + $0x210] sm:$0xff]  ;;  %v11069_v16 = vld [vmem:[#allocation2 + $0x2a0] sm:$0xff] }
 0x302   :  { %4704 = vmatpush.bf16.msra.mxu1 %v11632_v14  ;;  %4688 = vmatpush.bf16.msra.mxu0 %v11633_v19  ;;  %v11050_v19 = vld [vmem:[#allocation2 + $0x208] sm:$0xff] }
 0x303   :  { %v4521_v0 = vpack.c.bf16 %v3971_v60, %v3969_v58  ;;  %v4369_v13 = vpop.f32.mrf.mxu0  ;;  %v11078_v60 = vld [vmem:[#allocation2 + $0x2e8] sm:$0xff] }
 0x304   :  { %v4512_v32 = vpack.c.bf16 %v4369_v13, %v4367_v12  ;;  %v4388_v20 = vpop.f32.mrf.mxu1  ;;  %v4405_v61 = vpop.f32.mrf.mxu2  ;;  %v11079_v12 = vld [vmem:[#allocation2 + $0x2f0] sm:$0xff]  ;;  %v11058_v13 = vld [vmem:[#allocation2 + $0x248] sm:$0xff] }
 0x305   :  { %4562 = vmatmul.bf16.gmra.mxu1 %v4521_v0  ;;  %v4513_v47 = vpack.c.bf16 %v4388_v20, %v4386_v63  ;;  %v11068_v20 = vld [vmem:[#allocation2 + $0x298] sm:$0xff] }
 0x306   :  { %4705 = vmatpush.bf16.msra.mxu1 %v11634_v4  ;;  %4576 = vmatmul.bf16.vlgmr.msra.gmra.mxu2 %v4512_v32  ;;  %v11049_v4 = vld [vmem:[#allocation2 + $0x200] sm:$0xff] }
 0x307   :  { %4689 = vmatpush.bf16.msra.mxu0 %v11635_v57  ;;  %4595 = vmatmul.bf16.vlgmr.msra.gmra.mxu3 %v4513_v47  ;;  %v11057_v57 = vld [vmem:[#allocation2 + $0x240] sm:$0xff] }
 0x308   :  { %v4424_v8 = vpop.f32.mrf.mxu3  ;;  %4912 = vmatpush.bf16.msra.mxu2 %v11056_v43  ;;  %4931 = vmatpush.bf16.msra.mxu3 %v11064_v23 }
 0x30a   :  { %4706 = vmatpush.bf16.msra.mxu1 %v11636_v59  ;;  %v11067_v59 = vld [vmem:[#allocation2 + $0x290] sm:$0xff] }
 0x30b   :  { %v4372_v40 = vpop.f32.mrf.mxu0 }
 0x30c   :  { %v4391_v6 = vpop.f32.mrf.mxu1  ;;  %v4407_v37 = vpop.f32.mrf.mxu2  ;;  %4913 = vmatpush.bf16.msra.mxu2 %v11055_v38  ;;  %4932 = vmatpush.bf16.msra.mxu3 %v11063_v11  ;;  %v9733_v11 = vld [vmem:[#allocation5 + $0x370] sm:$0xf] }
 0x30d   :  { %v4514_v7 = vpack.c.bf16 %v4407_v37, %v4405_v61  ;;  %v11077_v61 = vld [vmem:[#allocation2 + $0x2e0] sm:$0xff]  ;;  %v9797_v37 = vld [vmem:[#allocation5 + $0x3f0] sm:$0xf] }
 0x30e   :  { %4707 = vmatpush.bf16.msra.mxu1 %v11637_v31 }
 0x30f   :  { %4614 = vmatmul.bf16.vlgmr.msrb.gmra.mxu0 %v4514_v7 }
 0x310   :  { %v4426_v52 = vpop.f32.mrf.mxu3  ;;  %4914 = vmatpush.bf16.msra.mxu2 %v11054_v41  ;;  %4933 = vmatpush.bf16.msra.mxu3 %v11062_v53  ;;  %v11066_v41 = vld [vmem:[#allocation2 + $0x288] sm:$0xff] }
 0x311   :  { %v4515_v55 = vpack.c.bf16 %v4426_v52, %v4424_v8  ;;  %4950 = vmatpush.bf16.msrb.mxu0 %v11072_v5  ;;  %v11240_v52 = vld [vmem:[#allocation5 + $0x3f4] sm:$0xf0]  ;;  %v9725_v5 = vld [vmem:[#allocation5 + $0x360] sm:$0xf] }
 0x312   :  { %4708 = vmatpush.bf16.msra.mxu1 %v11638_v46  ;;  %v9798_v53 = vor.u32 %v11240_v52, %v9797_v37  ;;  %v11075_v46 = vld [vmem:[#allocation2 + $0x2d0] sm:$0xff] }
 0x313   :  { %v4374_v28 = vpop.f32.mrf.mxu0  ;;  %v9701_v37 = vld [vmem:[#allocation5 + $0x330] sm:$0xf] }
 0x314   :  { %v4522_v2 = vpack.c.bf16 %v4374_v28, %v4372_v40  ;;  %v4393_v35 = vpop.f32.mrf.mxu1  ;;  %v4410_v9 = vpop.f32.mrf.mxu2  ;;  %4915 = vmatpush.bf16.msra.mxu2 %v11053_v25  ;;  %4934 = vmatpush.bf16.msra.mxu3 %v11061_v33  ;;  %v11076_v40 = vld [vmem:[#allocation2 + $0x2d8] sm:$0xff]  ;;  %v9789_v25 = vld [vmem:[#allocation5 + $0x3e0] sm:$0xf]  ;;  %v11238_v33 = vld [vmem:[#allocation5 + $0x3e4] sm:$0xf0] }
 0x315   :  { %4633 = vmatmul.bf16.vlgmr.msrb.gmra.mxu1 %v4515_v55  ;;  %v4523_v18 = vpack.c.bf16 %v4393_v35, %v4391_v6  ;;  %4951 = vmatpush.bf16.msrb.mxu0 %v11071_v17  ;;  %v11224_v6 = vld [vmem:[#allocation5 + $0x374] sm:$0xf0]  ;;  %v11222_v55 = vld [vmem:[#allocation5 + $0x364] sm:$0xf0]  ;;  %v9790_v17 = vor.u32 %v11238_v33, %v9789_v25  ;;  %v11237_v25 = vld [vmem:[#allocation5 + $0x3e4] sm:$0xf] }
 0x316   :  { %4581 = vmatmul.bf16.gmra.mxu2 %v4522_v2  ;;  %4969 = vmatpush.bf16.msrb.mxu1 %v11080_v22  ;;  %v9734_v31 = vor.u32 %v11224_v6, %v9733_v11  ;;  %v9726_v28 = vor.u32 %v11222_v55, %v9725_v5  ;;  %v11065_v22 = vld [vmem:[#allocation2 + $0x280] sm:$0xff]  ;;  %v11219_v5 = vld [vmem:[#allocation5 + $0x354] sm:$0xf]  ;;  %v9719_v55 = vld [vmem:[#allocation5 + $0x358] sm:$0xf0] }
 0x317   :  { %4600 = vmatmul.bf16.gmra.mxu3 %v4523_v18  ;;  %v9791_v33 = vld [vmem:[#allocation5 + $0x3e8] sm:$0xf0] }
 0x318   :  { %v4429_v36 = vpop.f32.mrf.mxu3  ;;  %4916 = vmatpush.bf16.msra.mxu2 %v11052_v30  ;;  %4935 = vmatpush.bf16.msra.mxu3 %v11060_v48  ;;  %v9717_v30 = vld [vmem:[#allocation5 + $0x350] sm:$0xf]  ;;  %v11220_v48 = vld [vmem:[#allocation5 + $0x354] sm:$0xf0] }
 0x319   :  { %4952 = vmatpush.bf16.msrb.mxu0 %v11070_v54  ;;  %v9781_v54 = vld [vmem:[#allocation5 + $0x3d0] sm:$0xf] }
 0x31a   :  { %4970 = vmatpush.bf16.msrb.mxu1 %v11079_v12 }
 0x31b   :  { %v4443_v63 = vpop.f32.mrf.mxu0 }
 0x31c   :  { %v4412_v58 = vpop.f32.mrf.mxu2  ;;  %v4462_v50 = vpop.f32.mrf.mxu1  ;;  %4917 = vmatpush.bf16.msra.mxu2 %v11051_v62  ;;  %4936 = vmatpush.bf16.msra.mxu3 %v11059_v26  ;;  %v9718_v62 = vor.u32 %v11220_v48, %v9717_v30  ;;  %v11223_v26 = vld [vmem:[#allocation5 + $0x374] sm:$0xf]  ;;  %v11217_v30 = vld [vmem:[#allocation5 + $0x344] sm:$0xf]  ;;  %v9711_v48 = vld [vmem:[#allocation5 + $0x348] sm:$0xf0] }
 0x31d   :  { %v4524_v14 = vpack.c.bf16 %v4412_v58, %v4410_v9  ;;  %4953 = vmatpush.bf16.msrb.mxu0 %v11069_v16  ;;  %v9735_v16 = vld [vmem:[#allocation5 + $0x378] sm:$0xf0] }
 0x31e   :  { %4971 = vmatpush.bf16.msrb.mxu1 %v11078_v60  ;;  %v11073_v60 = vld [vmem:[#allocation2 + $0x2c0] sm:$0xff] }
 0x31f   :  { %4619 = vmatmul.bf16.gmra.mxu0 %v4524_v14  ;;  %v9738_v14 = vor.u32 %v11223_v26, %v9735_v16  ;;  %v11212_v16 = vld [vmem:[#allocation5 + $0x314] sm:$0xf0] }
 0x320   :  { %v4431_v0 = vpop.f32.mrf.mxu3  ;;  %4918 = vmatpush.bf16.msra.mxu2 %v11050_v19  ;;  %4937 = vmatpush.bf16.msra.mxu3 %v11058_v13  ;;  %v11218_v19 = vld [vmem:[#allocation5 + $0x344] sm:$0xf0]  ;;  %v9773_v13 = vld [vmem:[#allocation5 + $0x3c0] sm:$0xf] }
 0x321   :  { %v4525_v32 = vpack.c.bf16 %v4431_v0, %v4429_v36  ;;  %4954 = vmatpush.bf16.msrb.mxu0 %v11068_v20  ;;  %v11074_v36 = vld [vmem:[#allocation2 + $0x2c8] sm:$0xff]  ;;  %v9709_v0 = vld [vmem:[#allocation5 + $0x340] sm:$0xf] }
 0x322   :  { %4972 = vmatpush.bf16.msrb.mxu1 %v11077_v61  ;;  %v9710_v20 = vor.u32 %v11218_v19, %v9709_v0  ;;  %v11234_v61 = vld [vmem:[#allocation5 + $0x3c4] sm:$0xf0]  ;;  %v11228_v19 = vld [vmem:[#allocation5 + $0x394] sm:$0xf0] }
 0x323   :  { %v4445_v47 = vpop.f32.mrf.mxu0 }
 0x324   :  { %v4516_v8 = vpack.c.bf16 %v4445_v47, %v4443_v63  ;;  %v4464_v43 = vpop.f32.mrf.mxu1  ;;  %v4481_v23 = vpop.f32.mrf.mxu2  ;;  %4919 = vmatpush.bf16.msra.mxu2 %v11049_v4  ;;  %4938 = vmatpush.bf16.msra.mxu3 %v11057_v57  ;;  %v11236_v63 = vld [vmem:[#allocation5 + $0x3d4] sm:$0xf0]  ;;  %v11221_v47 = vld [vmem:[#allocation5 + $0x364] sm:$0xf]  ;;  %v9727_v4 = vld [vmem:[#allocation5 + $0x368] sm:$0xf0] }
 0x325   :  { %4638 = vmatmul.bf16.gmra.mxu1 %v4525_v32  ;;  %v4517_v38 = vpack.c.bf16 %v4464_v43, %v4462_v50  ;;  %4955 = vmatpush.bf16.msrb.mxu0 %v11067_v59  ;;  %v9782_v50 = vor.u32 %v11236_v63, %v9781_v54  ;;  %v9730_v59 = vor.u32 %v11221_v47, %v9727_v4  ;;  %v11235_v54 = vld [vmem:[#allocation5 + $0x3d4] sm:$0xf]  ;;  %v11233_v4 = vld [vmem:[#allocation5 + $0x3c4] sm:$0xf] }
 0x326   :  { %4652 = vmatmul.bf16.vlgmr.msrb.gmra.mxu2 %v4516_v8  ;;  %4973 = vmatpush.bf16.msrb.mxu1 %v11076_v40  ;;  %v9799_v40 = vld [vmem:[#allocation5 + $0x3f8] sm:$0xf0]  ;;  %v9714_v63 = vor.u32 %v11217_v30, %v9711_v48  ;;  %v11209_v30 = vld [vmem:[#allocation5 + $0x304] sm:$0xf]  ;;  %v9679_v48 = vld [vmem:[#allocation5 + $0x308] sm:$0xf0] }
 0x327   :  { %4671 = vmatmul.bf16.vlgmr.msrb.gmra.mxu3 %v4517_v38  ;;  %v11239_v38 = vld [vmem:[#allocation5 + $0x3f4] sm:$0xf] }
 0x328   :  { %v4500_v7 = vpop.f32.mrf.mxu3  ;;  %5264 = vmatpush.bf16.msrb.mxu2 %v9734_v31  ;;  %5283 = vmatpush.bf16.msrb.mxu3 %v9798_v53  ;;  %v9802_v6 = vor.u32 %v11239_v38, %v9799_v40  ;;  %v9765_v31 = vld [vmem:[#allocation5 + $0x3b0] sm:$0xf]  ;;  %v11232_v53 = vld [vmem:[#allocation5 + $0x3b4] sm:$0xf0]  ;;  %v11226_v40 = vld [vmem:[#allocation5 + $0x384] sm:$0xf0] }
 0x329   :  { %4956 = vmatpush.bf16.msrb.mxu0 %v11066_v41 }
 0x32a   :  { %4974 = vmatpush.bf16.msrb.mxu1 %v11075_v46  ;;  %v9766_v46 = vor.u32 %v11232_v53, %v9765_v31  ;;  %v11231_v31 = vld [vmem:[#allocation5 + $0x3b4] sm:$0xf]  ;;  %v10029_v53 = vld [vmem:[#allocation7 + $0x7c0] sm:$0xf] }
 0x32b   :  { %v4448_v2 = vpop.f32.mrf.mxu0 }
 0x32c   :  { %v4467_v35 = vpop.f32.mrf.mxu1  ;;  %v4483_v9 = vpop.f32.mrf.mxu2  ;;  %5265 = vmatpush.bf16.msrb.mxu2 %v9726_v28  ;;  %5284 = vmatpush.bf16.msrb.mxu3 %v9790_v17  ;;  %v9722_v28 = vor.u32 %v11219_v5, %v9719_v55  ;;  %v9693_v17 = vld [vmem:[#allocation5 + $0x320] sm:$0xf]  ;;  %v11211_v55 = vld [vmem:[#allocation5 + $0x314] sm:$0xf] }
 0x32d   :  { %v4518_v18 = vpack.c.bf16 %v4483_v9, %v4481_v23  ;;  %4957 = vmatpush.bf16.msrb.mxu0 %v11065_v22  ;;  %v9774_v23 = vor.u32 %v11234_v61, %v9773_v13  ;;  %v9757_v9 = vld [vmem:[#allocation5 + $0x3a0] sm:$0xf]  ;;  %v11230_v22 = vld [vmem:[#allocation5 + $0x3a4] sm:$0xf0]  ;;  %v11215_v13 = vld [vmem:[#allocation5 + $0x334] sm:$0xf] }
 0x32e   :  { %4975 = vmatpush.bf16.msrb.mxu1 %v11074_v36  ;;  %v9758_v36 = vor.u32 %v11230_v22, %v9757_v9  ;;  %v11301_v5 = vld [vmem:[#allocation7 + $0x7dc] sm:$0xf0] }
 0x32f   :  { %4690 = vmatmul.bf16.vlgmr.msra.gmra.mxu0 %v4518_v18  ;;  %v9997_v9 = vld [vmem:[#allocation7 + $0x780] sm:$0xf] }
 0x330   :  { %v4502_v12 = vpop.f32.mrf.mxu3  ;;  %5266 = vmatpush.bf16.msrb.mxu2 %v9718_v62  ;;  %5285 = vmatpush.bf16.msrb.mxu3 %v9782_v50  ;;  %v9685_v50 = vld [vmem:[#allocation5 + $0x310] sm:$0xf] }
 0x331   :  { %v4519_v58 = vpack.c.bf16 %v4502_v12, %v4500_v7  ;;  %5302 = vmatpush.bf16.msra.mxu0 %v9738_v14  ;;  %v11216_v7 = vld [vmem:[#allocation5 + $0x334] sm:$0xf0]  ;;  %v9783_v12 = vld [vmem:[#allocation5 + $0x3d8] sm:$0xf0]  ;;  %v9686_v0 = vor.u32 %v11212_v16, %v9685_v50 }
 0x332   :  { %4976 = vmatpush.bf16.msrb.mxu1 %v11073_v60  ;;  %v9702_v41 = vor.u32 %v11216_v7, %v9701_v37  ;;  %v9786_v26 = vor.u32 %v11235_v54, %v9783_v12  ;;  %v9749_v60 = vld [vmem:[#allocation5 + $0x390] sm:$0xf]  ;;  %v11227_v12 = vld [vmem:[#allocation5 + $0x394] sm:$0xf] }
 0x333   :  { %v4450_v32 = vpop.f32.mrf.mxu0  ;;  %v9750_v61 = vor.u32 %v11228_v19, %v9749_v60  ;;  %v9965_v60 = vld [vmem:[#allocation7 + $0x740] sm:$0xf] }
 0x334   :  { %v4526_v57 = vpack.c.bf16 %v4450_v32, %v4448_v2  ;;  %v4469_v8 = vpop.f32.mrf.mxu1  ;;  %v4486_v43 = vpop.f32.mrf.mxu2  ;;  %5267 = vmatpush.bf16.msrb.mxu2 %v9710_v20  ;;  %5286 = vmatpush.bf16.msrb.mxu3 %v9774_v23  ;;  %v9794_v2 = vor.u32 %v11237_v25, %v9791_v33  ;;  %v9703_v32 = vld [vmem:[#allocation5 + $0x338] sm:$0xf0]  ;;  %v11210_v23 = vld [vmem:[#allocation5 + $0x304] sm:$0xf0]  ;;  %v11229_v25 = vld [vmem:[#allocation5 + $0x3a4] sm:$0xf] }
 0x335   :  { %4709 = vmatmul.bf16.vlgmr.msra.gmra.mxu1 %v4519_v58  ;;  %v4527_v11 = vpack.c.bf16 %v4469_v8, %v4467_v35  ;;  %5303 = vmatpush.bf16.msra.mxu0 %v9730_v59  ;;  %v11214_v35 = vld [vmem:[#allocation5 + $0x324] sm:$0xf0]  ;;  %v9706_v47 = vor.u32 %v11215_v13, %v9703_v32  ;;  %v9741_v59 = vld [vmem:[#allocation5 + $0x380] sm:$0xf]  ;;  %v9759_v33 = vld [vmem:[#allocation5 + $0x3a8] sm:$0xf0] }
 0x336   :  { %4657 = vmatmul.bf16.gmra.mxu2 %v4526_v57  ;;  %5321 = vmatpush.bf16.msra.mxu1 %v9802_v6  ;;  %v9694_v18 = vor.u32 %v11214_v35, %v9693_v17  ;;  %v9775_v57 = vld [vmem:[#allocation5 + $0x3c8] sm:$0xf0]  ;;  %v9742_v37 = vor.u32 %v11226_v40, %v9741_v59  ;;  %v10031_v35 = vld [vmem:[#allocation7 + $0x7e0] sm:$0xf0]  ;;  %v9762_v22 = vor.u32 %v11229_v25, %v9759_v33  ;;  %v9973_v25 = vld [vmem:[#allocation7 + $0x748] sm:$0xf] }
 0x337   :  { %4676 = vmatmul.bf16.gmra.mxu3 %v4527_v11  ;;  %v9778_v8 = vor.u32 %v11233_v4, %v9775_v57  ;;  %v11213_v11 = vld [vmem:[#allocation5 + $0x324] sm:$0xf]  ;;  %v9695_v6 = vld [vmem:[#allocation5 + $0x328] sm:$0xf0]  ;;  %v11302_v4 = vld [vmem:[#allocation7 + $0x7e4] sm:$0xf0] }
 0x338   :  { %v4505_v52 = vpop.f32.mrf.mxu3  ;;  %5268 = vmatpush.bf16.msrb.mxu2 %v9702_v41  ;;  %5287 = vmatpush.bf16.msrb.mxu3 %v9766_v46  ;;  %v9698_v7 = vor.u32 %v11213_v11, %v9695_v6  ;;  %v10030_v46 = vor.u32 %v11301_v5, %v10029_v53  ;;  %v9743_v13 = vld [vmem:[#allocation5 + $0x388] sm:$0xf0]  ;;  %v11281_v32 = vld [vmem:[#allocation7 + $0x744] sm:$0xf]  ;;  %v10005_v11 = vld [vmem:[#allocation7 + $0x788] sm:$0xf] }
 0x339   :  { %5304 = vmatpush.bf16.msra.mxu0 %v9722_v28  ;;  %v9687_v28 = vld [vmem:[#allocation5 + $0x318] sm:$0xf0]  ;;  %v11273_v59 = vld [vmem:[#allocation7 + $0x704] sm:$0xf]  ;;  %v11294_v6 = vld [vmem:[#allocation7 + $0x7a4] sm:$0xf0] }
 0x33a   :  { %5322 = vmatpush.bf16.msra.mxu1 %v9794_v2  ;;  %v9690_v17 = vor.u32 %v11211_v55, %v9687_v28  ;;  %v11297_v2 = vld [vmem:[#allocation7 + $0x7c4] sm:$0xf]  ;;  %v9901_v53 = vld [vmem:[#allocation7 + $0x6c0] sm:$0xf]  ;;  %v11286_v33 = vld [vmem:[#allocation7 + $0x764] sm:$0xf0] }
 0x33b   :  { %v9935_v40 = vld [vmem:[#allocation7 + $0x720] sm:$0xf0]  ;;  %v11269_v5 = vld [vmem:[#allocation7 + $0x6dc] sm:$0xf0] }
 0x33c   :  { %v4488_v62 = vpop.f32.mrf.mxu2  ;;  %5269 = vmatpush.bf16.msrb.mxu2 %v9694_v18  ;;  %5288 = vmatpush.bf16.msrb.mxu3 %v9758_v36  ;;  %v10034_v18 = vor.u32 %v11297_v2, %v10031_v35  ;;  %v11293_v36 = vld [vmem:[#allocation7 + $0x79c] sm:$0xf0]  ;;  %v11265_v55 = vld [vmem:[#allocation7 + $0x6c4] sm:$0xf]  ;;  %v9974_v2 = vor.u32 %v11286_v33, %v9973_v25  ;;  %v11290_v35 = vld [vmem:[#allocation7 + $0x78c] sm:$0xf] }
 0x33d   :  { %v4528_v58 = vpack.c.bf16 %v4488_v62, %v4486_v43  ;;  %5305 = vmatpush.bf16.msra.mxu0 %v9714_v63  ;;  %v9677_v43 = vld [vmem:[#allocation5 + $0x300] sm:$0xf]  ;;  %v9998_v54 = vor.u32 %v11293_v36, %v9997_v9  ;;  %v9751_v62 = vld [vmem:[#allocation5 + $0x398] sm:$0xf0]  ;;  %v11289_v63 = vld [vmem:[#allocation7 + $0x784] sm:$0xf] }
 0x33e   :  { %5323 = vmatpush.bf16.msra.mxu1 %v9786_v26  ;;  %v9678_v38 = vor.u32 %v11210_v23, %v9677_v43  ;;  %v9999_v26 = vld [vmem:[#allocation7 + $0x7a0] sm:$0xf0]  ;;  %v9754_v16 = vor.u32 %v11227_v12, %v9751_v62  ;;  %v9933_v43 = vld [vmem:[#allocation7 + $0x700] sm:$0xf]  ;;  %v10007_v9 = vld [vmem:[#allocation7 + $0x7a8] sm:$0xf0] }
 0x33f   :  { %4695 = vmatmul.bf16.gmra.mxu0 %v4528_v58  ;;  %v9682_v58 = vor.u32 %v11209_v30, %v9679_v48  ;;  %v10002_v50 = vor.u32 %v11289_v63, %v9999_v26  ;;  %v11277_v23 = vld [vmem:[#allocation7 + $0x71c] sm:$0xf0]  ;;  %v9903_v28 = vld [vmem:[#allocation7 + $0x6e0] sm:$0xf0]  ;;  %v9941_v12 = vld [vmem:[#allocation7 + $0x708] sm:$0xf] }
 0x340   :  { %v4507_v14 = vpop.f32.mrf.mxu3  ;;  %5270 = vmatpush.bf16.msrb.mxu2 %v9686_v0  ;;  %5289 = vmatpush.bf16.msrb.mxu3 %v9750_v61  ;;  %v11225_v0 = vld [vmem:[#allocation5 + $0x384] sm:$0xf]  ;;  %v11261_v36 = vld [vmem:[#allocation7 + $0x69c] sm:$0xf0]  ;;  %v11278_v62 = vld [vmem:[#allocation7 + $0x724] sm:$0xf0] }
 0x341   :  { %v4529_v20 = vpack.c.bf16 %v4507_v14, %v4505_v52  ;;  %5306 = vmatpush.bf16.msra.mxu0 %v9706_v47  ;;  %v9767_v52 = vld [vmem:[#allocation5 + $0x3b8] sm:$0xf0]  ;;  %v11285_v14 = vld [vmem:[#allocation7 + $0x75c] sm:$0xf0]  ;;  %v10037_v47 = vld [vmem:[#allocation7 + $0x7c8] sm:$0xf]  ;;  %v9746_v57 = vor.u32 %v11225_v0, %v9743_v13  ;;  %v9942_v26 = vor.u32 %v11278_v62, %v9941_v12 }
 0x342   :  { %5324 = vmatpush.bf16.msra.mxu1 %v9778_v8  ;;  %v9770_v41 = vor.u32 %v11231_v31, %v9767_v52  ;;  %v9966_v19 = vor.u32 %v11285_v14, %v9965_v60  ;;  %v10038_v8 = vor.u32 %v11302_v4, %v10037_v47  ;;  %v11298_v31 = vld [vmem:[#allocation7 + $0x7cc] sm:$0xf]  ;;  %v11257_v30 = vld [vmem:[#allocation7 + $0x684] sm:$0xf]  ;;  %v9837_v60 = vld [vmem:[#allocation7 + $0x640] sm:$0xf] }
 0x343   :  { %v10039_v52 = vld [vmem:[#allocation7 + $0x7e8] sm:$0xf0]  ;;  %v11253_v14 = vld [vmem:[#allocation7 + $0x65c] sm:$0xf0]  ;;  %v11249_v0 = vld [vmem:[#allocation7 + $0x644] sm:$0xf] }
 0x344   :  { %5271 = vmatpush.bf16.msrb.mxu2 %v9678_v38  ;;  %5290 = vmatpush.bf16.msrb.mxu3 %v9742_v37  ;;  %v9934_v38 = vor.u32 %v11277_v23, %v9933_v43  ;;  %v9938_v37 = vor.u32 %v11273_v59, %v9935_v40  ;;  %v9839_v13 = vld [vmem:[#allocation7 + $0x660] sm:$0xf0]  ;;  %v11274_v47 = vld [vmem:[#allocation7 + $0x70c] sm:$0xf]  ;;  %v9805_v43 = vld [vmem:[#allocation7 + $0x600] sm:$0xf] }
 0x345   :  { %4714 = vmatmul.bf16.gmra.mxu1 %v4529_v20  ;;  %5307 = vmatpush.bf16.msra.mxu0 %v9698_v7  ;;  %v9967_v20 = vld [vmem:[#allocation7 + $0x760] sm:$0xf0]  ;;  %v10006_v7 = vor.u32 %v11294_v6, %v10005_v11  ;;  %v9943_v4 = vld [vmem:[#allocation7 + $0x728] sm:$0xf0]  ;;  %v11245_v23 = vld [vmem:[#allocation7 + $0x61c] sm:$0xf0] }
 0x346   :  { %4920 = vmatmul.bf16.vlgmr.msra.gmra.mxu2 %v12184_v21  ;;  %5325 = vmatpush.bf16.msra.mxu1 %v9770_v41  ;;  %v9970_v61 = vor.u32 %v11281_v32, %v9967_v20  ;;  %v10042_v41 = vor.u32 %v11298_v31, %v10039_v52  ;;  %v9909_v32 = vld [vmem:[#allocation7 + $0x6c8] sm:$0xf]  ;;  %v11241_v59 = vld [vmem:[#allocation7 + $0x604] sm:$0xf]  ;;  %v9911_v31 = vld [vmem:[#allocation7 + $0x6e8] sm:$0xf0] }
 0x347   :  { %4939 = vmatmul.bf16.vlgmr.msra.gmra.mxu3 %v12186_v27  ;;  %v11270_v20 = vld [vmem:[#allocation7 + $0x6e4] sm:$0xf0]  ;;  %v9807_v40 = vld [vmem:[#allocation7 + $0x620] sm:$0xf0]  ;;  %v11299_v33 = vld [vmem:[#allocation7 + $0x7d4] sm:$0xf] }
 0x348   :  { %5725 = vmatpush.bf16.msra.mxu2 %v10030_v46  ;;  %5744 = vmatpush.bf16.msra.mxu3 %v10034_v18  ;;  %v9902_v46 = vor.u32 %v11269_v5, %v9901_v53  ;;  %v9869_v18 = vld [vmem:[#allocation7 + $0x680] sm:$0xf]  ;;  %v9877_v11 = vld [vmem:[#allocation7 + $0x688] sm:$0xf]  ;;  %v10045_v5 = vld [vmem:[#allocation7 + $0x7d0] sm:$0xf] }
 0x349   :  { %5308 = vmatpush.bf16.msra.mxu0 %v9690_v17  ;;  %v9906_v17 = vor.u32 %v11265_v55, %v9903_v28  ;;  %v9870_v48 = vor.u32 %v11261_v36, %v9869_v18  ;;  %v11262_v6 = vld [vmem:[#allocation7 + $0x6a4] sm:$0xf0]  ;;  %v11303_v55 = vld [vmem:[#allocation7 + $0x7ec] sm:$0xf0]  ;;  %v11291_v62 = vld [vmem:[#allocation7 + $0x794] sm:$0xf] }
 0x34a   :  { %5326 = vmatpush.bf16.msra.mxu1 %v9762_v22  ;;  %v10010_v22 = vor.u32 %v11290_v35, %v10007_v9  ;;  %v9878_v52 = vor.u32 %v11262_v6, %v9877_v11  ;;  %v10046_v28 = vor.u32 %v11303_v55, %v10045_v5  ;;  %v11254_v25 = vld [vmem:[#allocation7 + $0x664] sm:$0xf0]  ;;  %v11258_v35 = vld [vmem:[#allocation7 + $0x68c] sm:$0xf]  ;;  %v10013_v36 = vld [vmem:[#allocation7 + $0x790] sm:$0xf] }
 0x34b   :  { %v9879_v9 = vld [vmem:[#allocation7 + $0x6a8] sm:$0xf0]  ;;  %v11246_v12 = vld [vmem:[#allocation7 + $0x624] sm:$0xf0]  ;;  %v11279_v11 = vld [vmem:[#allocation7 + $0x72c] sm:$0xf0] }
 0x34c   :  { %5726 = vmatpush.bf16.msra.mxu2 %v9998_v54  ;;  %5745 = vmatpush.bf16.msra.mxu3 %v10002_v50  ;;  %v9871_v54 = vld [vmem:[#allocation7 + $0x6a0] sm:$0xf0]  ;;  %v9975_v50 = vld [vmem:[#allocation7 + $0x768] sm:$0xf0]  ;;  %v9882_v18 = vor.u32 %v11258_v35, %v9879_v9  ;;  %v11275_v6 = vld [vmem:[#allocation7 + $0x714] sm:$0xf] }
 0x34d   :  { %5309 = vmatpush.bf16.msra.mxu0 %v9682_v58  ;;  %v9874_v63 = vor.u32 %v11257_v30, %v9871_v54  ;;  %v11282_v58 = vld [vmem:[#allocation7 + $0x74c] sm:$0xf]  ;;  %v11295_v30 = vld [vmem:[#allocation7 + $0x7ac] sm:$0xf0]  ;;  %v11300_v55 = vld [vmem:[#allocation7 + $0x7dc] sm:$0xf] }
 0x34e   :  { %5327 = vmatpush.bf16.msra.mxu1 %v9754_v16  ;;  %v9978_v16 = vor.u32 %v11282_v58, %v9975_v50  ;;  %v10014_v54 = vor.u32 %v11295_v30, %v10013_v36  ;;  %v11250_v58 = vld [vmem:[#allocation7 + $0x64c] sm:$0xf]  ;;  %v9989_v35 = vld [vmem:[#allocation7 + $0x758] sm:$0xf]  ;;  %v11292_v36 = vld [vmem:[#allocation7 + $0x79c] sm:$0xf] }
 0x34f   :  { %4958 = vmatmul.bf16.vlgmr.msrb.gmra.mxu0 %v12193_v51  ;;  %v9847_v50 = vld [vmem:[#allocation7 + $0x668] sm:$0xf0]  ;;  %v11288_v9 = vld [vmem:[#allocation7 + $0x774] sm:$0xf0]  ;;  %v10023_v30 = vld [vmem:[#allocation7 + $0x7b8] sm:$0xf0] }
 0x350   :  { %5727 = vmatpush.bf16.msra.mxu2 %v9966_v19  ;;  %5746 = vmatpush.bf16.msra.mxu3 %v9970_v61  ;;  %v9838_v19 = vor.u32 %v11253_v14, %v9837_v60  ;;  %v9842_v61 = vor.u32 %v11249_v0, %v9839_v13  ;;  %v9850_v60 = vor.u32 %v11250_v58, %v9847_v50  ;;  %v9981_v14 = vld [vmem:[#allocation7 + $0x750] sm:$0xf]  ;;  %v11259_v58 = vld [vmem:[#allocation7 + $0x694] sm:$0xf] }
 0x351   :  { %5763 = vmatpush.bf16.msrb.mxu0 %v10038_v8  ;;  %v9946_v8 = vor.u32 %v11274_v47, %v9943_v4  ;;  %v11287_v0 = vld [vmem:[#allocation7 + $0x76c] sm:$0xf0] }
 0x352   :  { %5328 = vmatpush.bf16.msra.mxu1 %v9746_v57  ;;  %v9910_v57 = vor.u32 %v11270_v20, %v9909_v32  ;;  %v9982_v13 = vor.u32 %v11287_v0, %v9981_v14  ;;  %v9983_v32 = vld [vmem:[#allocation7 + $0x770] sm:$0xf0]  ;;  %v10053_v20 = vld [vmem:[#allocation7 + $0x7d8] sm:$0xf] }
 0x353   :  { %v11280_v14 = vld [vmem:[#allocation7 + $0x734] sm:$0xf0] }
 0x354   :  { %5728 = vmatpush.bf16.msra.mxu2 %v9934_v38  ;;  %5747 = vmatpush.bf16.msra.mxu3 %v9938_v37  ;;  %v9806_v38 = vor.u32 %v11245_v23, %v9805_v43  ;;  %v9810_v37 = vor.u32 %v11241_v59, %v9807_v40  ;;  %v9815_v43 = vld [vmem:[#allocation7 + $0x628] sm:$0xf0]  ;;  %v9949_v40 = vld [vmem:[#allocation7 + $0x710] sm:$0xf] }
 0x355   :  { %4977 = vmatmul.bf16.vlgmr.msrb.gmra.mxu1 %v12195_v1  ;;  %5764 = vmatpush.bf16.msrb.mxu0 %v10006_v7  ;;  %v11266_v7 = vld [vmem:[#allocation7 + $0x6cc] sm:$0xf] }
 0x356   :  { %4925 = vmatmul.bf16.gmra.mxu2 %v12202_v24  ;;  %5782 = vmatpush.bf16.msrb.mxu1 %v10042_v41  ;;  %v9914_v41 = vor.u32 %v11266_v7, %v9911_v31  ;;  %v9951_v7 = vld [vmem:[#allocation7 + $0x730] sm:$0xf0]  ;;  %v10021_v31 = vld [vmem:[#allocation7 + $0x798] sm:$0xf] }
 0x357   :  { %4944 = vmatmul.bf16.gmra.mxu3 %v12204_v29 }
 0x358   :  { %5729 = vmatpush.bf16.msra.mxu2 %v9902_v46  ;;  %5748 = vmatpush.bf16.msra.mxu3 %v9906_v17  ;;  %v9845_v46 = vld [vmem:[#allocation7 + $0x648] sm:$0xf]  ;;  %v10047_v17 = vld [vmem:[#allocation7 + $0x7f0] sm:$0xf0] }
 0x359   :  { %5765 = vmatpush.bf16.msrb.mxu0 %v9974_v2  ;;  %v10050_v2 = vor.u32 %v11299_v33, %v10047_v17  ;;  %v11267_v33 = vld [vmem:[#allocation7 + $0x6d4] sm:$0xf] }
 0x35a   :  { %5783 = vmatpush.bf16.msrb.mxu1 %v10010_v22  ;;  %v9846_v22 = vor.u32 %v11254_v25, %v9845_v46  ;;  %v10055_v46 = vld [vmem:[#allocation7 + $0x7f8] sm:$0xf0]  ;;  %v11271_v25 = vld [vmem:[#allocation7 + $0x6ec] sm:$0xf0] }
 0x35c   :  { %5730 = vmatpush.bf16.msra.mxu2 %v9870_v48  ;;  %5749 = vmatpush.bf16.msra.mxu3 %v9874_v63  ;;  %v9813_v48 = vld [vmem:[#allocation7 + $0x608] sm:$0xf]  ;;  %v10015_v63 = vld [vmem:[#allocation7 + $0x7b0] sm:$0xf0] }
 0x35d   :  { %5766 = vmatpush.bf16.msrb.mxu0 %v9942_v26  ;;  %v10018_v26 = vor.u32 %v11291_v62, %v10015_v63  ;;  %v9885_v63 = vld [vmem:[#allocation7 + $0x690] sm:$0xf] }
 0x35e   :  { %5784 = vmatpush.bf16.msrb.mxu1 %v9978_v16  ;;  %v9814_v16 = vor.u32 %v11246_v12, %v9813_v48 }
 0x35f   :  { %4963 = vmatmul.bf16.gmra.mxu0 %v12211_v56 }
 0x360   :  { %5731 = vmatpush.bf16.msra.mxu2 %v9838_v19  ;;  %5750 = vmatpush.bf16.msra.mxu3 %v9842_v61  ;;  %v11283_v19 = vld [vmem:[#allocation7 + $0x754] sm:$0xf]  ;;  %v11304_v61 = vld [vmem:[#allocation7 + $0x7f4] sm:$0xf0] }
 0x361   :  { %5767 = vmatpush.bf16.msrb.mxu0 %v9910_v57  ;;  %v9986_v4 = vor.u32 %v11283_v19, %v9983_v32  ;;  %v10054_v57 = vor.u32 %v11304_v61, %v10053_v20  ;;  %v9991_v32 = vld [vmem:[#allocation7 + $0x778] sm:$0xf0]  ;;  %v9853_v61 = vld [vmem:[#allocation7 + $0x650] sm:$0xf] }
 0x362   :  { %5785 = vmatpush.bf16.msrb.mxu1 %v9946_v8  ;;  %v11242_v8 = vld [vmem:[#allocation7 + $0x60c] sm:$0xf] }
 0x363   :  { %v9818_v59 = vor.u32 %v11242_v8, %v9815_v43  ;;  %v9855_v8 = vld [vmem:[#allocation7 + $0x670] sm:$0xf0]  ;;  %v9925_v43 = vld [vmem:[#allocation7 + $0x6d8] sm:$0xf] }
 0x364   :  { %5732 = vmatpush.bf16.msra.mxu2 %v9806_v38  ;;  %5751 = vmatpush.bf16.msra.mxu3 %v9810_v37  ;;  %v9950_v37 = vor.u32 %v11279_v11, %v9949_v40  ;;  %v11276_v11 = vld [vmem:[#allocation7 + $0x71c] sm:$0xf] }
 0x365   :  { %4982 = vmatmul.bf16.gmra.mxu1 %v12213_v3  ;;  %5768 = vmatpush.bf16.msrb.mxu0 %v9878_v52  ;;  %v11296_v52 = vld [vmem:[#allocation7 + $0x7b4] sm:$0xf0] }
 0x366   :  { %v4539_v53 = vpop.f32.mrf.mxu0  ;;  %5272 = vmatmul.bf16.vlgmr.msrb.gmra.mxu2 %v12142_v44  ;;  %5786 = vmatpush.bf16.msrb.mxu1 %v9914_v41  ;;  %v9954_v41 = vor.u32 %v11275_v6, %v9951_v7  ;;  %v10022_v5 = vor.u32 %v11296_v52, %v10021_v31  ;;  %v9959_v6 = vld [vmem:[#allocation7 + $0x738] sm:$0xf0]  ;;  %v9821_v52 = vld [vmem:[#allocation7 + $0x610] sm:$0xf] }
 0x367   :  { %5291 = vmatmul.bf16.vlgmr.msrb.gmra.mxu3 %v12144_v49  ;;  %v9962_v7 = vor.u32 %v11276_v11, %v9959_v6  ;;  %v11645_v11 = vld [vmem:[#allocation13 + $0x68] sm:$0xff] }
 0x368   :  { %5801 = vmatpush.bf16.msrb.mxu2 %v10046_v28  ;;  %5820 = vmatpush.bf16.msrb.mxu3 %v10050_v2  ;;  %v10058_v28 = vor.u32 %v11300_v55, %v10055_v46  ;;  %v9919_v2 = vld [vmem:[#allocation7 + $0x6f0] sm:$0xf0] }
 0x369   :  { %5769 = vmatpush.bf16.msrb.mxu0 %v9846_v22  ;;  %v9922_v22 = vor.u32 %v11267_v33, %v9919_v2  ;;  %v9823_v46 = vld [vmem:[#allocation7 + $0x630] sm:$0xf0]  ;;  %v11268_v2 = vld [vmem:[#allocation7 + $0x6dc] sm:$0xf] }
 0x36a   :  { %5787 = vmatpush.bf16.msrb.mxu1 %v9882_v18  ;;  %v9990_v18 = vor.u32 %v11288_v9, %v9989_v35  ;;  %v9927_v35 = vld [vmem:[#allocation7 + $0x6f8] sm:$0xf0] }
 0x36b   :  { %v9930_v9 = vor.u32 %v11268_v2, %v9927_v35  ;;  %v11654_v2 = vld [vmem:[#allocation13 + $0xf0] sm:$0xff]  ;;  %v11655_v35 = vld [vmem:[#allocation13 + $0xa8] sm:$0xff] }
 0x36c   :  { %5802 = vmatpush.bf16.msrb.mxu2 %v10014_v54  ;;  %5821 = vmatpush.bf16.msrb.mxu3 %v10018_v26  ;;  %v10026_v54 = vor.u32 %v11292_v36, %v10023_v30  ;;  %v11263_v26 = vld [vmem:[#allocation7 + $0x6ac] sm:$0xf0]  ;;  %v11256_v36 = vld [vmem:[#allocation7 + $0x674] sm:$0xf0] }
 0x36d   :  { %5770 = vmatpush.bf16.msrb.mxu0 %v9814_v16  ;;  %v9886_v50 = vor.u32 %v11263_v26, %v9885_v63  ;;  %v9887_v16 = vld [vmem:[#allocation7 + $0x6b0] sm:$0xf0] }
 0x36e   :  { %v4541_v47 = vpop.f32.mrf.mxu0  ;;  %5788 = vmatpush.bf16.msrb.mxu1 %v9850_v60  ;;  %v9957_v60 = vld [vmem:[#allocation7 + $0x718] sm:$0xf]  ;;  %v9890_v0 = vor.u32 %v11259_v58, %v9887_v16 }
 0x36f   :  { %5310 = vmatmul.bf16.vlgmr.msra.gmra.mxu0 %v12142_v44  ;;  %v9958_v19 = vor.u32 %v11280_v14, %v9957_v60  ;;  %v9829_v14 = vld [vmem:[#allocation7 + $0x618] sm:$0xf] }
 0x370   :  { %5803 = vmatpush.bf16.msrb.mxu2 %v9982_v13  ;;  %5822 = vmatpush.bf16.msrb.mxu3 %v9986_v4  ;;  %v11284_v13 = vld [vmem:[#allocation7 + $0x75c] sm:$0xf]  ;;  %v11251_v4 = vld [vmem:[#allocation7 + $0x654] sm:$0xf] }
 0x371   :  { %5839 = vmatpush.bf16.msra.mxu0 %v10054_v57  ;;  %v9994_v20 = vor.u32 %v11284_v13, %v9991_v32  ;;  %v11252_v32 = vld [vmem:[#allocation7 + $0x65c] sm:$0xf] }
 0x372   :  { %v4558_v23 = vpop.f32.mrf.mxu1  ;;  %5789 = vmatpush.bf16.msrb.mxu1 %v9818_v59  ;;  %v9858_v59 = vor.u32 %v11251_v4, %v9855_v8  ;;  %v11643_v4 = vld [vmem:[#allocation13 + $0x70] sm:$0xff]  ;;  %v9831_v8 = vld [vmem:[#allocation7 + $0x638] sm:$0xf0] }
 0x373   :  { %v12503_v38 = vadd.f32 %v4558_v23, %v4539_v53  ;;  %v9917_v53 = vld [vmem:[#allocation7 + $0x6d0] sm:$0xf]  ;;  %v11272_v23 = vld [vmem:[#allocation7 + $0x6f4] sm:$0xf0] }
 0x374   :  { %5823 = vmatpush.bf16.msrb.mxu3 %v9954_v41  ;;  %5804 = vmatpush.bf16.msrb.mxu2 %v9950_v37  ;;  %v9918_v17 = vor.u32 %v11271_v25, %v9917_v53  ;;  %v9926_v40 = vor.u32 %v11272_v23, %v9925_v43  ;;  %v11247_v41 = vld [vmem:[#allocation7 + $0x62c] sm:$0xf0]  ;;  %v11264_v53 = vld [vmem:[#allocation7 + $0x6b4] sm:$0xf0] }
 0x375   :  { %5329 = vmatmul.bf16.vlgmr.msra.gmra.mxu1 %v12144_v49  ;;  %5840 = vmatpush.bf16.msra.mxu0 %v10022_v5  ;;  %v11243_v5 = vld [vmem:[#allocation7 + $0x614] sm:$0xf]  ;;  %v9822_v55 = vor.u32 %v11247_v41, %v9821_v52  ;;  %v11644_v43 = vld [vmem:[#allocation13 + $0x28] sm:$0xff] }
 0x376   :  { %5277 = vmatmul.bf16.gmra.mxu2 %v12150_v34  ;;  %5858 = vmatpush.bf16.msra.mxu1 %v10058_v28  ;;  %v4544_v12 = vpop.f32.mrf.mxu0  ;;  %v9893_v28 = vld [vmem:[#allocation7 + $0x698] sm:$0xf]  ;;  %v9826_v33 = vor.u32 %v11243_v5, %v9823_v46  ;;  %v11647_v52 = vld [vmem:[#allocation13 + $0x20] sm:$0xff]  ;;  %v12536_v5 = vld [vmem:[#allocation11 + $0x8] sm:$0xff] }
 0x377   :  { %5296 = vmatmul.bf16.gmra.mxu3 %v12152_v39  ;;  %v11648_v41 = vld [vmem:[#allocation13 + $0x60] sm:$0xff]  ;;  %v11651_v46 = vld [vmem:[#allocation13 + $0xb0] sm:$0xff] }
 0x378   :  { %5824 = vmatpush.bf16.msrb.mxu3 %v9922_v22  ;;  %5805 = vmatpush.bf16.msrb.mxu2 %v9918_v17  ;;  %v9894_v17 = vor.u32 %v11264_v53, %v9893_v28  ;;  %v12514_v22 = vld [vmem:[#allocation11] sm:$0xff]  ;;  %v11652_v28 = vld [vmem:[#allocation13 + $0x18] sm:$0xff] }
 0x379   :  { %5841 = vmatpush.bf16.msra.mxu0 %v9990_v18  ;;  %v9861_v18 = vld [vmem:[#allocation7 + $0x658] sm:$0xf] }
 0x37a   :  { %v4560_v48 = vpop.f32.mrf.mxu1  ;;  %5859 = vmatpush.bf16.msra.mxu1 %v10026_v54  ;;  %v9862_v30 = vor.u32 %v11256_v36, %v9861_v18  ;;  %v9895_v54 = vld [vmem:[#allocation7 + $0x6b8] sm:$0xf0]  ;;  %v11656_v18 = vld [vmem:[#allocation13 + $0x10] sm:$0xff] }
 0x37b   :  { %v12508_v62 = vadd.f32 %v4560_v48, %v4541_v47  ;;  %v11255_v47 = vld [vmem:[#allocation7 + $0x66c] sm:$0xf0]  ;;  %v11260_v48 = vld [vmem:[#allocation7 + $0x69c] sm:$0xf]  ;;  %v11657_v36 = vld [vmem:[#allocation13 + $0x50] sm:$0xff] }
 0x37c   :  { %5825 = vmatpush.bf16.msrb.mxu3 %v9890_v0  ;;  %5806 = vmatpush.bf16.msrb.mxu2 %v9886_v50  ;;  %v9854_v57 = vor.u32 %v11255_v47, %v9853_v61  ;;  %v9898_v58 = vor.u32 %v11260_v48, %v9895_v54  ;;  %v11641_v50 = vld [vmem:[#allocation13 + $0x78] sm:$0xff]  ;;  %v11248_v0 = vld [vmem:[#allocation7 + $0x634] sm:$0xf0]  ;;  %v11642_v61 = vld [vmem:[#allocation13 + $0x30] sm:$0xff] }
 0x37d   :  { %5842 = vmatpush.bf16.msra.mxu0 %v9958_v19  ;;  %v9830_v13 = vor.u32 %v11248_v0, %v9829_v14  ;;  %v11659_v48 = vld [vmem:[#allocation13 + $0x8] sm:$0xff]  ;;  %v11660_v54 = vld [vmem:[#allocation13 + $0xa0] sm:$0xff] }
 0x37e   :  { %5860 = vmatpush.bf16.msra.mxu1 %v9994_v20  ;;  %v4546_v25 = vpop.f32.mrf.mxu0  ;;  %v9863_v20 = vld [vmem:[#allocation7 + $0x678] sm:$0xf0]  ;;  %v11662_v14 = vld [vmem:[#allocation13 + $0xe0] sm:$0xff] }
 0x37f   :  { %5315 = vmatmul.bf16.gmra.mxu0 %v12150_v34  ;;  %v9866_v47 = vor.u32 %v11252_v32, %v9863_v20  ;;  %v11664_v32 = vld [vmem:[#allocation13 + $0x40] sm:$0xff]  ;;  %v11665_v20 = vld [vmem:[#allocation13 + $0x98] sm:$0xff] }
 0x380   :  { %5826 = vmatpush.bf16.msrb.mxu3 %v9858_v59  ;;  %5807 = vmatpush.bf16.msrb.mxu2 %v9854_v57  ;;  %v11244_v57 = vld [vmem:[#allocation7 + $0x61c] sm:$0xf] }
 0x381   :  { %5843 = vmatpush.bf16.msra.mxu0 %v9926_v40  ;;  %v9834_v40 = vor.u32 %v11244_v57, %v9831_v8 }
 0x382   :  { %v4563_v37 = vpop.f32.mrf.mxu1  ;;  %5861 = vmatpush.bf16.msra.mxu1 %v9962_v7 }
 0x383   :  { %v12511_v31 = vadd.f32 %v4563_v37, %v4544_v12  ;;  %v11640_v12 = vld [vmem:[#allocation13 + $0x38] sm:$0xff] }
 0x384   :  { %5827 = vmatpush.bf16.msrb.mxu3 %v9826_v33  ;;  %5808 = vmatpush.bf16.msrb.mxu2 %v9822_v55  ;;  %v11646_v37 = vld [vmem:[#allocation13 + $0xb8] sm:$0xff] }
 0x385   :  { %5334 = vmatmul.bf16.gmra.mxu1 %v12152_v39  ;;  %5844 = vmatpush.bf16.msra.mxu0 %v9894_v17  ;;  %v11650_v55 = vld [vmem:[#allocation13 + $0xf8] sm:$0xff] }
 0x386   :  { %5733 = vmatmul.bf16.vlgmr.msra.gmra.mxu2 %v12514_v22  ;;  %5862 = vmatpush.bf16.msra.mxu1 %v9930_v9  ;;  %v11653_v33 = vld [vmem:[#allocation13 + $0x58] sm:$0xff] }
 0x387   :  { %5752 = vmatmul.bf16.vlgmr.msra.gmra.mxu3 %v12514_v22 }
 0x388   :  { %5897 = vmatpush.bf16.msra.mxu2 %v11640_v12  ;;  %5916 = vmatpush.bf16.msra.mxu3 %v11641_v50 }
 0x389   :  { %v12518_v26 = vpop.f32.mrf.mxu2  ;;  %5845 = vmatpush.bf16.msra.mxu0 %v9862_v30  ;;  %v11658_v30 = vld [vmem:[#allocation13 + $0xe8] sm:$0xff] }
 0x38a   :  { %v4565_v63 = vpop.f32.mrf.mxu1  ;;  %v12522_v60 = vpop.f32.mrf.mxu3  ;;  %5863 = vmatpush.bf16.msra.mxu1 %v9898_v58  ;;  %v11661_v58 = vld [vmem:[#allocation13 + $0x48] sm:$0xff] }
 0x38b   :  { %v12520_v16 = vadd.f32 %v4565_v63, %v4546_v25 }
 0x38c   :  { %v12524_v19 = vpop.f32.mrf.mxu0  ;;  %5898 = vmatpush.bf16.msra.mxu2 %v11642_v61  ;;  %5917 = vmatpush.bf16.msra.mxu3 %v11643_v4  ;;  %v11666_v61 = vld [vmem:[#allocation13 + $0xd8] sm:$0xff] }
 0x38d   :  { %5846 = vmatpush.bf16.msra.mxu0 %v9830_v13  ;;  %v11663_v13 = vld [vmem:[#allocation13] sm:$0xff]  ;;  %v11668_v4 = vld [vmem:[#allocation13 + $0x178] sm:$0xff] }
 0x38e   :  { %5864 = vmatpush.bf16.msra.mxu1 %v9866_v47  ;;  %v11667_v47 = vld [vmem:[#allocation13 + $0x138] sm:$0xff] }
 0x38f   :  { %5771 = vmatmul.bf16.vlgmr.msrb.gmra.mxu0 %v12514_v22 }
 0x390   :  { %5899 = vmatpush.bf16.msra.mxu2 %v11644_v43  ;;  %5918 = vmatpush.bf16.msra.mxu3 %v11645_v11  ;;  %v11669_v43 = vld [vmem:[#allocation13 + $0x90] sm:$0xff] }
 0x391   :  { %v12529_v59 = vpop.f32.mrf.mxu2  ;;  %5935 = vmatpush.bf16.msrb.mxu0 %v11646_v37  ;;  %v11670_v11 = vld [vmem:[#allocation13 + $0xd0] sm:$0xff] }
 0x392   :  { %v12527_v23 = vpop.f32.mrf.mxu1  ;;  %v12531_v6 = vpop.f32.mrf.mxu3  ;;  %5865 = vmatpush.bf16.msra.mxu1 %v9834_v40  ;;  %v11671_v37 = vld [vmem:[#allocation13 + $0x130] sm:$0xff] }
 0x394   :  { %v12533_v7 = vpop.f32.mrf.mxu0  ;;  %5900 = vmatpush.bf16.msra.mxu2 %v11647_v52  ;;  %5919 = vmatpush.bf16.msra.mxu3 %v11648_v41  ;;  %v11672_v41 = vld [vmem:[#allocation13 + $0x170] sm:$0xff] }
 0x395   :  { %5790 = vmatmul.bf16.vlgmr.msrb.gmra.mxu1 %v12514_v22  ;;  %5936 = vmatpush.bf16.msrb.mxu0 %v11651_v46  ;;  %v4578_v46 = vadd.f32 %v12518_v26, %v12503_v38  ;;  %v11679_v38 = vld [vmem:[#allocation13 + $0x1b8] sm:$0xff]  ;;  %v11680_v26 = vld [vmem:[#allocation13 + $0x120] sm:$0xff] }
 0x396   :  { %5738 = vmatmul.bf16.gmra.mxu2 %v12536_v5  ;;  %5954 = vmatpush.bf16.msrb.mxu1 %v11650_v55  ;;  %v11673_v55 = vld [vmem:[#allocation13 + $0x88] sm:$0xff] }
 0x397   :  { %5757 = vmatmul.bf16.gmra.mxu3 %v12536_v5 }
 0x398   :  { %5901 = vmatpush.bf16.msra.mxu2 %v11652_v28  ;;  %5920 = vmatpush.bf16.msra.mxu3 %v11653_v33  ;;  %v11674_v28 = vld [vmem:[#allocation13 + $0xc8] sm:$0xff] }
 0x399   :  { %v12542_v25 = vpop.f32.mrf.mxu2  ;;  %5937 = vmatpush.bf16.msrb.mxu0 %v11655_v35  ;;  %v11675_v33 = vld [vmem:[#allocation13 + $0x128] sm:$0xff] }
 0x39a   :  { %v12540_v53 = vpop.f32.mrf.mxu1  ;;  %v12544_v17 = vpop.f32.mrf.mxu3  ;;  %5955 = vmatpush.bf16.msrb.mxu1 %v11654_v2  ;;  %v11676_v2 = vld [vmem:[#allocation13 + $0x168] sm:$0xff] }
 0x39c   :  { %v12546_v9 = vpop.f32.mrf.mxu0  ;;  %5902 = vmatpush.bf16.msra.mxu2 %v11656_v18  ;;  %5921 = vmatpush.bf16.msra.mxu3 %v11657_v36  ;;  %v11677_v36 = vld [vmem:[#allocation13 + $0x80] sm:$0xff] }
 0x39d   :  { %5938 = vmatpush.bf16.msrb.mxu0 %v11660_v54  ;;  %v11678_v54 = vld [vmem:[#allocation13 + $0xc0] sm:$0xff] }
 0x39e   :  { %5956 = vmatpush.bf16.msrb.mxu1 %v11658_v30  ;;  %v4597_v30 = vadd.f32 %v12522_v60, %v4578_v46  ;;  %v4580_v60 = vadd.f32 %v12529_v59, %v12508_v62  ;;  %v11687_v59 = vld [vmem:[#allocation13 + $0x1a8] sm:$0xff]  ;;  %v11689_v46 = vld [vmem:[#allocation13 + $0x150] sm:$0xff] }
 0x39f   :  { %5776 = vmatmul.bf16.gmra.mxu0 %v12536_v5 }
 0x3a0   :  { %5903 = vmatpush.bf16.msra.mxu2 %v11659_v48  ;;  %5922 = vmatpush.bf16.msra.mxu3 %v11661_v58 }
 0x3a1   :  { %v12551_v63 = vpop.f32.mrf.mxu2  ;;  %5939 = vmatpush.bf16.msrb.mxu0 %v11665_v20  ;;  %v11683_v20 = vld [vmem:[#allocation13 + $0x1b0] sm:$0xff] }
 0x3a2   :  { %v12549_v12 = vpop.f32.mrf.mxu1  ;;  %v12553_v50 = vpop.f32.mrf.mxu3  ;;  %5957 = vmatpush.bf16.msrb.mxu1 %v11662_v14  ;;  %v11681_v14 = vld [vmem:[#allocation13 + $0x160] sm:$0xff] }
 0x3a4   :  { %v12555_v0 = vpop.f32.mrf.mxu0  ;;  %5904 = vmatpush.bf16.msra.mxu2 %v11663_v13  ;;  %5923 = vmatpush.bf16.msra.mxu3 %v11664_v32  ;;  %v11682_v13 = vld [vmem:[#allocation13 + $0x1f8] sm:$0xff]  ;;  %v4616_v32 = vadd.f32 %v12524_v19, %v4597_v30 }
 0x3a5   :  { %5795 = vmatmul.bf16.gmra.mxu1 %v12536_v5  ;;  %5940 = vmatpush.bf16.msrb.mxu0 %v11669_v43  ;;  %v11686_v43 = vld [vmem:[#allocation13 + $0x1f0] sm:$0xff] }
 0x3a6   :  { %5809 = vmatmul.bf16.vlgmr.msrb.gmra.mxu2 %v12514_v22  ;;  %5958 = vmatpush.bf16.msrb.mxu1 %v11666_v61  ;;  %v11684_v61 = vld [vmem:[#allocation13 + $0x118] sm:$0xff]  ;;  %v4635_v19 = vadd.f32 %v12527_v23, %v4616_v32  ;;  %v4583_v23 = vadd.f32 %v12542_v25, %v12511_v31 }
 0x3a7   :  { %5828 = vmatmul.bf16.vlgmr.msrb.gmra.mxu3 %v12514_v22  ;;  %v11695_v25 = vld [vmem:[#allocation13 + $0x198] sm:$0xff] }
 0x3a8   :  { %5973 = vmatpush.bf16.msrb.mxu2 %v11667_v47  ;;  %5992 = vmatpush.bf16.msrb.mxu3 %v11668_v4  ;;  %v11685_v47 = vld [vmem:[#allocation13 + $0x158] sm:$0xff] }
 0x3a9   :  { %v4653_v8 = vpop.f32.mrf.mxu2  ;;  %5941 = vmatpush.bf16.msrb.mxu0 %v11673_v55 }
 0x3aa   :  { %v12560_v57 = vpop.f32.mrf.mxu1  ;;  %v12562_v40 = vpop.f32.mrf.mxu3  ;;  %5959 = vmatpush.bf16.msrb.mxu1 %v11670_v11  ;;  %v4599_v11 = vadd.f32 %v12531_v6, %v4580_v60  ;;  %v11692_v6 = vld [vmem:[#allocation13 + $0x108] sm:$0xff]  ;;  %v11697_v60 = vld [vmem:[#allocation13 + $0x140] sm:$0xff] }
 0x3ac   :  { %5974 = vmatpush.bf16.msrb.mxu2 %v11671_v37  ;;  %v12564_v52 = vpop.f32.mrf.mxu0  ;;  %5993 = vmatpush.bf16.msrb.mxu3 %v11672_v41  ;;  %v11688_v37 = vld [vmem:[#allocation13 + $0x110] sm:$0xff]  ;;  %v4654_v41 = vadd.f32 %v4653_v8, %v4635_v19  ;;  %v11693_v8 = vld [vmem:[#allocation13 + $0x148] sm:$0xff] }
 0x3ad   :  { %5942 = vmatpush.bf16.msrb.mxu0 %v11677_v36  ;;  %v11700_v19 = vld [vmem:[#allocation13 + $0x1d0] sm:$0xff] }
 0x3ae   :  { %5960 = vmatpush.bf16.msrb.mxu1 %v11674_v28  ;;  %v11690_v28 = vld [vmem:[#allocation13 + $0x1e8] sm:$0xff]  ;;  %v4673_v36 = vadd.f32 %v12562_v40, %v4654_v41 }
 0x3af   :  { %5847 = vmatmul.bf16.vlgmr.msra.gmra.mxu0 %v12514_v22 }
 0x3b0   :  { %5975 = vmatpush.bf16.msrb.mxu2 %v11675_v33  ;;  %5994 = vmatpush.bf16.msrb.mxu3 %v11676_v2  ;;  %v4618_v33 = vadd.f32 %v12533_v7, %v4599_v11  ;;  %v11691_v2 = vld [vmem:[#allocation13 + $0x1a0] sm:$0xff] }
 0x3b1   :  { %v12571_v18 = vpop.f32.mrf.mxu2  ;;  %6011 = vmatpush.bf16.msra.mxu0 %v11679_v38  ;;  %v11694_v38 = vld [vmem:[#allocation13 + $0x1e0] sm:$0xff] }
 0x3b2   :  { %v12569_v35 = vpop.f32.mrf.mxu1  ;;  %v12574_v48 = vpop.f32.mrf.mxu3  ;;  %5961 = vmatpush.bf16.msrb.mxu1 %v11678_v54  ;;  %v4637_v7 = vadd.f32 %v12540_v53, %v4618_v33  ;;  %v11703_v33 = vld [vmem:[#allocation13 + $0x180] sm:$0xff] }
 0x3b4   :  { %5976 = vmatpush.bf16.msrb.mxu2 %v11680_v26  ;;  %v12576_v58 = vpop.f32.mrf.mxu0  ;;  %5995 = vmatpush.bf16.msrb.mxu3 %v11681_v14  ;;  %v4602_v26 = vadd.f32 %v12544_v17, %v4583_v23  ;;  %v11696_v14 = vld [vmem:[#allocation13 + $0x100] sm:$0xff]  ;;  %v4656_v40 = vadd.f32 %v12571_v18, %v4637_v7  ;;  %v4585_v17 = vadd.f32 %v12551_v63, %v12520_v16 }
 0x3b5   :  { %5866 = vmatmul.bf16.vlgmr.msra.gmra.mxu1 %v12514_v22  ;;  %6012 = vmatpush.bf16.msra.mxu0 %v11683_v20  ;;  %v11698_v20 = vld [vmem:[#allocation13 + $0x1d8] sm:$0xff] }
 0x3b6   :  { %6030 = vmatpush.bf16.msra.mxu1 %v11682_v13  ;;  %5814 = vmatmul.bf16.gmra.mxu2 %v12536_v5  ;;  %v4692_v13 = vadd.f32 %v12564_v52, %v4673_v36  ;;  %v4621_v53 = vadd.f32 %v12546_v9, %v4602_v26  ;;  %v4675_v52 = vadd.f32 %v12574_v48, %v4656_v40  ;;  %v11701_v9 = vld [vmem:[#allocation13 + $0x188] sm:$0xff]  ;;  %v11472_v36 = vld [vmem:[#allocation14 + $0x2] ss:$0 sm:$0xff] }
 0x3b7   :  { %5833 = vmatmul.bf16.gmra.mxu3 %v12536_v5  ;;  %v4604_v11 = vadd.f32 %v12553_v50, %v4585_v17 }
 0x3b8   :  { %5977 = vmatpush.bf16.msrb.mxu2 %v11684_v61  ;;  %5996 = vmatpush.bf16.msrb.mxu3 %v11685_v47  ;;  %v11699_v61 = vld [vmem:[#allocation13 + $0x190] sm:$0xff]  ;;  %v4711_v47 = vadd.f32 %v12569_v35, %v4692_v13  ;;  %v4694_v16 = vadd.f32 %v12576_v58, %v4675_v52  ;;  %v11702_v35 = vld [vmem:[#allocation13 + $0x1c8] sm:$0xff] }
 0x3b9   :  { %v4658_v4 = vpop.f32.mrf.mxu2  ;;  %6013 = vmatpush.bf16.msra.mxu0 %v11687_v59  ;;  %v4623_v48 = vadd.f32 %v12555_v0, %v4604_v11 }
 0x3ba   :  { %v12584_v22 = vpop.f32.mrf.mxu1  ;;  %6031 = vmatpush.bf16.msra.mxu1 %v11686_v43  ;;  %v12588_v62 = vpop.f32.mrf.mxu3 }
 0x3bb   :  { %v4642_v58 = vadd.f32 %v12560_v57, %v4623_v48 }
 0x3bc   :  { %5978 = vmatpush.bf16.msrb.mxu2 %v11688_v37  ;;  %v12590_v55 = vpop.f32.mrf.mxu0  ;;  %5997 = vmatpush.bf16.msrb.mxu3 %v11689_v46 }
 0x3bd   :  { %6014 = vmatpush.bf16.msra.mxu0 %v11691_v2 }
 0x3be   :  { %6032 = vmatpush.bf16.msra.mxu1 %v11690_v28 }
 0x3bf   :  { %5852 = vmatmul.bf16.gmra.mxu0 %v12536_v5 }
 0x3c0   :  { %5979 = vmatpush.bf16.msrb.mxu2 %v11692_v6  ;;  %5998 = vmatpush.bf16.msrb.mxu3 %v11693_v8  ;;  %v11704_v6 = vld [vmem:[#allocation13 + $0x1c0] sm:$0xff] }
 0x3c1   :  { %v4660_v54 = vpop.f32.mrf.mxu2  ;;  %6015 = vmatpush.bf16.msra.mxu0 %v11695_v25 }
 0x3c2   :  { %v12597_v30 = vpop.f32.mrf.mxu1  ;;  %6033 = vmatpush.bf16.msra.mxu1 %v11694_v38  ;;  %v4679_v31 = vpop.f32.mrf.mxu3  ;;  %v4661_v0 = vadd.f32 %v4660_v54, %v4642_v58 }
 0x3c4   :  { %5980 = vmatpush.bf16.msrb.mxu2 %v11696_v14  ;;  %v4698_v32 = vpop.f32.mrf.mxu0  ;;  %5999 = vmatpush.bf16.msrb.mxu3 %v11697_v60  ;;  %v4680_v40 = vadd.f32 %v4679_v31, %v4661_v0 }
 0x3c5   :  { %5871 = vmatmul.bf16.gmra.mxu1 %v12536_v5  ;;  %6016 = vmatpush.bf16.msra.mxu0 %v11699_v61  ;;  %v4640_v5 = vadd.f32 %v12549_v12, %v4621_v53  ;;  %v4713_v12 = vadd.f32 %v12584_v22, %v4694_v16 }
 0x3c6   :  { %6034 = vmatpush.bf16.msra.mxu1 %v11698_v20  ;;  %v4699_v61 = vadd.f32 %v4698_v32, %v4680_v40 }
 0x3c7   :  { %v4659_v63 = vadd.f32 %v4658_v4, %v4640_v5 }
 0x3c9   :  { %v4921_v18 = vpop.f32.mrf.mxu2  ;;  %6017 = vmatpush.bf16.msra.mxu0 %v11701_v9  ;;  %v4678_v50 = vadd.f32 %v12588_v62, %v4659_v63 }
 0x3ca   :  { %v4717_v43 = vpop.f32.mrf.mxu1  ;;  %6035 = vmatpush.bf16.msra.mxu1 %v11700_v19  ;;  %v4922_v59 = vadd.f32 %v4921_v18, %v4711_v47  ;;  %v4940_v37 = vpop.f32.mrf.mxu3 }
 0x3cb   :  { %v4697_v7 = vadd.f32 %v12590_v55, %v4678_v50  ;;  %v4718_v19 = vadd.f32 %v4717_v43, %v4699_v61 }
 0x3cc   :  { %v4941_v41 = vadd.f32 %v4940_v37, %v4922_v59  ;;  %v4959_v46 = vpop.f32.mrf.mxu0 }
 0x3cd   :  { %6018 = vmatpush.bf16.msra.mxu0 %v11703_v33  ;;  %v4716_v62 = vadd.f32 %v12597_v30, %v4697_v7 }
 0x3ce   :  { %6036 = vmatpush.bf16.msra.mxu1 %v11702_v35  ;;  %v4960_v28 = vadd.f32 %v4959_v46, %v4941_v41 }
 0x3d1   :  { %v4923_v2 = vpop.f32.mrf.mxu2 }
 0x3d2   :  { %v4978_v23 = vpop.f32.mrf.mxu1  ;;  %6037 = vmatpush.bf16.msra.mxu1 %v11704_v6  ;;  %v4924_v8 = vadd.f32 %v4923_v2, %v4713_v12  ;;  %v4942_v38 = vpop.f32.mrf.mxu3 }
 0x3d3   :  { %v4979_v4 = vadd.f32 %v4978_v23, %v4960_v28 }
 0x3d4   :  { %v4943_v25 = vadd.f32 %v4942_v38, %v4924_v8  ;;  %v4961_v14 = vpop.f32.mrf.mxu0  ;;  %v11705_v38 = vld [vmem:[#allocation13 + $0x238] sm:$0xff] }
 0x3d5   :  { %v4988_v26 = vadd.f32 %v4979_v4, %v12333_v15 }
 0x3d6   :  { %v4962_v13 = vadd.f32 %v4961_v14, %v4943_v25 }
 0x3d7   :  { %v4997_v22 = vmul.f32 %v11472_v36, %v4988_v26 }
 0x3d9   :  { %5002 = vst [vmem:[#allocation16 + $0x40] sm:$0xff] %v4997_v22  ;;  %v4926_v20 = vpop.f32.mrf.mxu2 }
 0x3da   :  { %v4980_v60 = vpop.f32.mrf.mxu1  ;;  %v4927_v53 = vadd.f32 %v4926_v20, %v4716_v62  ;;  %v4945_v17 = vpop.f32.mrf.mxu3  ;;  %v11708_v62 = vld [vmem:[#allocation13 + $0x228] sm:$0xff] }
 0x3db   :  { %v4981_v57 = vadd.f32 %v4980_v60, %v4962_v13  ;;  %v11706_v13 = vld [vmem:[#allocation13 + $0x230] sm:$0xff] }
 0x3dc   :  { %v4946_v55 = vadd.f32 %v4945_v17, %v4927_v53  ;;  %v4964_v54 = vpop.f32.mrf.mxu0  ;;  %v11709_v17 = vld [vmem:[#allocation13 + $0x270] sm:$0xff] }
 0x3dd   :  { %v4989_v47 = vadd.f32 %v4981_v57, %v12341_v10 }
 0x3de   :  { %v4965_v18 = vadd.f32 %v4964_v54, %v4946_v55  ;;  %v11711_v54 = vld [vmem:[#allocation13 + $0x268] sm:$0xff] }
 0x3df   :  { %v4998_v52 = vmul.f32 %v11472_v36, %v4989_v47  ;;  %v11710_v47 = vld [vmem:[#allocation13 + $0x220] sm:$0xff] }
 0x3e1   :  { %5003 = vst [vmem:[#allocation16 + $0x48] sm:$0xff] %v4998_v52  ;;  %v4928_v11 = vpop.f32.mrf.mxu2 }
 0x3e2   :  { %v4983_v5 = vpop.f32.mrf.mxu1  ;;  %v4929_v30 = vadd.f32 %v4928_v11, %v4718_v19  ;;  %v4947_v31 = vpop.f32.mrf.mxu3 }
 0x3e3   :  { %v4984_v59 = vadd.f32 %v4983_v5, %v4965_v18  ;;  %v11712_v18 = vld [vmem:[#allocation13 + $0x218] sm:$0xff] }
 0x3e4   :  { %v4948_v9 = vadd.f32 %v4947_v31, %v4929_v30  ;;  %v4966_v16 = vpop.f32.mrf.mxu0  ;;  %v11713_v30 = vld [vmem:[#allocation13 + $0x260] sm:$0xff] }
 0x3e5   :  { %v4990_v37 = vadd.f32 %v4984_v59, %v12346_v45 }
 0x3e6   :  { %v4967_v41 = vadd.f32 %v4966_v16, %v4948_v9  ;;  %v11714_v9 = vld [vmem:[#allocation13 + $0x210] sm:$0xff]  ;;  %v11715_v16 = vld [vmem:[#allocation13 + $0x258] sm:$0xff] }
 0x3e7   :  { %v4999_v63 = vmul.f32 %v11472_v36, %v4990_v37 }
 0x3e9   :  { %5004 = vst [vmem:[#allocation16 + $0x50] sm:$0xff] %v4999_v63  ;;  %v5273_v46 = vpop.f32.mrf.mxu2  ;;  %v11716_v63 = vld [vmem:[#allocation13 + $0x208] sm:$0xff] }
 0x3ea   :  { %v4985_v32 = vpop.f32.mrf.mxu1  ;;  %v5292_v48 = vpop.f32.mrf.mxu3 }
 0x3eb   :  { %v4986_v35 = vadd.f32 %v4985_v32, %v4967_v41  ;;  %v5293_v2 = vadd.f32 %v5292_v48, %v5273_v46 }
 0x3ec   :  { %v5311_v43 = vpop.f32.mrf.mxu0 }
 0x3ed   :  { %v4991_v28 = vadd.f32 %v4986_v35, %v12350_v42 }
 0x3ef   :  { %v5000_v33 = vmul.f32 %v11472_v36, %v4991_v28  ;;  %v11707_v36 = vld [vmem:[#allocation13 + $0x278] sm:$0xff]  ;;  %v11717_v28 = vld [vmem:[#allocation13 + $0x250] sm:$0xff] }
 0x3f1   :  { %5005 = vst [vmem:[#allocation16 + $0x58] sm:$0xff] %v5000_v33  ;;  %v5275_v50 = vpop.f32.mrf.mxu2  ;;  %v11718_v33 = vld [vmem:[#allocation13 + $0x200] sm:$0xff] }
 0x3f2   :  { %v5330_v12 = vpop.f32.mrf.mxu1  ;;  %v5294_v23 = vpop.f32.mrf.mxu3 }
 0x3f3   :  { %v5295_v6 = vadd.f32 %v5294_v23, %v5275_v50  ;;  %v5331_v8 = vadd.f32 %v5330_v12, %v5311_v43  ;;  %v11184_v50 = vld [vmem:[#allocation2 + $0x338] sm:$0xff] }
 0x3f4   :  { %v5313_v58 = vpop.f32.mrf.mxu0  ;;  %v11192_v23 = vld [vmem:[#allocation2 + $0x378] sm:$0xff] }
 0x3f5   :  { %v5877_v4 = vpack.c.bf16 %v5295_v6, %v5293_v2  ;;  %v11200_v2 = vld [vmem:[#allocation2 + $0x3b8] sm:$0xff]  ;;  %v11183_v6 = vld [vmem:[#allocation2 + $0x330] sm:$0xff] }
 0x3f7   :  { %5905 = vmatmul.bf16.vlgmr.msra.gmra.mxu2 %v5877_v4 }
 0x3f8   :  { %6049 = vmatpush.bf16.msra.mxu2 %v11705_v38  ;;  %v11191_v38 = vld [vmem:[#allocation2 + $0x370] sm:$0xff] }
 0x3f9   :  { %v5278_v0 = vpop.f32.mrf.mxu2 }
 0x3fa   :  { %v5332_v7 = vpop.f32.mrf.mxu1  ;;  %v5297_v25 = vpop.f32.mrf.mxu3 }
 0x3fb   :  { %v5333_v26 = vadd.f32 %v5332_v7, %v5313_v58  ;;  %v5298_v57 = vadd.f32 %v5297_v25, %v5278_v0  ;;  %v11719_v58 = vld [vmem:[#allocation13 + $0x248] sm:$0xff] }
 0x3fc   :  { %v5316_v22 = vpop.f32.mrf.mxu0  ;;  %6050 = vmatpush.bf16.msra.mxu2 %v11706_v13  ;;  %v11190_v13 = vld [vmem:[#allocation2 + $0x368] sm:$0xff] }
 0x3fd   :  { %v5878_v14 = vpack.c.bf16 %v5333_v26, %v5331_v8  ;;  %v11199_v26 = vld [vmem:[#allocation2 + $0x3b0] sm:$0xff] }
 0x3ff   :  { %5924 = vmatmul.bf16.vlgmr.msra.gmra.mxu3 %v5878_v14  ;;  %v11720_v14 = vld [vmem:[#allocation13 + $0x240] sm:$0xff] }
 0x400   :  { %6068 = vmatpush.bf16.msra.mxu3 %v11707_v36  ;;  %6051 = vmatpush.bf16.msra.mxu2 %v11708_v62  ;;  %v11208_v36 = vld [vmem:[#allocation2 + $0x3f8] sm:$0xff]  ;;  %v11198_v62 = vld [vmem:[#allocation2 + $0x3a8] sm:$0xff] }
 0x401   :  { %v5280_v60 = vpop.f32.mrf.mxu2 }
 0x402   :  { %v5335_v40 = vpop.f32.mrf.mxu1  ;;  %v5299_v20 = vpop.f32.mrf.mxu3 }
 0x403   :  { %v5300_v53 = vadd.f32 %v5299_v20, %v5280_v60  ;;  %v5336_v52 = vadd.f32 %v5335_v40, %v5316_v22  ;;  %v11182_v22 = vld [vmem:[#allocation2 + $0x328] sm:$0xff]  ;;  %v11181_v40 = vld [vmem:[#allocation2 + $0x320] sm:$0xff] }
 0x404   :  { %6069 = vmatpush.bf16.msra.mxu3 %v11709_v17  ;;  %v5318_v61 = vpop.f32.mrf.mxu0  ;;  %6052 = vmatpush.bf16.msra.mxu2 %v11710_v47 }
 0x405   :  { %v5887_v55 = vpack.c.bf16 %v5300_v53, %v5298_v57  ;;  %v11189_v57 = vld [vmem:[#allocation2 + $0x360] sm:$0xff]  ;;  %v11207_v53 = vld [vmem:[#allocation2 + $0x3f0] sm:$0xff] }
 0x407   :  { %5910 = vmatmul.bf16.gmra.mxu2 %v5887_v55  ;;  %v11197_v55 = vld [vmem:[#allocation2 + $0x3a0] sm:$0xff] }
 0x408   :  { %6070 = vmatpush.bf16.msra.mxu3 %v11711_v54  ;;  %6053 = vmatpush.bf16.msra.mxu2 %v11712_v18  ;;  %v11180_v18 = vld [vmem:[#allocation2 + $0x318] sm:$0xff] }
 0x409   :  { %v5734_v5 = vpop.f32.mrf.mxu2 }
 0x40a   :  { %v5337_v19 = vpop.f32.mrf.mxu1  ;;  %v5753_v59 = vpop.f32.mrf.mxu3 }
 0x40b   :  { %v5338_v11 = vadd.f32 %v5337_v19, %v5318_v61  ;;  %v11188_v19 = vld [vmem:[#allocation2 + $0x358] sm:$0xff] }
 0x40c   :  { %6071 = vmatpush.bf16.msra.mxu3 %v11713_v30  ;;  %v5772_v37 = vpop.f32.mrf.mxu0  ;;  %6054 = vmatpush.bf16.msra.mxu2 %v11714_v9  ;;  %v11205_v9 = vld [vmem:[#allocation2 + $0x3e0] sm:$0xff] }
 0x40d   :  { %v5888_v31 = vpack.c.bf16 %v5338_v11, %v5336_v52  ;;  %v11196_v11 = vld [vmem:[#allocation2 + $0x398] sm:$0xff] }
 0x40f   :  { %5929 = vmatmul.bf16.gmra.mxu3 %v5888_v31 }
 0x410   :  { %6072 = vmatpush.bf16.msra.mxu3 %v11715_v16  ;;  %6055 = vmatpush.bf16.msra.mxu2 %v11716_v63 }
 0x411   :  { %v5736_v41 = vpop.f32.mrf.mxu2 }
 0x412   :  { %v5791_v32 = vpop.f32.mrf.mxu1  ;;  %v5879_v46 = vpack.c.bf16 %v5736_v41, %v5734_v5  ;;  %v5755_v35 = vpop.f32.mrf.mxu3  ;;  %v11206_v5 = vld [vmem:[#allocation2 + $0x3e8] sm:$0xff]  ;;  %v11195_v41 = vld [vmem:[#allocation2 + $0x390] sm:$0xff] }
 0x413   :  { %v5880_v48 = vpack.c.bf16 %v5755_v35, %v5753_v59  ;;  %v11179_v59 = vld [vmem:[#allocation2 + $0x310] sm:$0xff]  ;;  %v11186_v35 = vld [vmem:[#allocation2 + $0x348] sm:$0xff] }
 0x414   :  { %6073 = vmatpush.bf16.msra.mxu3 %v11717_v28  ;;  %v5774_v43 = vpop.f32.mrf.mxu0  ;;  %5943 = vmatmul.bf16.vlgmr.msrb.gmra.mxu0 %v5879_v46  ;;  %v11178_v46 = vld [vmem:[#allocation2 + $0x308] sm:$0xff] }
 0x415   :  { %6056 = vmatpush.bf16.msra.mxu2 %v11718_v33  ;;  %v5881_v12 = vpack.c.bf16 %v5774_v43, %v5772_v37  ;;  %5962 = vmatmul.bf16.vlgmr.msrb.gmra.mxu1 %v5880_v48  ;;  %v11187_v37 = vld [vmem:[#allocation2 + $0x350] sm:$0xff]  ;;  %v11204_v48 = vld [vmem:[#allocation2 + $0x3d8] sm:$0xff]  ;;  %v11194_v28 = vld [vmem:[#allocation2 + $0x388] sm:$0xff] }
 0x416   :  { %6279 = vmatpush.bf16.msrb.mxu0 %v11184_v50  ;;  %6298 = vmatpush.bf16.msrb.mxu1 %v11192_v23  ;;  %v11177_v43 = vld [vmem:[#allocation2 + $0x300] sm:$0xff]  ;;  %v11203_v23 = vld [vmem:[#allocation2 + $0x3d0] sm:$0xff] }
 0x417   :  { %5981 = vmatmul.bf16.vlgmr.msrb.gmra.mxu2 %v5881_v12  ;;  %v11185_v33 = vld [vmem:[#allocation2 + $0x340] sm:$0xff] }
 0x418   :  { %6074 = vmatpush.bf16.msra.mxu3 %v11719_v58  ;;  %v11193_v58 = vld [vmem:[#allocation2 + $0x380] sm:$0xff] }
 0x419   :  { %v5739_v4 = vpop.f32.mrf.mxu2  ;;  %6317 = vmatpush.bf16.msrb.mxu2 %v11200_v2 }
 0x41a   :  { %v5793_v8 = vpop.f32.mrf.mxu1  ;;  %v5758_v7 = vpop.f32.mrf.mxu3  ;;  %6280 = vmatpush.bf16.msrb.mxu0 %v11183_v6  ;;  %6299 = vmatpush.bf16.msrb.mxu1 %v11191_v38  ;;  %v10245_v38 = vld [vmem:[#allocation5 + $0x470] sm:$0xf] }
 0x41b   :  { %v5882_v0 = vpack.c.bf16 %v5793_v8, %v5791_v32 }
 0x41c   :  { %v5777_v25 = vpop.f32.mrf.mxu0  ;;  %6075 = vmatpush.bf16.msra.mxu3 %v11720_v14  ;;  %v11202_v14 = vld [vmem:[#allocation2 + $0x3c8] sm:$0xff] }
 0x41d   :  { %6318 = vmatpush.bf16.msrb.mxu2 %v11199_v26 }
 0x41e   :  { %6281 = vmatpush.bf16.msrb.mxu0 %v11182_v22  ;;  %6300 = vmatpush.bf16.msrb.mxu1 %v11190_v13  ;;  %v11368_v22 = vld [vmem:[#allocation5 + $0x4f4] sm:$0xf0] }
 0x41f   :  { %6000 = vmatmul.bf16.vlgmr.msrb.gmra.mxu3 %v5882_v0  ;;  %v10309_v0 = vld [vmem:[#allocation5 + $0x4f0] sm:$0xf] }
 0x420   :  { %6336 = vmatpush.bf16.msrb.mxu3 %v11208_v36  ;;  %v10310_v13 = vor.u32 %v11368_v22, %v10309_v0  ;;  %v10237_v36 = vld [vmem:[#allocation5 + $0x460] sm:$0xf]  ;;  %v11344_v22 = vld [vmem:[#allocation5 + $0x434] sm:$0xf0] }
 0x421   :  { %v5741_v60 = vpop.f32.mrf.mxu2  ;;  %6319 = vmatpush.bf16.msrb.mxu2 %v11198_v62  ;;  %v11350_v62 = vld [vmem:[#allocation5 + $0x464] sm:$0xf0] }
 0x422   :  { %v5796_v20 = vpop.f32.mrf.mxu1  ;;  %v5889_v17 = vpack.c.bf16 %v5741_v60, %v5739_v4  ;;  %v5760_v61 = vpop.f32.mrf.mxu3  ;;  %6282 = vmatpush.bf16.msrb.mxu0 %v11181_v40  ;;  %6301 = vmatpush.bf16.msrb.mxu1 %v11189_v57  ;;  %v10238_v40 = vor.u32 %v11350_v62, %v10237_v36  ;;  %v10301_v60 = vld [vmem:[#allocation5 + $0x4e0] sm:$0xf]  ;;  %v11351_v57 = vld [vmem:[#allocation5 + $0x474] sm:$0xf] }
 0x423   :  { %v5890_v47 = vpack.c.bf16 %v5760_v61, %v5758_v7  ;;  %v11352_v7 = vld [vmem:[#allocation5 + $0x474] sm:$0xf0]  ;;  %v11201_v61 = vld [vmem:[#allocation2 + $0x3c0] sm:$0xff] }
 0x424   :  { %6337 = vmatpush.bf16.msrb.mxu3 %v11207_v53  ;;  %v5779_v54 = vpop.f32.mrf.mxu0  ;;  %5948 = vmatmul.bf16.gmra.mxu0 %v5889_v17 }
 0x425   :  { %v5891_v52 = vpack.c.bf16 %v5779_v54, %v5777_v25  ;;  %5967 = vmatmul.bf16.gmra.mxu1 %v5890_v47  ;;  %6320 = vmatpush.bf16.msrb.mxu2 %v11197_v55  ;;  %v10246_v25 = vor.u32 %v11352_v7, %v10245_v38  ;;  %v10247_v55 = vld [vmem:[#allocation5 + $0x478] sm:$0xf0] }
 0x426   :  { %6283 = vmatpush.bf16.msrb.mxu0 %v11180_v18  ;;  %6302 = vmatpush.bf16.msrb.mxu1 %v11188_v19  ;;  %v10250_v18 = vor.u32 %v11351_v57, %v10247_v55  ;;  %v10205_v55 = vld [vmem:[#allocation5 + $0x420] sm:$0xf] }
 0x427   :  { %5986 = vmatmul.bf16.gmra.mxu2 %v5891_v52 }
 0x428   :  { %6338 = vmatpush.bf16.msrb.mxu3 %v11206_v5  ;;  %v10229_v5 = vld [vmem:[#allocation5 + $0x450] sm:$0xf] }
 0x429   :  { %v5810_v31 = vpop.f32.mrf.mxu2  ;;  %6321 = vmatpush.bf16.msrb.mxu2 %v11196_v11  ;;  %v11348_v11 = vld [vmem:[#allocation5 + $0x454] sm:$0xf0] }
 0x42a   :  { %v5798_v30 = vpop.f32.mrf.mxu1  ;;  %v5829_v63 = vpop.f32.mrf.mxu3  ;;  %6284 = vmatpush.bf16.msrb.mxu0 %v11179_v59  ;;  %6303 = vmatpush.bf16.msrb.mxu1 %v11187_v37  ;;  %v10293_v59 = vld [vmem:[#allocation5 + $0x4d0] sm:$0xf]  ;;  %v11349_v37 = vld [vmem:[#allocation5 + $0x464] sm:$0xf] }
 0x42b   :  { %v5892_v16 = vpack.c.bf16 %v5798_v30, %v5796_v20  ;;  %v11366_v20 = vld [vmem:[#allocation5 + $0x4e4] sm:$0xf0]  ;;  %v10230_v30 = vor.u32 %v11348_v11, %v10229_v5  ;;  %v11343_v5 = vld [vmem:[#allocation5 + $0x434] sm:$0xf]  ;;  %v10215_v11 = vld [vmem:[#allocation5 + $0x438] sm:$0xf0] }
 0x42c   :  { %v5848_v32 = vpop.f32.mrf.mxu0  ;;  %6339 = vmatpush.bf16.msrb.mxu3 %v11205_v9  ;;  %v10302_v47 = vor.u32 %v11366_v20, %v10301_v60  ;;  %v10239_v9 = vld [vmem:[#allocation5 + $0x468] sm:$0xf0]  ;;  %v11345_v60 = vld [vmem:[#allocation5 + $0x444] sm:$0xf] }
 0x42d   :  { %6322 = vmatpush.bf16.msrb.mxu2 %v11195_v41  ;;  %v11367_v41 = vld [vmem:[#allocation5 + $0x4f4] sm:$0xf]  ;;  %v10223_v20 = vld [vmem:[#allocation5 + $0x448] sm:$0xf0] }
 0x42e   :  { %6285 = vmatpush.bf16.msrb.mxu0 %v11178_v46  ;;  %6304 = vmatpush.bf16.msrb.mxu1 %v11186_v35  ;;  %v10221_v46 = vld [vmem:[#allocation5 + $0x440] sm:$0xf] }
 0x42f   :  { %6005 = vmatmul.bf16.gmra.mxu3 %v5892_v16 }
 0x430   :  { %6340 = vmatpush.bf16.msrb.mxu3 %v11204_v48  ;;  %v11346_v48 = vld [vmem:[#allocation5 + $0x444] sm:$0xf0] }
 0x431   :  { %v5812_v12 = vpop.f32.mrf.mxu2  ;;  %6323 = vmatpush.bf16.msrb.mxu2 %v11194_v28  ;;  %v10285_v28 = vld [vmem:[#allocation5 + $0x4c0] sm:$0xf] }
 0x432   :  { %v5867_v50 = vpop.f32.mrf.mxu1  ;;  %v5883_v2 = vpack.c.bf16 %v5812_v12, %v5810_v31  ;;  %v5831_v6 = vpop.f32.mrf.mxu3  ;;  %6286 = vmatpush.bf16.msrb.mxu0 %v11177_v43  ;;  %6305 = vmatpush.bf16.msrb.mxu1 %v11185_v33  ;;  %v11364_v31 = vld [vmem:[#allocation5 + $0x4d4] sm:$0xf0]  ;;  %v11362_v43 = vld [vmem:[#allocation5 + $0x4c4] sm:$0xf0]  ;;  %v10222_v33 = vor.u32 %v11346_v48, %v10221_v46  ;;  %v10261_v46 = vld [vmem:[#allocation5 + $0x490] sm:$0xf] }
 0x433   :  { %v5884_v4 = vpack.c.bf16 %v5831_v6, %v5829_v63  ;;  %v10294_v16 = vor.u32 %v11364_v31, %v10293_v59  ;;  %v10242_v63 = vor.u32 %v11349_v37, %v10239_v9  ;;  %v10286_v12 = vor.u32 %v11362_v43, %v10285_v28  ;;  %v11361_v37 = vld [vmem:[#allocation5 + $0x4c4] sm:$0xf]  ;;  %v10287_v9 = vld [vmem:[#allocation5 + $0x4c8] sm:$0xf0]  ;;  %v11356_v48 = vld [vmem:[#allocation5 + $0x494] sm:$0xf0] }
 0x434   :  { %v5850_v8 = vpop.f32.mrf.mxu0  ;;  %6019 = vmatmul.bf16.vlgmr.msra.gmra.mxu0 %v5883_v2  ;;  %6341 = vmatpush.bf16.msrb.mxu3 %v11203_v23  ;;  %v10231_v23 = vld [vmem:[#allocation5 + $0x458] sm:$0xf0]  ;;  %v11365_v2 = vld [vmem:[#allocation5 + $0x4e4] sm:$0xf]  ;;  %v10218_v31 = vor.u32 %v11343_v5, %v10215_v11  ;;  %v10207_v43 = vld [vmem:[#allocation5 + $0x428] sm:$0xf0] }
 0x435   :  { %v5885_v26 = vpack.c.bf16 %v5850_v8, %v5848_v32  ;;  %6038 = vmatmul.bf16.vlgmr.msra.gmra.mxu1 %v5884_v4  ;;  %6324 = vmatpush.bf16.msrb.mxu2 %v11193_v58  ;;  %v10311_v32 = vld [vmem:[#allocation5 + $0x4f8] sm:$0xf0]  ;;  %v10303_v8 = vld [vmem:[#allocation5 + $0x4e8] sm:$0xf0]  ;;  %v11341_v28 = vld [vmem:[#allocation5 + $0x424] sm:$0xf] }
 0x436   :  { %6631 = vmatpush.bf16.msra.mxu0 %v10246_v25  ;;  %6650 = vmatpush.bf16.msra.mxu1 %v10310_v13  ;;  %v10314_v35 = vor.u32 %v11367_v41, %v10311_v32  ;;  %v10306_v0 = vor.u32 %v11365_v2, %v10303_v8  ;;  %v10277_v13 = vld [vmem:[#allocation5 + $0x4b0] sm:$0xf]  ;;  %v11340_v32 = vld [vmem:[#allocation5 + $0x414] sm:$0xf0]  ;;  %v10189_v2 = vld [vmem:[#allocation5 + $0x400] sm:$0xf] }
 0x437   :  { %6057 = vmatmul.bf16.vlgmr.msra.gmra.mxu2 %v5885_v26  ;;  %v10197_v41 = vld [vmem:[#allocation5 + $0x410] sm:$0xf]  ;;  %v11354_v8 = vld [vmem:[#allocation5 + $0x484] sm:$0xf0]  ;;  %v11353_v5 = vld [vmem:[#allocation5 + $0x484] sm:$0xf] }
 0x438   :  { %6342 = vmatpush.bf16.msrb.mxu3 %v11202_v14  ;;  %v10213_v14 = vld [vmem:[#allocation5 + $0x430] sm:$0xf]  ;;  %v10255_v11 = vld [vmem:[#allocation5 + $0x488] sm:$0xf0] }
 0x439   :  { %v5815_v53 = vpop.f32.mrf.mxu2  ;;  %6669 = vmatpush.bf16.msra.mxu2 %v10250_v18  ;;  %v10214_v62 = vor.u32 %v11344_v22, %v10213_v14  ;;  %v10271_v22 = vld [vmem:[#allocation5 + $0x4a8] sm:$0xf0] }
 0x43a   :  { %v5869_v17 = vpop.f32.mrf.mxu1  ;;  %v5834_v54 = vpop.f32.mrf.mxu3  ;;  %6632 = vmatpush.bf16.msra.mxu0 %v10238_v40  ;;  %6651 = vmatpush.bf16.msra.mxu1 %v10302_v47  ;;  %v11360_v40 = vld [vmem:[#allocation5 + $0x4b4] sm:$0xf0] }
 0x43b   :  { %v5886_v52 = vpack.c.bf16 %v5869_v17, %v5867_v50  ;;  %v11347_v50 = vld [vmem:[#allocation5 + $0x454] sm:$0xf]  ;;  %v10278_v57 = vor.u32 %v11360_v40, %v10277_v13  ;;  %v11337_v40 = vld [vmem:[#allocation5 + $0x404] sm:$0xf] }
 0x43c   :  { %v5853_v19 = vpop.f32.mrf.mxu0  ;;  %6343 = vmatpush.bf16.msrb.mxu3 %v11201_v61  ;;  %v10234_v4 = vor.u32 %v11347_v50, %v10231_v23  ;;  %v11363_v17 = vld [vmem:[#allocation5 + $0x4d4] sm:$0xf]  ;;  %v10295_v61 = vld [vmem:[#allocation5 + $0x4d8] sm:$0xf0] }
 0x43d   :  { %6670 = vmatpush.bf16.msra.mxu2 %v10242_v63  ;;  %v10298_v47 = vor.u32 %v11363_v17, %v10295_v61  ;;  %v10290_v63 = vor.u32 %v11361_v37, %v10287_v9  ;;  %v11359_v50 = vld [vmem:[#allocation5 + $0x4b4] sm:$0xf]  ;;  %v10279_v23 = vld [vmem:[#allocation5 + $0x4b8] sm:$0xf0]  ;;  %v11425_v61 = vld [vmem:[#allocation7 + $0x9c4] sm:$0xf] }
 0x43e   :  { %6633 = vmatpush.bf16.msra.mxu0 %v10230_v30  ;;  %6652 = vmatpush.bf16.msra.mxu1 %v10294_v16  ;;  %v11430_v37 = vld [vmem:[#allocation7 + $0x9e4] sm:$0xf0] }
 0x43f   :  { %6076 = vmatmul.bf16.vlgmr.msra.gmra.mxu3 %v5886_v52  ;;  %v10269_v52 = vld [vmem:[#allocation5 + $0x4a0] sm:$0xf] }
 0x440   :  { %6688 = vmatpush.bf16.msra.mxu3 %v10314_v35  ;;  %v10198_v35 = vor.u32 %v11340_v32, %v10197_v41  ;;  %v10477_v41 = vld [vmem:[#allocation7 + $0x940] sm:$0xf] }
 0x441   :  { %v5817_v6 = vpop.f32.mrf.mxu2  ;;  %6671 = vmatpush.bf16.msra.mxu2 %v10234_v4  ;;  %v10253_v4 = vld [vmem:[#allocation5 + $0x480] sm:$0xf] }
 0x442   :  { %v5872_v58 = vpop.f32.mrf.mxu1  ;;  %v5893_v38 = vpack.c.bf16 %v5817_v6, %v5815_v53  ;;  %v5836_v7 = vpop.f32.mrf.mxu3  ;;  %6634 = vmatpush.bf16.msra.mxu0 %v10222_v33  ;;  %6653 = vmatpush.bf16.msra.mxu1 %v10286_v12  ;;  %v10226_v53 = vor.u32 %v11345_v60, %v10223_v20  ;;  %v10262_v33 = vor.u32 %v11356_v48, %v10261_v46  ;;  %v10191_v20 = vld [vmem:[#allocation5 + $0x408] sm:$0xf0]  ;;  %v11413_v32 = vld [vmem:[#allocation7 + $0x95c] sm:$0xf0]  ;;  %v11409_v46 = vld [vmem:[#allocation7 + $0x944] sm:$0xf] }
 0x443   :  { %v5894_v26 = vpack.c.bf16 %v5836_v7, %v5834_v54  ;;  %v11342_v54 = vld [vmem:[#allocation5 + $0x424] sm:$0xf0]  ;;  %v10210_v12 = vor.u32 %v11341_v28, %v10207_v43  ;;  %v10282_v6 = vor.u32 %v11359_v50, %v10279_v23  ;;  %v10254_v7 = vor.u32 %v11354_v8, %v10253_v4  ;;  %v10479_v48 = vld [vmem:[#allocation7 + $0x960] sm:$0xf0]  ;;  %v11426_v50 = vld [vmem:[#allocation7 + $0x9cc] sm:$0xf] }
 0x444   :  { %v5855_v25 = vpop.f32.mrf.mxu0  ;;  %6024 = vmatmul.bf16.gmra.mxu0 %v5893_v38  ;;  %6689 = vmatpush.bf16.msra.mxu3 %v10306_v0  ;;  %v10206_v18 = vor.u32 %v11342_v54, %v10205_v55  ;;  %v11339_v0 = vld [vmem:[#allocation5 + $0x414] sm:$0xf]  ;;  %v10194_v17 = vor.u32 %v11337_v40, %v10191_v20  ;;  %v10517_v28 = vld [vmem:[#allocation7 + $0x988] sm:$0xf]  ;;  %v10551_v23 = vld [vmem:[#allocation7 + $0x9e8] sm:$0xf0] }
 0x445   :  { %v5895_v36 = vpack.c.bf16 %v5855_v25, %v5853_v19  ;;  %6043 = vmatmul.bf16.gmra.mxu1 %v5894_v26  ;;  %v11358_v19 = vld [vmem:[#allocation5 + $0x4a4] sm:$0xf0]  ;;  %6672 = vmatpush.bf16.msra.mxu2 %v10226_v53  ;;  %v10199_v26 = vld [vmem:[#allocation5 + $0x418] sm:$0xf0]  ;;  %v11357_v25 = vld [vmem:[#allocation5 + $0x4a4] sm:$0xf] }
 0x446   :  { %6635 = vmatpush.bf16.msra.mxu0 %v10214_v62  ;;  %6654 = vmatpush.bf16.msra.mxu1 %v10278_v57  ;;  %v10270_v30 = vor.u32 %v11358_v19, %v10269_v52  ;;  %v10202_v14 = vor.u32 %v11339_v0, %v10199_v26  ;;  %v10274_v13 = vor.u32 %v11357_v25, %v10271_v22  ;;  %v11429_v62 = vld [vmem:[#allocation7 + $0x9dc] sm:$0xf0]  ;;  %v11355_v57 = vld [vmem:[#allocation5 + $0x494] sm:$0xf]  ;;  %v10263_v53 = vld [vmem:[#allocation5 + $0x498] sm:$0xf0] }
 0x447   :  { %6062 = vmatmul.bf16.gmra.mxu2 %v5895_v36  ;;  %v10541_v36 = vld [vmem:[#allocation7 + $0x9c0] sm:$0xf]  ;;  %v10266_v55 = vor.u32 %v11355_v57, %v10263_v53  ;;  %v11422_v43 = vld [vmem:[#allocation7 + $0x9a4] sm:$0xf0]  ;;  %v11401_v4 = vld [vmem:[#allocation7 + $0x904] sm:$0xf] }
 0x448   :  { %6690 = vmatpush.bf16.msra.mxu3 %v10298_v47  ;;  %v10542_v60 = vor.u32 %v11429_v62, %v10541_v36  ;;  %v10543_v47 = vld [vmem:[#allocation7 + $0x9e0] sm:$0xf0]  ;;  %v10509_v52 = vld [vmem:[#allocation7 + $0x980] sm:$0xf]  ;;  %v11414_v0 = vld [vmem:[#allocation7 + $0x964] sm:$0xf0] }
 0x449   :  { %6673 = vmatpush.bf16.msra.mxu2 %v10218_v31  ;;  %v10546_v54 = vor.u32 %v11425_v61, %v10543_v47  ;;  %v10549_v31 = vld [vmem:[#allocation7 + $0x9c8] sm:$0xf]  ;;  %v10519_v22 = vld [vmem:[#allocation7 + $0x9a8] sm:$0xf0]  ;;  %v10413_v36 = vld [vmem:[#allocation7 + $0x8c0] sm:$0xf] }
 0x44a   :  { %v5874_v59 = vpop.f32.mrf.mxu1  ;;  %6636 = vmatpush.bf16.msra.mxu0 %v10206_v18  ;;  %6655 = vmatpush.bf16.msra.mxu1 %v10270_v30  ;;  %v11421_v18 = vld [vmem:[#allocation7 + $0x99c] sm:$0xf0]  ;;  %v10511_v30 = vld [vmem:[#allocation7 + $0x9a0] sm:$0xf0]  ;;  %v10453_v57 = vld [vmem:[#allocation7 + $0x908] sm:$0xf] }
 0x44b   :  { %v5896_v16 = vpack.c.bf16 %v5874_v59, %v5872_v58  ;;  %v11338_v58 = vld [vmem:[#allocation5 + $0x404] sm:$0xf0]  ;;  %v10510_v19 = vor.u32 %v11421_v18, %v10509_v52  ;;  %v11417_v59 = vld [vmem:[#allocation7 + $0x984] sm:$0xf]  ;;  %v11397_v62 = vld [vmem:[#allocation7 + $0x8dc] sm:$0xf0] }
 0x44c   :  { %6691 = vmatpush.bf16.msra.mxu3 %v10290_v63  ;;  %v10190_v38 = vor.u32 %v11338_v58, %v10189_v2  ;;  %v10514_v9 = vor.u32 %v11417_v59, %v10511_v30  ;;  %v10258_v63 = vor.u32 %v11353_v5, %v10255_v11  ;;  %v10554_v2 = vor.u32 %v11426_v50, %v10551_v23  ;;  %v11405_v58 = vld [vmem:[#allocation7 + $0x91c] sm:$0xf0]  ;;  %v11393_v40 = vld [vmem:[#allocation7 + $0x8c4] sm:$0xf]  ;;  %v11406_v53 = vld [vmem:[#allocation7 + $0x924] sm:$0xf0] }
 0x44d   :  { %6674 = vmatpush.bf16.msra.mxu2 %v10210_v12  ;;  %v10518_v12 = vor.u32 %v11422_v43, %v10517_v28  ;;  %v10415_v20 = vld [vmem:[#allocation7 + $0x8e0] sm:$0xf0]  ;;  %v10454_v61 = vor.u32 %v11406_v53, %v10453_v57  ;;  %v11410_v47 = vld [vmem:[#allocation7 + $0x94c] sm:$0xf]  ;;  %v10381_v52 = vld [vmem:[#allocation7 + $0x880] sm:$0xf] }
 0x44e   :  { %6637 = vmatpush.bf16.msra.mxu0 %v10198_v35  ;;  %6656 = vmatpush.bf16.msra.mxu1 %v10262_v33  ;;  %v10478_v35 = vor.u32 %v11413_v32, %v10477_v41  ;;  %v10482_v33 = vor.u32 %v11409_v46, %v10479_v48  ;;  %v11389_v18 = vld [vmem:[#allocation7 + $0x89c] sm:$0xf0]  ;;  %v10383_v11 = vld [vmem:[#allocation7 + $0x8a0] sm:$0xf0]  ;;  %v10421_v59 = vld [vmem:[#allocation7 + $0x8c8] sm:$0xf] }
 0x44f   :  { %6081 = vmatmul.bf16.gmra.mxu3 %v5896_v16  ;;  %v10550_v16 = vor.u32 %v11430_v37, %v10549_v31  ;;  %v10382_v5 = vor.u32 %v11389_v18, %v10381_v52  ;;  %v11398_v30 = vld [vmem:[#allocation7 + $0x8e4] sm:$0xf0]  ;;  %v10349_v41 = vld [vmem:[#allocation7 + $0x840] sm:$0xf]  ;;  %v11377_v46 = vld [vmem:[#allocation7 + $0x844] sm:$0xf] }
 0x450   :  { %6692 = vmatpush.bf16.msra.mxu3 %v10282_v6  ;;  %v10445_v6 = vld [vmem:[#allocation7 + $0x900] sm:$0xf]  ;;  %v10422_v37 = vor.u32 %v11398_v30, %v10421_v59  ;;  %v10351_v48 = vld [vmem:[#allocation7 + $0x860] sm:$0xf0]  ;;  %v10389_v28 = vld [vmem:[#allocation7 + $0x888] sm:$0xf] }
 0x451   :  { %6675 = vmatpush.bf16.msra.mxu2 %v10202_v14  ;;  %v10446_v8 = vor.u32 %v11405_v58, %v10445_v6  ;;  %v11418_v14 = vld [vmem:[#allocation7 + $0x98c] sm:$0xf]  ;;  %v11381_v32 = vld [vmem:[#allocation7 + $0x85c] sm:$0xf0]  ;;  %v11390_v43 = vld [vmem:[#allocation7 + $0x8a4] sm:$0xf0] }
 0x452   :  { %6638 = vmatpush.bf16.msra.mxu0 %v10190_v38  ;;  %6657 = vmatpush.bf16.msra.mxu1 %v10254_v7  ;;  %v10447_v38 = vld [vmem:[#allocation7 + $0x920] sm:$0xf0]  ;;  %v10485_v7 = vld [vmem:[#allocation7 + $0x948] sm:$0xf]  ;;  %v11394_v50 = vld [vmem:[#allocation7 + $0x8cc] sm:$0xf] }
 0x453   :  { %v10450_v26 = vor.u32 %v11401_v4, %v10447_v38  ;;  %v10486_v25 = vor.u32 %v11414_v0, %v10485_v7  ;;  %v10423_v23 = vld [vmem:[#allocation7 + $0x8e8] sm:$0xf0]  ;;  %v10317_v6 = vld [vmem:[#allocation7 + $0x800] sm:$0xf]  ;;  %v11369_v4 = vld [vmem:[#allocation7 + $0x804] sm:$0xf] }
 0x454   :  { %6287 = vmatmul.bf16.vlgmr.msrb.gmra.mxu0 %v12184_v21  ;;  %6693 = vmatpush.bf16.msra.mxu3 %v10274_v13  ;;  %v10522_v13 = vor.u32 %v11418_v14, %v10519_v22  ;;  %v11373_v58 = vld [vmem:[#allocation7 + $0x81c] sm:$0xf0]  ;;  %v10319_v38 = vld [vmem:[#allocation7 + $0x820] sm:$0xf0]  ;;  %v10357_v7 = vld [vmem:[#allocation7 + $0x848] sm:$0xf] }
 0x455   :  { %6306 = vmatmul.bf16.vlgmr.msrb.gmra.mxu1 %v12186_v27  ;;  %6676 = vmatpush.bf16.msra.mxu2 %v10194_v17  ;;  %v10418_v17 = vor.u32 %v11393_v40, %v10415_v20  ;;  %v11382_v0 = vld [vmem:[#allocation7 + $0x864] sm:$0xf0]  ;;  %v11386_v14 = vld [vmem:[#allocation7 + $0x88c] sm:$0xf]  ;;  %v11427_v57 = vld [vmem:[#allocation7 + $0x9d4] sm:$0xf] }
 0x456   :  { %7092 = vmatpush.bf16.msrb.mxu0 %v10542_v60  ;;  %7111 = vmatpush.bf16.msrb.mxu1 %v10546_v54  ;;  %v10414_v60 = vor.u32 %v11397_v62, %v10413_v36  ;;  %v10391_v22 = vld [vmem:[#allocation7 + $0x8a8] sm:$0xf0]  ;;  %v10557_v36 = vld [vmem:[#allocation7 + $0x9d0] sm:$0xf]  ;;  %v10325_v40 = vld [vmem:[#allocation7 + $0x808] sm:$0xf] }
 0x457   :  { %6325 = vmatmul.bf16.vlgmr.msrb.gmra.mxu2 %v12193_v51  ;;  %v11431_v62 = vld [vmem:[#allocation7 + $0x9ec] sm:$0xf0]  ;;  %v11374_v20 = vld [vmem:[#allocation7 + $0x824] sm:$0xf0]  ;;  %v10559_v53 = vld [vmem:[#allocation7 + $0x9f0] sm:$0xf0] }
 0x458   :  { %6694 = vmatpush.bf16.msra.mxu3 %v10266_v55  ;;  %v10487_v55 = vld [vmem:[#allocation7 + $0x968] sm:$0xf0]  ;;  %v10525_v52 = vld [vmem:[#allocation7 + $0x990] sm:$0xf]  ;;  %v10565_v59 = vld [vmem:[#allocation7 + $0x9d8] sm:$0xf] }
 0x459   :  { %7130 = vmatpush.bf16.msrb.mxu2 %v10550_v16  ;;  %v10490_v54 = vor.u32 %v11410_v47, %v10487_v55  ;;  %v10455_v16 = vld [vmem:[#allocation7 + $0x928] sm:$0xf0]  ;;  %v11423_v18 = vld [vmem:[#allocation7 + $0x9ac] sm:$0xf0]  ;;  %v11432_v30 = vld [vmem:[#allocation7 + $0x9f4] sm:$0xf0] }
 0x45a   :  { %7093 = vmatpush.bf16.msrb.mxu0 %v10510_v19  ;;  %7112 = vmatpush.bf16.msrb.mxu1 %v10514_v9  ;;  %v11385_v19 = vld [vmem:[#allocation7 + $0x884] sm:$0xf]  ;;  %v11402_v9 = vld [vmem:[#allocation7 + $0x90c] sm:$0xf] }
 0x45b   :  { %v10386_v31 = vor.u32 %v11385_v19, %v10383_v11  ;;  %v11378_v47 = vld [vmem:[#allocation7 + $0x84c] sm:$0xf]  ;;  %v11419_v19 = vld [vmem:[#allocation7 + $0x994] sm:$0xf] }
 0x45c   :  { %6695 = vmatpush.bf16.msra.mxu3 %v10258_v63  ;;  %v10458_v63 = vor.u32 %v11402_v9, %v10455_v16  ;;  %v10359_v55 = vld [vmem:[#allocation7 + $0x868] sm:$0xf0]  ;;  %v10527_v11 = vld [vmem:[#allocation7 + $0x9b0] sm:$0xf0]  ;;  %v10566_v9 = vor.u32 %v11432_v30, %v10565_v59 }
 0x45d   :  { %7131 = vmatpush.bf16.msrb.mxu2 %v10518_v12  ;;  %v10390_v12 = vor.u32 %v11390_v43, %v10389_v28  ;;  %v11370_v16 = vld [vmem:[#allocation7 + $0x80c] sm:$0xf]  ;;  %v10533_v28 = vld [vmem:[#allocation7 + $0x998] sm:$0xf] }
 0x45e   :  { %7094 = vmatpush.bf16.msrb.mxu0 %v10478_v35  ;;  %7113 = vmatpush.bf16.msrb.mxu1 %v10482_v33  ;;  %v10350_v35 = vor.u32 %v11381_v32, %v10349_v41  ;;  %v10354_v33 = vor.u32 %v11377_v46, %v10351_v48  ;;  %v11415_v32 = vld [vmem:[#allocation7 + $0x96c] sm:$0xf0]  ;;  %v11411_v46 = vld [vmem:[#allocation7 + $0x954] sm:$0xf]  ;;  %v11424_v43 = vld [vmem:[#allocation7 + $0x9b4] sm:$0xf0] }
 0x45f   :  { %6344 = vmatmul.bf16.vlgmr.msrb.gmra.mxu3 %v12195_v1  ;;  %v10495_v48 = vld [vmem:[#allocation7 + $0x970] sm:$0xf0] }
 0x460   :  { %7149 = vmatpush.bf16.msrb.mxu3 %v10554_v2  ;;  %v10426_v2 = vor.u32 %v11394_v50, %v10423_v23  ;;  %v11428_v50 = vld [vmem:[#allocation7 + $0x9dc] sm:$0xf] }
 0x461   :  { %7132 = vmatpush.bf16.msrb.mxu2 %v10486_v25  ;;  %v10358_v25 = vor.u32 %v11382_v0, %v10357_v7  ;;  %v10567_v23 = vld [vmem:[#allocation7 + $0x9f8] sm:$0xf0]  ;;  %v10463_v7 = vld [vmem:[#allocation7 + $0x930] sm:$0xf0]  ;;  %v10501_v0 = vld [vmem:[#allocation7 + $0x958] sm:$0xf] }
 0x462   :  { %7095 = vmatpush.bf16.msrb.mxu0 %v10446_v8  ;;  %7114 = vmatpush.bf16.msrb.mxu1 %v10450_v26  ;;  %v10318_v8 = vor.u32 %v11373_v58, %v10317_v6  ;;  %v10322_v26 = vor.u32 %v11369_v4, %v10319_v38  ;;  %v10461_v6 = vld [vmem:[#allocation7 + $0x910] sm:$0xf]  ;;  %v11403_v4 = vld [vmem:[#allocation7 + $0x914] sm:$0xf] }
 0x463   :  { %v11407_v58 = vld [vmem:[#allocation7 + $0x92c] sm:$0xf0] }
 0x464   :  { %6292 = vmatmul.bf16.gmra.mxu0 %v12202_v24  ;;  %7150 = vmatpush.bf16.msrb.mxu3 %v10522_v13  ;;  %v10394_v13 = vor.u32 %v11386_v14, %v10391_v22  ;;  %v10462_v38 = vor.u32 %v11407_v58, %v10461_v6  ;;  %v10466_v14 = vor.u32 %v11403_v4, %v10463_v7  ;;  %v11396_v6 = vld [vmem:[#allocation7 + $0x8dc] sm:$0xf]  ;;  %v11371_v7 = vld [vmem:[#allocation7 + $0x814] sm:$0xf] }
 0x465   :  { %6311 = vmatmul.bf16.gmra.mxu1 %v12204_v29  ;;  %7133 = vmatpush.bf16.msrb.mxu2 %v10454_v61  ;;  %v10562_v61 = vor.u32 %v11427_v57, %v10559_v53  ;;  %v10431_v53 = vld [vmem:[#allocation7 + $0x8f0] sm:$0xf0]  ;;  %v10439_v58 = vld [vmem:[#allocation7 + $0x8f8] sm:$0xf0] }
 0x466   :  { %7096 = vmatpush.bf16.msrb.mxu0 %v10414_v60  ;;  %7115 = vmatpush.bf16.msrb.mxu1 %v10418_v17  ;;  %v10558_v60 = vor.u32 %v11431_v62, %v10557_v36  ;;  %v10326_v17 = vor.u32 %v11374_v20, %v10325_v40  ;;  %v10535_v36 = vld [vmem:[#allocation7 + $0x9b8] sm:$0xf0]  ;;  %v10429_v40 = vld [vmem:[#allocation7 + $0x8d0] sm:$0xf]  ;;  %v11395_v20 = vld [vmem:[#allocation7 + $0x8d4] sm:$0xf]  ;;  %v10442_v4 = vor.u32 %v11396_v6, %v10439_v58 }
 0x467   :  { %6330 = vmatmul.bf16.gmra.mxu2 %v12211_v56  ;;  %v12670_v6 = vld [vmem:[#allocation11 + $0x8] sm:$0xff]  ;;  %v11734_v58 = vld [vmem:[#allocation13 + $0x60] sm:$0xff] }
 0x468   :  { %7151 = vmatpush.bf16.msrb.mxu3 %v10490_v54  ;;  %v10362_v54 = vor.u32 %v11378_v47, %v10359_v55  ;;  %v10434_v47 = vor.u32 %v11395_v20, %v10431_v53  ;;  %v11388_v20 = vld [vmem:[#allocation7 + $0x89c] sm:$0xf] }
 0x469   :  { %7134 = vmatpush.bf16.msrb.mxu2 %v10422_v37  ;;  %v10530_v37 = vor.u32 %v11419_v19, %v10527_v11  ;;  %v10397_v19 = vld [vmem:[#allocation7 + $0x890] sm:$0xf]  ;;  %v11387_v11 = vld [vmem:[#allocation7 + $0x894] sm:$0xf] }
 0x46a   :  { %7097 = vmatpush.bf16.msrb.mxu0 %v10382_v5  ;;  %7116 = vmatpush.bf16.msrb.mxu1 %v10386_v31  ;;  %v10526_v5 = vor.u32 %v11423_v18, %v10525_v52  ;;  %v10503_v52 = vld [vmem:[#allocation7 + $0x978] sm:$0xf0] }
 0x46c   :  { %7152 = vmatpush.bf16.msrb.mxu3 %v10458_v63  ;;  %v10327_v63 = vld [vmem:[#allocation7 + $0x828] sm:$0xf0] }
 0x46d   :  { %7135 = vmatpush.bf16.msrb.mxu2 %v10390_v12  ;;  %v10330_v41 = vor.u32 %v11370_v16, %v10327_v63  ;;  %v10534_v12 = vor.u32 %v11424_v43, %v10533_v28  ;;  %v11379_v28 = vld [vmem:[#allocation7 + $0x854] sm:$0xf] }
 0x46e   :  { %7098 = vmatpush.bf16.msrb.mxu0 %v10350_v35  ;;  %7117 = vmatpush.bf16.msrb.mxu1 %v10354_v33  ;;  %v10498_v33 = vor.u32 %v11411_v46, %v10495_v48  ;;  %v11383_v48 = vld [vmem:[#allocation7 + $0x86c] sm:$0xf0] }
 0x46f   :  { %6349 = vmatmul.bf16.gmra.mxu3 %v12213_v3 }
 0x470   :  { %7153 = vmatpush.bf16.msrb.mxu3 %v10426_v2  ;;  %v10570_v2 = vor.u32 %v11428_v50, %v10567_v23  ;;  %v11392_v50 = vld [vmem:[#allocation7 + $0x8b4] sm:$0xf0] }
 0x471   :  { %7136 = vmatpush.bf16.msrb.mxu2 %v10358_v25 }
 0x472   :  { %7099 = vmatpush.bf16.msrb.mxu0 %v10318_v8  ;;  %7118 = vmatpush.bf16.msrb.mxu1 %v10322_v26  ;;  %v11416_v26 = vld [vmem:[#allocation7 + $0x974] sm:$0xf0] }
 0x473   :  { %v10502_v22 = vor.u32 %v11416_v26, %v10501_v0 }
 0x474   :  { %6639 = vmatmul.bf16.vlgmr.msra.gmra.mxu0 %v12142_v44  ;;  %7154 = vmatpush.bf16.msrb.mxu3 %v10394_v13  ;;  %v11420_v13 = vld [vmem:[#allocation7 + $0x99c] sm:$0xf] }
 0x475   :  { %6658 = vmatmul.bf16.vlgmr.msra.gmra.mxu1 %v12144_v49  ;;  %7137 = vmatpush.bf16.msrb.mxu2 %v10326_v17  ;;  %v10538_v62 = vor.u32 %v11420_v13, %v10535_v36  ;;  %v10469_v17 = vld [vmem:[#allocation7 + $0x918] sm:$0xf] }
 0x476   :  { %7168 = vmatpush.bf16.msra.mxu0 %v10558_v60  ;;  %7187 = vmatpush.bf16.msra.mxu1 %v10562_v61  ;;  %v11399_v60 = vld [vmem:[#allocation7 + $0x8ec] sm:$0xf0]  ;;  %v11408_v61 = vld [vmem:[#allocation7 + $0x934] sm:$0xf0] }
 0x477   :  { %6677 = vmatmul.bf16.vlgmr.msra.gmra.mxu2 %v12142_v44  ;;  %v10493_v44 = vld [vmem:[#allocation7 + $0x950] sm:$0xf]  ;;  %v10430_v57 = vor.u32 %v11399_v60, %v10429_v40  ;;  %v10470_v55 = vor.u32 %v11408_v61, %v10469_v17  ;;  %v11384_v13 = vld [vmem:[#allocation7 + $0x874] sm:$0xf0]  ;;  %v12648_v17 = vld [vmem:[#allocation11] sm:$0xff] }
 0x478   :  { %7155 = vmatpush.bf16.msrb.mxu3 %v10362_v54  ;;  %v10494_v35 = vor.u32 %v11415_v32, %v10493_v44  ;;  %v11412_v54 = vld [vmem:[#allocation7 + $0x95c] sm:$0xf]  ;;  %v10341_v61 = vld [vmem:[#allocation7 + $0x818] sm:$0xf] }
 0x479   :  { %7206 = vmatpush.bf16.msra.mxu2 %v10566_v9  ;;  %v10506_v18 = vor.u32 %v11412_v54, %v10503_v52  ;;  %v11400_v9 = vld [vmem:[#allocation7 + $0x8f4] sm:$0xf0]  ;;  %v11404_v32 = vld [vmem:[#allocation7 + $0x91c] sm:$0xf] }
 0x47a   :  { %v5906_v31 = vpop.f32.mrf.mxu2  ;;  %7169 = vmatpush.bf16.msra.mxu0 %v10526_v5  ;;  %7188 = vmatpush.bf16.msra.mxu1 %v10530_v37  ;;  %v11391_v5 = vld [vmem:[#allocation7 + $0x8ac] sm:$0xf0]  ;;  %v10437_v37 = vld [vmem:[#allocation7 + $0x8d8] sm:$0xf]  ;;  %v11380_v54 = vld [vmem:[#allocation7 + $0x85c] sm:$0xf] }
 0x47b   :  { %v10398_v30 = vor.u32 %v11391_v5, %v10397_v19  ;;  %v10438_v44 = vor.u32 %v11400_v9, %v10437_v37  ;;  %v10375_v52 = vld [vmem:[#allocation7 + $0x878] sm:$0xf0]  ;;  %v11723_v5 = vld [vmem:[#allocation13 + $0x78] sm:$0xff] }
 0x47c   :  { %7156 = vmatpush.bf16.msrb.mxu3 %v10330_v41  ;;  %v10378_v19 = vor.u32 %v11380_v54, %v10375_v52  ;;  %v11747_v54 = vld [vmem:[#allocation13 + $0xd8] sm:$0xff] }
 0x47d   :  { %7207 = vmatpush.bf16.msra.mxu2 %v10534_v12  ;;  %v10405_v12 = vld [vmem:[#allocation7 + $0x898] sm:$0xf] }
 0x47e   :  { %7170 = vmatpush.bf16.msra.mxu0 %v10494_v35  ;;  %7189 = vmatpush.bf16.msra.mxu1 %v10498_v33  ;;  %v10365_v35 = vld [vmem:[#allocation7 + $0x850] sm:$0xf]  ;;  %v10367_v33 = vld [vmem:[#allocation7 + $0x870] sm:$0xf0] }
 0x47f   :  { %6696 = vmatmul.bf16.vlgmr.msra.gmra.mxu3 %v12144_v49  ;;  %v10366_v43 = vor.u32 %v11383_v48, %v10365_v35  ;;  %v10370_v23 = vor.u32 %v11379_v28, %v10367_v33  ;;  %v11728_v35 = vld [vmem:[#allocation13 + $0x28] sm:$0xff]  ;;  %v11730_v28 = vld [vmem:[#allocation13 + $0xf8] sm:$0xff] }
 0x480   :  { %7225 = vmatpush.bf16.msra.mxu3 %v10570_v2  ;;  %v10406_v2 = vor.u32 %v11392_v50, %v10405_v12  ;;  %v11729_v48 = vld [vmem:[#allocation13 + $0x68] sm:$0xff] }
 0x481   :  { %7208 = vmatpush.bf16.msra.mxu2 %v10502_v22  ;;  %v10373_v22 = vld [vmem:[#allocation7 + $0x858] sm:$0xf] }
 0x482   :  { %v5925_v8 = vpop.f32.mrf.mxu3  ;;  %v5908_v49 = vpop.f32.mrf.mxu2  ;;  %7171 = vmatpush.bf16.msra.mxu0 %v10462_v38  ;;  %7190 = vmatpush.bf16.msra.mxu1 %v10466_v14  ;;  %v11375_v38 = vld [vmem:[#allocation7 + $0x82c] sm:$0xf0]  ;;  %v10335_v14 = vld [vmem:[#allocation7 + $0x830] sm:$0xf0]  ;;  %v10374_v60 = vor.u32 %v11384_v13, %v10373_v22  ;;  %v11731_v12 = vld [vmem:[#allocation13 + $0xa8] sm:$0xff] }
 0x483   :  { %v12634_v25 = vadd.f32 %v5925_v8, %v5906_v31  ;;  %v10399_v31 = vld [vmem:[#allocation7 + $0x8b0] sm:$0xf0]  ;;  %v10333_v8 = vld [vmem:[#allocation7 + $0x810] sm:$0xf]  ;;  %v10338_v40 = vor.u32 %v11371_v7, %v10335_v14  ;;  %v11738_v7 = vld [vmem:[#allocation13 + $0x58] sm:$0xff] }
 0x484   :  { %6644 = vmatmul.bf16.gmra.mxu0 %v12150_v34  ;;  %7226 = vmatpush.bf16.msra.mxu3 %v10538_v62  ;;  %v10402_v41 = vor.u32 %v11387_v11, %v10399_v31  ;;  %v11739_v14 = vld [vmem:[#allocation13 + $0xe8] sm:$0xff] }
 0x485   :  { %6663 = vmatmul.bf16.gmra.mxu1 %v12152_v39  ;;  %7209 = vmatpush.bf16.msra.mxu2 %v10470_v55 }
 0x486   :  { %7172 = vmatpush.bf16.msra.mxu0 %v10430_v57  ;;  %7191 = vmatpush.bf16.msra.mxu1 %v10434_v47  ;;  %v10407_v57 = vld [vmem:[#allocation7 + $0x8b8] sm:$0xf0]  ;;  %v11376_v47 = vld [vmem:[#allocation7 + $0x834] sm:$0xf0] }
 0x487   :  { %6682 = vmatmul.bf16.gmra.mxu2 %v12150_v34  ;;  %v10471_v34 = vld [vmem:[#allocation7 + $0x938] sm:$0xf0]  ;;  %v10410_v53 = vor.u32 %v11388_v20, %v10407_v57  ;;  %v10342_v55 = vor.u32 %v11376_v47, %v10341_v61  ;;  %v11743_v20 = vld [vmem:[#allocation13 + $0xe0] sm:$0xff] }
 0x488   :  { %7227 = vmatpush.bf16.msra.mxu3 %v10506_v18  ;;  %v10474_v46 = vor.u32 %v11404_v32, %v10471_v34  ;;  %v11722_v18 = vld [vmem:[#allocation13 + $0x38] sm:$0xff]  ;;  %v11726_v34 = vld [vmem:[#allocation13 + $0x70] sm:$0xff]  ;;  %v11744_v57 = vld [vmem:[#allocation13 + $0x8] sm:$0xff] }
 0x489   :  { %7210 = vmatpush.bf16.msra.mxu2 %v10438_v44  ;;  %v11725_v44 = vld [vmem:[#allocation13 + $0x30] sm:$0xff]  ;;  %v11746_v61 = vld [vmem:[#allocation13 + $0x48] sm:$0xff] }
 0x48a   :  { %v5927_v59 = vpop.f32.mrf.mxu3  ;;  %v5911_v63 = vpop.f32.mrf.mxu2  ;;  %7173 = vmatpush.bf16.msra.mxu0 %v10398_v30  ;;  %7192 = vmatpush.bf16.msra.mxu1 %v10402_v41  ;;  %v11724_v30 = vld [vmem:[#allocation13 + $0xb8] sm:$0xff]  ;;  %v10343_v41 = vld [vmem:[#allocation7 + $0x838] sm:$0xf0] }
 0x48b   :  { %v12639_v16 = vadd.f32 %v5927_v59, %v5908_v49  ;;  %v10334_v49 = vor.u32 %v11375_v38, %v10333_v8  ;;  %v11736_v8 = vld [vmem:[#allocation13 + $0x18] sm:$0xff]  ;;  %v11737_v38 = vld [vmem:[#allocation13 + $0xa0] sm:$0xff] }
 0x48c   :  { %7228 = vmatpush.bf16.msra.mxu3 %v10474_v46  ;;  %v11727_v46 = vld [vmem:[#allocation13 + $0xb0] sm:$0xff] }
 0x48d   :  { %7211 = vmatpush.bf16.msra.mxu2 %v10406_v2  ;;  %v11732_v2 = vld [vmem:[#allocation13 + $0x20] sm:$0xff] }
 0x48e   :  { %7174 = vmatpush.bf16.msra.mxu0 %v10366_v43  ;;  %7193 = vmatpush.bf16.msra.mxu1 %v10370_v23 }
 0x48f   :  { %6701 = vmatmul.bf16.gmra.mxu3 %v12152_v39 }
 0x490   :  { %7229 = vmatpush.bf16.msra.mxu3 %v10442_v4  ;;  %v11735_v4 = vld [vmem:[#allocation13 + $0xf0] sm:$0xff] }
 0x491   :  { %v12642_v26 = vpop.f32.mrf.mxu0  ;;  %7212 = vmatpush.bf16.msra.mxu2 %v10374_v60  ;;  %v11742_v60 = vld [vmem:[#allocation13 + $0x50] sm:$0xff] }
 0x492   :  { %v5930_v0 = vpop.f32.mrf.mxu3  ;;  %v5913_v36 = vpop.f32.mrf.mxu2  ;;  %7175 = vmatpush.bf16.msra.mxu0 %v10334_v49  ;;  %7194 = vmatpush.bf16.msra.mxu1 %v10338_v40  ;;  %v11741_v40 = vld [vmem:[#allocation13 + $0x98] sm:$0xff] }
 0x493   :  { %v12644_v39 = vadd.f32 %v5930_v0, %v5911_v63  ;;  %v12646_v62 = vpop.f32.mrf.mxu1  ;;  %v11372_v63 = vld [vmem:[#allocation7 + $0x81c] sm:$0xf] }
 0x494   :  { %7100 = vmatmul.bf16.vlgmr.msrb.gmra.mxu0 %v12648_v17  ;;  %7230 = vmatpush.bf16.msra.mxu3 %v10410_v53  ;;  %v10346_v32 = vor.u32 %v11372_v63, %v10343_v41  ;;  %v11745_v53 = vld [vmem:[#allocation13 + $0x90] sm:$0xff]  ;;  %v11752_v63 = vld [vmem:[#allocation13 + $0x178] sm:$0xff] }
 0x495   :  { %7119 = vmatmul.bf16.vlgmr.msrb.gmra.mxu1 %v12648_v17  ;;  %7213 = vmatpush.bf16.msra.mxu2 %v10342_v55  ;;  %v11753_v41 = vld [vmem:[#allocation13 + $0xd0] sm:$0xff] }
 0x496   :  { %7264 = vmatpush.bf16.msrb.mxu0 %v11722_v18  ;;  %7283 = vmatpush.bf16.msrb.mxu1 %v11723_v5  ;;  %v11749_v5 = vld [vmem:[#allocation13 + $0x88] sm:$0xff] }
 0x497   :  { %7138 = vmatmul.bf16.vlgmr.msrb.gmra.mxu2 %v12648_v17 }
 0x498   :  { %7231 = vmatpush.bf16.msra.mxu3 %v10378_v19  ;;  %v11748_v19 = vld [vmem:[#allocation13] sm:$0xff] }
 0x499   :  { %v12653_v59 = vpop.f32.mrf.mxu0  ;;  %7302 = vmatpush.bf16.msrb.mxu2 %v11724_v30  ;;  %v11751_v30 = vld [vmem:[#allocation13 + $0x138] sm:$0xff] }
 0x49a   :  { %v5932_v11 = vpop.f32.mrf.mxu3  ;;  %v12659_v9 = vpop.f32.mrf.mxu2  ;;  %7265 = vmatpush.bf16.msrb.mxu0 %v11725_v44  ;;  %7284 = vmatpush.bf16.msrb.mxu1 %v11726_v34  ;;  %v11754_v44 = vld [vmem:[#allocation13 + $0x80] sm:$0xff] }
 0x49b   :  { %v12655_v31 = vadd.f32 %v5932_v11, %v5913_v36  ;;  %v12657_v37 = vpop.f32.mrf.mxu1  ;;  %v11740_v36 = vld [vmem:[#allocation13 + $0x10] sm:$0xff]  ;;  %v11750_v11 = vld [vmem:[#allocation13 + $0x40] sm:$0xff] }
 0x49c   :  { %7232 = vmatpush.bf16.msra.mxu3 %v10346_v32 }
 0x49d   :  { %7303 = vmatpush.bf16.msrb.mxu2 %v11727_v46  ;;  %v11755_v46 = vld [vmem:[#allocation13 + $0x130] sm:$0xff] }
 0x49e   :  { %7266 = vmatpush.bf16.msrb.mxu0 %v11728_v35  ;;  %7285 = vmatpush.bf16.msrb.mxu1 %v11729_v48  ;;  %v11756_v35 = vld [vmem:[#allocation13 + $0x1b8] sm:$0xff] }
 0x49f   :  { %7157 = vmatmul.bf16.vlgmr.msrb.gmra.mxu3 %v12648_v17 }
 0x4a0   :  { %7321 = vmatpush.bf16.msrb.mxu3 %v11730_v28 }
 0x4a1   :  { %v12664_v33 = vpop.f32.mrf.mxu0  ;;  %7304 = vmatpush.bf16.msrb.mxu2 %v11731_v12  ;;  %v11757_v12 = vld [vmem:[#allocation13 + $0x170] sm:$0xff] }
 0x4a2   :  { %v12662_v43 = vpop.f32.mrf.mxu3  ;;  %v12668_v23 = vpop.f32.mrf.mxu2  ;;  %7267 = vmatpush.bf16.msrb.mxu0 %v11732_v2  ;;  %7286 = vmatpush.bf16.msrb.mxu1 %v11734_v58  ;;  %v11758_v2 = vld [vmem:[#allocation13 + $0xc8] sm:$0xff] }
 0x4a3   :  { %v12666_v50 = vpop.f32.mrf.mxu1  ;;  %v11759_v58 = vld [vmem:[#allocation13 + $0x128] sm:$0xff] }
 0x4a4   :  { %7105 = vmatmul.bf16.gmra.mxu0 %v12670_v6  ;;  %7322 = vmatpush.bf16.msrb.mxu3 %v11735_v4  ;;  %v11760_v4 = vld [vmem:[#allocation13 + $0x1b0] sm:$0xff] }
 0x4a5   :  { %7124 = vmatmul.bf16.gmra.mxu1 %v12670_v6  ;;  %7305 = vmatpush.bf16.msrb.mxu2 %v11737_v38  ;;  %v11762_v38 = vld [vmem:[#allocation13 + $0xc0] sm:$0xff] }
 0x4a6   :  { %7268 = vmatpush.bf16.msrb.mxu0 %v11736_v8  ;;  %7287 = vmatpush.bf16.msrb.mxu1 %v11738_v7  ;;  %v11761_v8 = vld [vmem:[#allocation13 + $0x168] sm:$0xff]  ;;  %v11763_v7 = vld [vmem:[#allocation13 + $0x1f8] sm:$0xff] }
 0x4a7   :  { %7143 = vmatmul.bf16.gmra.mxu2 %v12670_v6 }
 0x4a8   :  { %7323 = vmatpush.bf16.msrb.mxu3 %v11739_v14 }
 0x4a9   :  { %v12677_v49 = vpop.f32.mrf.mxu0  ;;  %7306 = vmatpush.bf16.msrb.mxu2 %v11741_v40  ;;  %v11764_v40 = vld [vmem:[#allocation13 + $0x120] sm:$0xff] }
 0x4aa   :  { %v12675_v0 = vpop.f32.mrf.mxu3  ;;  %v12681_v13 = vpop.f32.mrf.mxu2  ;;  %7269 = vmatpush.bf16.msrb.mxu0 %v11740_v36  ;;  %7288 = vmatpush.bf16.msrb.mxu1 %v11742_v60  ;;  %v11765_v60 = vld [vmem:[#allocation13 + $0x1a8] sm:$0xff] }
 0x4ab   :  { %v12679_v22 = vpop.f32.mrf.mxu1 }
 0x4ac   :  { %7324 = vmatpush.bf16.msrb.mxu3 %v11743_v20 }
 0x4ad   :  { %7307 = vmatpush.bf16.msrb.mxu2 %v11745_v53  ;;  %v11766_v53 = vld [vmem:[#allocation13 + $0x160] sm:$0xff] }
 0x4ae   :  { %7270 = vmatpush.bf16.msrb.mxu0 %v11744_v57  ;;  %7289 = vmatpush.bf16.msrb.mxu1 %v11746_v61  ;;  %v11768_v61 = vld [vmem:[#allocation13 + $0x118] sm:$0xff] }
 0x4af   :  { %7162 = vmatmul.bf16.gmra.mxu3 %v12670_v6 }
 0x4b0   :  { %7325 = vmatpush.bf16.msrb.mxu3 %v11747_v54  ;;  %v5945_v54 = vadd.f32 %v12642_v26, %v12634_v25  ;;  %v11773_v25 = vld [vmem:[#allocation13 + $0x150] sm:$0xff]  ;;  %v11774_v26 = vld [vmem:[#allocation13 + $0x198] sm:$0xff] }
 0x4b1   :  { %v12686_v55 = vpop.f32.mrf.mxu0  ;;  %7308 = vmatpush.bf16.msrb.mxu2 %v11749_v5  ;;  %v11770_v5 = vld [vmem:[#allocation13 + $0x1a0] sm:$0xff] }
 0x4b2   :  { %v12684_v47 = vpop.f32.mrf.mxu3  ;;  %v12688_v52 = vpop.f32.mrf.mxu2  ;;  %7271 = vmatpush.bf16.msrb.mxu0 %v11748_v19  ;;  %7290 = vmatpush.bf16.msrb.mxu1 %v11750_v11  ;;  %v11769_v19 = vld [vmem:[#allocation13 + $0x158] sm:$0xff]  ;;  %v11771_v11 = vld [vmem:[#allocation13 + $0x1e8] sm:$0xff] }
 0x4b3   :  { %v12690_v18 = vpop.f32.mrf.mxu1 }
 0x4b4   :  { %7176 = vmatmul.bf16.vlgmr.msra.gmra.mxu0 %v12648_v17  ;;  %7326 = vmatpush.bf16.msrb.mxu3 %v11753_v41  ;;  %v11772_v41 = vld [vmem:[#allocation13 + $0x110] sm:$0xff] }
 0x4b5   :  { %7195 = vmatmul.bf16.vlgmr.msra.gmra.mxu1 %v12648_v17  ;;  %7309 = vmatpush.bf16.msrb.mxu2 %v11754_v44  ;;  %v5964_v44 = vadd.f32 %v12646_v62, %v5945_v54  ;;  %v11777_v62 = vld [vmem:[#allocation13 + $0x148] sm:$0xff] }
 0x4b6   :  { %7340 = vmatpush.bf16.msra.mxu0 %v11751_v30  ;;  %7359 = vmatpush.bf16.msra.mxu1 %v11752_v63 }
 0x4b7   :  { %7214 = vmatmul.bf16.vlgmr.msra.gmra.mxu2 %v12648_v17 }
 0x4b8   :  { %7327 = vmatpush.bf16.msrb.mxu3 %v11758_v2  ;;  %v11775_v2 = vld [vmem:[#allocation13 + $0x1e0] sm:$0xff] }
 0x4b9   :  { %v12697_v34 = vpop.f32.mrf.mxu0  ;;  %7378 = vmatpush.bf16.msra.mxu2 %v11756_v35 }
 0x4ba   :  { %v12695_v32 = vpop.f32.mrf.mxu3  ;;  %7341 = vmatpush.bf16.msra.mxu0 %v11755_v46  ;;  %v12701_v28 = vpop.f32.mrf.mxu2  ;;  %7360 = vmatpush.bf16.msra.mxu1 %v11757_v12  ;;  %v5983_v12 = vadd.f32 %v12659_v9, %v5964_v44 }
 0x4bb   :  { %v12699_v48 = vpop.f32.mrf.mxu1 }
 0x4bc   :  { %7328 = vmatpush.bf16.msrb.mxu3 %v11762_v38  ;;  %v11778_v38 = vld [vmem:[#allocation13 + $0x190] sm:$0xff] }
 0x4bd   :  { %7379 = vmatpush.bf16.msra.mxu2 %v11760_v4  ;;  %v5947_v4 = vadd.f32 %v12653_v59, %v12639_v16  ;;  %v11781_v59 = vld [vmem:[#allocation13 + $0x140] sm:$0xff] }
 0x4be   :  { %7342 = vmatpush.bf16.msra.mxu0 %v11759_v58  ;;  %7361 = vmatpush.bf16.msra.mxu1 %v11761_v8  ;;  %v11776_v58 = vld [vmem:[#allocation13 + $0x108] sm:$0xff]  ;;  %v6002_v8 = vadd.f32 %v12662_v43, %v5983_v12 }
 0x4bf   :  { %7233 = vmatmul.bf16.vlgmr.msra.gmra.mxu3 %v12648_v17  ;;  %v11767_v17 = vld [vmem:[#allocation13 + $0x1f0] sm:$0xff]  ;;  %v11782_v43 = vld [vmem:[#allocation13 + $0x188] sm:$0xff] }
 0x4c0   :  { %7397 = vmatpush.bf16.msra.mxu3 %v11763_v7  ;;  %v6021_v7 = vadd.f32 %v12686_v55, %v6002_v8  ;;  %v11783_v55 = vld [vmem:[#allocation13 + $0x1d0] sm:$0xff] }
 0x4c1   :  { %v12706_v36 = vpop.f32.mrf.mxu0  ;;  %7380 = vmatpush.bf16.msra.mxu2 %v11765_v60 }
 0x4c2   :  { %v12704_v14 = vpop.f32.mrf.mxu3  ;;  %7343 = vmatpush.bf16.msra.mxu0 %v11764_v40  ;;  %v12710_v57 = vpop.f32.mrf.mxu2  ;;  %7362 = vmatpush.bf16.msra.mxu1 %v11766_v53  ;;  %v11779_v40 = vld [vmem:[#allocation13 + $0x1d8] sm:$0xff]  ;;  %v11780_v53 = vld [vmem:[#allocation13 + $0x100] sm:$0xff]  ;;  %v6040_v54 = vadd.f32 %v12690_v18, %v6021_v7 }
 0x4c3   :  { %v12708_v20 = vpop.f32.mrf.mxu1 }
 0x4c4   :  { %7181 = vmatmul.bf16.gmra.mxu0 %v12670_v6  ;;  %7398 = vmatpush.bf16.msra.mxu3 %v11767_v17  ;;  %v5966_v17 = vadd.f32 %v12657_v37, %v5947_v4  ;;  %v6059_v37 = vadd.f32 %v12701_v28, %v6040_v54 }
 0x4c5   :  { %7200 = vmatmul.bf16.gmra.mxu1 %v12670_v6  ;;  %7381 = vmatpush.bf16.msra.mxu2 %v11770_v5 }
 0x4c6   :  { %7344 = vmatpush.bf16.msra.mxu0 %v11768_v61  ;;  %7363 = vmatpush.bf16.msra.mxu1 %v11769_v19  ;;  %v5950_v19 = vadd.f32 %v12664_v33, %v12644_v39  ;;  %v6078_v44 = vadd.f32 %v12704_v14, %v6059_v37 }
 0x4c7   :  { %7219 = vmatmul.bf16.gmra.mxu2 %v12670_v6 }
 0x4c8   :  { %7399 = vmatpush.bf16.msra.mxu3 %v11771_v11  ;;  %v11784_v11 = vld [vmem:[#allocation13 + $0x180] sm:$0xff]  ;;  %v5969_v18 = vadd.f32 %v12666_v50, %v5950_v19 }
 0x4c9   :  { %v12719_v63 = vpop.f32.mrf.mxu0  ;;  %7382 = vmatpush.bf16.msra.mxu2 %v11774_v26 }
 0x4ca   :  { %v12717_v30 = vpop.f32.mrf.mxu3  ;;  %7345 = vmatpush.bf16.msra.mxu0 %v11772_v41  ;;  %v12724_v35 = vpop.f32.mrf.mxu2  ;;  %7364 = vmatpush.bf16.msra.mxu1 %v11773_v25  ;;  %v11785_v25 = vld [vmem:[#allocation13 + $0x1c8] sm:$0xff]  ;;  %v5988_v39 = vadd.f32 %v12681_v13, %v5969_v18 }
 0x4cb   :  { %v12722_v46 = vpop.f32.mrf.mxu1 }
 0x4cc   :  { %7400 = vmatpush.bf16.msra.mxu3 %v11775_v2  ;;  %v6007_v28 = vadd.f32 %v12684_v47, %v5988_v39 }
 0x4cd   :  { %7383 = vmatpush.bf16.msra.mxu2 %v11778_v38 }
 0x4ce   :  { %7346 = vmatpush.bf16.msra.mxu0 %v11776_v58  ;;  %7365 = vmatpush.bf16.msra.mxu1 %v11777_v62  ;;  %v6026_v8 = vadd.f32 %v12706_v36, %v6007_v28 }
 0x4cf   :  { %7238 = vmatmul.bf16.gmra.mxu3 %v12670_v6  ;;  %v5985_v6 = vadd.f32 %v12668_v23, %v5966_v17 }
 0x4d0   :  { %7401 = vmatpush.bf16.msra.mxu3 %v11779_v40 }
 0x4d1   :  { %v6288_v60 = vpop.f32.mrf.mxu0  ;;  %7384 = vmatpush.bf16.msra.mxu2 %v11782_v43  ;;  %v6004_v5 = vadd.f32 %v12675_v0, %v5985_v6  ;;  %v11786_v0 = vld [vmem:[#allocation13 + $0x1c0] sm:$0xff] }
 0x4d2   :  { %v6082_v9 = vpop.f32.mrf.mxu3  ;;  %7347 = vmatpush.bf16.msra.mxu0 %v11780_v53  ;;  %v12733_v61 = vpop.f32.mrf.mxu2  ;;  %7366 = vmatpush.bf16.msra.mxu1 %v11781_v59  ;;  %v6289_v12 = vadd.f32 %v6288_v60, %v6078_v44  ;;  %v11473_v60 = vld [vmem:[#allocation14 + $0x3] ss:$0 sm:$0xff] }
 0x4d3   :  { %v6307_v16 = vpop.f32.mrf.mxu1  ;;  %v6023_v41 = vadd.f32 %v12697_v34, %v6004_v5  ;;  %v5952_v34 = vadd.f32 %v12677_v49, %v12655_v31  ;;  %v6045_v49 = vadd.f32 %v12708_v20, %v6026_v8 }
 0x4d4   :  { %7402 = vmatpush.bf16.msra.mxu3 %v11783_v55  ;;  %v6308_v4 = vadd.f32 %v6307_v16, %v6289_v12 }
 0x4d5   :  { %7385 = vmatpush.bf16.msra.mxu2 %v11784_v11  ;;  %v6042_v33 = vadd.f32 %v12699_v48, %v6023_v41  ;;  %v5971_v13 = vadd.f32 %v12679_v22, %v5952_v34 }
 0x4d7   :  { %v6061_v14 = vadd.f32 %v12710_v57, %v6042_v33  ;;  %v5990_v31 = vadd.f32 %v12688_v52, %v5971_v13  ;;  %v6064_v57 = vadd.f32 %v12724_v35, %v6045_v49 }
 0x4d8   :  { %7403 = vmatpush.bf16.msra.mxu3 %v11785_v25 }
 0x4d9   :  { %v6290_v26 = vpop.f32.mrf.mxu0  ;;  %v6080_v50 = vadd.f32 %v12717_v30, %v6061_v14  ;;  %v6009_v36 = vadd.f32 %v12695_v32, %v5990_v31  ;;  %v6083_v22 = vadd.f32 %v6082_v9, %v6064_v57 }
 0x4da   :  { %v6084_v23 = vpop.f32.mrf.mxu3  ;;  %v6326_v58 = vpop.f32.mrf.mxu2 }
 0x4db   :  { %v6309_v2 = vpop.f32.mrf.mxu1  ;;  %v6327_v62 = vadd.f32 %v6326_v58, %v6308_v4  ;;  %v6291_v48 = vadd.f32 %v6290_v26, %v6080_v50  ;;  %v6028_v59 = vadd.f32 %v12719_v63, %v6009_v36 }
 0x4dc   :  { %7404 = vmatpush.bf16.msra.mxu3 %v11786_v0 }
 0x4dd   :  { %v6310_v30 = vadd.f32 %v6309_v2, %v6291_v48  ;;  %v6047_v20 = vadd.f32 %v12722_v46, %v6028_v59  ;;  %v11790_v59 = vld [vmem:[#allocation13 + $0x220] sm:$0xff] }
 0x4df   :  { %v6066_v32 = vadd.f32 %v12733_v61, %v6047_v20  ;;  %v11794_v20 = vld [vmem:[#allocation13 + $0x210] sm:$0xff] }
 0x4e1   :  { %v6293_v7 = vpop.f32.mrf.mxu0  ;;  %v6085_v41 = vadd.f32 %v6084_v23, %v6066_v32 }
 0x4e2   :  { %v6345_v38 = vpop.f32.mrf.mxu3  ;;  %v6328_v17 = vpop.f32.mrf.mxu2  ;;  %v6294_v55 = vadd.f32 %v6293_v7, %v6083_v22 }
 0x4e3   :  { %v6346_v40 = vadd.f32 %v6345_v38, %v6327_v62  ;;  %v6312_v53 = vpop.f32.mrf.mxu1  ;;  %v6329_v43 = vadd.f32 %v6328_v17, %v6310_v30  ;;  %v11787_v62 = vld [vmem:[#allocation13 + $0x238] sm:$0xff]  ;;  %v11789_v17 = vld [vmem:[#allocation13 + $0x228] sm:$0xff] }
 0x4e4   :  { %v6313_v35 = vadd.f32 %v6312_v53, %v6294_v55 }
 0x4e5   :  { %v6355_v47 = vadd.f32 %v6346_v40, %v12333_v15  ;;  %v11788_v40 = vld [vmem:[#allocation13 + $0x230] sm:$0xff] }
 0x4e7   :  { %v6364_v16 = vmul.f32 %v11473_v60, %v6355_v47 }
 0x4e9   :  { %6369 = vst [vmem:[#allocation16 + $0x60] sm:$0xff] %v6364_v16  ;;  %v6295_v54 = vpop.f32.mrf.mxu0 }
 0x4ea   :  { %v6347_v6 = vpop.f32.mrf.mxu3  ;;  %v6331_v5 = vpop.f32.mrf.mxu2  ;;  %v6296_v25 = vadd.f32 %v6295_v54, %v6085_v41 }
 0x4eb   :  { %v6348_v19 = vadd.f32 %v6347_v6, %v6329_v43  ;;  %v6314_v52 = vpop.f32.mrf.mxu1  ;;  %v6332_v63 = vadd.f32 %v6331_v5, %v6313_v35  ;;  %v11791_v43 = vld [vmem:[#allocation13 + $0x278] sm:$0xff]  ;;  %v11793_v5 = vld [vmem:[#allocation13 + $0x270] sm:$0xff]  ;;  %v11796_v35 = vld [vmem:[#allocation13 + $0x208] sm:$0xff] }
 0x4ec   :  { %v6315_v58 = vadd.f32 %v6314_v52, %v6296_v25  ;;  %v11792_v6 = vld [vmem:[#allocation13 + $0x218] sm:$0xff] }
 0x4ed   :  { %v6356_v37 = vadd.f32 %v6348_v19, %v12341_v10 }
 0x4ef   :  { %v6365_v11 = vmul.f32 %v11473_v60, %v6356_v37  ;;  %v11795_v37 = vld [vmem:[#allocation13 + $0x268] sm:$0xff] }
 0x4f1   :  { %6370 = vst [vmem:[#allocation16 + $0x68] sm:$0xff] %v6365_v11  ;;  %v6640_v44 = vpop.f32.mrf.mxu0 }
 0x4f2   :  { %v6350_v9 = vpop.f32.mrf.mxu3  ;;  %v6333_v18 = vpop.f32.mrf.mxu2 }
 0x4f3   :  { %v6351_v26 = vadd.f32 %v6350_v9, %v6332_v63  ;;  %v6659_v12 = vpop.f32.mrf.mxu1  ;;  %v6334_v46 = vadd.f32 %v6333_v18, %v6315_v58  ;;  %v11797_v18 = vld [vmem:[#allocation13 + $0x260] sm:$0xff]  ;;  %v11312_v58 = vld [vmem:[#allocation2 + $0x438] sm:$0xff] }
 0x4f4   :  { %v6660_v23 = vadd.f32 %v6659_v12, %v6640_v44 }
 0x4f5   :  { %v6357_v2 = vadd.f32 %v6351_v26, %v12346_v45 }
 0x4f7   :  { %v6366_v39 = vmul.f32 %v11473_v60, %v6357_v2  ;;  %v11798_v2 = vld [vmem:[#allocation13 + $0x200] sm:$0xff] }
 0x4f9   :  { %6371 = vst [vmem:[#allocation16 + $0x70] sm:$0xff] %v6366_v39  ;;  %v6642_v0 = vpop.f32.mrf.mxu0  ;;  %v11320_v39 = vld [vmem:[#allocation2 + $0x478] sm:$0xff] }
 0x4fa   :  { %v6352_v33 = vpop.f32.mrf.mxu3  ;;  %v6678_v28 = vpop.f32.mrf.mxu2 }
 0x4fb   :  { %v6353_v61 = vadd.f32 %v6352_v33, %v6334_v46  ;;  %v6661_v34 = vpop.f32.mrf.mxu1  ;;  %v11799_v46 = vld [vmem:[#allocation13 + $0x258] sm:$0xff]  ;;  %v11311_v33 = vld [vmem:[#allocation2 + $0x430] sm:$0xff] }
 0x4fc   :  { %v6662_v14 = vadd.f32 %v6661_v34, %v6642_v0  ;;  %v11319_v34 = vld [vmem:[#allocation2 + $0x470] sm:$0xff] }
 0x4fd   :  { %v6358_v4 = vadd.f32 %v6353_v61, %v12350_v42 }
 0x4fe   :  { %v7244_v8 = vpack.c.bf16 %v6662_v14, %v6660_v23 }
 0x4ff   :  { %v6367_v50 = vmul.f32 %v11473_v60, %v6358_v4  ;;  %v11800_v4 = vld [vmem:[#allocation13 + $0x250] sm:$0xff] }
 0x500   :  { %7272 = vmatmul.bf16.vlgmr.msrb.gmra.mxu0 %v7244_v8  ;;  %v11310_v8 = vld [vmem:[#allocation2 + $0x428] sm:$0xff] }
 0x501   :  { %6372 = vst [vmem:[#allocation16 + $0x78] sm:$0xff] %v6367_v50  ;;  %7416 = vmatpush.bf16.msrb.mxu0 %v11787_v62  ;;  %v6645_v7 = vpop.f32.mrf.mxu0  ;;  %v11318_v50 = vld [vmem:[#allocation2 + $0x468] sm:$0xff]  ;;  %v12764_v62 = vld [vmem:[#allocation2 + $0x4b8] sm:$0xff] }
 0x502   :  { %v6697_v38 = vpop.f32.mrf.mxu3  ;;  %v6680_v48 = vpop.f32.mrf.mxu2 }
 0x503   :  { %v6664_v13 = vpop.f32.mrf.mxu1  ;;  %v6698_v53 = vadd.f32 %v6697_v38, %v6678_v28  ;;  %v11801_v38 = vld [vmem:[#allocation13 + $0x248] sm:$0xff] }
 0x504   :  { %v6665_v30 = vadd.f32 %v6664_v13, %v6645_v7  ;;  %v11309_v7 = vld [vmem:[#allocation2 + $0x420] sm:$0xff] }
 0x505   :  { %7417 = vmatpush.bf16.msrb.mxu0 %v11788_v40  ;;  %v11317_v40 = vld [vmem:[#allocation2 + $0x460] sm:$0xff] }
 0x509   :  { %7418 = vmatpush.bf16.msrb.mxu0 %v11789_v17  ;;  %v6647_v49 = vpop.f32.mrf.mxu0 }
 0x50a   :  { %v6699_v31 = vpop.f32.mrf.mxu3  ;;  %v6683_v57 = vpop.f32.mrf.mxu2 }
 0x50b   :  { %v6700_v47 = vadd.f32 %v6699_v31, %v6680_v48  ;;  %v6666_v36 = vpop.f32.mrf.mxu1 }
 0x50c   :  { %v6667_v60 = vadd.f32 %v6666_v36, %v6647_v49  ;;  %v11802_v36 = vld [vmem:[#allocation13 + $0x240] sm:$0xff] }
 0x50d   :  { %v7245_v16 = vpack.c.bf16 %v6700_v47, %v6698_v53  ;;  %7419 = vmatpush.bf16.msrb.mxu0 %v11790_v59  ;;  %v11326_v59 = vld [vmem:[#allocation2 + $0x4a8] sm:$0xff] }
 0x50e   :  { %v7254_v22 = vpack.c.bf16 %v6667_v60, %v6665_v30  ;;  %v11308_v30 = vld [vmem:[#allocation2 + $0x418] sm:$0xff] }
 0x50f   :  { %7291 = vmatmul.bf16.vlgmr.msrb.gmra.mxu1 %v7245_v16  ;;  %v11316_v60 = vld [vmem:[#allocation2 + $0x458] sm:$0xff] }
 0x510   :  { %7277 = vmatmul.bf16.gmra.mxu0 %v7254_v22  ;;  %7435 = vmatpush.bf16.msrb.mxu1 %v11791_v43  ;;  %v11336_v16 = vld [vmem:[#allocation2 + $0x4f8] sm:$0xff]  ;;  %v11307_v22 = vld [vmem:[#allocation2 + $0x410] sm:$0xff] }
 0x511   :  { %7420 = vmatpush.bf16.msrb.mxu0 %v11792_v6  ;;  %v7101_v55 = vpop.f32.mrf.mxu0 }
 0x512   :  { %v6702_v54 = vpop.f32.mrf.mxu3  ;;  %v6685_v52 = vpop.f32.mrf.mxu2 }
 0x513   :  { %v7120_v19 = vpop.f32.mrf.mxu1  ;;  %v6703_v32 = vadd.f32 %v6702_v54, %v6683_v57  ;;  %v11327_v57 = vld [vmem:[#allocation2 + $0x4b0] sm:$0xff] }
 0x514   :  { %7436 = vmatpush.bf16.msrb.mxu1 %v11793_v5  ;;  %v11315_v54 = vld [vmem:[#allocation2 + $0x450] sm:$0xff] }
 0x515   :  { %7421 = vmatpush.bf16.msrb.mxu0 %v11794_v20  ;;  %v11325_v20 = vld [vmem:[#allocation2 + $0x4a0] sm:$0xff] }
 0x518   :  { %7437 = vmatpush.bf16.msrb.mxu1 %v11795_v37  ;;  %v11306_v37 = vld [vmem:[#allocation2 + $0x408] sm:$0xff] }
 0x519   :  { %7422 = vmatpush.bf16.msrb.mxu0 %v11796_v35  ;;  %v7103_v41 = vpop.f32.mrf.mxu0  ;;  %v11334_v35 = vld [vmem:[#allocation2 + $0x4e8] sm:$0xff] }
 0x51a   :  { %v6704_v11 = vpop.f32.mrf.mxu3  ;;  %v7246_v9 = vpack.c.bf16 %v7103_v41, %v7101_v55  ;;  %v7139_v25 = vpop.f32.mrf.mxu2  ;;  %v11335_v55 = vld [vmem:[#allocation2 + $0x4f0] sm:$0xff]  ;;  %v11305_v41 = vld [vmem:[#allocation2 + $0x400] sm:$0xff] }
 0x51b   :  { %v6705_v63 = vadd.f32 %v6704_v11, %v6685_v52  ;;  %v7122_v44 = vpop.f32.mrf.mxu1  ;;  %v11324_v11 = vld [vmem:[#allocation2 + $0x498] sm:$0xff] }
 0x51c   :  { %v7247_v26 = vpack.c.bf16 %v7122_v44, %v7120_v19  ;;  %7438 = vmatpush.bf16.msrb.mxu1 %v11797_v18  ;;  %7310 = vmatmul.bf16.vlgmr.msrb.gmra.mxu2 %v7246_v9  ;;  %v11313_v44 = vld [vmem:[#allocation2 + $0x440] sm:$0xff] }
 0x51d   :  { %v7255_v12 = vpack.c.bf16 %v6705_v63, %v6703_v32  ;;  %7423 = vmatpush.bf16.msrb.mxu0 %v11798_v2  ;;  %7646 = vmatpush.bf16.msrb.mxu2 %v11312_v58  ;;  %v11314_v32 = vld [vmem:[#allocation2 + $0x448] sm:$0xff]  ;;  %v11323_v58 = vld [vmem:[#allocation2 + $0x490] sm:$0xff] }
 0x51e   :  { %7329 = vmatmul.bf16.vlgmr.msrb.gmra.mxu3 %v7247_v26 }
 0x51f   :  { %7296 = vmatmul.bf16.gmra.mxu1 %v7255_v12  ;;  %7665 = vmatpush.bf16.msrb.mxu3 %v11320_v39 }
 0x520   :  { %7439 = vmatpush.bf16.msrb.mxu1 %v11799_v46  ;;  %v11332_v46 = vld [vmem:[#allocation2 + $0x4d8] sm:$0xff] }
 0x521   :  { %v7106_v0 = vpop.f32.mrf.mxu0  ;;  %7647 = vmatpush.bf16.msrb.mxu2 %v11311_v33  ;;  %v11322_v33 = vld [vmem:[#allocation2 + $0x488] sm:$0xff] }
 0x522   :  { %v7158_v61 = vpop.f32.mrf.mxu3  ;;  %v7141_v23 = vpop.f32.mrf.mxu2 }
 0x523   :  { %v7125_v28 = vpop.f32.mrf.mxu1  ;;  %v7248_v14 = vpack.c.bf16 %v7141_v23, %v7139_v25  ;;  %7666 = vmatpush.bf16.msrb.mxu3 %v11319_v34  ;;  %v11333_v25 = vld [vmem:[#allocation2 + $0x4e0] sm:$0xff] }
 0x524   :  { %7440 = vmatpush.bf16.msrb.mxu1 %v11800_v4 }
 0x525   :  { %7348 = vmatmul.bf16.vlgmr.msra.gmra.mxu0 %v7248_v14  ;;  %7648 = vmatpush.bf16.msrb.mxu2 %v11310_v8  ;;  %v11321_v14 = vld [vmem:[#allocation2 + $0x480] sm:$0xff]  ;;  %v11330_v8 = vld [vmem:[#allocation2 + $0x4c8] sm:$0xff] }
 0x526   :  { %7684 = vmatpush.bf16.msra.mxu0 %v12764_v62 }
 0x527   :  { %7667 = vmatpush.bf16.msrb.mxu3 %v11318_v50  ;;  %v11329_v50 = vld [vmem:[#allocation2 + $0x4c0] sm:$0xff] }
 0x528   :  { %7441 = vmatpush.bf16.msrb.mxu1 %v11801_v38 }
 0x529   :  { %v7108_v13 = vpop.f32.mrf.mxu0  ;;  %7649 = vmatpush.bf16.msrb.mxu2 %v11309_v7 }
 0x52a   :  { %v7160_v48 = vpop.f32.mrf.mxu3  ;;  %v7256_v53 = vpack.c.bf16 %v7108_v13, %v7106_v0  ;;  %v7144_v49 = vpop.f32.mrf.mxu2  ;;  %7685 = vmatpush.bf16.msra.mxu0 %v11327_v57  ;;  %v11331_v0 = vld [vmem:[#allocation2 + $0x4d0] sm:$0xff] }
 0x52b   :  { %v7127_v17 = vpop.f32.mrf.mxu1  ;;  %v7249_v31 = vpack.c.bf16 %v7160_v48, %v7158_v61  ;;  %7668 = vmatpush.bf16.msrb.mxu3 %v11317_v40 }
 0x52c   :  { %v7257_v47 = vpack.c.bf16 %v7127_v17, %v7125_v28  ;;  %7442 = vmatpush.bf16.msrb.mxu1 %v11802_v36  ;;  %7315 = vmatmul.bf16.gmra.mxu2 %v7256_v53 }
 0x52d   :  { %7650 = vmatpush.bf16.msrb.mxu2 %v11308_v30 }
 0x52e   :  { %7334 = vmatmul.bf16.gmra.mxu3 %v7257_v47  ;;  %7686 = vmatpush.bf16.msra.mxu0 %v11326_v59 }
 0x52f   :  { %7367 = vmatmul.bf16.vlgmr.msra.gmra.mxu1 %v7249_v31  ;;  %7669 = vmatpush.bf16.msrb.mxu3 %v11316_v60 }
 0x530   :  { %7703 = vmatpush.bf16.msra.mxu1 %v11336_v16 }
 0x531   :  { %v7177_v6 = vpop.f32.mrf.mxu0  ;;  %7651 = vmatpush.bf16.msrb.mxu2 %v11307_v22 }
 0x532   :  { %v7163_v43 = vpop.f32.mrf.mxu3  ;;  %v7146_v52 = vpop.f32.mrf.mxu2  ;;  %7687 = vmatpush.bf16.msra.mxu0 %v11325_v20 }
 0x533   :  { %v7196_v19 = vpop.f32.mrf.mxu1  ;;  %v7258_v5 = vpack.c.bf16 %v7146_v52, %v7144_v49  ;;  %7670 = vmatpush.bf16.msrb.mxu3 %v11315_v54 }
 0x534   :  { %7704 = vmatpush.bf16.msra.mxu1 %v11335_v55 }
 0x535   :  { %7353 = vmatmul.bf16.gmra.mxu0 %v7258_v5  ;;  %7652 = vmatpush.bf16.msrb.mxu2 %v11306_v37 }
 0x536   :  { %7688 = vmatpush.bf16.msra.mxu0 %v11324_v11 }
 0x537   :  { %7671 = vmatpush.bf16.msrb.mxu3 %v11314_v32 }
 0x538   :  { %7705 = vmatpush.bf16.msra.mxu1 %v11334_v35 }
 0x539   :  { %v7179_v9 = vpop.f32.mrf.mxu0  ;;  %7653 = vmatpush.bf16.msrb.mxu2 %v11305_v41 }
 0x53a   :  { %v7165_v63 = vpop.f32.mrf.mxu3  ;;  %v7250_v18 = vpack.c.bf16 %v7179_v9, %v7177_v6  ;;  %v7215_v2 = vpop.f32.mrf.mxu2  ;;  %7689 = vmatpush.bf16.msra.mxu0 %v11323_v58 }
 0x53b   :  { %v7259_v26 = vpack.c.bf16 %v7165_v63, %v7163_v43  ;;  %v7198_v12 = vpop.f32.mrf.mxu1  ;;  %7672 = vmatpush.bf16.msrb.mxu3 %v11313_v44 }
 0x53c   :  { %v7251_v39 = vpack.c.bf16 %v7198_v12, %v7196_v19  ;;  %7706 = vmatpush.bf16.msra.mxu1 %v11333_v25  ;;  %7386 = vmatmul.bf16.vlgmr.msra.gmra.mxu2 %v7250_v18 }
 0x53d   :  { %11433 = vmatpush.bf16.msra.mxu2 %v12764_v62 }
 0x53e   :  { %7405 = vmatmul.bf16.vlgmr.msra.gmra.mxu3 %v7251_v39  ;;  %7690 = vmatpush.bf16.msra.mxu0 %v11322_v33 }
 0x53f   :  { %7372 = vmatmul.bf16.gmra.mxu1 %v7259_v26  ;;  %11441 = vmatpush.bf16.msra.mxu3 %v11336_v16 }
 0x540   :  { %7707 = vmatpush.bf16.msra.mxu1 %v11332_v46 }
 0x541   :  { %v7182_v61 = vpop.f32.mrf.mxu0  ;;  %11434 = vmatpush.bf16.msra.mxu2 %v11327_v57 }
 0x542   :  { %v7234_v34 = vpop.f32.mrf.mxu3  ;;  %v7217_v23 = vpop.f32.mrf.mxu2  ;;  %7691 = vmatpush.bf16.msra.mxu0 %v11321_v14 }
 0x543   :  { %v7201_v28 = vpop.f32.mrf.mxu1  ;;  %v7252_v4 = vpack.c.bf16 %v7217_v23, %v7215_v2  ;;  %11442 = vmatpush.bf16.msra.mxu3 %v11335_v55 }
 0x544   :  { %7708 = vmatpush.bf16.msra.mxu1 %v11331_v0 }
 0x545   :  { %7424 = vmatmul.bf16.vlgmr.msrb.gmra.mxu0 %v7252_v4  ;;  %11435 = vmatpush.bf16.msra.mxu2 %v11326_v59 }
 0x547   :  { %11443 = vmatpush.bf16.msra.mxu3 %v11334_v35 }
 0x548   :  { %7709 = vmatpush.bf16.msra.mxu1 %v11330_v8 }
 0x549   :  { %v7184_v62 = vpop.f32.mrf.mxu0  ;;  %11436 = vmatpush.bf16.msra.mxu2 %v11325_v20 }
 0x54a   :  { %v7236_v38 = vpop.f32.mrf.mxu3  ;;  %v7260_v7 = vpack.c.bf16 %v7184_v62, %v7182_v61  ;;  %v7220_v40 = vpop.f32.mrf.mxu2 }
 0x54b   :  { %v7203_v13 = vpop.f32.mrf.mxu1  ;;  %v7253_v48 = vpack.c.bf16 %v7236_v38, %v7234_v34  ;;  %11444 = vmatpush.bf16.msra.mxu3 %v11333_v25 }
 0x54c   :  { %v7261_v53 = vpack.c.bf16 %v7203_v13, %v7201_v28  ;;  %7710 = vmatpush.bf16.msra.mxu1 %v11329_v50  ;;  %7391 = vmatmul.bf16.gmra.mxu2 %v7260_v7 }
 0x54d   :  { %11437 = vmatpush.bf16.msra.mxu2 %v11324_v11 }
 0x54e   :  { %7410 = vmatmul.bf16.gmra.mxu3 %v7261_v53 }
 0x54f   :  { %7443 = vmatmul.bf16.vlgmr.msrb.gmra.mxu1 %v7253_v48  ;;  %11445 = vmatpush.bf16.msra.mxu3 %v11332_v46 }
 0x551   :  { %11438 = vmatpush.bf16.msra.mxu2 %v11323_v58 }
 0x552   :  { %v7239_v17 = vpop.f32.mrf.mxu3  ;;  %v7222_v31 = vpop.f32.mrf.mxu2 }
 0x553   :  { %v7262_v49 = vpack.c.bf16 %v7222_v31, %v7220_v40  ;;  %11446 = vmatpush.bf16.msra.mxu3 %v11331_v0 }
 0x555   :  { %7429 = vmatmul.bf16.gmra.mxu0 %v7262_v49  ;;  %11439 = vmatpush.bf16.msra.mxu2 %v11322_v33 }
 0x557   :  { %11447 = vmatpush.bf16.msra.mxu3 %v11330_v8 }
 0x559   :  { %11440 = vmatpush.bf16.msra.mxu2 %v11321_v14 }
 0x55a   :  { %v7241_v47 = vpop.f32.mrf.mxu3 }
 0x55b   :  { %v7263_v36 = vpack.c.bf16 %v7241_v47, %v7239_v17  ;;  %11448 = vmatpush.bf16.msra.mxu3 %v11329_v50 }
 0x55c   :  { %7654 = vmatmul.bf16.vlgmr.msrb.gmra.mxu2 %v12184_v21 }
 0x55e   :  { %7673 = vmatmul.bf16.vlgmr.msrb.gmra.mxu3 %v12186_v27 }
 0x55f   :  { %7448 = vmatmul.bf16.gmra.mxu1 %v7263_v36 }
 0x565   :  { %7692 = vmatmul.bf16.vlgmr.msra.gmra.mxu0 %v12193_v51 }
 0x56c   :  { %7659 = vmatmul.bf16.gmra.mxu2 %v12202_v24 }
 0x56e   :  { %7678 = vmatmul.bf16.gmra.mxu3 %v12204_v29 }
 0x56f   :  { %7711 = vmatmul.bf16.vlgmr.msra.gmra.mxu1 %v12195_v1 }
 0x57c   :  { %7697 = vmatmul.bf16.vlgmr.msra.gmra.mxu2 %v12211_v56 }
 0x57d   :  { %v7273_v57 = vpop.f32.mrf.mxu0 }
 0x57e   :  { %7716 = vmatmul.bf16.vlgmr.msra.gmra.mxu3 %v12213_v3 }
 0x585   :  { %v7275_v30 = vpop.f32.mrf.mxu0 }
 0x58c   :  { %v7292_v60 = vpop.f32.mrf.mxu1 }
 0x58d   :  { %v7293_v16 = vadd.f32 %v7292_v60, %v7273_v57  ;;  %v7278_v21 = vpop.f32.mrf.mxu0 }
 0x594   :  { %v7294_v59 = vpop.f32.mrf.mxu1 }
 0x595   :  { %v7295_v27 = vadd.f32 %v7294_v59, %v7275_v30  ;;  %v7280_v22 = vpop.f32.mrf.mxu0 }
 0x59c   :  { %v7297_v43 = vpop.f32.mrf.mxu1 }
 0x59d   :  { %v7298_v51 = vadd.f32 %v7297_v43, %v7278_v21 }
 0x59f   :  { %v7311_v6 = vpop.f32.mrf.mxu2 }
 0x5a0   :  { %v7312_v12 = vadd.f32 %v7311_v6, %v7293_v16 }
 0x5a1   :  { %v7330_v24 = vpop.f32.mrf.mxu3 }
 0x5a2   :  { %v7349_v54 = vpop.f32.mrf.mxu0  ;;  %v7331_v39 = vadd.f32 %v7330_v24, %v7312_v12 }
 0x5a4   :  { %v7299_v29 = vpop.f32.mrf.mxu1  ;;  %v7350_v0 = vadd.f32 %v7349_v54, %v7331_v39 }
 0x5a5   :  { %v7300_v55 = vadd.f32 %v7299_v29, %v7280_v22 }
 0x5a7   :  { %v7313_v1 = vpop.f32.mrf.mxu2 }
 0x5a8   :  { %v7314_v61 = vadd.f32 %v7313_v1, %v7295_v27 }
 0x5a9   :  { %v7332_v19 = vpop.f32.mrf.mxu3 }
 0x5aa   :  { %v7351_v52 = vpop.f32.mrf.mxu0  ;;  %v7333_v14 = vadd.f32 %v7332_v19, %v7314_v61 }
 0x5ac   :  { %v7368_v56 = vpop.f32.mrf.mxu1  ;;  %v7352_v62 = vadd.f32 %v7351_v52, %v7333_v14 }
 0x5ad   :  { %v7369_v23 = vadd.f32 %v7368_v56, %v7350_v0  ;;  %v11474_v56 = vld [vmem:[#allocation14 + $0x4] ss:$0 sm:$0xff] }
 0x5af   :  { %v7316_v5 = vpop.f32.mrf.mxu2 }
 0x5b0   :  { %v7317_v47 = vadd.f32 %v7316_v5, %v7298_v51 }
 0x5b1   :  { %v7335_v3 = vpop.f32.mrf.mxu3 }
 0x5b2   :  { %v7354_v20 = vpop.f32.mrf.mxu0  ;;  %v7336_v16 = vadd.f32 %v7335_v3, %v7317_v47 }
 0x5b4   :  { %v7370_v37 = vpop.f32.mrf.mxu1  ;;  %v7355_v6 = vadd.f32 %v7354_v20, %v7336_v16 }
 0x5b5   :  { %v7371_v48 = vadd.f32 %v7370_v37, %v7352_v62 }
 0x5b7   :  { %v7318_v32 = vpop.f32.mrf.mxu2 }
 0x5b8   :  { %v7319_v24 = vadd.f32 %v7318_v32, %v7300_v55 }
 0x5b9   :  { %v7337_v35 = vpop.f32.mrf.mxu3 }
 0x5ba   :  { %v7356_v11 = vpop.f32.mrf.mxu0  ;;  %v7338_v37 = vadd.f32 %v7337_v35, %v7319_v24 }
 0x5bc   :  { %v7373_v41 = vpop.f32.mrf.mxu1 }
 0x5bd   :  { %v7374_v19 = vadd.f32 %v7373_v41, %v7355_v6 }
 0x5bf   :  { %v7387_v63 = vpop.f32.mrf.mxu2 }
 0x5c0   :  { %v7388_v4 = vadd.f32 %v7387_v63, %v7369_v23 }
 0x5c1   :  { %v7406_v9 = vpop.f32.mrf.mxu3 }
 0x5c2   :  { %v7425_v44 = vpop.f32.mrf.mxu0  ;;  %v7407_v38 = vadd.f32 %v7406_v9, %v7388_v4 }
 0x5c4   :  { %v7375_v25 = vpop.f32.mrf.mxu1  ;;  %v7426_v40 = vadd.f32 %v7425_v44, %v7407_v38 }
 0x5c7   :  { %v7389_v26 = vpop.f32.mrf.mxu2 }
 0x5c8   :  { %v7390_v53 = vadd.f32 %v7389_v26, %v7371_v48 }
 0x5c9   :  { %v7408_v18 = vpop.f32.mrf.mxu3 }
 0x5ca   :  { %v7427_v2 = vpop.f32.mrf.mxu0  ;;  %v7409_v36 = vadd.f32 %v7408_v18, %v7390_v53  ;;  %v7357_v18 = vadd.f32 %v7356_v11, %v7338_v37 }
 0x5cc   :  { %v7444_v58 = vpop.f32.mrf.mxu1  ;;  %v7428_v21 = vadd.f32 %v7427_v2, %v7409_v36  ;;  %v7376_v32 = vadd.f32 %v7375_v25, %v7357_v18 }
 0x5cd   :  { %v7445_v31 = vadd.f32 %v7444_v58, %v7426_v40 }
 0x5cf   :  { %v7392_v46 = vpop.f32.mrf.mxu2 }
 0x5d0   :  { %v7393_v51 = vadd.f32 %v7392_v46, %v7374_v19 }
 0x5d1   :  { %v7411_v33 = vpop.f32.mrf.mxu3 }
 0x5d2   :  { %v7430_v34 = vpop.f32.mrf.mxu0  ;;  %v7412_v12 = vadd.f32 %v7411_v33, %v7393_v51 }
 0x5d4   :  { %v7446_v28 = vpop.f32.mrf.mxu1  ;;  %v7431_v58 = vadd.f32 %v7430_v34, %v7412_v12 }
 0x5d5   :  { %v7447_v22 = vadd.f32 %v7446_v28, %v7428_v21 }
 0x5d7   :  { %v7394_v8 = vpop.f32.mrf.mxu2 }
 0x5d8   :  { %v7395_v41 = vadd.f32 %v7394_v8, %v7376_v32 }
 0x5d9   :  { %v7413_v50 = vpop.f32.mrf.mxu3 }
 0x5da   :  { %v7432_v13 = vpop.f32.mrf.mxu0 }
 0x5dc   :  { %v7449_v7 = vpop.f32.mrf.mxu1 }
 0x5dd   :  { %v7450_v46 = vadd.f32 %v7449_v7, %v7431_v58 }
 0x5df   :  { %v7655_v17 = vpop.f32.mrf.mxu2 }
 0x5e0   :  { %v7656_v57 = vadd.f32 %v7655_v17, %v7445_v31 }
 0x5e1   :  { %v7674_v49 = vpop.f32.mrf.mxu3 }
 0x5e2   :  { %v7693_v60 = vpop.f32.mrf.mxu0  ;;  %v7675_v59 = vadd.f32 %v7674_v49, %v7656_v57 }
 0x5e4   :  { %v7451_v30 = vpop.f32.mrf.mxu1  ;;  %v7694_v54 = vadd.f32 %v7693_v60, %v7675_v59 }
 0x5e7   :  { %v7657_v27 = vpop.f32.mrf.mxu2 }
 0x5e8   :  { %v7658_v29 = vadd.f32 %v7657_v27, %v7447_v22 }
 0x5e9   :  { %v7676_v43 = vpop.f32.mrf.mxu3 }
 0x5ea   :  { %v7677_v5 = vadd.f32 %v7676_v43, %v7658_v29  ;;  %v7695_v9 = vpop.f32.mrf.mxu0 }
 0x5ec   :  { %v7712_v1 = vpop.f32.mrf.mxu1  ;;  %v7696_v20 = vadd.f32 %v7695_v9, %v7677_v5 }
 0x5ed   :  { %v7713_v52 = vadd.f32 %v7712_v1, %v7694_v54 }
 0x5ef   :  { %v7722_v63 = vadd.f32 %v7713_v52, %v12333_v15  ;;  %v7660_v3 = vpop.f32.mrf.mxu2  ;;  %v7414_v15 = vadd.f32 %v7413_v50, %v7395_v41 }
 0x5f0   :  { %v7661_v28 = vadd.f32 %v7660_v3, %v7450_v46 }
 0x5f1   :  { %v7731_v44 = vmul.f32 %v11474_v56, %v7722_v63  ;;  %v7679_v26 = vpop.f32.mrf.mxu3  ;;  %v7433_v23 = vadd.f32 %v7432_v13, %v7414_v15 }
 0x5f2   :  { %v7680_v14 = vadd.f32 %v7679_v26, %v7661_v28 }
 0x5f3   :  { %7736 = vst [vmem:[#allocation16 + $0x80] sm:$0xff] %v7731_v44  ;;  %v7452_v33 = vadd.f32 %v7451_v30, %v7433_v23 }
 0x5f4   :  { %v7714_v55 = vpop.f32.mrf.mxu1 }
 0x5f5   :  { %v7715_v2 = vadd.f32 %v7714_v55, %v7696_v20 }
 0x5f7   :  { %v7723_v39 = vadd.f32 %v7715_v2, %v12341_v10  ;;  %v7662_v35 = vpop.f32.mrf.mxu2 }
 0x5f8   :  { %v7663_v38 = vadd.f32 %v7662_v35, %v7452_v33 }
 0x5f9   :  { %v7732_v0 = vmul.f32 %v11474_v56, %v7723_v39  ;;  %v7681_v61 = vpop.f32.mrf.mxu3 }
 0x5fa   :  { %v7682_v8 = vadd.f32 %v7681_v61, %v7663_v38 }
 0x5fb   :  { %7737 = vst [vmem:[#allocation16 + $0x88] sm:$0xff] %v7732_v0 }
 0x5ff   :  { %v7698_v11 = vpop.f32.mrf.mxu2 }
 0x600   :  { %v7699_v4 = vadd.f32 %v7698_v11, %v7680_v14 }
 0x601   :  { %v7717_v62 = vpop.f32.mrf.mxu3 }
 0x602   :  { %v7718_v25 = vadd.f32 %v7717_v62, %v7699_v4 }
 0x604   :  { %v7724_v34 = vadd.f32 %v7718_v25, %v12346_v45 }
 0x606   :  { %v7733_v48 = vmul.f32 %v11474_v56, %v7724_v34 }
 0x607   :  { %v7700_v10 = vpop.f32.mrf.mxu2 }
 0x608   :  { %7738 = vst [vmem:[#allocation16 + $0x90] sm:$0xff] %v7733_v48  ;;  %v7701_v7 = vadd.f32 %v7700_v10, %v7682_v8 }
 0x609   :  { %v7719_v40 = vpop.f32.mrf.mxu3 }
 0x60a   :  { %v7720_v53 = vadd.f32 %v7719_v40, %v7701_v7 }
 0x60c   :  { %v7725_v50 = vadd.f32 %v7720_v53, %v12350_v42 }
 0x60e   :  { %v7734_v13 = vmul.f32 %v11474_v56, %v7725_v50 }
 0x610   :  { %7739 = vst [vmem:[#allocation16 + $0x98] sm:$0xff] %v7734_v13 }
 0x611   :  { %7752 = dma.vmem_to_hbm [thread:$0]  %s7745_s14, 2560, %s7747_s19, [#allocation4], %s12032_s17, %s12032_s17, %s12033_s18  }
 0x612   :  { %12029 = dma.done.wait [#allocation4], 2560  }
 0x613   :  { %12030 = vsyncadd [#allocation4], 4294964736 }
 0x614   :  { %7757 = vsyncpa [#allocation3], 1 }
 0x615   :  { %7758 = vsyncpa [#allocation6], 1 }
 0x616   :  { %7759 = vsyncpa [#allocation9], 1 }
 0x617   :  { %7760 = vsyncpa [#allocation12], 1 }
 0x618   :  { %7761 = vsyncpa [#allocation15], 1 }
 0x619   :  { %7762 = vsyncpa [#allocation4], 1 }

</bundles_post_ra>
